<compile_context>
chip_gen: v7x
topology: tpu7x:2x2x1
jax: 0.10.0
libtpu: 0.0.40
codegen_flags: <defaults>
</compile_context>

<pallas_src>
import functools

import jax
import jax.numpy as jnp
from jax.experimental import pallas as pl
from jax.experimental.pallas import tpu as pltpu


_VMEM_LIMIT = 32 * 1024 * 1024        # explicit scoped-VMEM cap (safe on v5e/v6e/v7x)
_TILE_BUDGET = 12 * 1024 * 1024       # working-set target when picking TM


def _round_up(x, m):
    return ((x + m - 1) // m) * m


def _pick_tm(m, k, cp):
    """Pick an M-tile keeping the double-buffered working set under budget."""
    tm = 512
    while tm > 16:
        need = 2 * (tm * k * 2 + tm * cp * 2) + k * cp * 2 + 32 * cp * 4
        if need <= _TILE_BUDGET:
            break
        tm //= 2
    tm = max(tm, 16)
    if m < tm:
        tm = max(16, _round_up(m, 16))
    return tm


# --------------------------------------------------------------------------
# Pallas kernels
# --------------------------------------------------------------------------
def _conv_bn_stats_kernel(p_ref, w_ref, b_ref, o_ref, s_ref, q_ref,
                          *, m_true, tm, need_mask):
    """Conv tile: out = patches @ W + b (bf16 in, f32 acc, bf16 out) and
    per-GROUP per-channel sum / sum-of-squares accumulated across the M axis."""
    i = pl.program_id(1)                       # M-tile index within this group
    acc = jnp.dot(p_ref[...], w_ref[...], preferred_element_type=jnp.float32)
    acc = acc + b_ref[...]
    o_ref[...] = acc.astype(o_ref.dtype)       # bf16 intermediate (halved HBM traffic)

    if need_mask:                              # padded rows must not pollute stats
        rows = i * tm + jax.lax.broadcasted_iota(jnp.int32, (acc.shape[0], 1), 0)
        acc = jnp.where(rows < m_true, acc, 0.0)

    @pl.when(i == 0)
    def _():
        s_ref[...] = jnp.zeros_like(s_ref)
        q_ref[...] = jnp.zeros_like(q_ref)

    s_ref[...] = s_ref[...] + jnp.sum(acc, axis=0, keepdims=True)[None]
    q_ref[...] = q_ref[...] + jnp.sum(acc * acc, axis=0, keepdims=True)[None]


def _bn_lrelu_kernel(x_ref, s_ref, q_ref, g_ref, b_ref, o_ref, *, m_true, eps, slope):
    """BatchNorm (training-mode, biased var from fused per-group sums) + LeakyReLU."""
    inv_m = 1.0 / m_true
    mean = s_ref[...][0] * inv_m                              # (1, cp)
    var = jnp.maximum(q_ref[...][0] * inv_m - mean * mean, 0.0)
    scale = jax.lax.rsqrt(var + eps) * g_ref[...]
    shift = b_ref[...] - mean * scale
    y = x_ref[...].astype(jnp.float32) * scale + shift
    o_ref[...] = jnp.where(y >= 0.0, y, slope * y).astype(o_ref.dtype)


def _conv_kernel(p_ref, w_ref, b_ref, o_ref):
    """Plain conv tile (no BN): out = patches @ W + b (f32 out for the head)."""
    acc = jnp.dot(p_ref[...], w_ref[...], preferred_element_type=jnp.float32)
    o_ref[...] = (acc + b_ref[...]).astype(o_ref.dtype)


# --------------------------------------------------------------------------
# pallas_call wrappers
# --------------------------------------------------------------------------
def _conv_stats_call(patches, w_mat, bias_row, tm, m_true, groups):
    gm, k = patches.shape
    mp = gm // groups
    cp = w_mat.shape[1]
    grid_m = mp // tm
    kernel = functools.partial(_conv_bn_stats_kernel, m_true=m_true, tm=tm,
                               need_mask=(mp != m_true))
    return pl.pallas_call(
        kernel,
        out_shape=(jax.ShapeDtypeStruct((gm, cp), jnp.bfloat16),
                   jax.ShapeDtypeStruct((groups, 1, cp), jnp.float32),
                   jax.ShapeDtypeStruct((groups, 1, cp), jnp.float32)),
        grid=(groups, grid_m),
        in_specs=[pl.BlockSpec((tm, k), lambda g, i: (g * grid_m + i, 0)),
                  pl.BlockSpec((k, cp), lambda g, i: (0, 0)),
                  pl.BlockSpec((1, cp), lambda g, i: (0, 0))],
        out_specs=(pl.BlockSpec((tm, cp), lambda g, i: (g * grid_m + i, 0)),
                   pl.BlockSpec((1, 1, cp), lambda g, i: (g, 0, 0)),
                   pl.BlockSpec((1, 1, cp), lambda g, i: (g, 0, 0))),
        compiler_params=pltpu.CompilerParams(
            dimension_semantics=("parallel", "arbitrary"),   # stats accumulate over M
            vmem_limit_bytes=_VMEM_LIMIT),
    )(patches, w_mat, bias_row)


def _bn_lrelu_call(x_bf, s, q, g_row, b_row, tm, m_true, groups, eps, slope):
    gm, cp = x_bf.shape
    mp = gm // groups
    grid_m = mp // tm
    return pl.pallas_call(
        functools.partial(_bn_lrelu_kernel, m_true=m_true, eps=eps, slope=slope),
        out_shape=jax.ShapeDtypeStruct((gm, cp), jnp.bfloat16),
        grid=(groups, grid_m),
        in_specs=[pl.BlockSpec((tm, cp), lambda g, i: (g * grid_m + i, 0)),
                  pl.BlockSpec((1, 1, cp), lambda g, i: (g, 0, 0)),
                  pl.BlockSpec((1, 1, cp), lambda g, i: (g, 0, 0)),
                  pl.BlockSpec((1, cp), lambda g, i: (0, 0)),
                  pl.BlockSpec((1, cp), lambda g, i: (0, 0))],
        out_specs=pl.BlockSpec((tm, cp), lambda g, i: (g * grid_m + i, 0)),
        compiler_params=pltpu.CompilerParams(
            dimension_semantics=("parallel", "arbitrary"),
            vmem_limit_bytes=_VMEM_LIMIT),
    )(x_bf, s, q, g_row, b_row)


def _conv_plain_call(patches, w_mat, bias_row, tm):
    mp, k = patches.shape
    cp = w_mat.shape[1]
    grid_m = mp // tm
    return pl.pallas_call(
        _conv_kernel,
        out_shape=jax.ShapeDtypeStruct((mp, cp), jnp.float32),
        grid=(grid_m,),
        in_specs=[pl.BlockSpec((tm, k), lambda i: (i, 0)),
                  pl.BlockSpec((k, cp), lambda i: (0, 0)),
                  pl.BlockSpec((1, cp), lambda i: (0, 0))],
        out_specs=pl.BlockSpec((tm, cp), lambda i: (i, 0)),
        compiler_params=pltpu.CompilerParams(
            dimension_semantics=("parallel",),
            vmem_limit_bytes=_VMEM_LIMIT),
    )(patches, w_mat, bias_row)


# --------------------------------------------------------------------------
# Plain-JAX glue: im2col + layer wrappers
# --------------------------------------------------------------------------
def _im2col(x, kh, kw, stride, pad):
    # TODO(synk): true im2col-free conv (shifted-window taps inside the kernel)
    # would remove the KH*KW inflation of HBM traffic; kept as bf16 glue here.
    n, h, w, c = x.shape
    if pad:
        x = jnp.pad(x, ((0, 0), (pad, pad), (pad, pad), (0, 0)))
    ho = (h + 2 * pad - kh) // stride + 1
    wo = (w + 2 * pad - kw) // stride + 1
    cols = []
    for i in range(kh):
        for j in range(kw):
            cols.append(x[:, i:i + stride * (ho - 1) + 1:stride,
                          j:j + stride * (wo - 1) + 1:stride, :])
    patches = jnp.concatenate(cols, axis=-1).reshape(n * ho * wo, kh * kw * c)
    return patches, (n, ho, wo)


def _prep_weight(w, cp):
    cout, cin, kh, kw = w.shape
    w_mat = jnp.transpose(w, (2, 3, 1, 0)).reshape(kh * kw * cin, cout)
    w_mat = jnp.pad(w_mat, ((0, 0), (0, cp - cout))).astype(jnp.bfloat16)
    return w_mat


def conv_bn_lrelu(x, w, b, gamma, beta, *, stride, pad, groups=1, eps=1e-5, slope=0.2):
    """x: NHWC bf16, batch laid out group-major (batch = groups * n_per_group).
    BatchNorm statistics are computed independently per group (per patch)."""
    cout, cin, kh, kw = w.shape
    patches, (nb, ho, wo) = _im2col(x, kh, kw, stride, pad)
    mt, k = patches.shape
    m = mt // groups                                  # rows per BN-statistics group
    cp = max(_round_up(cout, 128), 128)               # lane-dense output channels
    tm = _pick_tm(m, k, cp)
    mp = _round_up(m, tm)
    if mp > m:                                        # per-group row padding
        patches = patches.reshape(groups, m, k)
        patches = jnp.pad(patches, ((0, 0), (0, mp - m), (0, 0)))
        patches = patches.reshape(groups * mp, k)
    patches = patches.astype(jnp.bfloat16)

    w_mat = _prep_weight(w, cp)
    b_row = jnp.pad(b, (0, cp - cout)).reshape(1, cp).astype(jnp.float32)
    g_row = jnp.pad(gamma, (0, cp - cout), constant_values=1.0).reshape(1, cp).astype(jnp.float32)
    be_row = jnp.pad(beta, (0, cp - cout)).reshape(1, cp).astype(jnp.float32)

    conv_raw, s, q = _conv_stats_call(patches, w_mat, b_row, tm, m, groups)
    y = _bn_lrelu_call(conv_raw, s, q, g_row, be_row, tm, m, groups, eps, slope)
    y = y.reshape(groups, mp, cp)[:, :m, :cout]
    return y.reshape(nb, ho, wo, cout)


def conv_plain(x, w, b, *, stride, pad):
    """Conv2d without BN/activation (used for conv_out). -> NHWC f32."""
    cout, cin, kh, kw = w.shape
    patches, (n, ho, wo) = _im2col(x, kh, kw, stride, pad)
    m, k = patches.shape
    cp = max(_round_up(cout, 128), 128)
    tm = _pick_tm(m, k, cp)
    mp = _round_up(m, tm)
    if mp > m:
        patches = jnp.pad(patches, ((0, mp - m), (0, 0)))
    patches = patches.astype(jnp.bfloat16)

    w_mat = _prep_weight(w, cp)
    b_row = jnp.pad(b, (0, cp - cout)).reshape(1, cp).astype(jnp.float32)
    out = _conv_plain_call(patches, w_mat, b_row, tm)
    return out[:m, :cout].reshape(n, ho, wo, cout)


# --------------------------------------------------------------------------
# Parameters (deterministic synthetic init, PyTorch shapes)
# --------------------------------------------------------------------------
def init_params(key):
    p = {}
    keys = iter(jax.random.split(key, 64))

    def conv(name, cout, cin, k):
        p[name + '_w'] = jax.random.normal(next(keys), (cout, cin, k, k), jnp.float32) * 0.05
        p[name + '_b'] = jax.random.normal(next(keys), (cout,), jnp.float32) * 0.01

    def bn(name, c):
        p[name + '_g'] = jnp.ones((c,), jnp.float32)     # PyTorch default affine init
        p[name + '_b'] = jnp.zeros((c,), jnp.float32)

    cin = 3
    for l in range(4):                                    # shared patch feature extractor
        conv(f'feat{l}', 32, cin, 3)
        bn(f'feat{l}_bn', 32)
        cin = 32
    conv('conv1', 128, 128, 3); bn('bn1', 128)
    conv('conv2', 256, 128, 3); bn('bn2', 256)
    conv('conv3', 256, 256, 3); bn('bn3', 256)
    conv('conv4', 512, 256, 3); bn('bn4', 512)
    conv('conv_out', 1, 512, 1)
    return p


# --------------------------------------------------------------------------
# Forward pass (matches MultiPatchDiscriminator.forward, use_bn=True)
# --------------------------------------------------------------------------
def discriminator_forward(x_nchw, p, key, *, patch_size):
    # TODO(synk): use_bn=False path (conv -> LeakyReLU only) not implemented.
    x = jnp.transpose(x_nchw, (0, 2, 3, 1)).astype(jnp.bfloat16)    # NCHW -> NHWC, bf16
    n, h, w, c = x.shape

    keys = jax.random.split(key, 8)
    patches = []
    for i in range(4):
        idx = jax.random.randint(keys[2 * i], (), 0, h - patch_size).astype(jnp.int32)
        idy = jax.random.randint(keys[2 * i + 1], (), 0, w - patch_size).astype(jnp.int32)
        zero = jnp.zeros((), jnp.int32)
        patches.append(jax.lax.dynamic_slice(
            x, (zero, idx, idy, zero), (n, patch_size, patch_size, c)))

    # Stack the 4 patches along the batch axis (group-major) and run the SHARED
    # feature extractor once per layer.  BN stats remain per-patch via `groups`,
    # matching PyTorch (each patch normalized with its own batch statistics).
    hfeat = jnp.concatenate(patches, axis=0)                         # (4*n, ps, ps, 3)
    for l in range(4):
        hfeat = conv_bn_lrelu(hfeat,
                              p[f'feat{l}_w'], p[f'feat{l}_b'],
                              p[f'feat{l}_bn_g'], p[f'feat{l}_bn_b'],
                              stride=1, pad=1, groups=4)

    ps = patch_size
    feat = hfeat.reshape(4, n, ps, ps, 32)
    feat = jnp.transpose(feat, (1, 2, 3, 0, 4)).reshape(n, ps, ps, 128)   # torch.cat(dim=1)

    x = conv_bn_lrelu(feat, p['conv1_w'], p['conv1_b'], p['bn1_g'], p['bn1_b'], stride=2, pad=1)
    x = conv_bn_lrelu(x, p['conv2_w'], p['conv2_b'], p['bn2_g'], p['bn2_b'], stride=1, pad=1)
    x = conv_bn_lrelu(x, p['conv3_w'], p['conv3_b'], p['bn3_g'], p['bn3_b'], stride=2, pad=1)
    x = conv_bn_lrelu(x, p['conv4_w'], p['conv4_b'], p['bn4_g'], p['bn4_b'], stride=1, pad=1)

    x = conv_plain(x, p['conv_out_w'], p['conv_out_b'], stride=1, pad=0)   # (N, h', w', 1) f32
    return jnp.mean(x, axis=(1, 2))                                        # (N, 1)


if __name__ == "__main__":
    key = jax.random.PRNGKey(0)
    pkey, xkey, patchkey = jax.random.split(key, 3)
    params = init_params(pkey)

    PATCH_SIZE = 8
    x = jax.random.normal(xkey, (2, 3, 16, 16), jnp.float32)

    fwd = jax.jit(functools.partial(discriminator_forward, patch_size=PATCH_SIZE))
    out = jax.block_until_ready(fwd(x, params, patchkey))

    assert out.shape == (2, 1), out.shape
    assert out.dtype == jnp.float32
    assert bool(jnp.all(jnp.isfinite(out)))
    print("KERNEL_OK")
</pallas_src>

<mosaic_0001>
module attributes {stable_mosaic.version = 11 : i64} {
  func.func @_conv_bn_stats_kernel(%arg0: i32, %arg1: i32, %arg2: memref<128x27xbf16, #tpu.memory_space<vmem>>, %arg3: memref<27x128xbf16, #tpu.memory_space<vmem>>, %arg4: memref<1x128xf32, #tpu.memory_space<vmem>>, %arg5: memref<128x128xbf16, #tpu.memory_space<vmem>>, %arg6: memref<1x1x128xf32, #tpu.memory_space<vmem>>, %arg7: memref<1x1x128xf32, #tpu.memory_space<vmem>>) attributes {dimension_semantics = [#tpu.dimension_semantics<parallel>, #tpu.dimension_semantics<arbitrary>], iteration_bounds = array<i64: 4, 1>, scalar_prefetch = 0 : i64, scratch_operands = 0 : i64, tpu.core_type = #tpu.core_type<tc>, window_params = [{transform_indices = @transform_0, window_bounds = array<i64: 128, 27>}, {pipeline_mode = #tpu.pipeline_mode<synchronous>, transform_indices = @transform_1, window_bounds = array<i64: 27, 128>}, {pipeline_mode = #tpu.pipeline_mode<synchronous>, transform_indices = @transform_2, window_bounds = array<i64: 1, 128>}, {transform_indices = @transform_3, window_bounds = array<i64: 128, 128>}, {transform_indices = @transform_4, window_bounds = array<i64: 1, 1, 128>}, {transform_indices = @transform_5, window_bounds = array<i64: 1, 1, 128>}]} {
    %c0 = arith.constant 0 : index
    %c0_0 = arith.constant 0 : index
    %0 = vector.load %arg2[%c0, %c0_0] : memref<128x27xbf16, #tpu.memory_space<vmem>>, vector<128x27xbf16>
    %c0_1 = arith.constant 0 : index
    %c0_2 = arith.constant 0 : index
    %1 = vector.load %arg3[%c0_1, %c0_2] : memref<27x128xbf16, #tpu.memory_space<vmem>>, vector<27x128xbf16>
    %cst = arith.constant dense<0.000000e+00> : vector<128x128xf32>
    %2 = tpu.matmul %0, %1, %cst {dimension_numbers = #tpu.dot_dimension_numbers<[1], [0], [0], [1], [0, 0, 1, 1], [], []>} : vector<128x27xbf16>, vector<27x128xbf16>, vector<128x128xf32> -> vector<128x128xf32>
    %c0_3 = arith.constant 0 : index
    %c0_4 = arith.constant 0 : index
    %3 = vector.load %arg4[%c0_3, %c0_4] : memref<1x128xf32, #tpu.memory_space<vmem>>, vector<1x128xf32>
    %4 = vector.broadcast %3 : vector<1x128xf32> to vector<128x128xf32>
    %5 = arith.addf %2, %4 : vector<128x128xf32>
    %6 = arith.truncf %5 : vector<128x128xf32> to vector<128x128xbf16>
    %c0_5 = arith.constant 0 : index
    %c0_6 = arith.constant 0 : index
    %7 = vector.load %arg5[%c0_5, %c0_6] : memref<128x128xbf16, #tpu.memory_space<vmem>>, vector<128x128xbf16>
    tpu.vector_store %arg5[%c0_5, %c0_6], %6 {strides = array<i32>} : memref<128x128xbf16, #tpu.memory_space<vmem>>, vector<128x128xbf16>,
    %c0_i32 = arith.constant 0 : i32
    %8 = arith.cmpi eq, %arg1, %c0_i32 : i32
    %9 = arith.extui %8 : i1 to i32
    %c0_i32_7 = arith.constant 0 : i32
    %10 = arith.cmpi ne, %9, %c0_i32_7 : i32
    scf.if %10 {
      %cst_22 = arith.constant 0.000000e+00 : f32
      %24 = vector.broadcast %cst_22 : f32 to vector<1x1x128xf32>
      %c0_23 = arith.constant 0 : index
      %c0_24 = arith.constant 0 : index
      %c0_25 = arith.constant 0 : index
      %25 = vector.load %arg6[%c0_23, %c0_24, %c0_25] : memref<1x1x128xf32, #tpu.memory_space<vmem>>, vector<1x1x128xf32>
      tpu.vector_store %arg6[%c0_23, %c0_24, %c0_25], %24 {strides = array<i32>} : memref<1x1x128xf32, #tpu.memory_space<vmem>>, vector<1x1x128xf32>,
      %cst_26 = arith.constant 0.000000e+00 : f32
      %26 = vector.broadcast %cst_26 : f32 to vector<1x1x128xf32>
      %c0_27 = arith.constant 0 : index
      %c0_28 = arith.constant 0 : index
      %c0_29 = arith.constant 0 : index
      %27 = vector.load %arg7[%c0_27, %c0_28, %c0_29] : memref<1x1x128xf32, #tpu.memory_space<vmem>>, vector<1x1x128xf32>
      tpu.vector_store %arg7[%c0_27, %c0_28, %c0_29], %26 {strides = array<i32>} : memref<1x1x128xf32, #tpu.memory_space<vmem>>, vector<1x1x128xf32>,
    } else {
    }
    %c0_8 = arith.constant 0 : index
    %c0_9 = arith.constant 0 : index
    %c0_10 = arith.constant 0 : index
    %11 = vector.load %arg6[%c0_8, %c0_9, %c0_10] : memref<1x1x128xf32, #tpu.memory_space<vmem>>, vector<1x1x128xf32>
    %cst_11 = arith.constant dense<0.000000e+00> : vector<128xf32>
    %12 = vector.multi_reduction <add>, %5, %cst_11 [0] : vector<128x128xf32> to vector<128xf32>
    %13 = vector.shape_cast %12 : vector<128xf32> to vector<1x128xf32>
    %14 = vector.shape_cast %13 : vector<1x128xf32> to vector<1x1x128xf32>
    %15 = arith.addf %11, %14 : vector<1x1x128xf32>
    %c0_12 = arith.constant 0 : index
    %c0_13 = arith.constant 0 : index
    %c0_14 = arith.constant 0 : index
    %16 = vector.load %arg6[%c0_12, %c0_13, %c0_14] : memref<1x1x128xf32, #tpu.memory_space<vmem>>, vector<1x1x128xf32>
    tpu.vector_store %arg6[%c0_12, %c0_13, %c0_14], %15 {strides = array<i32>} : memref<1x1x128xf32, #tpu.memory_space<vmem>>, vector<1x1x128xf32>,
    %c0_15 = arith.constant 0 : index
    %c0_16 = arith.constant 0 : index
    %c0_17 = arith.constant 0 : index
    %17 = vector.load %arg7[%c0_15, %c0_16, %c0_17] : memref<1x1x128xf32, #tpu.memory_space<vmem>>, vector<1x1x128xf32>
    %18 = arith.mulf %5, %5 : vector<128x128xf32>
    %cst_18 = arith.constant dense<0.000000e+00> : vector<128xf32>
    %19 = vector.multi_reduction <add>, %18, %cst_18 [0] : vector<128x128xf32> to vector<128xf32>
    %20 = vector.shape_cast %19 : vector<128xf32> to vector<1x128xf32>
    %21 = vector.shape_cast %20 : vector<1x128xf32> to vector<1x1x128xf32>
    %22 = arith.addf %17, %21 : vector<1x1x128xf32>
    %c0_19 = arith.constant 0 : index
    %c0_20 = arith.constant 0 : index
    %c0_21 = arith.constant 0 : index
    %23 = vector.load %arg7[%c0_19, %c0_20, %c0_21] : memref<1x1x128xf32, #tpu.memory_space<vmem>>, vector<1x1x128xf32>
    tpu.vector_store %arg7[%c0_19, %c0_20, %c0_21], %22 {strides = array<i32>} : memref<1x1x128xf32, #tpu.memory_space<vmem>>, vector<1x1x128xf32>,
    return
  }
  func.func @transform_0(%arg0: i32, %arg1: i32) -> (i32, i32) {
    %c1_i32 = arith.constant 1 : i32
    %0 = arith.muli %arg0, %c1_i32 : i32
    %1 = arith.addi %0, %arg1 : i32
    %c0_i32 = arith.constant 0 : i32
    %c0_i32_0 = arith.constant 0 : i32
    return %1, %c0_i32 : i32, i32
  }
  func.func @transform_1(%arg0: i32, %arg1: i32) -> (i32, i32) {
    %c0_i32 = arith.constant 0 : i32
    %c0_i32_0 = arith.constant 0 : i32
    %c0_i32_1 = arith.constant 0 : i32
    return %c0_i32, %c0_i32_0 : i32, i32
  }
  func.func @transform_2(%arg0: i32, %arg1: i32) -> (i32, i32) {
    %c0_i32 = arith.constant 0 : i32
    %c0_i32_0 = arith.constant 0 : i32
    %c0_i32_1 = arith.constant 0 : i32
    return %c0_i32, %c0_i32_0 : i32, i32
  }
  func.func @transform_3(%arg0: i32, %arg1: i32) -> (i32, i32) {
    %c1_i32 = arith.constant 1 : i32
    %0 = arith.muli %arg0, %c1_i32 : i32
    %1 = arith.addi %0, %arg1 : i32
    %c0_i32 = arith.constant 0 : i32
    %c0_i32_0 = arith.constant 0 : i32
    return %1, %c0_i32 : i32, i32
  }
  func.func @transform_4(%arg0: i32, %arg1: i32) -> (i32, i32, i32) {
    %c0_i32 = arith.constant 0 : i32
    %c0_i32_0 = arith.constant 0 : i32
    %c0_i32_1 = arith.constant 0 : i32
    return %arg0, %c0_i32, %c0_i32_0 : i32, i32, i32
  }
  func.func @transform_5(%arg0: i32, %arg1: i32) -> (i32, i32, i32) {
    %c0_i32 = arith.constant 0 : i32
    %c0_i32_0 = arith.constant 0 : i32
    %c0_i32_1 = arith.constant 0 : i32
    return %arg0, %c0_i32, %c0_i32_0 : i32, i32, i32
  }
}

module attributes {stable_mosaic.version = 11 : i64} {
  func.func @_bn_lrelu_kernel(%arg0: i32, %arg1: i32, %arg2: memref<128x128xbf16, #tpu.memory_space<vmem>>, %arg3: memref<1x1x128xf32, #tpu.memory_space<vmem>>, %arg4: memref<1x1x128xf32, #tpu.memory_space<vmem>>, %arg5: memref<1x128xf32, #tpu.memory_space<vmem>>, %arg6: memref<1x128xf32, #tpu.memory_space<vmem>>, %arg7: memref<128x128xbf16, #tpu.memory_space<vmem>>) attributes {dimension_semantics = [#tpu.dimension_semantics<parallel>, #tpu.dimension_semantics<arbitrary>], iteration_bounds = array<i64: 4, 1>, scalar_prefetch = 0 : i64, scratch_operands = 0 : i64, tpu.core_type = #tpu.core_type<tc>, window_params = [{transform_indices = @transform_0, window_bounds = array<i64: 128, 128>}, {transform_indices = @transform_1, window_bounds = array<i64: 1, 1, 128>}, {transform_indices = @transform_2, window_bounds = array<i64: 1, 1, 128>}, {pipeline_mode = #tpu.pipeline_mode<synchronous>, transform_indices = @transform_3, window_bounds = array<i64: 1, 128>}, {pipeline_mode = #tpu.pipeline_mode<synchronous>, transform_indices = @transform_4, window_bounds = array<i64: 1, 128>}, {transform_indices = @transform_5, window_bounds = array<i64: 128, 128>}]} {
    %c0 = arith.constant 0 : index
    %c0_0 = arith.constant 0 : index
    %c0_1 = arith.constant 0 : index
    %0 = vector.load %arg3[%c0, %c0_0, %c0_1] : memref<1x1x128xf32, #tpu.memory_space<vmem>>, vector<1x1x128xf32>
    %1 = vector.shape_cast %0 : vector<1x1x128xf32> to vector<1x128xf32>
    %cst = arith.constant 7.812500e-03 : f32
    %2 = vector.broadcast %cst : f32 to vector<1x128xf32>
    %3 = arith.mulf %1, %2 : vector<1x128xf32>
    %c0_2 = arith.constant 0 : index
    %c0_3 = arith.constant 0 : index
    %c0_4 = arith.constant 0 : index
    %4 = vector.load %arg4[%c0_2, %c0_3, %c0_4] : memref<1x1x128xf32, #tpu.memory_space<vmem>>, vector<1x1x128xf32>
    %5 = vector.shape_cast %4 : vector<1x1x128xf32> to vector<1x128xf32>
    %cst_5 = arith.constant 7.812500e-03 : f32
    %6 = vector.broadcast %cst_5 : f32 to vector<1x128xf32>
    %7 = arith.mulf %5, %6 : vector<1x128xf32>
    %8 = arith.mulf %3, %3 : vector<1x128xf32>
    %9 = arith.subf %7, %8 : vector<1x128xf32>
    %cst_6 = arith.constant 0.000000e+00 : f32
    %10 = vector.broadcast %cst_6 : f32 to vector<1x128xf32>
    %11 = arith.maximumf %9, %10 : vector<1x128xf32>
    %cst_7 = arith.constant 9.99999974E-6 : f32
    %12 = vector.broadcast %cst_7 : f32 to vector<1x128xf32>
    %13 = arith.addf %11, %12 : vector<1x128xf32>
    %14 = math.rsqrt %13 : vector<1x128xf32>
    %c0_8 = arith.constant 0 : index
    %c0_9 = arith.constant 0 : index
    %15 = vector.load %arg5[%c0_8, %c0_9] : memref<1x128xf32, #tpu.memory_space<vmem>>, vector<1x128xf32>
    %16 = arith.mulf %14, %15 : vector<1x128xf32>
    %c0_10 = arith.constant 0 : index
    %c0_11 = arith.constant 0 : index
    %17 = vector.load %arg6[%c0_10, %c0_11] : memref<1x128xf32, #tpu.memory_space<vmem>>, vector<1x128xf32>
    %18 = arith.mulf %3, %16 : vector<1x128xf32>
    %19 = arith.subf %17, %18 : vector<1x128xf32>
    %c0_12 = arith.constant 0 : index
    %c0_13 = arith.constant 0 : index
    %20 = vector.load %arg2[%c0_12, %c0_13] : memref<128x128xbf16, #tpu.memory_space<vmem>>, vector<128x128xbf16>
    %21 = arith.extf %20 : vector<128x128xbf16> to vector<128x128xf32>
    %22 = vector.broadcast %16 : vector<1x128xf32> to vector<128x128xf32>
    %23 = arith.mulf %21, %22 : vector<128x128xf32>
    %24 = vector.broadcast %19 : vector<1x128xf32> to vector<128x128xf32>
    %25 = arith.addf %23, %24 : vector<128x128xf32>
    %cst_14 = arith.constant 0.000000e+00 : f32
    %26 = vector.broadcast %cst_14 : f32 to vector<128x128xf32>
    %27 = arith.cmpf oge, %25, %26 : vector<128x128xf32>
    %cst_15 = arith.constant 2.000000e-01 : f32
    %28 = vector.broadcast %cst_15 : f32 to vector<128x128xf32>
    %29 = arith.mulf %28, %25 : vector<128x128xf32>
    %30 = arith.select %27, %25, %29 : vector<128x128xi1>, vector<128x128xf32>
    %31 = arith.truncf %30 : vector<128x128xf32> to vector<128x128xbf16>
    %c0_16 = arith.constant 0 : index
    %c0_17 = arith.constant 0 : index
    %32 = vector.load %arg7[%c0_16, %c0_17] : memref<128x128xbf16, #tpu.memory_space<vmem>>, vector<128x128xbf16>
    tpu.vector_store %arg7[%c0_16, %c0_17], %31 {strides = array<i32>} : memref<128x128xbf16, #tpu.memory_space<vmem>>, vector<128x128xbf16>,
    return
  }
  func.func @transform_0(%arg0: i32, %arg1: i32) -> (i32, i32) {
    %c1_i32 = arith.constant 1 : i32
    %0 = arith.muli %arg0, %c1_i32 : i32
    %1 = arith.addi %0, %arg1 : i32
    %c0_i32 = arith.constant 0 : i32
    %c0_i32_0 = arith.constant 0 : i32
    return %1, %c0_i32 : i32, i32
  }
  func.func @transform_1(%arg0: i32, %arg1: i32) -> (i32, i32, i32) {
    %c0_i32 = arith.constant 0 : i32
    %c0_i32_0 = arith.constant 0 : i32
    %c0_i32_1 = arith.constant 0 : i32
    return %arg0, %c0_i32, %c0_i32_0 : i32, i32, i32
  }
  func.func @transform_2(%arg0: i32, %arg1: i32) -> (i32, i32, i32) {
    %c0_i32 = arith.constant 0 : i32
    %c0_i32_0 = arith.constant 0 : i32
    %c0_i32_1 = arith.constant 0 : i32
    return %arg0, %c0_i32, %c0_i32_0 : i32, i32, i32
  }
  func.func @transform_3(%arg0: i32, %arg1: i32) -> (i32, i32) {
    %c0_i32 = arith.constant 0 : i32
    %c0_i32_0 = arith.constant 0 : i32
    %c0_i32_1 = arith.constant 0 : i32
    return %c0_i32, %c0_i32_0 : i32, i32
  }
  func.func @transform_4(%arg0: i32, %arg1: i32) -> (i32, i32) {
    %c0_i32 = arith.constant 0 : i32
    %c0_i32_0 = arith.constant 0 : i32
    %c0_i32_1 = arith.constant 0 : i32
    return %c0_i32, %c0_i32_0 : i32, i32
  }
  func.func @transform_5(%arg0: i32, %arg1: i32) -> (i32, i32) {
    %c1_i32 = arith.constant 1 : i32
    %0 = arith.muli %arg0, %c1_i32 : i32
    %1 = arith.addi %0, %arg1 : i32
    %c0_i32 = arith.constant 0 : i32
    %c0_i32_0 = arith.constant 0 : i32
    return %1, %c0_i32 : i32, i32
  }
}

module attributes {stable_mosaic.version = 11 : i64} {
  func.func @_conv_bn_stats_kernel(%arg0: i32, %arg1: i32, %arg2: memref<128x288xbf16, #tpu.memory_space<vmem>>, %arg3: memref<288x128xbf16, #tpu.memory_space<vmem>>, %arg4: memref<1x128xf32, #tpu.memory_space<vmem>>, %arg5: memref<128x128xbf16, #tpu.memory_space<vmem>>, %arg6: memref<1x1x128xf32, #tpu.memory_space<vmem>>, %arg7: memref<1x1x128xf32, #tpu.memory_space<vmem>>) attributes {dimension_semantics = [#tpu.dimension_semantics<parallel>, #tpu.dimension_semantics<arbitrary>], iteration_bounds = array<i64: 4, 1>, scalar_prefetch = 0 : i64, scratch_operands = 0 : i64, tpu.core_type = #tpu.core_type<tc>, window_params = [{transform_indices = @transform_0, window_bounds = array<i64: 128, 288>}, {pipeline_mode = #tpu.pipeline_mode<synchronous>, transform_indices = @transform_1, window_bounds = array<i64: 288, 128>}, {pipeline_mode = #tpu.pipeline_mode<synchronous>, transform_indices = @transform_2, window_bounds = array<i64: 1, 128>}, {transform_indices = @transform_3, window_bounds = array<i64: 128, 128>}, {transform_indices = @transform_4, window_bounds = array<i64: 1, 1, 128>}, {transform_indices = @transform_5, window_bounds = array<i64: 1, 1, 128>}]} {
    %c0 = arith.constant 0 : index
    %c0_0 = arith.constant 0 : index
    %0 = vector.load %arg2[%c0, %c0_0] : memref<128x288xbf16, #tpu.memory_space<vmem>>, vector<128x288xbf16>
    %c0_1 = arith.constant 0 : index
    %c0_2 = arith.constant 0 : index
    %1 = vector.load %arg3[%c0_1, %c0_2] : memref<288x128xbf16, #tpu.memory_space<vmem>>, vector<288x128xbf16>
    %cst = arith.constant dense<0.000000e+00> : vector<128x128xf32>
    %2 = tpu.matmul %0, %1, %cst {dimension_numbers = #tpu.dot_dimension_numbers<[1], [0], [0], [1], [0, 0, 1, 1], [], []>} : vector<128x288xbf16>, vector<288x128xbf16>, vector<128x128xf32> -> vector<128x128xf32>
    %c0_3 = arith.constant 0 : index
    %c0_4 = arith.constant 0 : index
    %3 = vector.load %arg4[%c0_3, %c0_4] : memref<1x128xf32, #tpu.memory_space<vmem>>, vector<1x128xf32>
    %4 = vector.broadcast %3 : vector<1x128xf32> to vector<128x128xf32>
    %5 = arith.addf %2, %4 : vector<128x128xf32>
    %6 = arith.truncf %5 : vector<128x128xf32> to vector<128x128xbf16>
    %c0_5 = arith.constant 0 : index
    %c0_6 = arith.constant 0 : index
    %7 = vector.load %arg5[%c0_5, %c0_6] : memref<128x128xbf16, #tpu.memory_space<vmem>>, vector<128x128xbf16>
    tpu.vector_store %arg5[%c0_5, %c0_6], %6 {strides = array<i32>} : memref<128x128xbf16, #tpu.memory_space<vmem>>, vector<128x128xbf16>,
    %c0_i32 = arith.constant 0 : i32
    %8 = arith.cmpi eq, %arg1, %c0_i32 : i32
    %9 = arith.extui %8 : i1 to i32
    %c0_i32_7 = arith.constant 0 : i32
    %10 = arith.cmpi ne, %9, %c0_i32_7 : i32
    scf.if %10 {
      %cst_22 = arith.constant 0.000000e+00 : f32
      %24 = vector.broadcast %cst_22 : f32 to vector<1x1x128xf32>
      %c0_23 = arith.constant 0 : index
      %c0_24 = arith.constant 0 : index
      %c0_25 = arith.constant 0 : index
      %25 = vector.load %arg6[%c0_23, %c0_24, %c0_25] : memref<1x1x128xf32, #tpu.memory_space<vmem>>, vector<1x1x128xf32>
      tpu.vector_store %arg6[%c0_23, %c0_24, %c0_25], %24 {strides = array<i32>} : memref<1x1x128xf32, #tpu.memory_space<vmem>>, vector<1x1x128xf32>,
      %cst_26 = arith.constant 0.000000e+00 : f32
      %26 = vector.broadcast %cst_26 : f32 to vector<1x1x128xf32>
      %c0_27 = arith.constant 0 : index
      %c0_28 = arith.constant 0 : index
      %c0_29 = arith.constant 0 : index
      %27 = vector.load %arg7[%c0_27, %c0_28, %c0_29] : memref<1x1x128xf32, #tpu.memory_space<vmem>>, vector<1x1x128xf32>
      tpu.vector_store %arg7[%c0_27, %c0_28, %c0_29], %26 {strides = array<i32>} : memref<1x1x128xf32, #tpu.memory_space<vmem>>, vector<1x1x128xf32>,
    } else {
    }
    %c0_8 = arith.constant 0 : index
    %c0_9 = arith.constant 0 : index
    %c0_10 = arith.constant 0 : index
    %11 = vector.load %arg6[%c0_8, %c0_9, %c0_10] : memref<1x1x128xf32, #tpu.memory_space<vmem>>, vector<1x1x128xf32>
    %cst_11 = arith.constant dense<0.000000e+00> : vector<128xf32>
    %12 = vector.multi_reduction <add>, %5, %cst_11 [0] : vector<128x128xf32> to vector<128xf32>
    %13 = vector.shape_cast %12 : vector<128xf32> to vector<1x128xf32>
    %14 = vector.shape_cast %13 : vector<1x128xf32> to vector<1x1x128xf32>
    %15 = arith.addf %11, %14 : vector<1x1x128xf32>
    %c0_12 = arith.constant 0 : index
    %c0_13 = arith.constant 0 : index
    %c0_14 = arith.constant 0 : index
    %16 = vector.load %arg6[%c0_12, %c0_13, %c0_14] : memref<1x1x128xf32, #tpu.memory_space<vmem>>, vector<1x1x128xf32>
    tpu.vector_store %arg6[%c0_12, %c0_13, %c0_14], %15 {strides = array<i32>} : memref<1x1x128xf32, #tpu.memory_space<vmem>>, vector<1x1x128xf32>,
    %c0_15 = arith.constant 0 : index
    %c0_16 = arith.constant 0 : index
    %c0_17 = arith.constant 0 : index
    %17 = vector.load %arg7[%c0_15, %c0_16, %c0_17] : memref<1x1x128xf32, #tpu.memory_space<vmem>>, vector<1x1x128xf32>
    %18 = arith.mulf %5, %5 : vector<128x128xf32>
    %cst_18 = arith.constant dense<0.000000e+00> : vector<128xf32>
    %19 = vector.multi_reduction <add>, %18, %cst_18 [0] : vector<128x128xf32> to vector<128xf32>
    %20 = vector.shape_cast %19 : vector<128xf32> to vector<1x128xf32>
    %21 = vector.shape_cast %20 : vector<1x128xf32> to vector<1x1x128xf32>
    %22 = arith.addf %17, %21 : vector<1x1x128xf32>
    %c0_19 = arith.constant 0 : index
    %c0_20 = arith.constant 0 : index
    %c0_21 = arith.constant 0 : index
    %23 = vector.load %arg7[%c0_19, %c0_20, %c0_21] : memref<1x1x128xf32, #tpu.memory_space<vmem>>, vector<1x1x128xf32>
    tpu.vector_store %arg7[%c0_19, %c0_20, %c0_21], %22 {strides = array<i32>} : memref<1x1x128xf32, #tpu.memory_space<vmem>>, vector<1x1x128xf32>,
    return
  }
  func.func @transform_0(%arg0: i32, %arg1: i32) -> (i32, i32) {
    %c1_i32 = arith.constant 1 : i32
    %0 = arith.muli %arg0, %c1_i32 : i32
    %1 = arith.addi %0, %arg1 : i32
    %c0_i32 = arith.constant 0 : i32
    %c0_i32_0 = arith.constant 0 : i32
    return %1, %c0_i32 : i32, i32
  }
  func.func @transform_1(%arg0: i32, %arg1: i32) -> (i32, i32) {
    %c0_i32 = arith.constant 0 : i32
    %c0_i32_0 = arith.constant 0 : i32
    %c0_i32_1 = arith.constant 0 : i32
    return %c0_i32, %c0_i32_0 : i32, i32
  }
  func.func @transform_2(%arg0: i32, %arg1: i32) -> (i32, i32) {
    %c0_i32 = arith.constant 0 : i32
    %c0_i32_0 = arith.constant 0 : i32
    %c0_i32_1 = arith.constant 0 : i32
    return %c0_i32, %c0_i32_0 : i32, i32
  }
  func.func @transform_3(%arg0: i32, %arg1: i32) -> (i32, i32) {
    %c1_i32 = arith.constant 1 : i32
    %0 = arith.muli %arg0, %c1_i32 : i32
    %1 = arith.addi %0, %arg1 : i32
    %c0_i32 = arith.constant 0 : i32
    %c0_i32_0 = arith.constant 0 : i32
    return %1, %c0_i32 : i32, i32
  }
  func.func @transform_4(%arg0: i32, %arg1: i32) -> (i32, i32, i32) {
    %c0_i32 = arith.constant 0 : i32
    %c0_i32_0 = arith.constant 0 : i32
    %c0_i32_1 = arith.constant 0 : i32
    return %arg0, %c0_i32, %c0_i32_0 : i32, i32, i32
  }
  func.func @transform_5(%arg0: i32, %arg1: i32) -> (i32, i32, i32) {
    %c0_i32 = arith.constant 0 : i32
    %c0_i32_0 = arith.constant 0 : i32
    %c0_i32_1 = arith.constant 0 : i32
    return %arg0, %c0_i32, %c0_i32_0 : i32, i32, i32
  }
}

module attributes {stable_mosaic.version = 11 : i64} {
  func.func @_conv_bn_stats_kernel(%arg0: i32, %arg1: i32, %arg2: memref<32x1152xbf16, #tpu.memory_space<vmem>>, %arg3: memref<1152x128xbf16, #tpu.memory_space<vmem>>, %arg4: memref<1x128xf32, #tpu.memory_space<vmem>>, %arg5: memref<32x128xbf16, #tpu.memory_space<vmem>>, %arg6: memref<1x1x128xf32, #tpu.memory_space<vmem>>, %arg7: memref<1x1x128xf32, #tpu.memory_space<vmem>>) attributes {dimension_semantics = [#tpu.dimension_semantics<parallel>, #tpu.dimension_semantics<arbitrary>], iteration_bounds = array<i64: 1, 1>, scalar_prefetch = 0 : i64, scratch_operands = 0 : i64, tpu.core_type = #tpu.core_type<tc>, window_params = [{transform_indices = @transform_0, window_bounds = array<i64: 32, 1152>}, {pipeline_mode = #tpu.pipeline_mode<synchronous>, transform_indices = @transform_1, window_bounds = array<i64: 1152, 128>}, {pipeline_mode = #tpu.pipeline_mode<synchronous>, transform_indices = @transform_2, window_bounds = array<i64: 1, 128>}, {transform_indices = @transform_3, window_bounds = array<i64: 32, 128>}, {transform_indices = @transform_4, window_bounds = array<i64: 1, 1, 128>}, {transform_indices = @transform_5, window_bounds = array<i64: 1, 1, 128>}]} {
    %c0 = arith.constant 0 : index
    %c0_0 = arith.constant 0 : index
    %0 = vector.load %arg2[%c0, %c0_0] : memref<32x1152xbf16, #tpu.memory_space<vmem>>, vector<32x1152xbf16>
    %c0_1 = arith.constant 0 : index
    %c0_2 = arith.constant 0 : index
    %1 = vector.load %arg3[%c0_1, %c0_2] : memref<1152x128xbf16, #tpu.memory_space<vmem>>, vector<1152x128xbf16>
    %cst = arith.constant dense<0.000000e+00> : vector<32x128xf32>
    %2 = tpu.matmul %0, %1, %cst {dimension_numbers = #tpu.dot_dimension_numbers<[1], [0], [0], [1], [0, 0, 1, 1], [], []>} : vector<32x1152xbf16>, vector<1152x128xbf16>, vector<32x128xf32> -> vector<32x128xf32>
    %c0_3 = arith.constant 0 : index
    %c0_4 = arith.constant 0 : index
    %3 = vector.load %arg4[%c0_3, %c0_4] : memref<1x128xf32, #tpu.memory_space<vmem>>, vector<1x128xf32>
    %4 = vector.broadcast %3 : vector<1x128xf32> to vector<32x128xf32>
    %5 = arith.addf %2, %4 : vector<32x128xf32>
    %6 = arith.truncf %5 : vector<32x128xf32> to vector<32x128xbf16>
    %c0_5 = arith.constant 0 : index
    %c0_6 = arith.constant 0 : index
    %7 = vector.load %arg5[%c0_5, %c0_6] : memref<32x128xbf16, #tpu.memory_space<vmem>>, vector<32x128xbf16>
    tpu.vector_store %arg5[%c0_5, %c0_6], %6 {strides = array<i32>} : memref<32x128xbf16, #tpu.memory_space<vmem>>, vector<32x128xbf16>,
    %c0_i32 = arith.constant 0 : i32
    %8 = arith.cmpi eq, %arg1, %c0_i32 : i32
    %9 = arith.extui %8 : i1 to i32
    %c0_i32_7 = arith.constant 0 : i32
    %10 = arith.cmpi ne, %9, %c0_i32_7 : i32
    scf.if %10 {
      %cst_22 = arith.constant 0.000000e+00 : f32
      %24 = vector.broadcast %cst_22 : f32 to vector<1x1x128xf32>
      %c0_23 = arith.constant 0 : index
      %c0_24 = arith.constant 0 : index
      %c0_25 = arith.constant 0 : index
      %25 = vector.load %arg6[%c0_23, %c0_24, %c0_25] : memref<1x1x128xf32, #tpu.memory_space<vmem>>, vector<1x1x128xf32>
      tpu.vector_store %arg6[%c0_23, %c0_24, %c0_25], %24 {strides = array<i32>} : memref<1x1x128xf32, #tpu.memory_space<vmem>>, vector<1x1x128xf32>,
      %cst_26 = arith.constant 0.000000e+00 : f32
      %26 = vector.broadcast %cst_26 : f32 to vector<1x1x128xf32>
      %c0_27 = arith.constant 0 : index
      %c0_28 = arith.constant 0 : index
      %c0_29 = arith.constant 0 : index
      %27 = vector.load %arg7[%c0_27, %c0_28, %c0_29] : memref<1x1x128xf32, #tpu.memory_space<vmem>>, vector<1x1x128xf32>
      tpu.vector_store %arg7[%c0_27, %c0_28, %c0_29], %26 {strides = array<i32>} : memref<1x1x128xf32, #tpu.memory_space<vmem>>, vector<1x1x128xf32>,
    } else {
    }
    %c0_8 = arith.constant 0 : index
    %c0_9 = arith.constant 0 : index
    %c0_10 = arith.constant 0 : index
    %11 = vector.load %arg6[%c0_8, %c0_9, %c0_10] : memref<1x1x128xf32, #tpu.memory_space<vmem>>, vector<1x1x128xf32>
    %cst_11 = arith.constant dense<0.000000e+00> : vector<128xf32>
    %12 = vector.multi_reduction <add>, %5, %cst_11 [0] : vector<32x128xf32> to vector<128xf32>
    %13 = vector.shape_cast %12 : vector<128xf32> to vector<1x128xf32>
    %14 = vector.shape_cast %13 : vector<1x128xf32> to vector<1x1x128xf32>
    %15 = arith.addf %11, %14 : vector<1x1x128xf32>
    %c0_12 = arith.constant 0 : index
    %c0_13 = arith.constant 0 : index
    %c0_14 = arith.constant 0 : index
    %16 = vector.load %arg6[%c0_12, %c0_13, %c0_14] : memref<1x1x128xf32, #tpu.memory_space<vmem>>, vector<1x1x128xf32>
    tpu.vector_store %arg6[%c0_12, %c0_13, %c0_14], %15 {strides = array<i32>} : memref<1x1x128xf32, #tpu.memory_space<vmem>>, vector<1x1x128xf32>,
    %c0_15 = arith.constant 0 : index
    %c0_16 = arith.constant 0 : index
    %c0_17 = arith.constant 0 : index
    %17 = vector.load %arg7[%c0_15, %c0_16, %c0_17] : memref<1x1x128xf32, #tpu.memory_space<vmem>>, vector<1x1x128xf32>
    %18 = arith.mulf %5, %5 : vector<32x128xf32>
    %cst_18 = arith.constant dense<0.000000e+00> : vector<128xf32>
    %19 = vector.multi_reduction <add>, %18, %cst_18 [0] : vector<32x128xf32> to vector<128xf32>
    %20 = vector.shape_cast %19 : vector<128xf32> to vector<1x128xf32>
    %21 = vector.shape_cast %20 : vector<1x128xf32> to vector<1x1x128xf32>
    %22 = arith.addf %17, %21 : vector<1x1x128xf32>
    %c0_19 = arith.constant 0 : index
    %c0_20 = arith.constant 0 : index
    %c0_21 = arith.constant 0 : index
    %23 = vector.load %arg7[%c0_19, %c0_20, %c0_21] : memref<1x1x128xf32, #tpu.memory_space<vmem>>, vector<1x1x128xf32>
    tpu.vector_store %arg7[%c0_19, %c0_20, %c0_21], %22 {strides = array<i32>} : memref<1x1x128xf32, #tpu.memory_space<vmem>>, vector<1x1x128xf32>,
    return
  }
  func.func @transform_0(%arg0: i32, %arg1: i32) -> (i32, i32) {
    %c1_i32 = arith.constant 1 : i32
    %0 = arith.muli %arg0, %c1_i32 : i32
    %1 = arith.addi %0, %arg1 : i32
    %c0_i32 = arith.constant 0 : i32
    %c0_i32_0 = arith.constant 0 : i32
    return %1, %c0_i32 : i32, i32
  }
  func.func @transform_1(%arg0: i32, %arg1: i32) -> (i32, i32) {
    %c0_i32 = arith.constant 0 : i32
    %c0_i32_0 = arith.constant 0 : i32
    %c0_i32_1 = arith.constant 0 : i32
    return %c0_i32, %c0_i32_0 : i32, i32
  }
  func.func @transform_2(%arg0: i32, %arg1: i32) -> (i32, i32) {
    %c0_i32 = arith.constant 0 : i32
    %c0_i32_0 = arith.constant 0 : i32
    %c0_i32_1 = arith.constant 0 : i32
    return %c0_i32, %c0_i32_0 : i32, i32
  }
  func.func @transform_3(%arg0: i32, %arg1: i32) -> (i32, i32) {
    %c1_i32 = arith.constant 1 : i32
    %0 = arith.muli %arg0, %c1_i32 : i32
    %1 = arith.addi %0, %arg1 : i32
    %c0_i32 = arith.constant 0 : i32
    %c0_i32_0 = arith.constant 0 : i32
    return %1, %c0_i32 : i32, i32
  }
  func.func @transform_4(%arg0: i32, %arg1: i32) -> (i32, i32, i32) {
    %c0_i32 = arith.constant 0 : i32
    %c0_i32_0 = arith.constant 0 : i32
    %c0_i32_1 = arith.constant 0 : i32
    return %arg0, %c0_i32, %c0_i32_0 : i32, i32, i32
  }
  func.func @transform_5(%arg0: i32, %arg1: i32) -> (i32, i32, i32) {
    %c0_i32 = arith.constant 0 : i32
    %c0_i32_0 = arith.constant 0 : i32
    %c0_i32_1 = arith.constant 0 : i32
    return %arg0, %c0_i32, %c0_i32_0 : i32, i32, i32
  }
}

module attributes {stable_mosaic.version = 11 : i64} {
  func.func @_bn_lrelu_kernel(%arg0: i32, %arg1: i32, %arg2: memref<32x128xbf16, #tpu.memory_space<vmem>>, %arg3: memref<1x1x128xf32, #tpu.memory_space<vmem>>, %arg4: memref<1x1x128xf32, #tpu.memory_space<vmem>>, %arg5: memref<1x128xf32, #tpu.memory_space<vmem>>, %arg6: memref<1x128xf32, #tpu.memory_space<vmem>>, %arg7: memref<32x128xbf16, #tpu.memory_space<vmem>>) attributes {dimension_semantics = [#tpu.dimension_semantics<parallel>, #tpu.dimension_semantics<arbitrary>], iteration_bounds = array<i64: 1, 1>, scalar_prefetch = 0 : i64, scratch_operands = 0 : i64, tpu.core_type = #tpu.core_type<tc>, window_params = [{transform_indices = @transform_0, window_bounds = array<i64: 32, 128>}, {transform_indices = @transform_1, window_bounds = array<i64: 1, 1, 128>}, {transform_indices = @transform_2, window_bounds = array<i64: 1, 1, 128>}, {pipeline_mode = #tpu.pipeline_mode<synchronous>, transform_indices = @transform_3, window_bounds = array<i64: 1, 128>}, {pipeline_mode = #tpu.pipeline_mode<synchronous>, transform_indices = @transform_4, window_bounds = array<i64: 1, 128>}, {transform_indices = @transform_5, window_bounds = array<i64: 32, 128>}]} {
    %c0 = arith.constant 0 : index
    %c0_0 = arith.constant 0 : index
    %c0_1 = arith.constant 0 : index
    %0 = vector.load %arg3[%c0, %c0_0, %c0_1] : memref<1x1x128xf32, #tpu.memory_space<vmem>>, vector<1x1x128xf32>
    %1 = vector.shape_cast %0 : vector<1x1x128xf32> to vector<1x128xf32>
    %cst = arith.constant 3.125000e-02 : f32
    %2 = vector.broadcast %cst : f32 to vector<1x128xf32>
    %3 = arith.mulf %1, %2 : vector<1x128xf32>
    %c0_2 = arith.constant 0 : index
    %c0_3 = arith.constant 0 : index
    %c0_4 = arith.constant 0 : index
    %4 = vector.load %arg4[%c0_2, %c0_3, %c0_4] : memref<1x1x128xf32, #tpu.memory_space<vmem>>, vector<1x1x128xf32>
    %5 = vector.shape_cast %4 : vector<1x1x128xf32> to vector<1x128xf32>
    %cst_5 = arith.constant 3.125000e-02 : f32
    %6 = vector.broadcast %cst_5 : f32 to vector<1x128xf32>
    %7 = arith.mulf %5, %6 : vector<1x128xf32>
    %8 = arith.mulf %3, %3 : vector<1x128xf32>
    %9 = arith.subf %7, %8 : vector<1x128xf32>
    %cst_6 = arith.constant 0.000000e+00 : f32
    %10 = vector.broadcast %cst_6 : f32 to vector<1x128xf32>
    %11 = arith.maximumf %9, %10 : vector<1x128xf32>
    %cst_7 = arith.constant 9.99999974E-6 : f32
    %12 = vector.broadcast %cst_7 : f32 to vector<1x128xf32>
    %13 = arith.addf %11, %12 : vector<1x128xf32>
    %14 = math.rsqrt %13 : vector<1x128xf32>
    %c0_8 = arith.constant 0 : index
    %c0_9 = arith.constant 0 : index
    %15 = vector.load %arg5[%c0_8, %c0_9] : memref<1x128xf32, #tpu.memory_space<vmem>>, vector<1x128xf32>
    %16 = arith.mulf %14, %15 : vector<1x128xf32>
    %c0_10 = arith.constant 0 : index
    %c0_11 = arith.constant 0 : index
    %17 = vector.load %arg6[%c0_10, %c0_11] : memref<1x128xf32, #tpu.memory_space<vmem>>, vector<1x128xf32>
    %18 = arith.mulf %3, %16 : vector<1x128xf32>
    %19 = arith.subf %17, %18 : vector<1x128xf32>
    %c0_12 = arith.constant 0 : index
    %c0_13 = arith.constant 0 : index
    %20 = vector.load %arg2[%c0_12, %c0_13] : memref<32x128xbf16, #tpu.memory_space<vmem>>, vector<32x128xbf16>
    %21 = arith.extf %20 : vector<32x128xbf16> to vector<32x128xf32>
    %22 = vector.broadcast %16 : vector<1x128xf32> to vector<32x128xf32>
    %23 = arith.mulf %21, %22 : vector<32x128xf32>
    %24 = vector.broadcast %19 : vector<1x128xf32> to vector<32x128xf32>
    %25 = arith.addf %23, %24 : vector<32x128xf32>
    %cst_14 = arith.constant 0.000000e+00 : f32
    %26 = vector.broadcast %cst_14 : f32 to vector<32x128xf32>
    %27 = arith.cmpf oge, %25, %26 : vector<32x128xf32>
    %cst_15 = arith.constant 2.000000e-01 : f32
    %28 = vector.broadcast %cst_15 : f32 to vector<32x128xf32>
    %29 = arith.mulf %28, %25 : vector<32x128xf32>
    %30 = arith.select %27, %25, %29 : vector<32x128xi1>, vector<32x128xf32>
    %31 = arith.truncf %30 : vector<32x128xf32> to vector<32x128xbf16>
    %c0_16 = arith.constant 0 : index
    %c0_17 = arith.constant 0 : index
    %32 = vector.load %arg7[%c0_16, %c0_17] : memref<32x128xbf16, #tpu.memory_space<vmem>>, vector<32x128xbf16>
    tpu.vector_store %arg7[%c0_16, %c0_17], %31 {strides = array<i32>} : memref<32x128xbf16, #tpu.memory_space<vmem>>, vector<32x128xbf16>,
    return
  }
  func.func @transform_0(%arg0: i32, %arg1: i32) -> (i32, i32) {
    %c1_i32 = arith.constant 1 : i32
    %0 = arith.muli %arg0, %c1_i32 : i32
    %1 = arith.addi %0, %arg1 : i32
    %c0_i32 = arith.constant 0 : i32
    %c0_i32_0 = arith.constant 0 : i32
    return %1, %c0_i32 : i32, i32
  }
  func.func @transform_1(%arg0: i32, %arg1: i32) -> (i32, i32, i32) {
    %c0_i32 = arith.constant 0 : i32
    %c0_i32_0 = arith.constant 0 : i32
    %c0_i32_1 = arith.constant 0 : i32
    return %arg0, %c0_i32, %c0_i32_0 : i32, i32, i32
  }
  func.func @transform_2(%arg0: i32, %arg1: i32) -> (i32, i32, i32) {
    %c0_i32 = arith.constant 0 : i32
    %c0_i32_0 = arith.constant 0 : i32
    %c0_i32_1 = arith.constant 0 : i32
    return %arg0, %c0_i32, %c0_i32_0 : i32, i32, i32
  }
  func.func @transform_3(%arg0: i32, %arg1: i32) -> (i32, i32) {
    %c0_i32 = arith.constant 0 : i32
    %c0_i32_0 = arith.constant 0 : i32
    %c0_i32_1 = arith.constant 0 : i32
    return %c0_i32, %c0_i32_0 : i32, i32
  }
  func.func @transform_4(%arg0: i32, %arg1: i32) -> (i32, i32) {
    %c0_i32 = arith.constant 0 : i32
    %c0_i32_0 = arith.constant 0 : i32
    %c0_i32_1 = arith.constant 0 : i32
    return %c0_i32, %c0_i32_0 : i32, i32
  }
  func.func @transform_5(%arg0: i32, %arg1: i32) -> (i32, i32) {
    %c1_i32 = arith.constant 1 : i32
    %0 = arith.muli %arg0, %c1_i32 : i32
    %1 = arith.addi %0, %arg1 : i32
    %c0_i32 = arith.constant 0 : i32
    %c0_i32_0 = arith.constant 0 : i32
    return %1, %c0_i32 : i32, i32
  }
}

module attributes {stable_mosaic.version = 11 : i64} {
  func.func @_conv_bn_stats_kernel(%arg0: i32, %arg1: i32, %arg2: memref<32x1152xbf16, #tpu.memory_space<vmem>>, %arg3: memref<1152x256xbf16, #tpu.memory_space<vmem>>, %arg4: memref<1x256xf32, #tpu.memory_space<vmem>>, %arg5: memref<32x256xbf16, #tpu.memory_space<vmem>>, %arg6: memref<1x1x256xf32, #tpu.memory_space<vmem>>, %arg7: memref<1x1x256xf32, #tpu.memory_space<vmem>>) attributes {dimension_semantics = [#tpu.dimension_semantics<parallel>, #tpu.dimension_semantics<arbitrary>], iteration_bounds = array<i64: 1, 1>, scalar_prefetch = 0 : i64, scratch_operands = 0 : i64, tpu.core_type = #tpu.core_type<tc>, window_params = [{transform_indices = @transform_0, window_bounds = array<i64: 32, 1152>}, {pipeline_mode = #tpu.pipeline_mode<synchronous>, transform_indices = @transform_1, window_bounds = array<i64: 1152, 256>}, {pipeline_mode = #tpu.pipeline_mode<synchronous>, transform_indices = @transform_2, window_bounds = array<i64: 1, 256>}, {transform_indices = @transform_3, window_bounds = array<i64: 32, 256>}, {transform_indices = @transform_4, window_bounds = array<i64: 1, 1, 256>}, {transform_indices = @transform_5, window_bounds = array<i64: 1, 1, 256>}]} {
    %c0 = arith.constant 0 : index
    %c0_0 = arith.constant 0 : index
    %0 = vector.load %arg2[%c0, %c0_0] : memref<32x1152xbf16, #tpu.memory_space<vmem>>, vector<32x1152xbf16>
    %c0_1 = arith.constant 0 : index
    %c0_2 = arith.constant 0 : index
    %1 = vector.load %arg3[%c0_1, %c0_2] : memref<1152x256xbf16, #tpu.memory_space<vmem>>, vector<1152x256xbf16>
    %cst = arith.constant dense<0.000000e+00> : vector<32x256xf32>
    %2 = tpu.matmul %0, %1, %cst {dimension_numbers = #tpu.dot_dimension_numbers<[1], [0], [0], [1], [0, 0, 1, 1], [], []>} : vector<32x1152xbf16>, vector<1152x256xbf16>, vector<32x256xf32> -> vector<32x256xf32>
    %c0_3 = arith.constant 0 : index
    %c0_4 = arith.constant 0 : index
    %3 = vector.load %arg4[%c0_3, %c0_4] : memref<1x256xf32, #tpu.memory_space<vmem>>, vector<1x256xf32>
    %4 = vector.broadcast %3 : vector<1x256xf32> to vector<32x256xf32>
    %5 = arith.addf %2, %4 : vector<32x256xf32>
    %6 = arith.truncf %5 : vector<32x256xf32> to vector<32x256xbf16>
    %c0_5 = arith.constant 0 : index
    %c0_6 = arith.constant 0 : index
    %7 = vector.load %arg5[%c0_5, %c0_6] : memref<32x256xbf16, #tpu.memory_space<vmem>>, vector<32x256xbf16>
    tpu.vector_store %arg5[%c0_5, %c0_6], %6 {strides = array<i32>} : memref<32x256xbf16, #tpu.memory_space<vmem>>, vector<32x256xbf16>,
    %c0_i32 = arith.constant 0 : i32
    %8 = arith.cmpi eq, %arg1, %c0_i32 : i32
    %9 = arith.extui %8 : i1 to i32
    %c0_i32_7 = arith.constant 0 : i32
    %10 = arith.cmpi ne, %9, %c0_i32_7 : i32
    scf.if %10 {
      %cst_22 = arith.constant 0.000000e+00 : f32
      %24 = vector.broadcast %cst_22 : f32 to vector<1x1x256xf32>
      %c0_23 = arith.constant 0 : index
      %c0_24 = arith.constant 0 : index
      %c0_25 = arith.constant 0 : index
      %25 = vector.load %arg6[%c0_23, %c0_24, %c0_25] : memref<1x1x256xf32, #tpu.memory_space<vmem>>, vector<1x1x256xf32>
      tpu.vector_store %arg6[%c0_23, %c0_24, %c0_25], %24 {strides = array<i32>} : memref<1x1x256xf32, #tpu.memory_space<vmem>>, vector<1x1x256xf32>,
      %cst_26 = arith.constant 0.000000e+00 : f32
      %26 = vector.broadcast %cst_26 : f32 to vector<1x1x256xf32>
      %c0_27 = arith.constant 0 : index
      %c0_28 = arith.constant 0 : index
      %c0_29 = arith.constant 0 : index
      %27 = vector.load %arg7[%c0_27, %c0_28, %c0_29] : memref<1x1x256xf32, #tpu.memory_space<vmem>>, vector<1x1x256xf32>
      tpu.vector_store %arg7[%c0_27, %c0_28, %c0_29], %26 {strides = array<i32>} : memref<1x1x256xf32, #tpu.memory_space<vmem>>, vector<1x1x256xf32>,
    } else {
    }
    %c0_8 = arith.constant 0 : index
    %c0_9 = arith.constant 0 : index
    %c0_10 = arith.constant 0 : index
    %11 = vector.load %arg6[%c0_8, %c0_9, %c0_10] : memref<1x1x256xf32, #tpu.memory_space<vmem>>, vector<1x1x256xf32>
    %cst_11 = arith.constant dense<0.000000e+00> : vector<256xf32>
    %12 = vector.multi_reduction <add>, %5, %cst_11 [0] : vector<32x256xf32> to vector<256xf32>
    %13 = vector.shape_cast %12 : vector<256xf32> to vector<1x256xf32>
    %14 = vector.shape_cast %13 : vector<1x256xf32> to vector<1x1x256xf32>
    %15 = arith.addf %11, %14 : vector<1x1x256xf32>
    %c0_12 = arith.constant 0 : index
    %c0_13 = arith.constant 0 : index
    %c0_14 = arith.constant 0 : index
    %16 = vector.load %arg6[%c0_12, %c0_13, %c0_14] : memref<1x1x256xf32, #tpu.memory_space<vmem>>, vector<1x1x256xf32>
    tpu.vector_store %arg6[%c0_12, %c0_13, %c0_14], %15 {strides = array<i32>} : memref<1x1x256xf32, #tpu.memory_space<vmem>>, vector<1x1x256xf32>,
    %c0_15 = arith.constant 0 : index
    %c0_16 = arith.constant 0 : index
    %c0_17 = arith.constant 0 : index
    %17 = vector.load %arg7[%c0_15, %c0_16, %c0_17] : memref<1x1x256xf32, #tpu.memory_space<vmem>>, vector<1x1x256xf32>
    %18 = arith.mulf %5, %5 : vector<32x256xf32>
    %cst_18 = arith.constant dense<0.000000e+00> : vector<256xf32>
    %19 = vector.multi_reduction <add>, %18, %cst_18 [0] : vector<32x256xf32> to vector<256xf32>
    %20 = vector.shape_cast %19 : vector<256xf32> to vector<1x256xf32>
    %21 = vector.shape_cast %20 : vector<1x256xf32> to vector<1x1x256xf32>
    %22 = arith.addf %17, %21 : vector<1x1x256xf32>
    %c0_19 = arith.constant 0 : index
    %c0_20 = arith.constant 0 : index
    %c0_21 = arith.constant 0 : index
    %23 = vector.load %arg7[%c0_19, %c0_20, %c0_21] : memref<1x1x256xf32, #tpu.memory_space<vmem>>, vector<1x1x256xf32>
    tpu.vector_store %arg7[%c0_19, %c0_20, %c0_21], %22 {strides = array<i32>} : memref<1x1x256xf32, #tpu.memory_space<vmem>>, vector<1x1x256xf32>,
    return
  }
  func.func @transform_0(%arg0: i32, %arg1: i32) -> (i32, i32) {
    %c1_i32 = arith.constant 1 : i32
    %0 = arith.muli %arg0, %c1_i32 : i32
    %1 = arith.addi %0, %arg1 : i32
    %c0_i32 = arith.constant 0 : i32
    %c0_i32_0 = arith.constant 0 : i32
    return %1, %c0_i32 : i32, i32
  }
  func.func @transform_1(%arg0: i32, %arg1: i32) -> (i32, i32) {
    %c0_i32 = arith.constant 0 : i32
    %c0_i32_0 = arith.constant 0 : i32
    %c0_i32_1 = arith.constant 0 : i32
    return %c0_i32, %c0_i32_0 : i32, i32
  }
  func.func @transform_2(%arg0: i32, %arg1: i32) -> (i32, i32) {
    %c0_i32 = arith.constant 0 : i32
    %c0_i32_0 = arith.constant 0 : i32
    %c0_i32_1 = arith.constant 0 : i32
    return %c0_i32, %c0_i32_0 : i32, i32
  }
  func.func @transform_3(%arg0: i32, %arg1: i32) -> (i32, i32) {
    %c1_i32 = arith.constant 1 : i32
    %0 = arith.muli %arg0, %c1_i32 : i32
    %1 = arith.addi %0, %arg1 : i32
    %c0_i32 = arith.constant 0 : i32
    %c0_i32_0 = arith.constant 0 : i32
    return %1, %c0_i32 : i32, i32
  }
  func.func @transform_4(%arg0: i32, %arg1: i32) -> (i32, i32, i32) {
    %c0_i32 = arith.constant 0 : i32
    %c0_i32_0 = arith.constant 0 : i32
    %c0_i32_1 = arith.constant 0 : i32
    return %arg0, %c0_i32, %c0_i32_0 : i32, i32, i32
  }
  func.func @transform_5(%arg0: i32, %arg1: i32) -> (i32, i32, i32) {
    %c0_i32 = arith.constant 0 : i32
    %c0_i32_0 = arith.constant 0 : i32
    %c0_i32_1 = arith.constant 0 : i32
    return %arg0, %c0_i32, %c0_i32_0 : i32, i32, i32
  }
}

module attributes {stable_mosaic.version = 11 : i64} {
  func.func @_bn_lrelu_kernel(%arg0: i32, %arg1: i32, %arg2: memref<32x256xbf16, #tpu.memory_space<vmem>>, %arg3: memref<1x1x256xf32, #tpu.memory_space<vmem>>, %arg4: memref<1x1x256xf32, #tpu.memory_space<vmem>>, %arg5: memref<1x256xf32, #tpu.memory_space<vmem>>, %arg6: memref<1x256xf32, #tpu.memory_space<vmem>>, %arg7: memref<32x256xbf16, #tpu.memory_space<vmem>>) attributes {dimension_semantics = [#tpu.dimension_semantics<parallel>, #tpu.dimension_semantics<arbitrary>], iteration_bounds = array<i64: 1, 1>, scalar_prefetch = 0 : i64, scratch_operands = 0 : i64, tpu.core_type = #tpu.core_type<tc>, window_params = [{transform_indices = @transform_0, window_bounds = array<i64: 32, 256>}, {transform_indices = @transform_1, window_bounds = array<i64: 1, 1, 256>}, {transform_indices = @transform_2, window_bounds = array<i64: 1, 1, 256>}, {pipeline_mode = #tpu.pipeline_mode<synchronous>, transform_indices = @transform_3, window_bounds = array<i64: 1, 256>}, {pipeline_mode = #tpu.pipeline_mode<synchronous>, transform_indices = @transform_4, window_bounds = array<i64: 1, 256>}, {transform_indices = @transform_5, window_bounds = array<i64: 32, 256>}]} {
    %c0 = arith.constant 0 : index
    %c0_0 = arith.constant 0 : index
    %c0_1 = arith.constant 0 : index
    %0 = vector.load %arg3[%c0, %c0_0, %c0_1] : memref<1x1x256xf32, #tpu.memory_space<vmem>>, vector<1x1x256xf32>
    %1 = vector.shape_cast %0 : vector<1x1x256xf32> to vector<1x256xf32>
    %cst = arith.constant 3.125000e-02 : f32
    %2 = vector.broadcast %cst : f32 to vector<1x256xf32>
    %3 = arith.mulf %1, %2 : vector<1x256xf32>
    %c0_2 = arith.constant 0 : index
    %c0_3 = arith.constant 0 : index
    %c0_4 = arith.constant 0 : index
    %4 = vector.load %arg4[%c0_2, %c0_3, %c0_4] : memref<1x1x256xf32, #tpu.memory_space<vmem>>, vector<1x1x256xf32>
    %5 = vector.shape_cast %4 : vector<1x1x256xf32> to vector<1x256xf32>
    %cst_5 = arith.constant 3.125000e-02 : f32
    %6 = vector.broadcast %cst_5 : f32 to vector<1x256xf32>
    %7 = arith.mulf %5, %6 : vector<1x256xf32>
    %8 = arith.mulf %3, %3 : vector<1x256xf32>
    %9 = arith.subf %7, %8 : vector<1x256xf32>
    %cst_6 = arith.constant 0.000000e+00 : f32
    %10 = vector.broadcast %cst_6 : f32 to vector<1x256xf32>
    %11 = arith.maximumf %9, %10 : vector<1x256xf32>
    %cst_7 = arith.constant 9.99999974E-6 : f32
    %12 = vector.broadcast %cst_7 : f32 to vector<1x256xf32>
    %13 = arith.addf %11, %12 : vector<1x256xf32>
    %14 = math.rsqrt %13 : vector<1x256xf32>
    %c0_8 = arith.constant 0 : index
    %c0_9 = arith.constant 0 : index
    %15 = vector.load %arg5[%c0_8, %c0_9] : memref<1x256xf32, #tpu.memory_space<vmem>>, vector<1x256xf32>
    %16 = arith.mulf %14, %15 : vector<1x256xf32>
    %c0_10 = arith.constant 0 : index
    %c0_11 = arith.constant 0 : index
    %17 = vector.load %arg6[%c0_10, %c0_11] : memref<1x256xf32, #tpu.memory_space<vmem>>, vector<1x256xf32>
    %18 = arith.mulf %3, %16 : vector<1x256xf32>
    %19 = arith.subf %17, %18 : vector<1x256xf32>
    %c0_12 = arith.constant 0 : index
    %c0_13 = arith.constant 0 : index
    %20 = vector.load %arg2[%c0_12, %c0_13] : memref<32x256xbf16, #tpu.memory_space<vmem>>, vector<32x256xbf16>
    %21 = arith.extf %20 : vector<32x256xbf16> to vector<32x256xf32>
    %22 = vector.broadcast %16 : vector<1x256xf32> to vector<32x256xf32>
    %23 = arith.mulf %21, %22 : vector<32x256xf32>
    %24 = vector.broadcast %19 : vector<1x256xf32> to vector<32x256xf32>
    %25 = arith.addf %23, %24 : vector<32x256xf32>
    %cst_14 = arith.constant 0.000000e+00 : f32
    %26 = vector.broadcast %cst_14 : f32 to vector<32x256xf32>
    %27 = arith.cmpf oge, %25, %26 : vector<32x256xf32>
    %cst_15 = arith.constant 2.000000e-01 : f32
    %28 = vector.broadcast %cst_15 : f32 to vector<32x256xf32>
    %29 = arith.mulf %28, %25 : vector<32x256xf32>
    %30 = arith.select %27, %25, %29 : vector<32x256xi1>, vector<32x256xf32>
    %31 = arith.truncf %30 : vector<32x256xf32> to vector<32x256xbf16>
    %c0_16 = arith.constant 0 : index
    %c0_17 = arith.constant 0 : index
    %32 = vector.load %arg7[%c0_16, %c0_17] : memref<32x256xbf16, #tpu.memory_space<vmem>>, vector<32x256xbf16>
    tpu.vector_store %arg7[%c0_16, %c0_17], %31 {strides = array<i32>} : memref<32x256xbf16, #tpu.memory_space<vmem>>, vector<32x256xbf16>,
    return
  }
  func.func @transform_0(%arg0: i32, %arg1: i32) -> (i32, i32) {
    %c1_i32 = arith.constant 1 : i32
    %0 = arith.muli %arg0, %c1_i32 : i32
    %1 = arith.addi %0, %arg1 : i32
    %c0_i32 = arith.constant 0 : i32
    %c0_i32_0 = arith.constant 0 : i32
    return %1, %c0_i32 : i32, i32
  }
  func.func @transform_1(%arg0: i32, %arg1: i32) -> (i32, i32, i32) {
    %c0_i32 = arith.constant 0 : i32
    %c0_i32_0 = arith.constant 0 : i32
    %c0_i32_1 = arith.constant 0 : i32
    return %arg0, %c0_i32, %c0_i32_0 : i32, i32, i32
  }
  func.func @transform_2(%arg0: i32, %arg1: i32) -> (i32, i32, i32) {
    %c0_i32 = arith.constant 0 : i32
    %c0_i32_0 = arith.constant 0 : i32
    %c0_i32_1 = arith.constant 0 : i32
    return %arg0, %c0_i32, %c0_i32_0 : i32, i32, i32
  }
  func.func @transform_3(%arg0: i32, %arg1: i32) -> (i32, i32) {
    %c0_i32 = arith.constant 0 : i32
    %c0_i32_0 = arith.constant 0 : i32
    %c0_i32_1 = arith.constant 0 : i32
    return %c0_i32, %c0_i32_0 : i32, i32
  }
  func.func @transform_4(%arg0: i32, %arg1: i32) -> (i32, i32) {
    %c0_i32 = arith.constant 0 : i32
    %c0_i32_0 = arith.constant 0 : i32
    %c0_i32_1 = arith.constant 0 : i32
    return %c0_i32, %c0_i32_0 : i32, i32
  }
  func.func @transform_5(%arg0: i32, %arg1: i32) -> (i32, i32) {
    %c1_i32 = arith.constant 1 : i32
    %0 = arith.muli %arg0, %c1_i32 : i32
    %1 = arith.addi %0, %arg1 : i32
    %c0_i32 = arith.constant 0 : i32
    %c0_i32_0 = arith.constant 0 : i32
    return %1, %c0_i32 : i32, i32
  }
}

module attributes {stable_mosaic.version = 11 : i64} {
  func.func @_conv_bn_stats_kernel(%arg0: i32, %arg1: i32, %arg2: memref<16x2304xbf16, #tpu.memory_space<vmem>>, %arg3: memref<2304x256xbf16, #tpu.memory_space<vmem>>, %arg4: memref<1x256xf32, #tpu.memory_space<vmem>>, %arg5: memref<16x256xbf16, #tpu.memory_space<vmem>>, %arg6: memref<1x1x256xf32, #tpu.memory_space<vmem>>, %arg7: memref<1x1x256xf32, #tpu.memory_space<vmem>>) attributes {dimension_semantics = [#tpu.dimension_semantics<parallel>, #tpu.dimension_semantics<arbitrary>], iteration_bounds = array<i64: 1, 1>, scalar_prefetch = 0 : i64, scratch_operands = 0 : i64, tpu.core_type = #tpu.core_type<tc>, window_params = [{transform_indices = @transform_0, window_bounds = array<i64: 16, 2304>}, {pipeline_mode = #tpu.pipeline_mode<synchronous>, transform_indices = @transform_1, window_bounds = array<i64: 2304, 256>}, {pipeline_mode = #tpu.pipeline_mode<synchronous>, transform_indices = @transform_2, window_bounds = array<i64: 1, 256>}, {transform_indices = @transform_3, window_bounds = array<i64: 16, 256>}, {transform_indices = @transform_4, window_bounds = array<i64: 1, 1, 256>}, {transform_indices = @transform_5, window_bounds = array<i64: 1, 1, 256>}]} {
    %c0 = arith.constant 0 : index
    %c0_0 = arith.constant 0 : index
    %0 = vector.load %arg2[%c0, %c0_0] : memref<16x2304xbf16, #tpu.memory_space<vmem>>, vector<16x2304xbf16>
    %c0_1 = arith.constant 0 : index
    %c0_2 = arith.constant 0 : index
    %1 = vector.load %arg3[%c0_1, %c0_2] : memref<2304x256xbf16, #tpu.memory_space<vmem>>, vector<2304x256xbf16>
    %cst = arith.constant dense<0.000000e+00> : vector<16x256xf32>
    %2 = tpu.matmul %0, %1, %cst {dimension_numbers = #tpu.dot_dimension_numbers<[1], [0], [0], [1], [0, 0, 1, 1], [], []>} : vector<16x2304xbf16>, vector<2304x256xbf16>, vector<16x256xf32> -> vector<16x256xf32>
    %c0_3 = arith.constant 0 : index
    %c0_4 = arith.constant 0 : index
    %3 = vector.load %arg4[%c0_3, %c0_4] : memref<1x256xf32, #tpu.memory_space<vmem>>, vector<1x256xf32>
    %4 = vector.broadcast %3 : vector<1x256xf32> to vector<16x256xf32>
    %5 = arith.addf %2, %4 : vector<16x256xf32>
    %6 = arith.truncf %5 : vector<16x256xf32> to vector<16x256xbf16>
    %c0_5 = arith.constant 0 : index
    %c0_6 = arith.constant 0 : index
    %7 = vector.load %arg5[%c0_5, %c0_6] : memref<16x256xbf16, #tpu.memory_space<vmem>>, vector<16x256xbf16>
    tpu.vector_store %arg5[%c0_5, %c0_6], %6 {strides = array<i32>} : memref<16x256xbf16, #tpu.memory_space<vmem>>, vector<16x256xbf16>,
    %c16_i32 = arith.constant 16 : i32
    %8 = arith.muli %arg1, %c16_i32 : i32
    %9 = tpu.iota {dimensions = array<i32: 0>} : vector<16x1xi32>
    %10 = vector.broadcast %8 : i32 to vector<16x1xi32>
    %11 = arith.addi %10, %9 : vector<16x1xi32>
    %c8_i32 = arith.constant 8 : i32
    %12 = vector.broadcast %c8_i32 : i32 to vector<16x1xi32>
    %13 = arith.cmpi slt, %11, %12 : vector<16x1xi32>
    %cst_7 = arith.constant 0.000000e+00 : f32
    %14 = vector.shape_cast %13 : vector<16x1xi1> to vector<16x1xi1>
    %15 = vector.broadcast %14 : vector<16x1xi1> to vector<16x256xi1>
    %16 = vector.broadcast %cst_7 : f32 to vector<16x256xf32>
    %17 = arith.select %15, %5, %16 : vector<16x256xi1>, vector<16x256xf32>
    %c0_i32 = arith.constant 0 : i32
    %18 = arith.cmpi eq, %arg1, %c0_i32 : i32
    %19 = arith.extui %18 : i1 to i32
    %c0_i32_8 = arith.constant 0 : i32
    %20 = arith.cmpi ne, %19, %c0_i32_8 : i32
    scf.if %20 {
      %cst_23 = arith.constant 0.000000e+00 : f32
      %34 = vector.broadcast %cst_23 : f32 to vector<1x1x256xf32>
      %c0_24 = arith.constant 0 : index
      %c0_25 = arith.constant 0 : index
      %c0_26 = arith.constant 0 : index
      %35 = vector.load %arg6[%c0_24, %c0_25, %c0_26] : memref<1x1x256xf32, #tpu.memory_space<vmem>>, vector<1x1x256xf32>
      tpu.vector_store %arg6[%c0_24, %c0_25, %c0_26], %34 {strides = array<i32>} : memref<1x1x256xf32, #tpu.memory_space<vmem>>, vector<1x1x256xf32>,
      %cst_27 = arith.constant 0.000000e+00 : f32
      %36 = vector.broadcast %cst_27 : f32 to vector<1x1x256xf32>
      %c0_28 = arith.constant 0 : index
      %c0_29 = arith.constant 0 : index
      %c0_30 = arith.constant 0 : index
      %37 = vector.load %arg7[%c0_28, %c0_29, %c0_30] : memref<1x1x256xf32, #tpu.memory_space<vmem>>, vector<1x1x256xf32>
      tpu.vector_store %arg7[%c0_28, %c0_29, %c0_30], %36 {strides = array<i32>} : memref<1x1x256xf32, #tpu.memory_space<vmem>>, vector<1x1x256xf32>,
    } else {
    }
    %c0_9 = arith.constant 0 : index
    %c0_10 = arith.constant 0 : index
    %c0_11 = arith.constant 0 : index
    %21 = vector.load %arg6[%c0_9, %c0_10, %c0_11] : memref<1x1x256xf32, #tpu.memory_space<vmem>>, vector<1x1x256xf32>
    %cst_12 = arith.constant dense<0.000000e+00> : vector<256xf32>
    %22 = vector.multi_reduction <add>, %17, %cst_12 [0] : vector<16x256xf32> to vector<256xf32>
    %23 = vector.shape_cast %22 : vector<256xf32> to vector<1x256xf32>
    %24 = vector.shape_cast %23 : vector<1x256xf32> to vector<1x1x256xf32>
    %25 = arith.addf %21, %24 : vector<1x1x256xf32>
    %c0_13 = arith.constant 0 : index
    %c0_14 = arith.constant 0 : index
    %c0_15 = arith.constant 0 : index
    %26 = vector.load %arg6[%c0_13, %c0_14, %c0_15] : memref<1x1x256xf32, #tpu.memory_space<vmem>>, vector<1x1x256xf32>
    tpu.vector_store %arg6[%c0_13, %c0_14, %c0_15], %25 {strides = array<i32>} : memref<1x1x256xf32, #tpu.memory_space<vmem>>, vector<1x1x256xf32>,
    %c0_16 = arith.constant 0 : index
    %c0_17 = arith.constant 0 : index
    %c0_18 = arith.constant 0 : index
    %27 = vector.load %arg7[%c0_16, %c0_17, %c0_18] : memref<1x1x256xf32, #tpu.memory_space<vmem>>, vector<1x1x256xf32>
    %28 = arith.mulf %17, %17 : vector<16x256xf32>
    %cst_19 = arith.constant dense<0.000000e+00> : vector<256xf32>
    %29 = vector.multi_reduction <add>, %28, %cst_19 [0] : vector<16x256xf32> to vector<256xf32>
    %30 = vector.shape_cast %29 : vector<256xf32> to vector<1x256xf32>
    %31 = vector.shape_cast %30 : vector<1x256xf32> to vector<1x1x256xf32>
    %32 = arith.addf %27, %31 : vector<1x1x256xf32>
    %c0_20 = arith.constant 0 : index
    %c0_21 = arith.constant 0 : index
    %c0_22 = arith.constant 0 : index
    %33 = vector.load %arg7[%c0_20, %c0_21, %c0_22] : memref<1x1x256xf32, #tpu.memory_space<vmem>>, vector<1x1x256xf32>
    tpu.vector_store %arg7[%c0_20, %c0_21, %c0_22], %32 {strides = array<i32>} : memref<1x1x256xf32, #tpu.memory_space<vmem>>, vector<1x1x256xf32>,
    return
  }
  func.func @transform_0(%arg0: i32, %arg1: i32) -> (i32, i32) {
    %c1_i32 = arith.constant 1 : i32
    %0 = arith.muli %arg0, %c1_i32 : i32
    %1 = arith.addi %0, %arg1 : i32
    %c0_i32 = arith.constant 0 : i32
    %c0_i32_0 = arith.constant 0 : i32
    return %1, %c0_i32 : i32, i32
  }
  func.func @transform_1(%arg0: i32, %arg1: i32) -> (i32, i32) {
    %c0_i32 = arith.constant 0 : i32
    %c0_i32_0 = arith.constant 0 : i32
    %c0_i32_1 = arith.constant 0 : i32
    return %c0_i32, %c0_i32_0 : i32, i32
  }
  func.func @transform_2(%arg0: i32, %arg1: i32) -> (i32, i32) {
    %c0_i32 = arith.constant 0 : i32
    %c0_i32_0 = arith.constant 0 : i32
    %c0_i32_1 = arith.constant 0 : i32
    return %c0_i32, %c0_i32_0 : i32, i32
  }
  func.func @transform_3(%arg0: i32, %arg1: i32) -> (i32, i32) {
    %c1_i32 = arith.constant 1 : i32
    %0 = arith.muli %arg0, %c1_i32 : i32
    %1 = arith.addi %0, %arg1 : i32
    %c0_i32 = arith.constant 0 : i32
    %c0_i32_0 = arith.constant 0 : i32
    return %1, %c0_i32 : i32, i32
  }
  func.func @transform_4(%arg0: i32, %arg1: i32) -> (i32, i32, i32) {
    %c0_i32 = arith.constant 0 : i32
    %c0_i32_0 = arith.constant 0 : i32
    %c0_i32_1 = arith.constant 0 : i32
    return %arg0, %c0_i32, %c0_i32_0 : i32, i32, i32
  }
  func.func @transform_5(%arg0: i32, %arg1: i32) -> (i32, i32, i32) {
    %c0_i32 = arith.constant 0 : i32
    %c0_i32_0 = arith.constant 0 : i32
    %c0_i32_1 = arith.constant 0 : i32
    return %arg0, %c0_i32, %c0_i32_0 : i32, i32, i32
  }
}

module attributes {stable_mosaic.version = 11 : i64} {
  func.func @_bn_lrelu_kernel(%arg0: i32, %arg1: i32, %arg2: memref<16x256xbf16, #tpu.memory_space<vmem>>, %arg3: memref<1x1x256xf32, #tpu.memory_space<vmem>>, %arg4: memref<1x1x256xf32, #tpu.memory_space<vmem>>, %arg5: memref<1x256xf32, #tpu.memory_space<vmem>>, %arg6: memref<1x256xf32, #tpu.memory_space<vmem>>, %arg7: memref<16x256xbf16, #tpu.memory_space<vmem>>) attributes {dimension_semantics = [#tpu.dimension_semantics<parallel>, #tpu.dimension_semantics<arbitrary>], iteration_bounds = array<i64: 1, 1>, scalar_prefetch = 0 : i64, scratch_operands = 0 : i64, tpu.core_type = #tpu.core_type<tc>, window_params = [{transform_indices = @transform_0, window_bounds = array<i64: 16, 256>}, {transform_indices = @transform_1, window_bounds = array<i64: 1, 1, 256>}, {transform_indices = @transform_2, window_bounds = array<i64: 1, 1, 256>}, {pipeline_mode = #tpu.pipeline_mode<synchronous>, transform_indices = @transform_3, window_bounds = array<i64: 1, 256>}, {pipeline_mode = #tpu.pipeline_mode<synchronous>, transform_indices = @transform_4, window_bounds = array<i64: 1, 256>}, {transform_indices = @transform_5, window_bounds = array<i64: 16, 256>}]} {
    %c0 = arith.constant 0 : index
    %c0_0 = arith.constant 0 : index
    %c0_1 = arith.constant 0 : index
    %0 = vector.load %arg3[%c0, %c0_0, %c0_1] : memref<1x1x256xf32, #tpu.memory_space<vmem>>, vector<1x1x256xf32>
    %1 = vector.shape_cast %0 : vector<1x1x256xf32> to vector<1x256xf32>
    %cst = arith.constant 1.250000e-01 : f32
    %2 = vector.broadcast %cst : f32 to vector<1x256xf32>
    %3 = arith.mulf %1, %2 : vector<1x256xf32>
    %c0_2 = arith.constant 0 : index
    %c0_3 = arith.constant 0 : index
    %c0_4 = arith.constant 0 : index
    %4 = vector.load %arg4[%c0_2, %c0_3, %c0_4] : memref<1x1x256xf32, #tpu.memory_space<vmem>>, vector<1x1x256xf32>
    %5 = vector.shape_cast %4 : vector<1x1x256xf32> to vector<1x256xf32>
    %cst_5 = arith.constant 1.250000e-01 : f32
    %6 = vector.broadcast %cst_5 : f32 to vector<1x256xf32>
    %7 = arith.mulf %5, %6 : vector<1x256xf32>
    %8 = arith.mulf %3, %3 : vector<1x256xf32>
    %9 = arith.subf %7, %8 : vector<1x256xf32>
    %cst_6 = arith.constant 0.000000e+00 : f32
    %10 = vector.broadcast %cst_6 : f32 to vector<1x256xf32>
    %11 = arith.maximumf %9, %10 : vector<1x256xf32>
    %cst_7 = arith.constant 9.99999974E-6 : f32
    %12 = vector.broadcast %cst_7 : f32 to vector<1x256xf32>
    %13 = arith.addf %11, %12 : vector<1x256xf32>
    %14 = math.rsqrt %13 : vector<1x256xf32>
    %c0_8 = arith.constant 0 : index
    %c0_9 = arith.constant 0 : index
    %15 = vector.load %arg5[%c0_8, %c0_9] : memref<1x256xf32, #tpu.memory_space<vmem>>, vector<1x256xf32>
    %16 = arith.mulf %14, %15 : vector<1x256xf32>
    %c0_10 = arith.constant 0 : index
    %c0_11 = arith.constant 0 : index
    %17 = vector.load %arg6[%c0_10, %c0_11] : memref<1x256xf32, #tpu.memory_space<vmem>>, vector<1x256xf32>
    %18 = arith.mulf %3, %16 : vector<1x256xf32>
    %19 = arith.subf %17, %18 : vector<1x256xf32>
    %c0_12 = arith.constant 0 : index
    %c0_13 = arith.constant 0 : index
    %20 = vector.load %arg2[%c0_12, %c0_13] : memref<16x256xbf16, #tpu.memory_space<vmem>>, vector<16x256xbf16>
    %21 = arith.extf %20 : vector<16x256xbf16> to vector<16x256xf32>
    %22 = vector.broadcast %16 : vector<1x256xf32> to vector<16x256xf32>
    %23 = arith.mulf %21, %22 : vector<16x256xf32>
    %24 = vector.broadcast %19 : vector<1x256xf32> to vector<16x256xf32>
    %25 = arith.addf %23, %24 : vector<16x256xf32>
    %cst_14 = arith.constant 0.000000e+00 : f32
    %26 = vector.broadcast %cst_14 : f32 to vector<16x256xf32>
    %27 = arith.cmpf oge, %25, %26 : vector<16x256xf32>
    %cst_15 = arith.constant 2.000000e-01 : f32
    %28 = vector.broadcast %cst_15 : f32 to vector<16x256xf32>
    %29 = arith.mulf %28, %25 : vector<16x256xf32>
    %30 = arith.select %27, %25, %29 : vector<16x256xi1>, vector<16x256xf32>
    %31 = arith.truncf %30 : vector<16x256xf32> to vector<16x256xbf16>
    %c0_16 = arith.constant 0 : index
    %c0_17 = arith.constant 0 : index
    %32 = vector.load %arg7[%c0_16, %c0_17] : memref<16x256xbf16, #tpu.memory_space<vmem>>, vector<16x256xbf16>
    tpu.vector_store %arg7[%c0_16, %c0_17], %31 {strides = array<i32>} : memref<16x256xbf16, #tpu.memory_space<vmem>>, vector<16x256xbf16>,
    return
  }
  func.func @transform_0(%arg0: i32, %arg1: i32) -> (i32, i32) {
    %c1_i32 = arith.constant 1 : i32
    %0 = arith.muli %arg0, %c1_i32 : i32
    %1 = arith.addi %0, %arg1 : i32
    %c0_i32 = arith.constant 0 : i32
    %c0_i32_0 = arith.constant 0 : i32
    return %1, %c0_i32 : i32, i32
  }
  func.func @transform_1(%arg0: i32, %arg1: i32) -> (i32, i32, i32) {
    %c0_i32 = arith.constant 0 : i32
    %c0_i32_0 = arith.constant 0 : i32
    %c0_i32_1 = arith.constant 0 : i32
    return %arg0, %c0_i32, %c0_i32_0 : i32, i32, i32
  }
  func.func @transform_2(%arg0: i32, %arg1: i32) -> (i32, i32, i32) {
    %c0_i32 = arith.constant 0 : i32
    %c0_i32_0 = arith.constant 0 : i32
    %c0_i32_1 = arith.constant 0 : i32
    return %arg0, %c0_i32, %c0_i32_0 : i32, i32, i32
  }
  func.func @transform_3(%arg0: i32, %arg1: i32) -> (i32, i32) {
    %c0_i32 = arith.constant 0 : i32
    %c0_i32_0 = arith.constant 0 : i32
    %c0_i32_1 = arith.constant 0 : i32
    return %c0_i32, %c0_i32_0 : i32, i32
  }
  func.func @transform_4(%arg0: i32, %arg1: i32) -> (i32, i32) {
    %c0_i32 = arith.constant 0 : i32
    %c0_i32_0 = arith.constant 0 : i32
    %c0_i32_1 = arith.constant 0 : i32
    return %c0_i32, %c0_i32_0 : i32, i32
  }
  func.func @transform_5(%arg0: i32, %arg1: i32) -> (i32, i32) {
    %c1_i32 = arith.constant 1 : i32
    %0 = arith.muli %arg0, %c1_i32 : i32
    %1 = arith.addi %0, %arg1 : i32
    %c0_i32 = arith.constant 0 : i32
    %c0_i32_0 = arith.constant 0 : i32
    return %1, %c0_i32 : i32, i32
  }
}

module attributes {stable_mosaic.version = 11 : i64} {
  func.func @_conv_bn_stats_kernel(%arg0: i32, %arg1: i32, %arg2: memref<16x2304xbf16, #tpu.memory_space<vmem>>, %arg3: memref<2304x512xbf16, #tpu.memory_space<vmem>>, %arg4: memref<1x512xf32, #tpu.memory_space<vmem>>, %arg5: memref<16x512xbf16, #tpu.memory_space<vmem>>, %arg6: memref<1x1x512xf32, #tpu.memory_space<vmem>>, %arg7: memref<1x1x512xf32, #tpu.memory_space<vmem>>) attributes {dimension_semantics = [#tpu.dimension_semantics<parallel>, #tpu.dimension_semantics<arbitrary>], iteration_bounds = array<i64: 1, 1>, scalar_prefetch = 0 : i64, scratch_operands = 0 : i64, tpu.core_type = #tpu.core_type<tc>, window_params = [{transform_indices = @transform_0, window_bounds = array<i64: 16, 2304>}, {pipeline_mode = #tpu.pipeline_mode<synchronous>, transform_indices = @transform_1, window_bounds = array<i64: 2304, 512>}, {pipeline_mode = #tpu.pipeline_mode<synchronous>, transform_indices = @transform_2, window_bounds = array<i64: 1, 512>}, {transform_indices = @transform_3, window_bounds = array<i64: 16, 512>}, {transform_indices = @transform_4, window_bounds = array<i64: 1, 1, 512>}, {transform_indices = @transform_5, window_bounds = array<i64: 1, 1, 512>}]} {
    %c0 = arith.constant 0 : index
    %c0_0 = arith.constant 0 : index
    %0 = vector.load %arg2[%c0, %c0_0] : memref<16x2304xbf16, #tpu.memory_space<vmem>>, vector<16x2304xbf16>
    %c0_1 = arith.constant 0 : index
    %c0_2 = arith.constant 0 : index
    %1 = vector.load %arg3[%c0_1, %c0_2] : memref<2304x512xbf16, #tpu.memory_space<vmem>>, vector<2304x512xbf16>
    %cst = arith.constant dense<0.000000e+00> : vector<16x512xf32>
    %2 = tpu.matmul %0, %1, %cst {dimension_numbers = #tpu.dot_dimension_numbers<[1], [0], [0], [1], [0, 0, 1, 1], [], []>} : vector<16x2304xbf16>, vector<2304x512xbf16>, vector<16x512xf32> -> vector<16x512xf32>
    %c0_3 = arith.constant 0 : index
    %c0_4 = arith.constant 0 : index
    %3 = vector.load %arg4[%c0_3, %c0_4] : memref<1x512xf32, #tpu.memory_space<vmem>>, vector<1x512xf32>
    %4 = vector.broadcast %3 : vector<1x512xf32> to vector<16x512xf32>
    %5 = arith.addf %2, %4 : vector<16x512xf32>
    %6 = arith.truncf %5 : vector<16x512xf32> to vector<16x512xbf16>
    %c0_5 = arith.constant 0 : index
    %c0_6 = arith.constant 0 : index
    %7 = vector.load %arg5[%c0_5, %c0_6] : memref<16x512xbf16, #tpu.memory_space<vmem>>, vector<16x512xbf16>
    tpu.vector_store %arg5[%c0_5, %c0_6], %6 {strides = array<i32>} : memref<16x512xbf16, #tpu.memory_space<vmem>>, vector<16x512xbf16>,
    %c16_i32 = arith.constant 16 : i32
    %8 = arith.muli %arg1, %c16_i32 : i32
    %9 = tpu.iota {dimensions = array<i32: 0>} : vector<16x1xi32>
    %10 = vector.broadcast %8 : i32 to vector<16x1xi32>
    %11 = arith.addi %10, %9 : vector<16x1xi32>
    %c8_i32 = arith.constant 8 : i32
    %12 = vector.broadcast %c8_i32 : i32 to vector<16x1xi32>
    %13 = arith.cmpi slt, %11, %12 : vector<16x1xi32>
    %cst_7 = arith.constant 0.000000e+00 : f32
    %14 = vector.shape_cast %13 : vector<16x1xi1> to vector<16x1xi1>
    %15 = vector.broadcast %14 : vector<16x1xi1> to vector<16x512xi1>
    %16 = vector.broadcast %cst_7 : f32 to vector<16x512xf32>
    %17 = arith.select %15, %5, %16 : vector<16x512xi1>, vector<16x512xf32>
    %c0_i32 = arith.constant 0 : i32
    %18 = arith.cmpi eq, %arg1, %c0_i32 : i32
    %19 = arith.extui %18 : i1 to i32
    %c0_i32_8 = arith.constant 0 : i32
    %20 = arith.cmpi ne, %19, %c0_i32_8 : i32
    scf.if %20 {
      %cst_23 = arith.constant 0.000000e+00 : f32
      %34 = vector.broadcast %cst_23 : f32 to vector<1x1x512xf32>
      %c0_24 = arith.constant 0 : index
      %c0_25 = arith.constant 0 : index
      %c0_26 = arith.constant 0 : index
      %35 = vector.load %arg6[%c0_24, %c0_25, %c0_26] : memref<1x1x512xf32, #tpu.memory_space<vmem>>, vector<1x1x512xf32>
      tpu.vector_store %arg6[%c0_24, %c0_25, %c0_26], %34 {strides = array<i32>} : memref<1x1x512xf32, #tpu.memory_space<vmem>>, vector<1x1x512xf32>,
      %cst_27 = arith.constant 0.000000e+00 : f32
      %36 = vector.broadcast %cst_27 : f32 to vector<1x1x512xf32>
      %c0_28 = arith.constant 0 : index
      %c0_29 = arith.constant 0 : index
      %c0_30 = arith.constant 0 : index
      %37 = vector.load %arg7[%c0_28, %c0_29, %c0_30] : memref<1x1x512xf32, #tpu.memory_space<vmem>>, vector<1x1x512xf32>
      tpu.vector_store %arg7[%c0_28, %c0_29, %c0_30], %36 {strides = array<i32>} : memref<1x1x512xf32, #tpu.memory_space<vmem>>, vector<1x1x512xf32>,
    } else {
    }
    %c0_9 = arith.constant 0 : index
    %c0_10 = arith.constant 0 : index
    %c0_11 = arith.constant 0 : index
    %21 = vector.load %arg6[%c0_9, %c0_10, %c0_11] : memref<1x1x512xf32, #tpu.memory_space<vmem>>, vector<1x1x512xf32>
    %cst_12 = arith.constant dense<0.000000e+00> : vector<512xf32>
    %22 = vector.multi_reduction <add>, %17, %cst_12 [0] : vector<16x512xf32> to vector<512xf32>
    %23 = vector.shape_cast %22 : vector<512xf32> to vector<1x512xf32>
    %24 = vector.shape_cast %23 : vector<1x512xf32> to vector<1x1x512xf32>
    %25 = arith.addf %21, %24 : vector<1x1x512xf32>
    %c0_13 = arith.constant 0 : index
    %c0_14 = arith.constant 0 : index
    %c0_15 = arith.constant 0 : index
    %26 = vector.load %arg6[%c0_13, %c0_14, %c0_15] : memref<1x1x512xf32, #tpu.memory_space<vmem>>, vector<1x1x512xf32>
    tpu.vector_store %arg6[%c0_13, %c0_14, %c0_15], %25 {strides = array<i32>} : memref<1x1x512xf32, #tpu.memory_space<vmem>>, vector<1x1x512xf32>,
    %c0_16 = arith.constant 0 : index
    %c0_17 = arith.constant 0 : index
    %c0_18 = arith.constant 0 : index
    %27 = vector.load %arg7[%c0_16, %c0_17, %c0_18] : memref<1x1x512xf32, #tpu.memory_space<vmem>>, vector<1x1x512xf32>
    %28 = arith.mulf %17, %17 : vector<16x512xf32>
    %cst_19 = arith.constant dense<0.000000e+00> : vector<512xf32>
    %29 = vector.multi_reduction <add>, %28, %cst_19 [0] : vector<16x512xf32> to vector<512xf32>
    %30 = vector.shape_cast %29 : vector<512xf32> to vector<1x512xf32>
    %31 = vector.shape_cast %30 : vector<1x512xf32> to vector<1x1x512xf32>
    %32 = arith.addf %27, %31 : vector<1x1x512xf32>
    %c0_20 = arith.constant 0 : index
    %c0_21 = arith.constant 0 : index
    %c0_22 = arith.constant 0 : index
    %33 = vector.load %arg7[%c0_20, %c0_21, %c0_22] : memref<1x1x512xf32, #tpu.memory_space<vmem>>, vector<1x1x512xf32>
    tpu.vector_store %arg7[%c0_20, %c0_21, %c0_22], %32 {strides = array<i32>} : memref<1x1x512xf32, #tpu.memory_space<vmem>>, vector<1x1x512xf32>,
    return
  }
  func.func @transform_0(%arg0: i32, %arg1: i32) -> (i32, i32) {
    %c1_i32 = arith.constant 1 : i32
    %0 = arith.muli %arg0, %c1_i32 : i32
    %1 = arith.addi %0, %arg1 : i32
    %c0_i32 = arith.constant 0 : i32
    %c0_i32_0 = arith.constant 0 : i32
    return %1, %c0_i32 : i32, i32
  }
  func.func @transform_1(%arg0: i32, %arg1: i32) -> (i32, i32) {
    %c0_i32 = arith.constant 0 : i32
    %c0_i32_0 = arith.constant 0 : i32
    %c0_i32_1 = arith.constant 0 : i32
    return %c0_i32, %c0_i32_0 : i32, i32
  }
  func.func @transform_2(%arg0: i32, %arg1: i32) -> (i32, i32) {
    %c0_i32 = arith.constant 0 : i32
    %c0_i32_0 = arith.constant 0 : i32
    %c0_i32_1 = arith.constant 0 : i32
    return %c0_i32, %c0_i32_0 : i32, i32
  }
  func.func @transform_3(%arg0: i32, %arg1: i32) -> (i32, i32) {
    %c1_i32 = arith.constant 1 : i32
    %0 = arith.muli %arg0, %c1_i32 : i32
    %1 = arith.addi %0, %arg1 : i32
    %c0_i32 = arith.constant 0 : i32
    %c0_i32_0 = arith.constant 0 : i32
    return %1, %c0_i32 : i32, i32
  }
  func.func @transform_4(%arg0: i32, %arg1: i32) -> (i32, i32, i32) {
    %c0_i32 = arith.constant 0 : i32
    %c0_i32_0 = arith.constant 0 : i32
    %c0_i32_1 = arith.constant 0 : i32
    return %arg0, %c0_i32, %c0_i32_0 : i32, i32, i32
  }
  func.func @transform_5(%arg0: i32, %arg1: i32) -> (i32, i32, i32) {
    %c0_i32 = arith.constant 0 : i32
    %c0_i32_0 = arith.constant 0 : i32
    %c0_i32_1 = arith.constant 0 : i32
    return %arg0, %c0_i32, %c0_i32_0 : i32, i32, i32
  }
}

module attributes {stable_mosaic.version = 11 : i64} {
  func.func @_bn_lrelu_kernel(%arg0: i32, %arg1: i32, %arg2: memref<16x512xbf16, #tpu.memory_space<vmem>>, %arg3: memref<1x1x512xf32, #tpu.memory_space<vmem>>, %arg4: memref<1x1x512xf32, #tpu.memory_space<vmem>>, %arg5: memref<1x512xf32, #tpu.memory_space<vmem>>, %arg6: memref<1x512xf32, #tpu.memory_space<vmem>>, %arg7: memref<16x512xbf16, #tpu.memory_space<vmem>>) attributes {dimension_semantics = [#tpu.dimension_semantics<parallel>, #tpu.dimension_semantics<arbitrary>], iteration_bounds = array<i64: 1, 1>, scalar_prefetch = 0 : i64, scratch_operands = 0 : i64, tpu.core_type = #tpu.core_type<tc>, window_params = [{transform_indices = @transform_0, window_bounds = array<i64: 16, 512>}, {transform_indices = @transform_1, window_bounds = array<i64: 1, 1, 512>}, {transform_indices = @transform_2, window_bounds = array<i64: 1, 1, 512>}, {pipeline_mode = #tpu.pipeline_mode<synchronous>, transform_indices = @transform_3, window_bounds = array<i64: 1, 512>}, {pipeline_mode = #tpu.pipeline_mode<synchronous>, transform_indices = @transform_4, window_bounds = array<i64: 1, 512>}, {transform_indices = @transform_5, window_bounds = array<i64: 16, 512>}]} {
    %c0 = arith.constant 0 : index
    %c0_0 = arith.constant 0 : index
    %c0_1 = arith.constant 0 : index
    %0 = vector.load %arg3[%c0, %c0_0, %c0_1] : memref<1x1x512xf32, #tpu.memory_space<vmem>>, vector<1x1x512xf32>
    %1 = vector.shape_cast %0 : vector<1x1x512xf32> to vector<1x512xf32>
    %cst = arith.constant 1.250000e-01 : f32
    %2 = vector.broadcast %cst : f32 to vector<1x512xf32>
    %3 = arith.mulf %1, %2 : vector<1x512xf32>
    %c0_2 = arith.constant 0 : index
    %c0_3 = arith.constant 0 : index
    %c0_4 = arith.constant 0 : index
    %4 = vector.load %arg4[%c0_2, %c0_3, %c0_4] : memref<1x1x512xf32, #tpu.memory_space<vmem>>, vector<1x1x512xf32>
    %5 = vector.shape_cast %4 : vector<1x1x512xf32> to vector<1x512xf32>
    %cst_5 = arith.constant 1.250000e-01 : f32
    %6 = vector.broadcast %cst_5 : f32 to vector<1x512xf32>
    %7 = arith.mulf %5, %6 : vector<1x512xf32>
    %8 = arith.mulf %3, %3 : vector<1x512xf32>
    %9 = arith.subf %7, %8 : vector<1x512xf32>
    %cst_6 = arith.constant 0.000000e+00 : f32
    %10 = vector.broadcast %cst_6 : f32 to vector<1x512xf32>
    %11 = arith.maximumf %9, %10 : vector<1x512xf32>
    %cst_7 = arith.constant 9.99999974E-6 : f32
    %12 = vector.broadcast %cst_7 : f32 to vector<1x512xf32>
    %13 = arith.addf %11, %12 : vector<1x512xf32>
    %14 = math.rsqrt %13 : vector<1x512xf32>
    %c0_8 = arith.constant 0 : index
    %c0_9 = arith.constant 0 : index
    %15 = vector.load %arg5[%c0_8, %c0_9] : memref<1x512xf32, #tpu.memory_space<vmem>>, vector<1x512xf32>
    %16 = arith.mulf %14, %15 : vector<1x512xf32>
    %c0_10 = arith.constant 0 : index
    %c0_11 = arith.constant 0 : index
    %17 = vector.load %arg6[%c0_10, %c0_11] : memref<1x512xf32, #tpu.memory_space<vmem>>, vector<1x512xf32>
    %18 = arith.mulf %3, %16 : vector<1x512xf32>
    %19 = arith.subf %17, %18 : vector<1x512xf32>
    %c0_12 = arith.constant 0 : index
    %c0_13 = arith.constant 0 : index
    %20 = vector.load %arg2[%c0_12, %c0_13] : memref<16x512xbf16, #tpu.memory_space<vmem>>, vector<16x512xbf16>
    %21 = arith.extf %20 : vector<16x512xbf16> to vector<16x512xf32>
    %22 = vector.broadcast %16 : vector<1x512xf32> to vector<16x512xf32>
    %23 = arith.mulf %21, %22 : vector<16x512xf32>
    %24 = vector.broadcast %19 : vector<1x512xf32> to vector<16x512xf32>
    %25 = arith.addf %23, %24 : vector<16x512xf32>
    %cst_14 = arith.constant 0.000000e+00 : f32
    %26 = vector.broadcast %cst_14 : f32 to vector<16x512xf32>
    %27 = arith.cmpf oge, %25, %26 : vector<16x512xf32>
    %cst_15 = arith.constant 2.000000e-01 : f32
    %28 = vector.broadcast %cst_15 : f32 to vector<16x512xf32>
    %29 = arith.mulf %28, %25 : vector<16x512xf32>
    %30 = arith.select %27, %25, %29 : vector<16x512xi1>, vector<16x512xf32>
    %31 = arith.truncf %30 : vector<16x512xf32> to vector<16x512xbf16>
    %c0_16 = arith.constant 0 : index
    %c0_17 = arith.constant 0 : index
    %32 = vector.load %arg7[%c0_16, %c0_17] : memref<16x512xbf16, #tpu.memory_space<vmem>>, vector<16x512xbf16>
    tpu.vector_store %arg7[%c0_16, %c0_17], %31 {strides = array<i32>} : memref<16x512xbf16, #tpu.memory_space<vmem>>, vector<16x512xbf16>,
    return
  }
  func.func @transform_0(%arg0: i32, %arg1: i32) -> (i32, i32) {
    %c1_i32 = arith.constant 1 : i32
    %0 = arith.muli %arg0, %c1_i32 : i32
    %1 = arith.addi %0, %arg1 : i32
    %c0_i32 = arith.constant 0 : i32
    %c0_i32_0 = arith.constant 0 : i32
    return %1, %c0_i32 : i32, i32
  }
  func.func @transform_1(%arg0: i32, %arg1: i32) -> (i32, i32, i32) {
    %c0_i32 = arith.constant 0 : i32
    %c0_i32_0 = arith.constant 0 : i32
    %c0_i32_1 = arith.constant 0 : i32
    return %arg0, %c0_i32, %c0_i32_0 : i32, i32, i32
  }
  func.func @transform_2(%arg0: i32, %arg1: i32) -> (i32, i32, i32) {
    %c0_i32 = arith.constant 0 : i32
    %c0_i32_0 = arith.constant 0 : i32
    %c0_i32_1 = arith.constant 0 : i32
    return %arg0, %c0_i32, %c0_i32_0 : i32, i32, i32
  }
  func.func @transform_3(%arg0: i32, %arg1: i32) -> (i32, i32) {
    %c0_i32 = arith.constant 0 : i32
    %c0_i32_0 = arith.constant 0 : i32
    %c0_i32_1 = arith.constant 0 : i32
    return %c0_i32, %c0_i32_0 : i32, i32
  }
  func.func @transform_4(%arg0: i32, %arg1: i32) -> (i32, i32) {
    %c0_i32 = arith.constant 0 : i32
    %c0_i32_0 = arith.constant 0 : i32
    %c0_i32_1 = arith.constant 0 : i32
    return %c0_i32, %c0_i32_0 : i32, i32
  }
  func.func @transform_5(%arg0: i32, %arg1: i32) -> (i32, i32) {
    %c1_i32 = arith.constant 1 : i32
    %0 = arith.muli %arg0, %c1_i32 : i32
    %1 = arith.addi %0, %arg1 : i32
    %c0_i32 = arith.constant 0 : i32
    %c0_i32_0 = arith.constant 0 : i32
    return %1, %c0_i32 : i32, i32
  }
}

module attributes {stable_mosaic.version = 11 : i64} {
  func.func @_conv_kernel(%arg0: i32, %arg1: memref<16x512xbf16, #tpu.memory_space<vmem>>, %arg2: memref<512x128xbf16, #tpu.memory_space<vmem>>, %arg3: memref<1x128xf32, #tpu.memory_space<vmem>>, %arg4: memref<16x128xf32, #tpu.memory_space<vmem>>) attributes {dimension_semantics = [#tpu.dimension_semantics<parallel>], iteration_bounds = array<i64: 1>, scalar_prefetch = 0 : i64, scratch_operands = 0 : i64, tpu.core_type = #tpu.core_type<tc>, window_params = [{transform_indices = @transform_0, window_bounds = array<i64: 16, 512>}, {pipeline_mode = #tpu.pipeline_mode<synchronous>, transform_indices = @transform_1, window_bounds = array<i64: 512, 128>}, {pipeline_mode = #tpu.pipeline_mode<synchronous>, transform_indices = @transform_2, window_bounds = array<i64: 1, 128>}, {transform_indices = @transform_3, window_bounds = array<i64: 16, 128>}]} {
    %c0 = arith.constant 0 : index
    %c0_0 = arith.constant 0 : index
    %0 = vector.load %arg1[%c0, %c0_0] : memref<16x512xbf16, #tpu.memory_space<vmem>>, vector<16x512xbf16>
    %c0_1 = arith.constant 0 : index
    %c0_2 = arith.constant 0 : index
    %1 = vector.load %arg2[%c0_1, %c0_2] : memref<512x128xbf16, #tpu.memory_space<vmem>>, vector<512x128xbf16>
    %cst = arith.constant dense<0.000000e+00> : vector<16x128xf32>
    %2 = tpu.matmul %0, %1, %cst {dimension_numbers = #tpu.dot_dimension_numbers<[1], [0], [0], [1], [0, 0, 1, 1], [], []>} : vector<16x512xbf16>, vector<512x128xbf16>, vector<16x128xf32> -> vector<16x128xf32>
    %c0_3 = arith.constant 0 : index
    %c0_4 = arith.constant 0 : index
    %3 = vector.load %arg3[%c0_3, %c0_4] : memref<1x128xf32, #tpu.memory_space<vmem>>, vector<1x128xf32>
    %4 = vector.broadcast %3 : vector<1x128xf32> to vector<16x128xf32>
    %5 = arith.addf %2, %4 : vector<16x128xf32>
    %c0_5 = arith.constant 0 : index
    %c0_6 = arith.constant 0 : index
    %6 = vector.load %arg4[%c0_5, %c0_6] : memref<16x128xf32, #tpu.memory_space<vmem>>, vector<16x128xf32>
    tpu.vector_store %arg4[%c0_5, %c0_6], %5 {strides = array<i32>} : memref<16x128xf32, #tpu.memory_space<vmem>>, vector<16x128xf32>,
    return
  }
  func.func @transform_0(%arg0: i32) -> (i32, i32) {
    %c0_i32 = arith.constant 0 : i32
    %c0_i32_0 = arith.constant 0 : i32
    return %arg0, %c0_i32 : i32, i32
  }
  func.func @transform_1(%arg0: i32) -> (i32, i32) {
    %c0_i32 = arith.constant 0 : i32
    %c0_i32_0 = arith.constant 0 : i32
    %c0_i32_1 = arith.constant 0 : i32
    return %c0_i32, %c0_i32_0 : i32, i32
  }
  func.func @transform_2(%arg0: i32) -> (i32, i32) {
    %c0_i32 = arith.constant 0 : i32
    %c0_i32_0 = arith.constant 0 : i32
    %c0_i32_1 = arith.constant 0 : i32
    return %c0_i32, %c0_i32_0 : i32, i32
  }
  func.func @transform_3(%arg0: i32) -> (i32, i32) {
    %c0_i32 = arith.constant 0 : i32
    %c0_i32_0 = arith.constant 0 : i32
    return %arg0, %c0_i32 : i32, i32
  }
}

</mosaic_0001>

<bundles_post_ra>
// kernel: discriminator_forward.20
= control target key start
LH: loop header
LB: loop body
LE: loop exit
PB: predicated region body
PF: predicated region fallthrough
CT: control target
= control target key end

     0   :  { %s793_s18 = smov 0   ;;  %s795_s19 = smov 0   ;;  %s899_s0 = inlined_call_operand.vmem [shape: bf16[512,128], index: 0, kind: input, shape index: {}]   ;;  %s900_s1 = inlined_call_operand.vmem [shape: f32[4,1,128], index: 1, kind: input, shape index: {}]   ;;  %s901_s2 = inlined_call_operand.vmem [shape: f32[4,1,128], index: 2, kind: input, shape index: {}]   ;;  %s902_s3 = inlined_call_operand.vmem [shape: f32[1,128], index: 3, kind: input, shape index: {}]   ;;  %s903_s4 = inlined_call_operand.vmem [shape: f32[1,128], index: 4, kind: input, shape index: {}]   ;;  %s904_s5 = inlined_call_operand.vmem [shape: bf16[512,128], index: 5, kind: output, shape index: {}]  }
   0x1   :  { %s797_s20 = smov 0  }
   0x2 LB: > { %s27_s21 = sadd.s32 1, %s757_s19  ;;  %p588_p0 = scmp.ge.s32.totalorder %s761_s20, 1  ;;  %s761_s20 = sphi %s797_s20, %s15_s20   ;;  %s757_s19 = sphi %s795_s19, %s906_s19   ;;  %s753_s18 = sphi %s793_s18, %s905_s18  }
   0x3   : > { %p29_p1 = scmp.ge.s32.totalorder %s27_s21, 4  ;;  %p222_p2 = scmp.lt.s32.totalorder %s761_s20, 5 }
   0x5   : > { %s908_s21 = smov (%p29_p1, %s27_s21), 0  ;;  %p223_p3 = pnand %p588_p0, %p222_p2 }
   0x6   : > { %p266_p4 = scmp.lt.s32.totalorder (!%p223_p3), %s753_s18, 3  ;;  %s589_s29 = sshll.u32 (!%p223_p3), %s753_s18, 4  ;;  %v327_v8 = vlaneseq (!%p223_p3)  ;;  %v289_v12 = vld [vmem:[%s902_s3] sm:$0x1] (!%p223_p3) }
   0x7   : > { %226 = sbr.rel (%p223_p3) target bundleno = 72 (0x48), region = 40  ;;  %p260_p5 = scmp.lt.s32.totalorder (!%p223_p3), %s589_s29, 63  ;;  %v291_v28 = vld [vmem:[%s903_s4] sm:$0x1] (!%p223_p3) }
   0x8   : > { %v328_v9 = vshrl.u32 (!%p223_p3), %v327_v8, 7 }
   0xa   : > { %v329_v14 = vsub.s32 (!%p223_p3), 0, %v328_v9 }
   0xe   : > { %s267_s22 = scalar_select %p266_p4, %s753_s18, 3 }
   0xf   : > { %s910_s29 = smov (!%p260_p5, %s589_s29), 63 }
  0x10   : > { %s268_s25 = scalar_lea.vmem %s900_s1, %s267_s22  ;;  %s271_s28 = scalar_lea.vmem %s901_s2, %s267_s22 }
  0x11   : > { %v280_v0 = vld [vmem:[%s268_s25] sm:$0x1]  ;;  %s590_s30 = sshll.u32 %s910_s29, 2 }
  0x12   : > { %v282_v1 = vld [vmem:[%s271_s28] sm:$0x1]  ;;  %v281_v2 = vmul.f32 0.0078125, %v280_v0  ;;  %s263_s8 = scalar_lea.vmem %s899_s0, %s590_s30  ;;  %s866_s15 = scalar_lea.vmem %s904_s5, %s590_s30 }
  0x13   : > { %v283_v3 = vmul.f32 0.0078125, %v282_v1  ;;  %v628_v10 = vld [vmem:[%s263_s8] sm:$0xff]   ;;  %v699_v11 = vld [vmem:[%s263_s8 + $0x8] sm:$0xff]   ;;  %v700_v13 = vld [vmem:[%s263_s8 + $0x10] sm:$0xff]  }
  0x14   : > { %v284_v4 = vmul.f32 %v281_v2, %v281_v2  ;;  %v701_v15 = vld [vmem:[%s263_s8 + $0x18] sm:$0xff]   ;;  %v702_v16 = vld [vmem:[%s263_s8 + $0x20] sm:$0xff]   ;;  %v629_v18 = vunpack.c.l.bf16 %v628_v10  ;;  %v630_v19 = vunpack.c.h.bf16 %v628_v10  ;;  %v633_v20 = vunpack.c.l.bf16 %v699_v11  ;;  %v703_v21 = vld [vmem:[%s263_s8 + $0x28] sm:$0xff]  }
  0x15   : > { %v634_v23 = vunpack.c.h.bf16 %v699_v11  ;;  %v637_v24 = vunpack.c.l.bf16 %v700_v13  ;;  %v638_v25 = vunpack.c.h.bf16 %v700_v13  ;;  %v704_v26 = vld [vmem:[%s263_s8 + $0x30] sm:$0xff]   ;;  %v828_v27 = vld [vmem:[%s263_s8 + $0x38] sm:$0xff]   ;;  %v641_v29 = vunpack.c.l.bf16 %v701_v15 }
  0x16   : > { %v285_v5 = vsub.f32 %v283_v3, %v284_v4  ;;  %v642_v30 = vunpack.c.h.bf16 %v701_v15  ;;  %v645_v31 = vunpack.c.l.bf16 %v702_v16  ;;  %v646_v32 = vunpack.c.h.bf16 %v702_v16 }
  0x17   : > { %v649_v35 = vunpack.c.l.bf16 %v703_v21  ;;  %v650_v36 = vunpack.c.h.bf16 %v703_v21  ;;  %v653_v37 = vunpack.c.l.bf16 %v704_v26  ;;  %v654_v38 = vunpack.c.h.bf16 %v704_v26 }
  0x18   : > { %v286_v6 = vmax.f32 %v285_v5, 0.0  ;;  %v657_v39 = vunpack.c.l.bf16 %v828_v27  ;;  %v658_v40 = vunpack.c.h.bf16 %v828_v27 }
  0x1a   : > { %v287_v7 = vadd.f32 1e-05, %v286_v6 }
  0x1c   : > { %737 = vrsqrt.f32 %v287_v7 }
  0x26   : > { %v738_v17 = vpop.eup %737 }
  0x27   : > { %v290_v22 = vmul.f32 %v738_v17, %v289_v12 }
  0x29   : > { %v292_v33 = vmul.f32 %v290_v22, %v281_v2  ;;  %v833_v34 = vrot.slane %v290_v22, %v329_v14 }
  0x2b   : > { %v293_v41 = vsub.f32 %v291_v28, %v292_v33  ;;  %v332_v42 = vmul.f32 %v629_v18, %v833_v34  ;;  %v333_v43 = vmul.f32 %v630_v19, %v833_v34  ;;  %v334_v44 = vmul.f32 %v633_v20, %v833_v34 }
  0x2c   : > { %v335_v45 = vmul.f32 %v634_v23, %v833_v34  ;;  %v336_v46 = vmul.f32 %v637_v24, %v833_v34  ;;  %v337_v47 = vmul.f32 %v638_v25, %v833_v34  ;;  %v338_v48 = vmul.f32 %v641_v29, %v833_v34 }
  0x2d   : > { %v844_v49 = vrot.slane %v293_v41, %v329_v14  ;;  %v339_v50 = vmul.f32 %v642_v30, %v833_v34  ;;  %v340_v51 = vmul.f32 %v645_v31, %v833_v34  ;;  %v341_v52 = vmul.f32 %v646_v32, %v833_v34 }
  0x2e   : > { %v342_v53 = vmul.f32 %v649_v35, %v833_v34  ;;  %v343_v54 = vmul.f32 %v650_v36, %v833_v34  ;;  %v344_v55 = vmul.f32 %v653_v37, %v833_v34  ;;  %v345_v56 = vmul.f32 %v654_v38, %v833_v34 }
  0x2f   : > { %v354_v57 = vadd.f32 %v844_v49, %v332_v42  ;;  %v355_v58 = vadd.f32 %v844_v49, %v333_v43  ;;  %v356_v59 = vadd.f32 %v844_v49, %v334_v44  ;;  %v357_v60 = vadd.f32 %v844_v49, %v335_v45 }
  0x30   : > { %v358_v61 = vadd.f32 %v844_v49, %v336_v46  ;;  %v359_v62 = vadd.f32 %v844_v49, %v337_v47  ;;  %v360_v63 = vadd.f32 %v844_v49, %v338_v48  ;;  %v361_v0 = vadd.f32 %v844_v49, %v339_v50 }
  0x31   : > { %vm370_vm0 = vcmp.ge.f32.partialorder %v354_v57, 0.0  ;;  %vm371_vm1 = vcmp.ge.f32.partialorder %v355_v58, 0.0  ;;  %v386_v1 = vmul.f32 0.2, %v354_v57  ;;  %v387_v2 = vmul.f32 0.2, %v355_v58 }
  0x32   : > { %vm372_vm2 = vcmp.ge.f32.partialorder %v356_v59, 0.0  ;;  %vm373_vm3 = vcmp.ge.f32.partialorder %v357_v60, 0.0  ;;  %v388_v3 = vmul.f32 0.2, %v356_v59  ;;  %v389_v4 = vmul.f32 0.2, %v357_v60 }
  0x33   : > { %v402_v5 = vsel %vm370_vm0, %v354_v57, %v386_v1  ;;  %v403_v6 = vsel %vm371_vm1, %v355_v58, %v387_v2  ;;  %vm374_vm4 = vcmp.ge.f32.partialorder %v358_v61, 0.0  ;;  %vm375_vm5 = vcmp.ge.f32.partialorder %v359_v62, 0.0 }
  0x34   : > { %v662_v7 = vpack.c.bf16 %v403_v6, %v402_v5  ;;  %v404_v8 = vsel %vm372_vm2, %v356_v59, %v388_v3  ;;  %v405_v9 = vsel %vm373_vm3, %v357_v60, %v389_v4  ;;  %v390_v10 = vmul.f32 0.2, %v358_v61 }
  0x35   : > { %v667_v11 = vpack.c.bf16 %v405_v9, %v404_v8  ;;  %v391_v12 = vmul.f32 0.2, %v359_v62  ;;  %vm376_vm6 = vcmp.ge.f32.partialorder %v360_v63, 0.0  ;;  %vm377_vm7 = vcmp.ge.f32.partialorder %v361_v0, 0.0 }
  0x36   : > { %663 = vst [vmem:[%s866_s15] sm:$0xff] %v662_v7   ;;  %v406_v13 = vsel %vm374_vm4, %v358_v61, %v390_v10  ;;  %v392_v14 = vmul.f32 0.2, %v360_v63  ;;  %v393_v15 = vmul.f32 0.2, %v361_v0  ;;  %v362_v16 = vadd.f32 %v844_v49, %v340_v51 }
  0x37   : > { %706 = vst [vmem:[%s866_s15 + $0x8] sm:$0xff] %v667_v11   ;;  %v407_v17 = vsel %vm375_vm5, %v359_v62, %v391_v12  ;;  %v363_v18 = vadd.f32 %v844_v49, %v341_v52  ;;  %v364_v19 = vadd.f32 %v844_v49, %v342_v53  ;;  %v365_v20 = vadd.f32 %v844_v49, %v343_v54 }
  0x38   : > { %v672_v21 = vpack.c.bf16 %v407_v17, %v406_v13  ;;  %v408_v22 = vsel %vm376_vm6, %v360_v63, %v392_v14  ;;  %v409_v23 = vsel %vm377_vm7, %v361_v0, %v393_v15  ;;  %vm378_vm8 = vcmp.ge.f32.partialorder %v362_v16, 0.0 }
  0x39   : > { %v677_v24 = vpack.c.bf16 %v409_v23, %v408_v22  ;;  %vm379_vm9 = vcmp.ge.f32.partialorder %v363_v18, 0.0  ;;  %v394_v25 = vmul.f32 0.2, %v362_v16  ;;  %v395_v26 = vmul.f32 0.2, %v363_v18 }
  0x3a   : > { %707 = vst [vmem:[%s866_s15 + $0x10] sm:$0xff] %v672_v21   ;;  %vm380_vm10 = vcmp.ge.f32.partialorder %v364_v19, 0.0  ;;  %vm381_vm11 = vcmp.ge.f32.partialorder %v365_v20, 0.0  ;;  %v396_v28 = vmul.f32 0.2, %v364_v19  ;;  %v366_v32 = vadd.f32 %v844_v49, %v344_v55 }
  0x3b   : > { %v397_v29 = vmul.f32 0.2, %v365_v20  ;;  %708 = vst [vmem:[%s866_s15 + $0x18] sm:$0xff] %v677_v24   ;;  %v410_v30 = vsel %vm378_vm8, %v362_v16, %v394_v25  ;;  %v411_v31 = vsel %vm379_vm9, %v363_v18, %v395_v26  ;;  %v367_v33 = vadd.f32 %v844_v49, %v345_v56 }
  0x3c   : > { %v682_v35 = vpack.c.bf16 %v411_v31, %v410_v30  ;;  %v412_v36 = vsel %vm380_vm10, %v364_v19, %v396_v28  ;;  %v346_v38 = vmul.f32 %v657_v39, %v833_v34  ;;  %vm382_vm12 = vcmp.ge.f32.partialorder %v366_v32, 0.0 }
  0x3d   : > { %v413_v37 = vsel %vm381_vm11, %v365_v20, %v397_v29  ;;  %vm383_vm13 = vcmp.ge.f32.partialorder %v367_v33, 0.0  ;;  %v398_v42 = vmul.f32 0.2, %v366_v32  ;;  %v399_v43 = vmul.f32 0.2, %v367_v33 }
  0x3e   : > { %v687_v41 = vpack.c.bf16 %v413_v37, %v412_v36  ;;  %709 = vst [vmem:[%s866_s15 + $0x20] sm:$0xff] %v682_v35   ;;  %v347_v44 = vmul.f32 %v658_v40, %v833_v34  ;;  %v368_v45 = vadd.f32 %v844_v49, %v346_v38 }
  0x3f   : > { %v414_v46 = vsel %vm382_vm12, %v366_v32, %v398_v42  ;;  %v415_v47 = vsel %vm383_vm13, %v367_v33, %v399_v43 }
  0x40   : > { %710 = vst [vmem:[%s866_s15 + $0x28] sm:$0xff] %v687_v41   ;;  %v369_v48 = vadd.f32 %v844_v49, %v347_v44  ;;  %vm384_vm14 = vcmp.ge.f32.partialorder %v368_v45, 0.0  ;;  %v400_v39 = vmul.f32 0.2, %v368_v45  ;;  %v692_v50 = vpack.c.bf16 %v415_v47, %v414_v46 }
  0x42   : > { %vm385_vm15 = vcmp.ge.f32.partialorder %v369_v48, 0.0  ;;  %v401_v51 = vmul.f32 0.2, %v369_v48  ;;  %v416_v52 = vsel %vm384_vm14, %v368_v45, %v400_v39  ;;  %711 = vst [vmem:[%s866_s15 + $0x30] sm:$0xff] %v692_v50  }
  0x44   : > { %v417_v53 = vsel %vm385_vm15, %v369_v48, %v401_v51 }
  0x45   : > { %v697_v54 = vpack.c.bf16 %v417_v53, %v416_v52 }
  0x47   : > { %712 = vst [vmem:[%s866_s15 + $0x38] sm:$0xff] %v697_v54  }
  0x48 PF: > { %s15_s20 = sadd.s32 1, %s761_s20   ;;  %s905_s18 = smov %s757_s19 }
  0x49   : > { %p12_p6 = scmp.ge.s32.totalorder %s15_s20, 6   ;;  %s906_s19 = smov %s908_s21 }
  0x4b   :  { %14 = sbr.rel (!%p12_p6) target bundleno = 2 (0x2), region = 76 }

// kernel: discriminator_forward.19
= control target key start
LH: loop header
LB: loop body
LE: loop exit
PB: predicated region body
PF: predicated region fallthrough
CT: control target
= control target key end

     0   :  { %s980_s18 = smov 0   ;;  %s982_s19 = smov 0   ;;  %s1092_s0 = inlined_call_operand.vmem [shape: bf16[512,27], index: 0, kind: input, shape index: {}]   ;;  %s1093_s1 = inlined_call_operand.vmem [shape: bf16[27,128], index: 1, kind: input, shape index: {}]   ;;  %s1094_s2 = inlined_call_operand.vmem [shape: f32[1,128], index: 2, kind: input, shape index: {}]   ;;  %s1095_s3 = inlined_call_operand.vmem [shape: bf16[512,128], index: 3, kind: output, shape index: {0}]   ;;  %s1096_s4 = inlined_call_operand.vmem [shape: f32[4,1,128], index: 4, kind: output, shape index: {1}]   ;;  %s1097_s5 = inlined_call_operand.vmem [shape: f32[4,1,128], index: 5, kind: output, shape index: {2}]  }
   0x1   :  { %s984_s20 = smov 0  }
   0x2 LB: > { %s28_s21 = sadd.s32 1, %s942_s19  ;;  %p749_p0 = scmp.ge.s32.totalorder %s946_s20, 1  ;;  %s946_s20 = sphi %s984_s20, %s16_s20   ;;  %s942_s19 = sphi %s982_s19, %s1099_s19   ;;  %s938_s18 = sphi %s980_s18, %s1098_s18  }
   0x3   : > { %p30_p1 = scmp.ge.s32.totalorder %s28_s21, 4  ;;  %p211_p2 = scmp.lt.s32.totalorder %s946_s20, 5 }
   0x5   : > { %s1101_s21 = smov (%p30_p1, %s28_s21), 0  ;;  %p212_p3 = pnand %p749_p0, %p211_p2 }
   0x6   : > { %v914_v0 = vld [vmem:[%s1093_s1] sm:$0xff] (!%p212_p3)   ;;  %vm373_vm0 = vcmask (!%p212_p3), 1044480   ;;  %v915_v1 = vld [vmem:[%s1093_s1 + $0x8] sm:$0x3f] (!%p212_p3)   ;;  %vm374_vm1 = vcmask (!%p212_p3), 1045504   ;;  %s750_s26 = sshll.u32 (!%p212_p3), %s938_s18, 4 }
   0x7   : > { %215 = sbr.rel (%p212_p3) target bundleno = 283 (0x11b), region = 32  ;;  %864 = vmatprep.subr.bf16.mxu0 (!%p212_p3), %v914_v0  ;;  %884 = vmatprep.subr.bf16.mxu1 (!%p212_p3), %v914_v0  ;;  %v948_v2 = vmov (!%p212_p3), 65535   ;;  %p249_p4 = scmp.lt.s32.totalorder (!%p212_p3), %s750_s26, 63  ;;  %vm348_vm2 = vcmask (!%p212_p3), 220160   ;;  %v949_v14 = vmov (!%p212_p3), 0.0  }
   0x8   : > { %865 = vmatpush3.bf16.msra.mxu0 (!%p212_p3), %v914_v0  ;;  %v375_v3 = vsel (!%p212_p3), %vm373_vm0, 4294967295, %v948_v2  ;;  %886 = vmatpush3.bf16.msra.mxu1 (!%p212_p3), %v914_v0  ;;  %p263_p5 = scmp.lt.s32.totalorder (!%p212_p3), %s938_s18, 3  ;;  %v1040_v15 = vld [vmem:[%s1094_s2] ss:$0 sm:$0xff] (!%p212_p3) }
   0x9   : > { %v376_v4 = vsel (!%p212_p3), %vm374_vm1, %v375_v3, 0 }
   0xa   : > { %v378_v5 = vand.u32 (!%p212_p3), %v915_v1, %v376_v4 }
   0xc   : > { %866 = vmatprep.subr.bf16.mxu0 (!%p212_p3), %v378_v5  ;;  %885 = vmatprep.subr.bf16.mxu1 (!%p212_p3), %v378_v5 }
   0xd   : > { %867 = vmatpush3.bf16.msra.mxu0 (!%p212_p3), %v378_v5  ;;  %887 = vmatpush3.bf16.msra.mxu1 (!%p212_p3), %v378_v5 }
   0xe   : > { %s1103_s26 = smov (!%p249_p4, %s750_s26), 63  ;;  %s1105_s18 = smov (!%p263_p5, %s938_s18), 3 }
   0xf   : > { %s751_s27 = sshll.u32 %s1103_s26, 2  ;;  %s1028_s8 = scalar_lea.vmem %s1096_s4, %s1105_s18 }
  0x10   : > { %s252_s30 = scalar_lea.vmem %s1092_s0, %s751_s27  ;;  %s1033_s11 = scalar_lea.vmem %s1097_s5, %s1105_s18  ;;  %561 = vst [vmem:[%s1028_s8] sm:$0x1] %v949_v14 }
  0x11   : > { %v916_v6 = vld [vmem:[%s252_s30] sm:$0xff]   ;;  %v917_v7 = vld [vmem:[%s252_s30 + $0x8] sm:$0xff]   ;;  %v918_v8 = vld [vmem:[%s252_s30 + $0x10] sm:$0xff]   ;;  %562 = vst [vmem:[%s1033_s11] sm:$0x1] %v949_v14  ;;  %s1050_s16 = scalar_lea.vmem %s1095_s3, %s751_s27 }
  0x12   : > { %868 = vmatprep.mubr.msk.bf16.mxu0 %vm348_vm2, %v916_v6  ;;  %v920_v9 = vld [vmem:[%s252_s30 + $0x20] sm:$0xff]   ;;  %v921_v10 = vld [vmem:[%s252_s30 + $0x28] sm:$0xff]   ;;  %v922_v11 = vld [vmem:[%s252_s30 + $0x30] sm:$0xff]  }
  0x13   : > { %869 = vmatmul.mubr.msk.bf16.vlgmr.msra.gmra.mrb[0].mxu0 %vm348_vm2, %v917_v7  ;;  %876 = vmatprep.mubr.msk.bf16.mxu1 %vm348_vm2, %v920_v9  ;;  %v919_v12 = vld [vmem:[%s252_s30 + $0x18] sm:$0xff]  }
  0x14   : > { %872 = vmatprep.mubr.msk.bf16.mxu0 %vm348_vm2, %v918_v8  ;;  %877 = vmatmul.mubr.msk.bf16.vlgmr.msra.gmra.mrb[0].mxu1 %vm348_vm2, %v921_v10  ;;  %v923_v13 = vld [vmem:[%s252_s30 + $0x38] sm:$0xff]  }
  0x15   : > { %880 = vmatprep.mubr.msk.bf16.mxu1 %vm348_vm2, %v922_v11 }
  0x1b   : > { %873 = vmatmul.mubr.msk.bf16.gmra.mrb[4].mxu0 %vm348_vm2, %v919_v12 }
  0x1c   : > { %881 = vmatmul.mubr.msk.bf16.gmra.mrb[4].mxu1 %vm348_vm2, %v923_v13 }
  0xe6   : > { %v870_v16 = vpop.f32.mrb[0].mxu0 }
  0xe7   : > { %v414_v17 = vpop.f32.mrb[1].mxu0  ;;  %v423_v20 = vadd.f32 %v870_v16, %v1040_v15  ;;  %v878_v24 = vpop.f32.mrb[0].mxu1 }
  0xe8   : > { %v415_v18 = vadd.f32 %v1040_v15, %v414_v17  ;;  %v871_v19 = vpop.f32.mrb[2].mxu0  ;;  %v1054_v27 = vadd.f32 %v878_v24, %v1040_v15  ;;  %v446_v28 = vpop.f32.mrb[1].mxu1 }
  0xe9   : > { %v426_v21 = vadd.f32 %v871_v19, %v1040_v15  ;;  %v417_v22 = vpop.f32.mrb[3].mxu0  ;;  %v447_v32 = vadd.f32 %v1040_v15, %v446_v28  ;;  %v879_v33 = vpop.f32.mrb[2].mxu1  ;;  %v590_v36 = vmul.f32 %v423_v20, %v423_v20 }
  0xea   : > { %v418_v23 = vadd.f32 %v1040_v15, %v417_v22  ;;  %v588_v25 = vmul.f32 %v415_v18, %v415_v18  ;;  %v458_v34 = vadd.f32 %v879_v33, %v1040_v15  ;;  %v449_v35 = vpop.f32.mrb[3].mxu1 }
  0xeb   : > { %v815_v26 = vpack.c.bf16 %v426_v21, %v423_v20  ;;  %v450_v40 = vadd.f32 %v1040_v15, %v449_v35  ;;  %v591_v41 = vmul.f32 %v426_v21, %v426_v21  ;;  %v596_v8 = vmul.f32 %v447_v32, %v447_v32 }
  0xec   : > { %v810_v29 = vpack.c.bf16 %v418_v23, %v415_v18  ;;  %v564_v30 = vadd.f32 %v418_v23, %v415_v18  ;;  %v589_v31 = vmul.f32 %v418_v23, %v418_v23  ;;  %v835_v43 = vpack.c.bf16 %v458_v34, %v1054_v27 }
  0xed   : > { %847 = vst [vmem:[%s1050_s16 + $0x8] sm:$0xff] %v815_v26   ;;  %v830_v48 = vpack.c.bf16 %v450_v40, %v447_v32  ;;  %v597_v19 = vmul.f32 %v450_v40, %v450_v40 }
  0xee   : > { %811 = vst [vmem:[%s1050_s16] sm:$0xff] %v810_v29   ;;  %v565_v37 = vadd.f32 %v564_v30, %v423_v20  ;;  %v604_v38 = vadd.f32 %v589_v31, %v588_v25  ;;  %v874_v39 = vpop.f32.mrb[4].mxu0  ;;  %851 = vst [vmem:[%s1050_s16 + $0x28] sm:$0xff] %v835_v43   ;;  %v598_v20 = vmul.f32 %v1054_v27, %v1054_v27 }
  0xef   : > { %v430_v42 = vpop.f32.mrb[5].mxu0  ;;  %v439_v49 = vadd.f32 %v874_v39, %v1040_v15  ;;  %850 = vst [vmem:[%s1050_s16 + $0x20] sm:$0xff] %v830_v48   ;;  %v882_v56 = vpop.f32.mrb[4].mxu1 }
  0xf0   : > { %v605_v44 = vadd.f32 %v604_v38, %v590_v36  ;;  %v431_v45 = vadd.f32 %v1040_v15, %v430_v42  ;;  %v566_v46 = vadd.f32 %v565_v37, %v426_v21  ;;  %v875_v47 = vpop.f32.mrb[6].mxu0  ;;  %v471_v58 = vadd.f32 %v882_v56, %v1040_v15  ;;  %v462_v59 = vpop.f32.mrb[5].mxu1 }
  0xf1   : > { %v442_v50 = vadd.f32 %v875_v47, %v1040_v15  ;;  %v433_v51 = vpop.f32.mrb[7].mxu0  ;;  %v883_v0 = vpop.f32.mrb[6].mxu1  ;;  %v463_v1 = vadd.f32 %v1040_v15, %v462_v59  ;;  %v594_v4 = vmul.f32 %v439_v49, %v439_v49  ;;  %v563_v47 = vld [vmem:[%s1028_s8] sm:$0x1] }
  0xf2   : > { %v567_v52 = vadd.f32 %v566_v46, %v431_v45  ;;  %v592_v53 = vmul.f32 %v431_v45, %v431_v45  ;;  %v606_v54 = vadd.f32 %v605_v44, %v591_v41  ;;  %v434_v55 = vadd.f32 %v1040_v15, %v433_v51  ;;  %v465_v3 = vpop.f32.mrb[7].mxu1 }
  0xf3   : > { %v825_v57 = vpack.c.bf16 %v442_v50, %v439_v49  ;;  %v474_v2 = vadd.f32 %v883_v0, %v1040_v15  ;;  %v466_v7 = vadd.f32 %v1040_v15, %v465_v3  ;;  %v595_v10 = vmul.f32 %v442_v50, %v442_v50 }
  0xf4   : > { %v607_v60 = vadd.f32 %v606_v54, %v592_v53  ;;  %v820_v61 = vpack.c.bf16 %v434_v55, %v431_v45  ;;  %v568_v62 = vadd.f32 %v567_v52, %v434_v55  ;;  %v593_v63 = vmul.f32 %v434_v55, %v434_v55 }
  0xf5   : > { %849 = vst [vmem:[%s1050_s16 + $0x18] sm:$0xff] %v825_v57   ;;  %v845_v9 = vpack.c.bf16 %v474_v2, %v471_v58  ;;  %v840_v13 = vpack.c.bf16 %v466_v7, %v463_v1  ;;  %v599_v15 = vmul.f32 %v458_v34, %v458_v34  ;;  %v600_v25 = vmul.f32 %v463_v1, %v463_v1 }
  0xf6   : > { %848 = vst [vmem:[%s1050_s16 + $0x10] sm:$0xff] %v820_v61   ;;  %v569_v5 = vadd.f32 %v568_v62, %v439_v49  ;;  %v608_v6 = vadd.f32 %v607_v60, %v593_v63  ;;  %v601_v31 = vmul.f32 %v466_v7, %v466_v7  ;;  %v603_v36 = vmul.f32 %v474_v2, %v474_v2 }
  0xf7   : > { %853 = vst [vmem:[%s1050_s16 + $0x38] sm:$0xff] %v845_v9   ;;  %852 = vst [vmem:[%s1050_s16 + $0x30] sm:$0xff] %v840_v13  }
  0xf8   : > { %v609_v11 = vadd.f32 %v608_v6, %v594_v4  ;;  %v570_v12 = vadd.f32 %v569_v5, %v442_v50  ;;  %v587_v50 = vld [vmem:[%s1033_s11] sm:$0x1] }
  0xfa   : > { %v571_v14 = vadd.f32 %v570_v12, %v447_v32  ;;  %v610_v16 = vadd.f32 %v609_v11, %v595_v10  ;;  %v602_v32 = vmul.f32 %v471_v58, %v471_v58 }
  0xfc   : > { %v611_v17 = vadd.f32 %v610_v16, %v596_v8  ;;  %v572_v18 = vadd.f32 %v571_v14, %v450_v40 }
  0xfe   : > { %v573_v21 = vadd.f32 %v572_v18, %v1054_v27  ;;  %v612_v22 = vadd.f32 %v611_v17, %v597_v19 }
 0x100   : > { %v613_v23 = vadd.f32 %v612_v22, %v598_v20  ;;  %v574_v24 = vadd.f32 %v573_v21, %v458_v34 }
 0x102   : > { %v575_v26 = vadd.f32 %v574_v24, %v463_v1  ;;  %v614_v28 = vadd.f32 %v613_v23, %v599_v15 }
 0x104   : > { %v615_v29 = vadd.f32 %v614_v28, %v600_v25  ;;  %v576_v30 = vadd.f32 %v575_v26, %v466_v7 }
 0x106   : > { %v577_v33 = vadd.f32 %v576_v30, %v471_v58  ;;  %v616_v35 = vadd.f32 %v615_v29, %v601_v31 }
 0x108   : > { %v578_v37 = vadd.f32 %v577_v33, %v474_v2  ;;  %v617_v38 = vadd.f32 %v616_v35, %v602_v32 }
 0x10a   : > { %v579_v39 = vrot.slane %v578_v37, 4  ;;  %v618_v27 = vadd.f32 %v617_v38, %v603_v36 }
 0x10c   : > { %v580_v40 = vadd.f32 %v579_v39, %v578_v37  ;;  %v619_v34 = vrot.slane %v618_v27, 4 }
 0x10e   : > { %v581_v41 = vrot.slane %v580_v40, 2  ;;  %v620_v42 = vadd.f32 %v619_v34, %v618_v27 }
 0x110   : > { %v582_v43 = vadd.f32 %v581_v41, %v580_v40  ;;  %v621_v44 = vrot.slane %v620_v42, 2 }
 0x112   : > { %v583_v45 = vrot.slane %v582_v43, 1  ;;  %v622_v46 = vadd.f32 %v621_v44, %v620_v42 }
 0x114   : > { %v584_v48 = vadd.f32 %v583_v45, %v582_v43  ;;  %v623_v49 = vrot.slane %v622_v46, 1 }
 0x116   : > { %v585_v51 = vadd.f32 %v584_v48, %v563_v47  ;;  %v624_v52 = vadd.f32 %v623_v49, %v622_v46 }
 0x118   : > { %586 = vst [vmem:[%s1028_s8] sm:$0x1] %v585_v51  ;;  %v625_v53 = vadd.f32 %v624_v52, %v587_v50 }
 0x11a   : > { %626 = vst [vmem:[%s1033_s11] sm:$0x1] %v625_v53 }
 0x11b PF: > { %s16_s20 = sadd.s32 1, %s946_s20   ;;  %s1098_s18 = smov %s942_s19 }
 0x11c   : > { %p13_p6 = scmp.ge.s32.totalorder %s16_s20, 6   ;;  %s1099_s19 = smov %s1101_s21 }
 0x11e   :  { %15 = sbr.rel (!%p13_p6) target bundleno = 2 (0x2), region = 90 }

// kernel: discriminator_forward.21
= control target key start
LH: loop header
LB: loop body
LE: loop exit
PB: predicated region body
PF: predicated region fallthrough
CT: control target
= control target key end

     0   :  { %s1445_s18 = smov 0   ;;  %s1447_s19 = smov 0   ;;  %s1634_s0 = inlined_call_operand.vmem [shape: bf16[512,288], index: 0, kind: input, shape index: {}]   ;;  %s1635_s1 = inlined_call_operand.vmem [shape: bf16[288,128], index: 1, kind: input, shape index: {}]   ;;  %s1636_s2 = inlined_call_operand.vmem [shape: f32[1,128], index: 2, kind: input, shape index: {}]   ;;  %s1637_s3 = inlined_call_operand.vmem [shape: bf16[512,128], index: 3, kind: output, shape index: {0}]   ;;  %s1638_s4 = inlined_call_operand.vmem [shape: f32[4,1,128], index: 4, kind: output, shape index: {1}]   ;;  %s1639_s5 = inlined_call_operand.vmem [shape: f32[4,1,128], index: 5, kind: output, shape index: {2}]  }
   0x1   :  { %s1449_s20 = smov 0  }
   0x2 LB: > { %s28_s21 = sadd.s32 1, %s1408_s19  ;;  %p1067_p0 = scmp.ge.s32.totalorder %s1412_s20, 1  ;;  %s1412_s20 = sphi %s1449_s20, %s16_s20   ;;  %s1408_s19 = sphi %s1447_s19, %s1641_s19   ;;  %s1404_s18 = sphi %s1445_s18, %s1640_s18  }
   0x3   : > { %p30_p1 = scmp.ge.s32.totalorder %s28_s21, 4  ;;  %p212_p2 = scmp.lt.s32.totalorder %s1412_s20, 5 }
   0x5   : > { %s1643_s21 = smov (%p30_p1, %s28_s21), 0  ;;  %p213_p3 = pnand %p1067_p0, %p212_p2 }
   0x6   : > { %v1340_v0 = vld [vmem:[%s1635_s1 + $0x40] sm:$0xff] (!%p213_p3)   ;;  %s1068_s24 = sshll.u32 (!%p213_p3), %s1404_s18, 4  ;;  %v1342_v2 = vld [vmem:[%s1635_s1 + $0x48] sm:$0xff] (!%p213_p3)   ;;  %v1344_v4 = vld [vmem:[%s1635_s1 + $0x50] sm:$0xff] (!%p213_p3)   ;;  %vm576_vm0 = vcmask (!%p213_p3), 261120   ;;  %p266_p5 = scmp.lt.s32.totalorder (!%p213_p3), %s1404_s18, 3 }
   0x7   : > { %216 = sbr.rel (%p213_p3) target bundleno = 328 (0x148), region = 32  ;;  %v1341_v1 = vld [vmem:[%s1635_s1] sm:$0xff] (!%p213_p3)   ;;  %1204 = vmatprep.subr.bf16.mxu0 (!%p213_p3), %v1340_v0  ;;  %1298 = vmatprep.subr.bf16.mxu1 (!%p213_p3), %v1340_v0  ;;  %p251_p4 = scmp.lt.s32.totalorder (!%p213_p3), %s1068_s24, 63  ;;  %v1343_v3 = vld [vmem:[%s1635_s1 + $0x8] sm:$0xff] (!%p213_p3)   ;;  %v1345_v5 = vld [vmem:[%s1635_s1 + $0x10] sm:$0xff] (!%p213_p3)   ;;  %v1414_v42 = vmov (!%p213_p3), 0.0  }
   0x8   : > { %1205 = vmatpush3.bf16.msra.mxu0 (!%p213_p3), %v1341_v1  ;;  %1306 = vmatpush3.bf16.msra.mxu1 (!%p213_p3), %v1341_v1  ;;  %v1346_v6 = vld [vmem:[%s1635_s1 + $0x58] sm:$0xff] (!%p213_p3)   ;;  %v1348_v8 = vld [vmem:[%s1635_s1 + $0x60] sm:$0xff] (!%p213_p3)   ;;  %v1350_v10 = vld [vmem:[%s1635_s1 + $0x68] sm:$0xff] (!%p213_p3)  }
   0x9   : > { %1206 = vmatprep.subr.bf16.mxu0 (!%p213_p3), %v1342_v2  ;;  %1299 = vmatprep.subr.bf16.mxu1 (!%p213_p3), %v1342_v2  ;;  %v1347_v7 = vld [vmem:[%s1635_s1 + $0x18] sm:$0xff] (!%p213_p3)   ;;  %v1349_v9 = vld [vmem:[%s1635_s1 + $0x20] sm:$0xff] (!%p213_p3)   ;;  %v1351_v13 = vld [vmem:[%s1635_s1 + $0x28] sm:$0xff] (!%p213_p3)  }
   0xa   : > { %v1352_v14 = vld [vmem:[%s1635_s1 + $0x70] sm:$0xff] (!%p213_p3)   ;;  %v1354_v16 = vld [vmem:[%s1635_s1 + $0x78] sm:$0xff] (!%p213_p3)   ;;  %v1366_v19 = vld [vmem:[%s1635_s1 + $0x80] sm:$0xff] (!%p213_p3)  }
   0xb   : > { %v1353_v15 = vld [vmem:[%s1635_s1 + $0x30] sm:$0xff] (!%p213_p3)   ;;  %v1355_v17 = vld [vmem:[%s1635_s1 + $0x38] sm:$0xff] (!%p213_p3)   ;;  %v1369_v23 = vld [vmem:[%s1635_s1 + $0x88] sm:$0xff] (!%p213_p3)  }
   0xc   : > { %1207 = vmatpush3.bf16.msra.mxu0 (!%p213_p3), %v1343_v3  ;;  %1307 = vmatpush3.bf16.msra.mxu1 (!%p213_p3), %v1343_v3  ;;  %v1585_v3 = vld [vmem:[%s1636_s2] ss:$0 sm:$0xff] (!%p213_p3) }
   0xd   : > { %1208 = vmatprep.subr.bf16.mxu0 (!%p213_p3), %v1344_v4  ;;  %1300 = vmatprep.subr.bf16.mxu1 (!%p213_p3), %v1344_v4 }
   0xe   : > { %s1645_s24 = smov (!%p251_p4, %s1068_s24), 63  ;;  %s1647_s18 = smov (!%p266_p5, %s1404_s18), 3 }
   0xf   : > { %s1314_s12 = smul.u32 12, %s1645_s24  ;;  %s1565_s26 = scalar_lea.vmem %s1638_s4, %s1647_s18 }
  0x10   : > { %1209 = vmatpush3.bf16.msra.mxu0 %v1345_v5  ;;  %1308 = vmatpush3.bf16.msra.mxu1 %v1345_v5  ;;  %s1570_s29 = scalar_lea.vmem %s1639_s5, %s1647_s18  ;;  %879 = vst [vmem:[%s1565_s26] sm:$0x1] %v1414_v42  ;;  %s1071_s30 = sshll.u32 %s1645_s24, 2 }
  0x11   : > { %1210 = vmatprep.subr.bf16.mxu0 %v1346_v6  ;;  %1301 = vmatprep.subr.bf16.mxu1 %v1346_v6  ;;  %s1499_s23 = scalar_lea.vmem %s1634_s0, %s1314_s12  ;;  %880 = vst [vmem:[%s1570_s29] sm:$0x1] %v1414_v42  ;;  %s1595_s8 = scalar_lea.vmem %s1637_s3, %s1071_s30 }
  0x12   : > { %v1358_v11 = vld [vmem:[%s1499_s23 + $0x4] ss:$12 sps:$4 sm:$0xff]   ;;  %v1361_v12 = vld [vmem:[%s1499_s23 + $0x94] ss:$12 sps:$4 sm:$0xff]   ;;  %v1362_v21 = vld [vmem:[%s1499_s23 + $0x1c] ss:$12 sps:$4 sm:$0xff]  }
  0x13   : > { %633 = vmatprep.mubr.bf16.mxu0 %v1358_v11  ;;  %681 = vmatprep.mubr.bf16.mxu1 %v1361_v12  ;;  %v1356_v18 = vld [vmem:[%s1499_s23] ss:$12 sps:$4 sm:$0xff]   ;;  %v1359_v20 = vld [vmem:[%s1499_s23 + $0x90] ss:$12 sps:$4 sm:$0xff]   ;;  %v1367_v24 = vld [vmem:[%s1499_s23 + $0x18] ss:$12 sps:$4 sm:$0xff]  }
  0x14   : > { %1211 = vmatpush3.bf16.msra.mxu0 %v1347_v7  ;;  %1309 = vmatpush3.bf16.msra.mxu1 %v1347_v7  ;;  %v1364_v22 = vld [vmem:[%s1499_s23 + $0xac] ss:$12 sps:$4 sm:$0xff]   ;;  %v1368_v25 = vld [vmem:[%s1499_s23 + $0xa8] ss:$12 sps:$4 sm:$0xff]   ;;  %v1373_v28 = vld [vmem:[%s1499_s23 + $0x30] ss:$12 sps:$4 sm:$0xff]  }
  0x15   : > { %1212 = vmatprep.subr.bf16.mxu0 %v1348_v8  ;;  %1302 = vmatprep.subr.bf16.mxu1 %v1348_v8  ;;  %v1370_v26 = vld [vmem:[%s1499_s23 + $0x34] ss:$12 sps:$4 sm:$0xff]   ;;  %v1375_v30 = vld [vmem:[%s1499_s23 + $0x4c] ss:$12 sps:$4 sm:$0xff]   ;;  %v1379_v33 = vld [vmem:[%s1499_s23 + $0x50] ss:$12 sps:$4 sm:$0xff]  }
  0x16   : > { %v1372_v27 = vld [vmem:[%s1499_s23 + $0x8] ss:$12 sps:$4 sm:$0xff]   ;;  %v1374_v29 = vld [vmem:[%s1499_s23 + $0x20] ss:$12 sps:$4 sm:$0xff]   ;;  %v1377_v31 = vld [vmem:[%s1499_s23 + $0x38] ss:$12 sps:$4 sm:$0xff]  }
  0x17   : > { %v1378_v32 = vld [vmem:[%s1499_s23 + $0x48] ss:$12 sps:$4 sm:$0xff]   ;;  %v1380_v34 = vld [vmem:[%s1499_s23 + $0x64] ss:$12 sps:$4 sm:$0xff]   ;;  %v1383_v36 = vld [vmem:[%s1499_s23 + $0x60] ss:$12 sps:$4 sm:$0xff]  }
  0x18   : > { %1213 = vmatpush3.bf16.msra.mxu0 %v1349_v9  ;;  %1310 = vmatpush3.bf16.msra.mxu1 %v1349_v9  ;;  %v1382_v35 = vld [vmem:[%s1499_s23 + $0x68] ss:$12 sps:$4 sm:$0xff]   ;;  %v1384_v37 = vld [vmem:[%s1499_s23 + $0x80] ss:$12 sps:$4 sm:$0xff]   ;;  %v1387_v39 = vld [vmem:[%s1499_s23 + $0x98] ss:$12 sps:$4 sm:$0xff]  }
  0x19   : > { %1214 = vmatprep.subr.bf16.mxu0 %v1350_v10  ;;  %1303 = vmatprep.subr.bf16.mxu1 %v1350_v10  ;;  %v1385_v38 = vld [vmem:[%s1499_s23 + $0x7c] ss:$12 sps:$4 sm:$0xff]   ;;  %v1388_v40 = vld [vmem:[%s1499_s23 + $0x78] ss:$12 sps:$4 sm:$0xff]  }
  0x1a   : > { %v1389_v41 = vld [vmem:[%s1499_s23 + $0xb0] ss:$12 sps:$4 sm:$0xff]  }
  0x1c   : > { %1215 = vmatpush3.bf16.msra.mxu0 %v1351_v13  ;;  %1311 = vmatpush3.bf16.msra.mxu1 %v1351_v13 }
  0x1d   : > { %1216 = vmatprep.subr.bf16.mxu0 %v1352_v14  ;;  %1304 = vmatprep.subr.bf16.mxu1 %v1352_v14 }
  0x20   : > { %1217 = vmatpush3.bf16.msra.mxu0 %v1353_v15  ;;  %1312 = vmatpush3.bf16.msra.mxu1 %v1353_v15 }
  0x21   : > { %1218 = vmatprep.subr.bf16.mxu0 %v1354_v16  ;;  %1305 = vmatprep.subr.bf16.mxu1 %v1354_v16 }
  0x24   : > { %1219 = vmatpush3.bf16.msra.mxu0 %v1355_v17  ;;  %1313 = vmatpush3.bf16.msra.mxu1 %v1355_v17 }
  0x25   : > { %1278 = vmatprep.subr.bf16.mxu1 %v1366_v19 }
  0x27   : > { %634 = vmatmul.mubr.bf16.vlgmr.msra.gmra.mrb[0].mxu0 %v1356_v18  ;;  %682 = vmatmul.mubr.bf16.vlgmr.msra.gmra.mrb[0].mxu1 %v1359_v20 }
  0x28   : > { %641 = vmatprep.mubr.bf16.mxu0 %v1362_v21  ;;  %689 = vmatprep.mubr.bf16.mxu1 %v1364_v22 }
  0x29   : > { %1279 = vmatpush3.bf16.msra.mxu1 %v1366_v19 }
  0x2a   : > { %1280 = vmatprep.subr.bf16.mxu1 %v1369_v23 }
  0x2d   : > { %1281 = vmatpush3.bf16.msra.mxu1 %v1369_v23 }
  0x2f   : > { %642 = vmatmul.mubr.bf16.gmra.mrb[4].mxu0 %v1367_v24  ;;  %690 = vmatmul.mubr.bf16.gmra.mrb[4].mxu1 %v1368_v25 }
  0x30   : > { %649 = vmatprep.mubr.bf16.mxu0 %v1370_v26  ;;  %1282 = vmatprep.mubr.msk.bf16.mxu1 %vm576_vm0, %v1372_v27 }
  0x37   : > { %650 = vmatmul.mubr.bf16.gmra.mrb[8].mxu0 %v1373_v28  ;;  %1283 = vmatmul.mubr.msk.bf16.vlgmr.msra.gmra.mrb[8].mxu1 %vm576_vm0, %v1374_v29 }
  0x38   : > { %657 = vmatprep.mubr.bf16.mxu0 %v1375_v30  ;;  %1286 = vmatprep.mubr.msk.bf16.mxu1 %vm576_vm0, %v1377_v31 }
  0x3f   : > { %658 = vmatmul.mubr.bf16.gmra.mrb[12].mxu0 %v1378_v32  ;;  %1287 = vmatmul.mubr.msk.bf16.gmra.mrb[12].mxu1 %vm576_vm0, %v1379_v33 }
  0x40   : > { %665 = vmatprep.mubr.bf16.mxu0 %v1380_v34  ;;  %1290 = vmatprep.mubr.msk.bf16.mxu1 %vm576_vm0, %v1382_v35 }
  0x47   : > { %666 = vmatmul.mubr.bf16.gmra.mrb[16].mxu0 %v1383_v36  ;;  %1291 = vmatmul.mubr.msk.bf16.gmra.mrb[16].mxu1 %vm576_vm0, %v1384_v37 }
  0x48   : > { %673 = vmatprep.mubr.bf16.mxu0 %v1385_v38  ;;  %1294 = vmatprep.mubr.msk.bf16.mxu1 %vm576_vm0, %v1387_v39 }
  0x4f   : > { %674 = vmatmul.mubr.bf16.gmra.mrb[20].mxu0 %v1388_v40  ;;  %1295 = vmatmul.mubr.msk.bf16.gmra.mrb[20].mxu1 %vm576_vm0, %v1389_v41 }
  0xfa   : > { %v1220_v43 = vpop.f32.mrb[0].mxu0  ;;  %v1256_v44 = vpop.f32.mrb[0].mxu1 }
  0xfb   : > { %v1221_v45 = vpop.f32.mrb[1].mxu0  ;;  %v1257_v46 = vpop.f32.mrb[1].mxu1 }
  0xfc   : > { %v1222_v47 = vadd.f32 %v1221_v45, %v1220_v43  ;;  %v1223_v48 = vpop.f32.mrb[2].mxu0  ;;  %v1574_v49 = vadd.f32 %v1257_v46, %v1256_v44  ;;  %v1259_v50 = vpop.f32.mrb[2].mxu1 }
  0xfd   : > { %v1224_v51 = vpop.f32.mrb[3].mxu0  ;;  %v1260_v52 = vpop.f32.mrb[3].mxu1 }
  0xfe   : > { %v1225_v53 = vadd.f32 %v1224_v51, %v1223_v48  ;;  %v1576_v54 = vadd.f32 %v1260_v52, %v1259_v50  ;;  %v636_v7 = vadd.f32 %v1222_v47, %v1585_v3 }
 0x100   : > { %v639_v16 = vadd.f32 %v1225_v53, %v1585_v3 }
 0x102   : > { %v1226_v55 = vpop.f32.mrb[4].mxu0  ;;  %v1262_v56 = vpop.f32.mrb[4].mxu1 }
 0x103   : > { %v1227_v57 = vpop.f32.mrb[5].mxu0  ;;  %v1263_v58 = vpop.f32.mrb[5].mxu1 }
 0x104   : > { %v1228_v59 = vadd.f32 %v1227_v57, %v1226_v55  ;;  %v1229_v60 = vpop.f32.mrb[6].mxu0  ;;  %v1578_v61 = vadd.f32 %v1263_v58, %v1262_v56  ;;  %v1265_v62 = vpop.f32.mrb[6].mxu1 }
 0x105   : > { %v1230_v63 = vpop.f32.mrb[7].mxu0  ;;  %v1266_v0 = vpop.f32.mrb[7].mxu1 }
 0x106   : > { %v1231_v1 = vadd.f32 %v1230_v63, %v1229_v60  ;;  %v1580_v2 = vadd.f32 %v1266_v0, %v1265_v62  ;;  %v644_v4 = vadd.f32 %v1228_v59, %v1585_v3 }
 0x108   : > { %v647_v11 = vadd.f32 %v1231_v1, %v1585_v3 }
 0x10a   : > { %v1232_v5 = vpop.f32.mrb[8].mxu0  ;;  %v1284_v6 = vpop.f32.mrb[8].mxu1 }
 0x10b   : > { %v741_v8 = vadd.f32 %v1284_v6, %v644_v4  ;;  %v1233_v9 = vpop.f32.mrb[9].mxu0  ;;  %v732_v10 = vpop.f32.mrb[9].mxu1 }
 0x10c   : > { %v1234_v12 = vadd.f32 %v1233_v9, %v1232_v5  ;;  %v733_v13 = vadd.f32 %v732_v10, %v636_v7  ;;  %v1235_v14 = vpop.f32.mrb[10].mxu0  ;;  %v1285_v15 = vpop.f32.mrb[10].mxu1 }
 0x10d   : > { %v744_v17 = vadd.f32 %v1285_v15, %v647_v11  ;;  %v1236_v18 = vpop.f32.mrb[11].mxu0  ;;  %v735_v19 = vpop.f32.mrb[11].mxu1  ;;  %v908_v27 = vmul.f32 %v741_v8, %v741_v8 }
 0x10e   : > { %v1237_v20 = vadd.f32 %v1236_v18, %v1235_v14  ;;  %v736_v21 = vadd.f32 %v735_v19, %v639_v16  ;;  %v906_v23 = vmul.f32 %v733_v13, %v733_v13  ;;  %v652_v32 = vadd.f32 %v1234_v12, %v1585_v3 }
 0x10f   : > { %v1165_v22 = vpack.c.bf16 %v744_v17, %v741_v8  ;;  %v909_v33 = vmul.f32 %v744_v17, %v744_v17 }
 0x110   : > { %v1160_v24 = vpack.c.bf16 %v736_v21, %v733_v13  ;;  %v882_v25 = vadd.f32 %v736_v21, %v733_v13  ;;  %v907_v26 = vmul.f32 %v736_v21, %v736_v21  ;;  %v655_v43 = vadd.f32 %v1237_v20, %v1585_v3 }
 0x111   : > { %1197 = vst [vmem:[%s1595_s8 + $0x8] sm:$0xff] %v1165_v22   ;;  %v692_v20 = vadd.f32 %v1578_v61, %v1585_v3 }
 0x112   : > { %1161 = vst [vmem:[%s1595_s8] sm:$0xff] %v1160_v24   ;;  %v883_v28 = vadd.f32 %v882_v25, %v741_v8  ;;  %v922_v29 = vadd.f32 %v907_v26, %v906_v23  ;;  %v1238_v30 = vpop.f32.mrb[12].mxu0  ;;  %v1288_v31 = vpop.f32.mrb[12].mxu1 }
 0x113   : > { %v1239_v34 = vpop.f32.mrb[13].mxu0  ;;  %v748_v35 = vpop.f32.mrb[13].mxu1 }
 0x114   : > { %v923_v36 = vadd.f32 %v922_v29, %v908_v27  ;;  %v1240_v37 = vadd.f32 %v1239_v34, %v1238_v30  ;;  %v749_v38 = vadd.f32 %v748_v35, %v652_v32  ;;  %v884_v39 = vadd.f32 %v883_v28, %v744_v17  ;;  %v1241_v40 = vpop.f32.mrb[14].mxu0  ;;  %v1289_v41 = vpop.f32.mrb[14].mxu1 }
 0x115   : > { %v1242_v42 = vpop.f32.mrb[15].mxu0  ;;  %v751_v44 = vpop.f32.mrb[15].mxu1  ;;  %v684_v28 = vadd.f32 %v1574_v49, %v1585_v3  ;;  %v695_v30 = vadd.f32 %v1580_v2, %v1585_v3 }
 0x116   : > { %v660_v45 = vadd.f32 %v1240_v37, %v1585_v3  ;;  %v885_v46 = vadd.f32 %v884_v39, %v749_v38  ;;  %v910_v47 = vmul.f32 %v749_v38, %v749_v38  ;;  %v924_v48 = vadd.f32 %v923_v36, %v909_v33 }
 0x117   : > { %v1243_v50 = vadd.f32 %v1242_v42, %v1241_v40  ;;  %v752_v51 = vadd.f32 %v751_v44, %v655_v43 }
 0x118   : > { %v757_v52 = vadd.f32 %v1288_v31, %v660_v45  ;;  %v925_v53 = vadd.f32 %v924_v48, %v910_v47  ;;  %v687_v31 = vadd.f32 %v1576_v54, %v1585_v3 }
 0x119   : > { %v663_v55 = vadd.f32 %v1243_v50, %v1585_v3  ;;  %v1170_v56 = vpack.c.bf16 %v752_v51, %v749_v38  ;;  %v886_v57 = vadd.f32 %v885_v46, %v752_v51  ;;  %v911_v58 = vmul.f32 %v752_v51, %v752_v51 }
 0x11a   : > { %v912_v59 = vmul.f32 %v757_v52, %v757_v52  ;;  %v1244_v60 = vpop.f32.mrb[16].mxu0  ;;  %v1292_v62 = vpop.f32.mrb[16].mxu1 }
 0x11b   : > { %v760_v63 = vadd.f32 %v1289_v41, %v663_v55  ;;  %1198 = vst [vmem:[%s1595_s8 + $0x10] sm:$0xff] %v1170_v56   ;;  %v887_v0 = vadd.f32 %v886_v57, %v757_v52  ;;  %v926_v1 = vadd.f32 %v925_v53, %v911_v58  ;;  %v1245_v4 = vpop.f32.mrb[17].mxu0  ;;  %v764_v5 = vpop.f32.mrb[17].mxu1 }
 0x11c   : > { %v1246_v6 = vadd.f32 %v1245_v4, %v1244_v60  ;;  %v1247_v7 = vpop.f32.mrb[18].mxu0  ;;  %v1293_v8 = vpop.f32.mrb[18].mxu1 }
 0x11d   : > { %v1175_v9 = vpack.c.bf16 %v760_v63, %v757_v52  ;;  %v913_v10 = vmul.f32 %v760_v63, %v760_v63  ;;  %v927_v11 = vadd.f32 %v926_v1, %v912_v59  ;;  %v1248_v12 = vpop.f32.mrb[19].mxu0  ;;  %v888_v13 = vadd.f32 %v887_v0, %v760_v63  ;;  %v767_v14 = vpop.f32.mrb[19].mxu1 }
 0x11e   : > { %v1249_v15 = vadd.f32 %v1248_v12, %v1247_v7  ;;  %v668_v16 = vadd.f32 %v1246_v6, %v1585_v3 }
 0x11f   : > { %1199 = vst [vmem:[%s1595_s8 + $0x18] sm:$0xff] %v1175_v9   ;;  %v928_v17 = vadd.f32 %v927_v11, %v913_v10 }
 0x120   : > { %v765_v18 = vadd.f32 %v764_v5, %v668_v16  ;;  %v671_v19 = vadd.f32 %v1249_v15, %v1585_v3  ;;  %v881_v16 = vld [vmem:[%s1565_s26] sm:$0x1] }
 0x122   : > { %v889_v21 = vadd.f32 %v888_v13, %v765_v18  ;;  %v914_v22 = vmul.f32 %v765_v18, %v765_v18  ;;  %v768_v23 = vadd.f32 %v767_v14, %v671_v19  ;;  %v1250_v24 = vpop.f32.mrb[20].mxu0  ;;  %v1296_v25 = vpop.f32.mrb[20].mxu1  ;;  %v905_v19 = vld [vmem:[%s1570_s29] sm:$0x1] }
 0x123   : > { %v789_v26 = vadd.f32 %v1296_v25, %v692_v20  ;;  %v1251_v27 = vpop.f32.mrb[21].mxu0  ;;  %v780_v29 = vpop.f32.mrb[21].mxu1 }
 0x124   : > { %v929_v32 = vadd.f32 %v928_v17, %v914_v22  ;;  %v1180_v61 = vpack.c.bf16 %v768_v23, %v765_v18  ;;  %v890_v33 = vadd.f32 %v889_v21, %v768_v23  ;;  %v915_v34 = vmul.f32 %v768_v23, %v768_v23  ;;  %v1253_v35 = vpop.f32.mrb[22].mxu0  ;;  %v1297_v36 = vpop.f32.mrb[22].mxu1 }
 0x125   : > { %v1252_v37 = vadd.f32 %v1251_v27, %v1250_v24  ;;  %v781_v38 = vadd.f32 %v780_v29, %v684_v28  ;;  %v792_v39 = vadd.f32 %v1297_v36, %v695_v30  ;;  %v1254_v40 = vpop.f32.mrb[23].mxu0  ;;  %v783_v49 = vpop.f32.mrb[23].mxu1  ;;  %v920_v0 = vmul.f32 %v789_v26, %v789_v26 }
 0x126   : > { %1200 = vst [vmem:[%s1595_s8 + $0x20] sm:$0xff] %v1180_v61   ;;  %v930_v41 = vadd.f32 %v929_v32, %v915_v34  ;;  %v1255_v42 = vadd.f32 %v1254_v40, %v1253_v35  ;;  %v784_v2 = vadd.f32 %v783_v49, %v687_v31 }
 0x127   : > { %v676_v54 = vadd.f32 %v1252_v37, %v1585_v3  ;;  %v1195_v43 = vpack.c.bf16 %v792_v39, %v789_v26  ;;  %v918_v56 = vmul.f32 %v781_v38, %v781_v38  ;;  %v921_v1 = vmul.f32 %v792_v39, %v792_v39 }
 0x128   : > { %v679_v44 = vadd.f32 %v1255_v42, %v1585_v3  ;;  %v1190_v45 = vpack.c.bf16 %v784_v2, %v781_v38  ;;  %v919_v60 = vmul.f32 %v784_v2, %v784_v2 }
 0x129   : > { %v773_v46 = vadd.f32 %v1292_v62, %v676_v54  ;;  %1203 = vst [vmem:[%s1595_s8 + $0x38] sm:$0xff] %v1195_v43  }
 0x12a   : > { %v776_v47 = vadd.f32 %v1293_v8, %v679_v44  ;;  %1202 = vst [vmem:[%s1595_s8 + $0x30] sm:$0xff] %v1190_v45  }
 0x12b   : > { %v891_v48 = vadd.f32 %v890_v33, %v773_v46  ;;  %v916_v50 = vmul.f32 %v773_v46, %v773_v46 }
 0x12c   : > { %v1185_v51 = vpack.c.bf16 %v776_v47, %v773_v46  ;;  %v917_v52 = vmul.f32 %v776_v47, %v776_v47 }
 0x12d   : > { %v931_v53 = vadd.f32 %v930_v41, %v916_v50  ;;  %v892_v55 = vadd.f32 %v891_v48, %v776_v47 }
 0x12e   : > { %1201 = vst [vmem:[%s1595_s8 + $0x28] sm:$0xff] %v1185_v51  }
 0x12f   : > { %v893_v57 = vadd.f32 %v892_v55, %v781_v38  ;;  %v932_v58 = vadd.f32 %v931_v53, %v917_v52 }
 0x131   : > { %v894_v59 = vadd.f32 %v893_v57, %v784_v2  ;;  %v933_v63 = vadd.f32 %v932_v58, %v918_v56 }
 0x133   : > { %v895_v3 = vadd.f32 %v894_v59, %v789_v26  ;;  %v934_v62 = vadd.f32 %v933_v63, %v919_v60 }
 0x135   : > { %v896_v4 = vadd.f32 %v895_v3, %v792_v39  ;;  %v935_v5 = vadd.f32 %v934_v62, %v920_v0 }
 0x137   : > { %v897_v6 = vrot.slane %v896_v4, 4  ;;  %v936_v7 = vadd.f32 %v935_v5, %v921_v1 }
 0x139   : > { %v898_v8 = vadd.f32 %v897_v6, %v896_v4  ;;  %v937_v9 = vrot.slane %v936_v7, 4 }
 0x13b   : > { %v899_v10 = vrot.slane %v898_v8, 2  ;;  %v938_v11 = vadd.f32 %v937_v9, %v936_v7 }
 0x13d   : > { %v900_v12 = vadd.f32 %v899_v10, %v898_v8  ;;  %v939_v13 = vrot.slane %v938_v11, 2 }
 0x13f   : > { %v901_v14 = vrot.slane %v900_v12, 1  ;;  %v940_v15 = vadd.f32 %v939_v13, %v938_v11 }
 0x141   : > { %v902_v17 = vadd.f32 %v901_v14, %v900_v12  ;;  %v941_v18 = vrot.slane %v940_v15, 1 }
 0x143   : > { %v903_v20 = vadd.f32 %v902_v17, %v881_v16  ;;  %v942_v21 = vadd.f32 %v941_v18, %v940_v15 }
 0x145   : > { %904 = vst [vmem:[%s1565_s26] sm:$0x1] %v903_v20  ;;  %v943_v22 = vadd.f32 %v942_v21, %v905_v19 }
 0x147   : > { %944 = vst [vmem:[%s1570_s29] sm:$0x1] %v943_v22 }
 0x148 PF: > { %s16_s20 = sadd.s32 1, %s1412_s20   ;;  %s1640_s18 = smov %s1408_s19 }
 0x149   : > { %p13_p6 = scmp.ge.s32.totalorder %s16_s20, 6   ;;  %s1641_s19 = smov %s1643_s21 }
 0x14b   :  { %15 = sbr.rel (!%p13_p6) target bundleno = 2 (0x2), region = 90 }

// kernel: discriminator_forward.28
= control target key start
LH: loop header
LB: loop body
LE: loop exit
PB: predicated region body
PF: predicated region fallthrough
CT: control target
= control target key end

     0   :  { %v79_v8 = vlaneseq  ;;  %s246_s1 = inlined_call_operand.vmem [shape: f32[1,1,128], index: 1, kind: input, shape index: {}]   ;;  %s247_s2 = inlined_call_operand.vmem [shape: f32[1,1,128], index: 2, kind: input, shape index: {}]   ;;  %s248_s0 = inlined_call_operand.vmem [shape: bf16[32,128], index: 0, kind: input, shape index: {}]   ;;  %s249_s3 = inlined_call_operand.vmem [shape: f32[1,128], index: 3, kind: input, shape index: {}]   ;;  %s250_s4 = inlined_call_operand.vmem [shape: f32[1,128], index: 4, kind: input, shape index: {}]   ;;  %s251_s5 = inlined_call_operand.vmem [shape: bf16[32,128], index: 5, kind: output, shape index: {}]  }
   0x1   :  { %v56_v0 = vld [vmem:[%s246_s1] sm:$0x1]  ;;  %v188_v12 = vld [vmem:[%s248_s0 + $0x8] sm:$0xff]  }
   0x2   :  { %v58_v1 = vld [vmem:[%s247_s2] sm:$0x1]  ;;  %v57_v2 = vmul.f32 0.03125, %v56_v0  ;;  %v80_v9 = vshrl.u32 %v79_v8, 7  ;;  %v176_v18 = vunpack.c.l.bf16 %v188_v12  ;;  %v177_v20 = vunpack.c.h.bf16 %v188_v12 }
   0x3   :  { %v59_v3 = vmul.f32 0.03125, %v58_v1  ;;  %v65_v10 = vld [vmem:[%s249_s3] sm:$0x1] }
   0x4   :  { %v60_v4 = vmul.f32 %v57_v2, %v57_v2  ;;  %v171_v11 = vld [vmem:[%s248_s0] sm:$0xff]   ;;  %v81_v13 = vsub.s32 0, %v80_v9 }
   0x5   :  { %v172_v16 = vunpack.c.l.bf16 %v171_v11  ;;  %v173_v17 = vunpack.c.h.bf16 %v171_v11  ;;  %v67_v19 = vld [vmem:[%s250_s4] sm:$0x1] }
   0x6   :  { %v61_v5 = vsub.f32 %v59_v3, %v60_v4 }
   0x8   :  { %v62_v6 = vmax.f32 %v61_v5, 0.0 }
   0xa   :  { %v63_v7 = vadd.f32 1e-05, %v62_v6 }
   0xc   :  { %190 = vrsqrt.f32 %v63_v7 }
  0x16   :  { %v191_v14 = vpop.eup %190 }
  0x17   :  { %v66_v15 = vmul.f32 %v191_v14, %v65_v10 }
  0x19   :  { %v68_v21 = vmul.f32 %v66_v15, %v57_v2  ;;  %v82_v22 = vrot.slane %v66_v15, %v81_v13 }
  0x1b   :  { %v69_v23 = vsub.f32 %v67_v19, %v68_v21  ;;  %v84_v24 = vmul.f32 %v172_v16, %v82_v22  ;;  %v85_v25 = vmul.f32 %v173_v17, %v82_v22  ;;  %v86_v26 = vmul.f32 %v176_v18, %v82_v22 }
  0x1c   :  { %v87_v27 = vmul.f32 %v177_v20, %v82_v22 }
  0x1d   :  { %v92_v28 = vrot.slane %v69_v23, %v81_v13 }
  0x1f   :  { %v94_v29 = vadd.f32 %v92_v28, %v84_v24  ;;  %v95_v30 = vadd.f32 %v92_v28, %v85_v25  ;;  %v96_v31 = vadd.f32 %v92_v28, %v86_v26  ;;  %v97_v32 = vadd.f32 %v92_v28, %v87_v27 }
  0x21   :  { %vm98_vm0 = vcmp.ge.f32.partialorder %v94_v29, 0.0  ;;  %vm99_vm1 = vcmp.ge.f32.partialorder %v95_v30, 0.0  ;;  %v102_v33 = vmul.f32 0.2, %v94_v29  ;;  %v103_v34 = vmul.f32 0.2, %v95_v30 }
  0x22   :  { %vm100_vm2 = vcmp.ge.f32.partialorder %v96_v31, 0.0  ;;  %vm101_vm3 = vcmp.ge.f32.partialorder %v97_v32, 0.0  ;;  %v104_v35 = vmul.f32 0.2, %v96_v31  ;;  %v105_v36 = vmul.f32 0.2, %v97_v32 }
  0x23   :  { %v106_v37 = vsel %vm98_vm0, %v94_v29, %v102_v33  ;;  %v107_v38 = vsel %vm99_vm1, %v95_v30, %v103_v34 }
  0x24   :  { %v181_v39 = vpack.c.bf16 %v107_v38, %v106_v37  ;;  %v108_v40 = vsel %vm100_vm2, %v96_v31, %v104_v35  ;;  %v109_v41 = vsel %vm101_vm3, %v97_v32, %v105_v36 }
  0x25   :  { %v186_v42 = vpack.c.bf16 %v109_v41, %v108_v40 }
  0x26   :  { %182 = vst [vmem:[%s251_s5] sm:$0xff] %v181_v39  }
  0x27   :  { %189 = vst [vmem:[%s251_s5 + $0x8] sm:$0xff] %v186_v42  }

// kernel: discriminator_forward.27
= control target key start
LH: loop header
LB: loop body
LE: loop exit
PB: predicated region body
PF: predicated region fallthrough
CT: control target
= control target key end

     0   :  { %s1770_s1 = inlined_call_operand.vmem [shape: bf16[1152,128], index: 1, kind: input, shape index: {}]   ;;  %s1771_s0 = inlined_call_operand.vmem [shape: bf16[32,1152], index: 0, kind: input, shape index: {}]   ;;  %s1772_s4 = inlined_call_operand.vmem [shape: f32[1,1,128], index: 4, kind: output, shape index: {1}]   ;;  %s1773_s5 = inlined_call_operand.vmem [shape: f32[1,1,128], index: 5, kind: output, shape index: {2}]   ;;  %s1774_s2 = inlined_call_operand.vmem [shape: f32[1,128], index: 2, kind: input, shape index: {}]   ;;  %s1775_s3 = inlined_call_operand.vmem [shape: bf16[32,128], index: 3, kind: output, shape index: {0}]  }
   0x1   :  { %v1344_v0 = vld [vmem:[%s1770_s1 + $0x40] sm:$0xff]   ;;  %v1348_v4 = vld [vmem:[%s1770_s1 + $0x48] sm:$0xff]   ;;  %v1352_v8 = vld [vmem:[%s1770_s1 + $0x50] sm:$0xff]  }
   0x2   :  { %v1345_v1 = vld [vmem:[%s1770_s1] sm:$0xff]   ;;  %1201 = vmatprep.subr.bf16.mxu0 %v1344_v0  ;;  %v1349_v5 = vld [vmem:[%s1770_s1 + $0x8] sm:$0xff]   ;;  %v1353_v9 = vld [vmem:[%s1770_s1 + $0x10] sm:$0xff]  }
   0x3   :  { %v1346_v2 = vld [vmem:[%s1770_s1 + $0xc0] sm:$0xff]   ;;  %1202 = vmatpush3.bf16.msra.mxu0 %v1345_v1  ;;  %v1350_v6 = vld [vmem:[%s1770_s1 + $0xc8] sm:$0xff]   ;;  %v1354_v10 = vld [vmem:[%s1770_s1 + $0xd0] sm:$0xff]  }
   0x4   :  { %v1347_v3 = vld [vmem:[%s1770_s1 + $0x80] sm:$0xff]   ;;  %1229 = vmatprep.subr.bf16.mxu1 %v1346_v2  ;;  %1203 = vmatprep.subr.bf16.mxu0 %v1348_v4  ;;  %v1351_v7 = vld [vmem:[%s1770_s1 + $0x88] sm:$0xff]   ;;  %v1355_v11 = vld [vmem:[%s1770_s1 + $0x90] sm:$0xff]  }
   0x5   :  { %1230 = vmatpush3.bf16.msra.mxu1 %v1347_v3  ;;  %v1356_v12 = vld [vmem:[%s1770_s1 + $0x58] sm:$0xff]   ;;  %v1360_v16 = vld [vmem:[%s1770_s1 + $0x60] sm:$0xff]   ;;  %v1364_v20 = vld [vmem:[%s1770_s1 + $0x68] sm:$0xff]  }
   0x6   :  { %1231 = vmatprep.subr.bf16.mxu1 %v1350_v6  ;;  %v1357_v13 = vld [vmem:[%s1770_s1 + $0x18] sm:$0xff]   ;;  %v1361_v17 = vld [vmem:[%s1770_s1 + $0x20] sm:$0xff]   ;;  %v1365_v21 = vld [vmem:[%s1770_s1 + $0x28] sm:$0xff]  }
   0x7   :  { %1204 = vmatpush3.bf16.msra.mxu0 %v1349_v5  ;;  %v1358_v14 = vld [vmem:[%s1770_s1 + $0xd8] sm:$0xff]   ;;  %v1362_v18 = vld [vmem:[%s1770_s1 + $0xe0] sm:$0xff]   ;;  %v1366_v22 = vld [vmem:[%s1770_s1 + $0xe8] sm:$0xff]  }
   0x8   :  { %1205 = vmatprep.subr.bf16.mxu0 %v1352_v8  ;;  %v1359_v15 = vld [vmem:[%s1770_s1 + $0x98] sm:$0xff]   ;;  %v1363_v19 = vld [vmem:[%s1770_s1 + $0xa0] sm:$0xff]   ;;  %v1367_v23 = vld [vmem:[%s1770_s1 + $0xa8] sm:$0xff]  }
   0x9   :  { %1232 = vmatpush3.bf16.msra.mxu1 %v1351_v7  ;;  %v1368_v24 = vld [vmem:[%s1770_s1 + $0x70] sm:$0xff]   ;;  %v1372_v28 = vld [vmem:[%s1770_s1 + $0x78] sm:$0xff]   ;;  %v1375_v31 = vld [vmem:[%s1771_s0] ss:$36 sps:$4 sm:$0xff]  }
   0xa   :  { %1233 = vmatprep.subr.bf16.mxu1 %v1354_v10  ;;  %v1369_v25 = vld [vmem:[%s1770_s1 + $0x30] sm:$0xff]   ;;  %v1373_v29 = vld [vmem:[%s1770_s1 + $0x38] sm:$0xff]   ;;  %v1377_v32 = vld [vmem:[%s1771_s0 + $0x4] ss:$36 sps:$4 sm:$0xff]  }
   0xb   :  { %1206 = vmatpush3.bf16.msra.mxu0 %v1353_v9  ;;  %v1370_v26 = vld [vmem:[%s1770_s1 + $0xf0] sm:$0xff]   ;;  %v1374_v30 = vld [vmem:[%s1770_s1 + $0xf8] sm:$0xff]   ;;  %784 = vmatprep.mubr.bf16.mxu0 %v1377_v32  ;;  %v1379_v34 = vld [vmem:[%s1770_s1 + $0x140] sm:$0xff]  }
   0xc   :  { %1207 = vmatprep.subr.bf16.mxu0 %v1356_v12  ;;  %v1371_v27 = vld [vmem:[%s1770_s1 + $0xb0] sm:$0xff]   ;;  %v1378_v33 = vld [vmem:[%s1770_s1 + $0xb8] sm:$0xff]   ;;  %v1380_v35 = vld [vmem:[%s1771_s0 + $0x8] ss:$36 sps:$4 sm:$0xff]  }
   0xd   :  { %1234 = vmatpush3.bf16.msra.mxu1 %v1355_v11  ;;  %v1382_v36 = vld [vmem:[%s1771_s0 + $0xc] ss:$36 sps:$4 sm:$0xff]   ;;  %v1383_v37 = vld [vmem:[%s1770_s1 + $0x100] sm:$0xff]   ;;  %v1394_v48 = vld [vmem:[%s1770_s1 + $0x158] sm:$0xff]  }
   0xe   :  { %1235 = vmatprep.subr.bf16.mxu1 %v1358_v14  ;;  %833 = vmatprep.mubr.bf16.mxu1 %v1382_v36  ;;  %v1384_v38 = vld [vmem:[%s1770_s1 + $0x1c0] sm:$0xff]   ;;  %v1386_v40 = vld [vmem:[%s1770_s1 + $0x148] sm:$0xff]   ;;  %v1390_v44 = vld [vmem:[%s1770_s1 + $0x150] sm:$0xff]  }
   0xf   :  { %1208 = vmatpush3.bf16.msra.mxu0 %v1357_v13  ;;  %v1385_v39 = vld [vmem:[%s1770_s1 + $0x180] sm:$0xff]   ;;  %v1387_v41 = vld [vmem:[%s1770_s1 + $0x108] sm:$0xff]   ;;  %v1391_v45 = vld [vmem:[%s1770_s1 + $0x110] sm:$0xff]  }
  0x10   :  { %1209 = vmatprep.subr.bf16.mxu0 %v1360_v16  ;;  %v1388_v42 = vld [vmem:[%s1770_s1 + $0x1c8] sm:$0xff]   ;;  %v1392_v46 = vld [vmem:[%s1770_s1 + $0x1d0] sm:$0xff]   ;;  %v1395_v49 = vld [vmem:[%s1770_s1 + $0x118] sm:$0xff]  }
  0x11   :  { %1236 = vmatpush3.bf16.msra.mxu1 %v1359_v15  ;;  %v1389_v43 = vld [vmem:[%s1770_s1 + $0x188] sm:$0xff]   ;;  %v1393_v47 = vld [vmem:[%s1770_s1 + $0x190] sm:$0xff]   ;;  %v1396_v50 = vld [vmem:[%s1770_s1 + $0x1d8] sm:$0xff]  }
  0x12   :  { %1237 = vmatprep.subr.bf16.mxu1 %v1362_v18  ;;  %v1397_v51 = vld [vmem:[%s1770_s1 + $0x198] sm:$0xff]   ;;  %v1398_v52 = vld [vmem:[%s1770_s1 + $0x160] sm:$0xff]   ;;  %v1402_v56 = vld [vmem:[%s1770_s1 + $0x168] sm:$0xff]  }
  0x13   :  { %1210 = vmatpush3.bf16.msra.mxu0 %v1361_v17  ;;  %v1399_v53 = vld [vmem:[%s1770_s1 + $0x120] sm:$0xff]   ;;  %v1403_v57 = vld [vmem:[%s1771_s0 + $0x4c] ss:$36 sps:$4 sm:$0xff]   ;;  %v1408_v61 = vld [vmem:[%s1771_s0 + $0x54] ss:$36 sps:$4 sm:$0xff]  }
  0x14   :  { %1211 = vmatprep.subr.bf16.mxu0 %v1364_v20  ;;  %v1400_v54 = vld [vmem:[%s1770_s1 + $0x1e0] sm:$0xff]   ;;  %v1405_v58 = vld [vmem:[%s1770_s1 + $0x128] sm:$0xff]   ;;  %v1411_v63 = vld [vmem:[%s1771_s0 + $0x50] ss:$36 sps:$4 sm:$0xff]  }
  0x15   :  { %1238 = vmatpush3.bf16.msra.mxu1 %v1363_v19  ;;  %v1401_v55 = vld [vmem:[%s1770_s1 + $0x1a0] sm:$0xff]   ;;  %v1406_v59 = vld [vmem:[%s1771_s0 + $0x48] ss:$36 sps:$4 sm:$0xff]   ;;  %v1412_v0 = vld [vmem:[%s1770_s1 + $0x170] sm:$0xff]  }
  0x16   :  { %1239 = vmatprep.subr.bf16.mxu1 %v1366_v22  ;;  %v1407_v60 = vld [vmem:[%s1770_s1 + $0x1e8] sm:$0xff]   ;;  %v1413_v1 = vld [vmem:[%s1770_s1 + $0x130] sm:$0xff]   ;;  %v1416_v4 = vld [vmem:[%s1770_s1 + $0x178] sm:$0xff]  }
  0x17   :  { %1212 = vmatpush3.bf16.msra.mxu0 %v1365_v21  ;;  %v1410_v62 = vld [vmem:[%s1770_s1 + $0x1a8] sm:$0xff]   ;;  %v1414_v2 = vld [vmem:[%s1770_s1 + $0x1f0] sm:$0xff]   ;;  %v1417_v5 = vld [vmem:[%s1770_s1 + $0x138] sm:$0xff]  }
  0x18   :  { %1213 = vmatprep.subr.bf16.mxu0 %v1368_v24  ;;  %v1415_v3 = vld [vmem:[%s1770_s1 + $0x1b0] sm:$0xff]   ;;  %v1418_v6 = vld [vmem:[%s1770_s1 + $0x1f8] sm:$0xff]   ;;  %v1423_v10 = vld [vmem:[%s1770_s1 + $0x200] sm:$0xff]  }
  0x19   :  { %1240 = vmatpush3.bf16.msra.mxu1 %v1367_v23  ;;  %v1419_v7 = vld [vmem:[%s1771_s0 + $0x10] ss:$36 sps:$4 sm:$0xff]   ;;  %v1422_v9 = vld [vmem:[%s1770_s1 + $0x1b8] sm:$0xff]   ;;  %v1427_v13 = vld [vmem:[%s1770_s1 + $0x208] sm:$0xff]  }
  0x1a   :  { %1241 = vmatprep.subr.bf16.mxu1 %v1370_v26  ;;  %v1421_v8 = vld [vmem:[%s1771_s0 + $0x14] ss:$36 sps:$4 sm:$0xff]   ;;  %v1426_v12 = vld [vmem:[%s1771_s0 + $0x1c] ss:$36 sps:$4 sm:$0xff]   ;;  %v1432_v17 = vld [vmem:[%s1771_s0 + $0x64] ss:$36 sps:$4 sm:$0xff]  }
  0x1b   :  { %1214 = vmatpush3.bf16.msra.mxu0 %v1369_v25  ;;  %v1424_v11 = vld [vmem:[%s1771_s0 + $0x18] ss:$36 sps:$4 sm:$0xff]   ;;  %v1431_v16 = vld [vmem:[%s1770_s1 + $0x210] sm:$0xff]   ;;  %v1434_v18 = vld [vmem:[%s1771_s0 + $0x60] ss:$36 sps:$4 sm:$0xff]   ;;  %v1442_v26 = vmov 0.0  }
  0x1c   :  { %1215 = vmatprep.subr.bf16.mxu0 %v1372_v28  ;;  %v1428_v14 = vld [vmem:[%s1771_s0 + $0x5c] ss:$36 sps:$4 sm:$0xff]   ;;  %v1437_v22 = vld [vmem:[%s1770_s1 + $0x228] sm:$0xff]   ;;  %v1438_v23 = vld [vmem:[%s1770_s1 + $0x230] sm:$0xff]   ;;  %1021 = vst [vmem:[%s1772_s4] sm:$0x1] %v1442_v26 }
  0x1d   :  { %1242 = vmatpush3.bf16.msra.mxu1 %v1371_v27  ;;  %v1430_v15 = vld [vmem:[%s1771_s0 + $0x58] ss:$36 sps:$4 sm:$0xff]   ;;  %v1436_v20 = vld [vmem:[%s1770_s1 + $0x220] sm:$0xff]   ;;  %v1441_v25 = vld [vmem:[%s1771_s0 + $0x68] ss:$36 sps:$4 sm:$0xff]   ;;  %1022 = vst [vmem:[%s1773_s5] sm:$0x1] %v1442_v26 }
  0x1e   :  { %1243 = vmatprep.subr.bf16.mxu1 %v1374_v30  ;;  %v1435_v19 = vld [vmem:[%s1770_s1 + $0x218] sm:$0xff]   ;;  %v1440_v21 = vld [vmem:[%s1771_s0 + $0x20] ss:$36 sps:$4 sm:$0xff]  }
  0x1f   :  { %1216 = vmatpush3.bf16.msra.mxu0 %v1373_v29  ;;  %v1439_v24 = vld [vmem:[%s1770_s1 + $0x238] sm:$0xff]   ;;  %v1091_v28 = vld [vmem:[%s1774_s2] ss:$0 sm:$0xff] }
  0x20   :  { %1257 = vmatprep.subr.bf16.mxu0 %v1379_v34 }
  0x21   :  { %1244 = vmatpush3.bf16.msra.mxu1 %v1378_v33 }
  0x22   :  { %785 = vmatmul.mubr.bf16.vlgmr.msra.gmra.mrb[0].mxu0 %v1375_v31  ;;  %1285 = vmatprep.subr.bf16.mxu1 %v1384_v38 }
  0x23   :  { %1258 = vmatpush3.bf16.msra.mxu0 %v1383_v37  ;;  %792 = vmatprep.mubr.bf16.mxu0 %v1403_v57 }
  0x24   :  { %834 = vmatmul.mubr.bf16.vlgmr.msra.gmra.mrb[0].mxu1 %v1380_v35  ;;  %1259 = vmatprep.subr.bf16.mxu0 %v1386_v40 }
  0x25   :  { %1286 = vmatpush3.bf16.msra.mxu1 %v1385_v39  ;;  %841 = vmatprep.mubr.bf16.mxu1 %v1408_v61 }
  0x26   :  { %1287 = vmatprep.subr.bf16.mxu1 %v1388_v42 }
  0x27   :  { %1260 = vmatpush3.bf16.msra.mxu0 %v1387_v41 }
  0x28   :  { %1261 = vmatprep.subr.bf16.mxu0 %v1390_v44 }
  0x29   :  { %1288 = vmatpush3.bf16.msra.mxu1 %v1389_v43 }
  0x2a   :  { %1289 = vmatprep.subr.bf16.mxu1 %v1392_v46  ;;  %793 = vmatmul.mubr.bf16.gmra.mrb[4].mxu0 %v1406_v59 }
  0x2b   :  { %1262 = vmatpush3.bf16.msra.mxu0 %v1391_v45  ;;  %882 = vmatprep.mubr.bf16.mxu0 %v1421_v8 }
  0x2c   :  { %1263 = vmatprep.subr.bf16.mxu0 %v1394_v48  ;;  %842 = vmatmul.mubr.bf16.gmra.mrb[4].mxu1 %v1411_v63 }
  0x2d   :  { %1290 = vmatpush3.bf16.msra.mxu1 %v1393_v47  ;;  %931 = vmatprep.mubr.bf16.mxu1 %v1426_v12 }
  0x2e   :  { %1291 = vmatprep.subr.bf16.mxu1 %v1396_v50 }
  0x2f   :  { %1264 = vmatpush3.bf16.msra.mxu0 %v1395_v49 }
  0x30   :  { %1265 = vmatprep.subr.bf16.mxu0 %v1398_v52 }
  0x31   :  { %1292 = vmatpush3.bf16.msra.mxu1 %v1397_v51 }
  0x32   :  { %1293 = vmatprep.subr.bf16.mxu1 %v1400_v54 }
  0x33   :  { %1266 = vmatpush3.bf16.msra.mxu0 %v1399_v53 }
  0x34   :  { %1267 = vmatprep.subr.bf16.mxu0 %v1402_v56 }
  0x35   :  { %1294 = vmatpush3.bf16.msra.mxu1 %v1401_v55 }
  0x36   :  { %1295 = vmatprep.subr.bf16.mxu1 %v1407_v60 }
  0x37   :  { %1268 = vmatpush3.bf16.msra.mxu0 %v1405_v58 }
  0x38   :  { %1269 = vmatprep.subr.bf16.mxu0 %v1412_v0 }
  0x39   :  { %1296 = vmatpush3.bf16.msra.mxu1 %v1410_v62 }
  0x3a   :  { %1297 = vmatprep.subr.bf16.mxu1 %v1414_v2 }
  0x3b   :  { %1270 = vmatpush3.bf16.msra.mxu0 %v1413_v1 }
  0x3c   :  { %1271 = vmatprep.subr.bf16.mxu0 %v1416_v4 }
  0x3d   :  { %1298 = vmatpush3.bf16.msra.mxu1 %v1415_v3 }
  0x3e   :  { %1299 = vmatprep.subr.bf16.mxu1 %v1418_v6 }
  0x3f   :  { %1272 = vmatpush3.bf16.msra.mxu0 %v1417_v5 }
  0x40   :  { %1323 = vmatprep.subr.bf16.mxu0 %v1423_v10 }
  0x41   :  { %1300 = vmatpush3.bf16.msra.mxu1 %v1422_v9 }
  0x42   :  { %883 = vmatmul.mubr.bf16.vlgmr.msra.gmra.mrb[8].mxu0 %v1419_v7 }
  0x43   :  { %1324 = vmatpush3.bf16.msra.mxu0 %v1423_v10  ;;  %890 = vmatprep.mubr.bf16.mxu0 %v1428_v14 }
  0x44   :  { %932 = vmatmul.mubr.bf16.vlgmr.msra.gmra.mrb[8].mxu1 %v1424_v11  ;;  %1325 = vmatprep.subr.bf16.mxu0 %v1427_v13 }
  0x45   :  { %939 = vmatprep.mubr.bf16.mxu1 %v1432_v17 }
  0x47   :  { %1326 = vmatpush3.bf16.msra.mxu0 %v1427_v13 }
  0x48   :  { %1327 = vmatprep.subr.bf16.mxu0 %v1431_v16 }
  0x4a   :  { %891 = vmatmul.mubr.bf16.gmra.mrb[12].mxu0 %v1430_v15 }
  0x4b   :  { %1328 = vmatpush3.bf16.msra.mxu0 %v1431_v16  ;;  %1339 = vmatprep.mubr.bf16.mxu0 %v1440_v21 }
  0x4c   :  { %940 = vmatmul.mubr.bf16.gmra.mrb[12].mxu1 %v1434_v18  ;;  %1329 = vmatprep.subr.bf16.mxu0 %v1435_v19 }
  0x4f   :  { %1330 = vmatpush3.bf16.msra.mxu0 %v1435_v19 }
  0x50   :  { %1331 = vmatprep.subr.bf16.mxu0 %v1436_v20 }
  0x53   :  { %1332 = vmatpush3.bf16.msra.mxu0 %v1436_v20 }
  0x54   :  { %1333 = vmatprep.subr.bf16.mxu0 %v1437_v22 }
  0x57   :  { %1334 = vmatpush3.bf16.msra.mxu0 %v1437_v22 }
  0x58   :  { %1335 = vmatprep.subr.bf16.mxu0 %v1438_v23 }
  0x5b   :  { %1336 = vmatpush3.bf16.msra.mxu0 %v1438_v23 }
  0x5c   :  { %1337 = vmatprep.subr.bf16.mxu0 %v1439_v24 }
  0x5f   :  { %1338 = vmatpush3.bf16.msra.mxu0 %v1439_v24 }
  0x62   :  { %1340 = vmatmul.mubr.bf16.vlgmr.msra.gmra.mrb[16].mxu0 %v1441_v25 }
  0xf5   :  { %v1217_v27 = vpop.f32.mrb[0].mxu0 }
  0xf6   :  { %v1218_v29 = vpop.f32.mrb[1].mxu0 }
  0xf7   :  { %v1219_v30 = vadd.f32 %v1218_v29, %v1217_v27  ;;  %v1220_v31 = vpop.f32.mrb[2].mxu0  ;;  %v1245_v32 = vpop.f32.mrb[0].mxu1 }
  0xf8   :  { %v1221_v33 = vpop.f32.mrb[3].mxu0  ;;  %v1246_v36 = vpop.f32.mrb[1].mxu1 }
  0xf9   :  { %v787_v34 = vadd.f32 %v1219_v30, %v1091_v28  ;;  %v1222_v35 = vadd.f32 %v1221_v33, %v1220_v31  ;;  %v1247_v37 = vadd.f32 %v1246_v36, %v1245_v32  ;;  %v1248_v38 = vpop.f32.mrb[2].mxu1 }
  0xfa   :  { %v1249_v40 = vpop.f32.mrb[3].mxu1 }
  0xfb   :  { %v790_v39 = vadd.f32 %v1222_v35, %v1091_v28  ;;  %v836_v41 = vadd.f32 %v1247_v37, %v787_v34  ;;  %v1250_v42 = vadd.f32 %v1249_v40, %v1248_v38 }
  0xfd   :  { %v839_v43 = vadd.f32 %v1250_v42, %v790_v39  ;;  %v1223_v44 = vpop.f32.mrb[4].mxu0 }
  0xfe   :  { %v1224_v45 = vpop.f32.mrb[5].mxu0 }
  0xff   :  { %v1225_v46 = vadd.f32 %v1224_v45, %v1223_v44  ;;  %v1226_v47 = vpop.f32.mrb[6].mxu0  ;;  %v1251_v48 = vpop.f32.mrb[4].mxu1 }
 0x100   :  { %v1227_v49 = vpop.f32.mrb[7].mxu0  ;;  %v1252_v52 = vpop.f32.mrb[5].mxu1 }
 0x101   :  { %v795_v50 = vadd.f32 %v1225_v46, %v1091_v28  ;;  %v1228_v51 = vadd.f32 %v1227_v49, %v1226_v47  ;;  %v1253_v53 = vadd.f32 %v1252_v52, %v1251_v48  ;;  %v1254_v54 = vpop.f32.mrb[6].mxu1 }
 0x102   :  { %v1255_v56 = vpop.f32.mrb[7].mxu1 }
 0x103   :  { %v798_v55 = vadd.f32 %v1228_v51, %v1091_v28  ;;  %v844_v57 = vadd.f32 %v1253_v53, %v795_v50  ;;  %v1256_v58 = vadd.f32 %v1255_v56, %v1254_v54 }
 0x105   :  { %v847_v59 = vadd.f32 %v1256_v58, %v798_v55 }
 0x115   :  { %v1273_v60 = vpop.f32.mrb[8].mxu0 }
 0x116   :  { %v1274_v61 = vpop.f32.mrb[9].mxu0 }
 0x117   :  { %v1275_v62 = vadd.f32 %v1274_v61, %v1273_v60  ;;  %v1276_v63 = vpop.f32.mrb[10].mxu0  ;;  %v1301_v0 = vpop.f32.mrb[8].mxu1  ;;  %v1035_v60 = vld [vmem:[%s1773_s5] sm:$0x1] }
 0x118   :  { %v1277_v1 = vpop.f32.mrb[11].mxu0  ;;  %v1302_v4 = vpop.f32.mrb[9].mxu1 }
 0x119   :  { %v885_v2 = vadd.f32 %v1275_v62, %v836_v41  ;;  %v1278_v3 = vadd.f32 %v1277_v1, %v1276_v63  ;;  %v1303_v5 = vadd.f32 %v1302_v4, %v1301_v0  ;;  %v1304_v6 = vpop.f32.mrb[10].mxu1 }
 0x11a   :  { %v1305_v8 = vpop.f32.mrb[11].mxu1 }
 0x11b   :  { %v888_v7 = vadd.f32 %v1278_v3, %v839_v43  ;;  %v1306_v9 = vadd.f32 %v1305_v8, %v1304_v6  ;;  %v934_v10 = vadd.f32 %v1303_v5, %v885_v2 }
 0x11d   :  { %v1279_v11 = vpop.f32.mrb[12].mxu0  ;;  %v937_v13 = vadd.f32 %v1306_v9, %v888_v7 }
 0x11e   :  { %v1280_v12 = vpop.f32.mrb[13].mxu0 }
 0x11f   :  { %v1281_v14 = vadd.f32 %v1280_v12, %v1279_v11  ;;  %v1282_v15 = vpop.f32.mrb[14].mxu0  ;;  %v1307_v16 = vpop.f32.mrb[12].mxu1 }
 0x120   :  { %v1283_v17 = vpop.f32.mrb[15].mxu0  ;;  %v1308_v20 = vpop.f32.mrb[13].mxu1 }
 0x121   :  { %v893_v18 = vadd.f32 %v1281_v14, %v844_v57  ;;  %v1284_v19 = vadd.f32 %v1283_v17, %v1282_v15  ;;  %v1309_v21 = vadd.f32 %v1308_v20, %v1307_v16  ;;  %v1310_v22 = vpop.f32.mrb[14].mxu1  ;;  %v1023_v57 = vld [vmem:[%s1772_s4] sm:$0x1] }
 0x122   :  { %v1311_v24 = vpop.f32.mrb[15].mxu1 }
 0x123   :  { %v896_v23 = vadd.f32 %v1284_v19, %v847_v59  ;;  %v1312_v25 = vadd.f32 %v1311_v24, %v1310_v22  ;;  %v942_v26 = vadd.f32 %v1309_v21, %v893_v18 }
 0x125   :  { %v945_v27 = vadd.f32 %v1312_v25, %v896_v23 }
 0x135   :  { %v1341_v28 = vpop.f32.mrb[16].mxu0 }
 0x136   :  { %v991_v29 = vadd.f32 %v1341_v28, %v942_v26  ;;  %v982_v30 = vpop.f32.mrb[17].mxu0 }
 0x137   :  { %v983_v31 = vadd.f32 %v982_v30, %v934_v10  ;;  %v1342_v32 = vpop.f32.mrb[18].mxu0 }
 0x138   :  { %v994_v33 = vadd.f32 %v1342_v32, %v945_v27  ;;  %v985_v34 = vpop.f32.mrb[19].mxu0  ;;  %v1038_v41 = vmul.f32 %v991_v29, %v991_v29 }
 0x139   :  { %v986_v35 = vadd.f32 %v985_v34, %v937_v13  ;;  %v1036_v37 = vmul.f32 %v983_v31, %v983_v31 }
 0x13a   :  { %v1198_v36 = vpack.c.bf16 %v994_v33, %v991_v29  ;;  %v1039_v44 = vmul.f32 %v994_v33, %v994_v33 }
 0x13b   :  { %v1193_v38 = vpack.c.bf16 %v986_v35, %v983_v31  ;;  %v1024_v39 = vadd.f32 %v986_v35, %v983_v31  ;;  %v1037_v40 = vmul.f32 %v986_v35, %v986_v35 }
 0x13c   :  { %1200 = vst [vmem:[%s1775_s3 + $0x8] sm:$0xff] %v1198_v36  }
 0x13d   :  { %1194 = vst [vmem:[%s1775_s3] sm:$0xff] %v1193_v38   ;;  %v1025_v42 = vadd.f32 %v1024_v39, %v991_v29  ;;  %v1040_v43 = vadd.f32 %v1037_v40, %v1036_v37 }
 0x13f   :  { %v1026_v45 = vadd.f32 %v1025_v42, %v994_v33  ;;  %v1041_v46 = vadd.f32 %v1040_v43, %v1038_v41 }
 0x141   :  { %v1027_v47 = vrot.slane %v1026_v45, 4  ;;  %v1042_v48 = vadd.f32 %v1041_v46, %v1039_v44 }
 0x143   :  { %v1028_v49 = vadd.f32 %v1027_v47, %v1026_v45  ;;  %v1043_v50 = vrot.slane %v1042_v48, 4 }
 0x145   :  { %v1029_v51 = vrot.slane %v1028_v49, 2  ;;  %v1044_v52 = vadd.f32 %v1043_v50, %v1042_v48 }
 0x147   :  { %v1030_v53 = vadd.f32 %v1029_v51, %v1028_v49  ;;  %v1045_v54 = vrot.slane %v1044_v52, 2 }
 0x149   :  { %v1031_v55 = vrot.slane %v1030_v53, 1  ;;  %v1046_v56 = vadd.f32 %v1045_v54, %v1044_v52 }
 0x14b   :  { %v1032_v58 = vadd.f32 %v1031_v55, %v1030_v53  ;;  %v1047_v59 = vrot.slane %v1046_v56, 1 }
 0x14d   :  { %v1033_v61 = vadd.f32 %v1032_v58, %v1023_v57  ;;  %v1048_v62 = vadd.f32 %v1047_v59, %v1046_v56 }
 0x14f   :  { %1034 = vst [vmem:[%s1772_s4] sm:$0x1] %v1033_v61  ;;  %v1049_v63 = vadd.f32 %v1048_v62, %v1035_v60 }
 0x151   :  { %1050 = vst [vmem:[%s1773_s5] sm:$0x1] %v1049_v63 }

// kernel: discriminator_forward.30
= control target key start
LH: loop header
LB: loop body
LE: loop exit
PB: predicated region body
PF: predicated region fallthrough
CT: control target
= control target key end

     0   :  { %v88_v8 = vlaneseq  ;;  %s287_s1 = inlined_call_operand.vmem [shape: f32[1,1,256], index: 1, kind: input, shape index: {}]   ;;  %s288_s2 = inlined_call_operand.vmem [shape: f32[1,1,256], index: 2, kind: input, shape index: {}]   ;;  %s289_s0 = inlined_call_operand.vmem [shape: bf16[32,256], index: 0, kind: input, shape index: {}]   ;;  %s290_s3 = inlined_call_operand.vmem [shape: f32[1,256], index: 3, kind: input, shape index: {}]   ;;  %s291_s4 = inlined_call_operand.vmem [shape: f32[1,256], index: 4, kind: input, shape index: {}]   ;;  %s292_s5 = inlined_call_operand.vmem [shape: bf16[32,256], index: 5, kind: output, shape index: {}]  }
   0x1   :  { %v61_v0 = vld [vmem:[%s287_s1] sm:$0x3]  ;;  %v76_v12 = vld [vmem:[%s289_s0 + $0x8] sm:$0xff]  ;;  %v77_v15 = vld [vmem:[%s289_s0 + $0x10] sm:$0xff] }
   0x2   :  { %v63_v1 = vld [vmem:[%s288_s2] sm:$0x3]  ;;  %v62_v2 = vmul.f32 0.03125, %v61_v0  ;;  %v89_v9 = vshrl.u32 %v88_v8, 7  ;;  %v78_v16 = vld [vmem:[%s289_s0 + $0x18] sm:$0xff]  ;;  %v81_v21 = vunpack.c.l.bf16 %v76_v12  ;;  %v82_v23 = vunpack.c.h.bf16 %v76_v12 }
   0x3   :  { %v64_v3 = vmul.f32 0.03125, %v63_v1  ;;  %v70_v10 = vld [vmem:[%s290_s3] sm:$0x3]  ;;  %v83_v24 = vunpack.c.l.bf16 %v77_v15  ;;  %v84_v25 = vunpack.c.h.bf16 %v77_v15  ;;  %v85_v26 = vunpack.c.l.bf16 %v78_v16 }
   0x4   :  { %v65_v4 = vmul.f32 %v62_v2, %v62_v2  ;;  %v75_v11 = vld [vmem:[%s289_s0] sm:$0xff]  ;;  %v90_v13 = vsub.s32 0, %v89_v9  ;;  %v94_v14 = vsub.s32 1, %v89_v9  ;;  %v86_v30 = vunpack.c.h.bf16 %v78_v16 }
   0x5   :  { %v79_v19 = vunpack.c.l.bf16 %v75_v11  ;;  %v80_v20 = vunpack.c.h.bf16 %v75_v11  ;;  %v72_v22 = vld [vmem:[%s291_s4] sm:$0x3] }
   0x6   :  { %v66_v5 = vsub.f32 %v64_v3, %v65_v4 }
   0x8   :  { %v67_v6 = vmax.f32 %v66_v5, 0.0 }
   0xa   :  { %v68_v7 = vadd.f32 1e-05, %v67_v6 }
   0xc   :  { %219 = vrsqrt.f32 %v68_v7 }
  0x16   :  { %v220_v17 = vpop.eup %219 }
  0x17   :  { %v71_v18 = vmul.f32 %v220_v17, %v70_v10 }
  0x19   :  { %v73_v27 = vmul.f32 %v71_v18, %v62_v2  ;;  %v91_v28 = vrot.slane %v71_v18, %v90_v13  ;;  %v95_v29 = vrot.slane %v71_v18, %v94_v14 }
  0x1b   :  { %v74_v31 = vsub.f32 %v72_v22, %v73_v27  ;;  %v98_v32 = vmul.f32 %v91_v28, %v79_v19  ;;  %v99_v33 = vmul.f32 %v95_v29, %v80_v20  ;;  %v100_v34 = vmul.f32 %v91_v28, %v81_v21 }
  0x1c   :  { %v101_v35 = vmul.f32 %v95_v29, %v82_v23  ;;  %v102_v36 = vmul.f32 %v91_v28, %v83_v24  ;;  %v103_v37 = vmul.f32 %v95_v29, %v84_v25  ;;  %v104_v38 = vmul.f32 %v91_v28, %v85_v26 }
  0x1d   :  { %v110_v39 = vrot.slane %v74_v31, %v90_v13  ;;  %v114_v40 = vrot.slane %v74_v31, %v94_v14  ;;  %v105_v41 = vmul.f32 %v95_v29, %v86_v30 }
  0x1f   :  { %v117_v42 = vadd.f32 %v110_v39, %v98_v32  ;;  %v118_v43 = vadd.f32 %v114_v40, %v99_v33  ;;  %v119_v44 = vadd.f32 %v110_v39, %v100_v34  ;;  %v120_v45 = vadd.f32 %v114_v40, %v101_v35 }
  0x20   :  { %v121_v46 = vadd.f32 %v110_v39, %v102_v36  ;;  %v122_v47 = vadd.f32 %v114_v40, %v103_v37  ;;  %v123_v48 = vadd.f32 %v110_v39, %v104_v38  ;;  %v124_v49 = vadd.f32 %v114_v40, %v105_v41 }
  0x21   :  { %vm125_vm0 = vcmp.ge.f32.partialorder %v117_v42, 0.0  ;;  %vm126_vm1 = vcmp.ge.f32.partialorder %v118_v43, 0.0  ;;  %v133_v50 = vmul.f32 0.2, %v117_v42  ;;  %v134_v51 = vmul.f32 0.2, %v118_v43 }
  0x22   :  { %vm127_vm2 = vcmp.ge.f32.partialorder %v119_v44, 0.0  ;;  %vm128_vm3 = vcmp.ge.f32.partialorder %v120_v45, 0.0  ;;  %v135_v52 = vmul.f32 0.2, %v119_v44  ;;  %v136_v53 = vmul.f32 0.2, %v120_v45 }
  0x23   :  { %v141_v54 = vsel %vm125_vm0, %v117_v42, %v133_v50  ;;  %v142_v55 = vsel %vm126_vm1, %v118_v43, %v134_v51  ;;  %vm129_vm4 = vcmp.ge.f32.partialorder %v121_v46, 0.0  ;;  %vm130_vm5 = vcmp.ge.f32.partialorder %v122_v47, 0.0 }
  0x24   :  { %v215_v56 = vpack.c.bf16 %v142_v55, %v141_v54  ;;  %v143_v57 = vsel %vm127_vm2, %v119_v44, %v135_v52  ;;  %v144_v58 = vsel %vm128_vm3, %v120_v45, %v136_v53  ;;  %v137_v59 = vmul.f32 0.2, %v121_v46 }
  0x25   :  { %v216_v60 = vpack.c.bf16 %v144_v58, %v143_v57  ;;  %v138_v61 = vmul.f32 0.2, %v122_v47  ;;  %vm131_vm6 = vcmp.ge.f32.partialorder %v123_v48, 0.0  ;;  %vm132_vm7 = vcmp.ge.f32.partialorder %v124_v49, 0.0 }
  0x26   :  { %173 = vst [vmem:[%s292_s5] sm:$0xff] %v215_v56  ;;  %v145_v62 = vsel %vm129_vm4, %v121_v46, %v137_v59  ;;  %v139_v63 = vmul.f32 0.2, %v123_v48  ;;  %v140_v0 = vmul.f32 0.2, %v124_v49 }
  0x27   :  { %174 = vst [vmem:[%s292_s5 + $0x8] sm:$0xff] %v216_v60  ;;  %v146_v1 = vsel %vm130_vm5, %v122_v47, %v138_v61 }
  0x28   :  { %v217_v2 = vpack.c.bf16 %v146_v1, %v145_v62  ;;  %v147_v3 = vsel %vm131_vm6, %v123_v48, %v139_v63  ;;  %v148_v4 = vsel %vm132_vm7, %v124_v49, %v140_v0 }
  0x29   :  { %v218_v5 = vpack.c.bf16 %v148_v4, %v147_v3 }
  0x2a   :  { %175 = vst [vmem:[%s292_s5 + $0x10] sm:$0xff] %v217_v2 }
  0x2b   :  { %176 = vst [vmem:[%s292_s5 + $0x18] sm:$0xff] %v218_v5 }

// kernel: discriminator_forward.29
= control target key start
LH: loop header
LB: loop body
LE: loop exit
PB: predicated region body
PF: predicated region fallthrough
CT: control target
= control target key end

     0   :  { %s2522_s1 = inlined_call_operand.vmem [shape: bf16[1152,256], index: 1, kind: input, shape index: {}]   ;;  %s2523_s0 = inlined_call_operand.vmem [shape: bf16[32,1152], index: 0, kind: input, shape index: {}]   ;;  %s2524_s5 = inlined_call_operand.vmem [shape: f32[1,1,256], index: 5, kind: output, shape index: {2}]   ;;  %s2525_s4 = inlined_call_operand.vmem [shape: f32[1,1,256], index: 4, kind: output, shape index: {1}]   ;;  %s2526_s2 = inlined_call_operand.vmem [shape: f32[1,256], index: 2, kind: input, shape index: {}]   ;;  %s2527_s3 = inlined_call_operand.vmem [shape: bf16[32,256], index: 3, kind: output, shape index: {0}]  }
   0x1   :  { %v1711_v0 = vld [vmem:[%s2522_s1 + $0x4] ss:$8 sps:$4 sm:$0xff]   ;;  %v1715_v2 = vld [vmem:[%s2522_s1] ss:$8 sps:$4 sm:$0xff]   ;;  %v1717_v4 = vld [vmem:[%s2522_s1 + $0x14] ss:$8 sps:$4 sm:$0xff]  }
   0x2   :  { %v1713_v1 = vld [vmem:[%s2522_s1 + $0x204] ss:$8 sps:$4 sm:$0xff]   ;;  %1047 = vmatprep.subr.bf16.mxu1 %v1711_v0  ;;  %v1716_v3 = vld [vmem:[%s2522_s1 + $0x200] ss:$8 sps:$4 sm:$0xff]   ;;  %v1719_v5 = vld [vmem:[%s2522_s1 + $0x214] ss:$8 sps:$4 sm:$0xff]  }
   0x3   :  { %1153 = vmatprep.subr.bf16.mxu0 %v1713_v1  ;;  %1048 = vmatpush1.bf16.msra.mxu1 %v1715_v2  ;;  %v1721_v6 = vld [vmem:[%s2522_s1 + $0x10] ss:$8 sps:$4 sm:$0xff]   ;;  %v1723_v8 = vld [vmem:[%s2522_s1 + $0x24] ss:$8 sps:$4 sm:$0xff]   ;;  %v1727_v10 = vld [vmem:[%s2522_s1 + $0x20] ss:$8 sps:$4 sm:$0xff]  }
   0x4   :  { %1154 = vmatpush1.bf16.msra.mxu0 %v1716_v3  ;;  %1049 = vmatprep.subr.bf16.mxu1 %v1717_v4  ;;  %v1722_v7 = vld [vmem:[%s2522_s1 + $0x210] ss:$8 sps:$4 sm:$0xff]   ;;  %v1725_v9 = vld [vmem:[%s2522_s1 + $0x224] ss:$8 sps:$4 sm:$0xff]   ;;  %v1728_v11 = vld [vmem:[%s2522_s1 + $0x220] ss:$8 sps:$4 sm:$0xff]  }
   0x5   :  { %1155 = vmatprep.subr.bf16.mxu0 %v1719_v5  ;;  %v1729_v12 = vld [vmem:[%s2522_s1 + $0x34] ss:$8 sps:$4 sm:$0xff]   ;;  %v1733_v14 = vld [vmem:[%s2522_s1 + $0x30] ss:$8 sps:$4 sm:$0xff]   ;;  %v1735_v16 = vld [vmem:[%s2522_s1 + $0x44] ss:$8 sps:$4 sm:$0xff]  }
   0x6   :  { %v1731_v13 = vld [vmem:[%s2522_s1 + $0x234] ss:$8 sps:$4 sm:$0xff]   ;;  %v1734_v15 = vld [vmem:[%s2522_s1 + $0x230] ss:$8 sps:$4 sm:$0xff]   ;;  %v1737_v17 = vld [vmem:[%s2522_s1 + $0x244] ss:$8 sps:$4 sm:$0xff]  }
   0x7   :  { %1050 = vmatpush1.bf16.msra.mxu1 %v1721_v6  ;;  %v1739_v18 = vld [vmem:[%s2522_s1 + $0x40] ss:$8 sps:$4 sm:$0xff]   ;;  %v1741_v20 = vld [vmem:[%s2522_s1 + $0x54] ss:$8 sps:$4 sm:$0xff]   ;;  %v1745_v22 = vld [vmem:[%s2522_s1 + $0x50] ss:$8 sps:$4 sm:$0xff]  }
   0x8   :  { %1156 = vmatpush1.bf16.msra.mxu0 %v1722_v7  ;;  %1051 = vmatprep.subr.bf16.mxu1 %v1723_v8  ;;  %v1740_v19 = vld [vmem:[%s2522_s1 + $0x240] ss:$8 sps:$4 sm:$0xff]   ;;  %v1743_v21 = vld [vmem:[%s2522_s1 + $0x254] ss:$8 sps:$4 sm:$0xff]   ;;  %v1746_v23 = vld [vmem:[%s2522_s1 + $0x250] ss:$8 sps:$4 sm:$0xff]  }
   0x9   :  { %1157 = vmatprep.subr.bf16.mxu0 %v1725_v9  ;;  %v1747_v24 = vld [vmem:[%s2522_s1 + $0x64] ss:$8 sps:$4 sm:$0xff]   ;;  %v1751_v26 = vld [vmem:[%s2522_s1 + $0x60] ss:$8 sps:$4 sm:$0xff]   ;;  %v1753_v28 = vld [vmem:[%s2522_s1 + $0x74] ss:$8 sps:$4 sm:$0xff]  }
   0xa   :  { %v1749_v25 = vld [vmem:[%s2522_s1 + $0x264] ss:$8 sps:$4 sm:$0xff]   ;;  %v1752_v27 = vld [vmem:[%s2522_s1 + $0x260] ss:$8 sps:$4 sm:$0xff]   ;;  %v1755_v29 = vld [vmem:[%s2522_s1 + $0x274] ss:$8 sps:$4 sm:$0xff]  }
   0xb   :  { %1052 = vmatpush1.bf16.msra.mxu1 %v1727_v10  ;;  %v1757_v30 = vld [vmem:[%s2522_s1 + $0x70] ss:$8 sps:$4 sm:$0xff]   ;;  %v1759_v32 = vld [vmem:[%s2522_s1 + $0x84] ss:$8 sps:$4 sm:$0xff]   ;;  %v1763_v34 = vld [vmem:[%s2522_s1 + $0x80] ss:$8 sps:$4 sm:$0xff]  }
   0xc   :  { %1158 = vmatpush1.bf16.msra.mxu0 %v1728_v11  ;;  %1053 = vmatprep.subr.bf16.mxu1 %v1729_v12  ;;  %v1758_v31 = vld [vmem:[%s2522_s1 + $0x270] ss:$8 sps:$4 sm:$0xff]   ;;  %v1761_v33 = vld [vmem:[%s2522_s1 + $0x284] ss:$8 sps:$4 sm:$0xff]   ;;  %v1764_v35 = vld [vmem:[%s2522_s1 + $0x280] ss:$8 sps:$4 sm:$0xff]  }
   0xd   :  { %1159 = vmatprep.subr.bf16.mxu0 %v1731_v13  ;;  %v1765_v36 = vld [vmem:[%s2522_s1 + $0x94] ss:$8 sps:$4 sm:$0xff]   ;;  %v1769_v38 = vld [vmem:[%s2522_s1 + $0x90] ss:$8 sps:$4 sm:$0xff]   ;;  %v1771_v40 = vld [vmem:[%s2522_s1 + $0xa4] ss:$8 sps:$4 sm:$0xff]  }
   0xe   :  { %v1767_v37 = vld [vmem:[%s2522_s1 + $0x294] ss:$8 sps:$4 sm:$0xff]   ;;  %v1770_v39 = vld [vmem:[%s2522_s1 + $0x290] ss:$8 sps:$4 sm:$0xff]   ;;  %v1773_v41 = vld [vmem:[%s2522_s1 + $0x2a4] ss:$8 sps:$4 sm:$0xff]  }
   0xf   :  { %1054 = vmatpush1.bf16.msra.mxu1 %v1733_v14  ;;  %v1775_v42 = vld [vmem:[%s2522_s1 + $0xa0] ss:$8 sps:$4 sm:$0xff]   ;;  %v1777_v44 = vld [vmem:[%s2522_s1 + $0xb4] ss:$8 sps:$4 sm:$0xff]   ;;  %v1781_v46 = vld [vmem:[%s2522_s1 + $0xb0] ss:$8 sps:$4 sm:$0xff]  }
  0x10   :  { %1160 = vmatpush1.bf16.msra.mxu0 %v1734_v15  ;;  %1055 = vmatprep.subr.bf16.mxu1 %v1735_v16  ;;  %v1776_v43 = vld [vmem:[%s2522_s1 + $0x2a0] ss:$8 sps:$4 sm:$0xff]   ;;  %v1779_v45 = vld [vmem:[%s2522_s1 + $0x2b4] ss:$8 sps:$4 sm:$0xff]   ;;  %v1782_v47 = vld [vmem:[%s2522_s1 + $0x2b0] ss:$8 sps:$4 sm:$0xff]  }
  0x11   :  { %1161 = vmatprep.subr.bf16.mxu0 %v1737_v17  ;;  %v1809_v48 = vld [vmem:[%s2523_s0 + $0x4] ss:$36 sps:$4 sm:$0xff]   ;;  %v1815_v51 = vld [vmem:[%s2523_s0 + $0x14] ss:$36 sps:$4 sm:$0xff]  }
  0x12   :  { %v1783_v49 = vld [vmem:[%s2522_s1 + $0xc4] ss:$8 sps:$4 sm:$0xff]   ;;  %1079 = vmatprep.mubr.bf16.mxu1 %v1809_v48  ;;  %v1787_v52 = vld [vmem:[%s2522_s1 + $0xc0] ss:$8 sps:$4 sm:$0xff]   ;;  %v1789_v54 = vld [vmem:[%s2522_s1 + $0xd4] ss:$8 sps:$4 sm:$0xff]   ;;  %1185 = vmatprep.mubr.bf16.mxu0 %v1815_v51 }
  0x13   :  { %1056 = vmatpush1.bf16.msra.mxu1 %v1739_v18  ;;  %v1785_v50 = vld [vmem:[%s2522_s1 + $0x2c4] ss:$8 sps:$4 sm:$0xff]   ;;  %v1788_v53 = vld [vmem:[%s2522_s1 + $0x2c0] ss:$8 sps:$4 sm:$0xff]   ;;  %v1791_v55 = vld [vmem:[%s2522_s1 + $0x2d4] ss:$8 sps:$4 sm:$0xff]  }
  0x14   :  { %1162 = vmatpush1.bf16.msra.mxu0 %v1740_v19  ;;  %1057 = vmatprep.subr.bf16.mxu1 %v1741_v20  ;;  %v1793_v56 = vld [vmem:[%s2522_s1 + $0xd0] ss:$8 sps:$4 sm:$0xff]   ;;  %v1795_v58 = vld [vmem:[%s2522_s1 + $0xe4] ss:$8 sps:$4 sm:$0xff]   ;;  %v1799_v60 = vld [vmem:[%s2522_s1 + $0xe0] ss:$8 sps:$4 sm:$0xff]  }
  0x15   :  { %1163 = vmatprep.subr.bf16.mxu0 %v1743_v21  ;;  %v1794_v57 = vld [vmem:[%s2522_s1 + $0x2d0] ss:$8 sps:$4 sm:$0xff]   ;;  %v1797_v59 = vld [vmem:[%s2522_s1 + $0x2e4] ss:$8 sps:$4 sm:$0xff]   ;;  %v1800_v61 = vld [vmem:[%s2522_s1 + $0x2e0] ss:$8 sps:$4 sm:$0xff]  }
  0x16   :  { %v1801_v62 = vld [vmem:[%s2522_s1 + $0xf4] ss:$8 sps:$4 sm:$0xff]   ;;  %v1805_v0 = vld [vmem:[%s2522_s1 + $0xf0] ss:$8 sps:$4 sm:$0xff]   ;;  %v1812_v2 = vld [vmem:[%s2522_s1 + $0x104] ss:$8 sps:$4 sm:$0xff]  }
  0x17   :  { %1058 = vmatpush1.bf16.msra.mxu1 %v1745_v22  ;;  %v1803_v63 = vld [vmem:[%s2522_s1 + $0x2f4] ss:$8 sps:$4 sm:$0xff]   ;;  %v1806_v1 = vld [vmem:[%s2522_s1 + $0x2f0] ss:$8 sps:$4 sm:$0xff]   ;;  %v1818_v3 = vld [vmem:[%s2522_s1 + $0x304] ss:$8 sps:$4 sm:$0xff]  }
  0x18   :  { %1164 = vmatpush1.bf16.msra.mxu0 %v1746_v23  ;;  %1059 = vmatprep.subr.bf16.mxu1 %v1747_v24  ;;  %v1807_v4 = vld [vmem:[%s2523_s0] ss:$36 sps:$4 sm:$0xff]   ;;  %v1813_v6 = vld [vmem:[%s2523_s0 + $0x10] ss:$36 sps:$4 sm:$0xff]  }
  0x19   :  { %1165 = vmatprep.subr.bf16.mxu0 %v1749_v25  ;;  %v1810_v5 = vld [vmem:[%s2522_s1 + $0x100] ss:$8 sps:$4 sm:$0xff]   ;;  %v1821_v8 = vld [vmem:[%s2522_s1 + $0x114] ss:$8 sps:$4 sm:$0xff]   ;;  %v1819_v10 = vld [vmem:[%s2522_s1 + $0x110] ss:$8 sps:$4 sm:$0xff]  }
  0x1a   :  { %v1816_v7 = vld [vmem:[%s2522_s1 + $0x300] ss:$8 sps:$4 sm:$0xff]   ;;  %v1824_v9 = vld [vmem:[%s2522_s1 + $0x314] ss:$8 sps:$4 sm:$0xff]   ;;  %v1822_v11 = vld [vmem:[%s2522_s1 + $0x310] ss:$8 sps:$4 sm:$0xff]  }
  0x1b   :  { %1060 = vmatpush1.bf16.msra.mxu1 %v1751_v26  ;;  %v1827_v12 = vld [vmem:[%s2522_s1 + $0x124] ss:$8 sps:$4 sm:$0xff]   ;;  %v1825_v14 = vld [vmem:[%s2522_s1 + $0x120] ss:$8 sps:$4 sm:$0xff]   ;;  %v1833_v16 = vld [vmem:[%s2522_s1 + $0x134] ss:$8 sps:$4 sm:$0xff]  }
  0x1c   :  { %1166 = vmatpush1.bf16.msra.mxu0 %v1752_v27  ;;  %1061 = vmatprep.subr.bf16.mxu1 %v1753_v28  ;;  %v1830_v13 = vld [vmem:[%s2522_s1 + $0x324] ss:$8 sps:$4 sm:$0xff]   ;;  %v1828_v15 = vld [vmem:[%s2522_s1 + $0x320] ss:$8 sps:$4 sm:$0xff]   ;;  %v1836_v17 = vld [vmem:[%s2522_s1 + $0x334] ss:$8 sps:$4 sm:$0xff]  }
  0x1d   :  { %1167 = vmatprep.subr.bf16.mxu0 %v1755_v29  ;;  %v1831_v18 = vld [vmem:[%s2522_s1 + $0x130] ss:$8 sps:$4 sm:$0xff]   ;;  %v1839_v20 = vld [vmem:[%s2522_s1 + $0x144] ss:$8 sps:$4 sm:$0xff]   ;;  %v1837_v22 = vld [vmem:[%s2522_s1 + $0x140] ss:$8 sps:$4 sm:$0xff]  }
  0x1e   :  { %v1834_v19 = vld [vmem:[%s2522_s1 + $0x330] ss:$8 sps:$4 sm:$0xff]   ;;  %v1842_v21 = vld [vmem:[%s2522_s1 + $0x344] ss:$8 sps:$4 sm:$0xff]   ;;  %v1840_v23 = vld [vmem:[%s2522_s1 + $0x340] ss:$8 sps:$4 sm:$0xff]  }
  0x1f   :  { %1062 = vmatpush1.bf16.msra.mxu1 %v1757_v30  ;;  %v1845_v24 = vld [vmem:[%s2522_s1 + $0x154] ss:$8 sps:$4 sm:$0xff]   ;;  %v1843_v26 = vld [vmem:[%s2522_s1 + $0x150] ss:$8 sps:$4 sm:$0xff]   ;;  %v1851_v28 = vld [vmem:[%s2522_s1 + $0x164] ss:$8 sps:$4 sm:$0xff]  }
  0x20   :  { %1168 = vmatpush1.bf16.msra.mxu0 %v1758_v31  ;;  %1063 = vmatprep.subr.bf16.mxu1 %v1759_v32  ;;  %v1848_v25 = vld [vmem:[%s2522_s1 + $0x354] ss:$8 sps:$4 sm:$0xff]   ;;  %v1846_v27 = vld [vmem:[%s2522_s1 + $0x350] ss:$8 sps:$4 sm:$0xff]   ;;  %v1901_v31 = vld [vmem:[%s2523_s0 + $0x48] ss:$36 sps:$4 sm:$0xff]  }
  0x21   :  { %1169 = vmatprep.subr.bf16.mxu0 %v1761_v33  ;;  %v1897_v29 = vld [vmem:[%s2523_s0 + $0x4c] ss:$36 sps:$4 sm:$0xff]   ;;  %v1899_v30 = vld [vmem:[%s2523_s0 + $0x5c] ss:$36 sps:$4 sm:$0xff]  }
  0x22   :  { %v1854_v32 = vld [vmem:[%s2522_s1 + $0x364] ss:$8 sps:$4 sm:$0xff]   ;;  %v1905_v33 = vld [vmem:[%s2523_s0 + $0x58] ss:$36 sps:$4 sm:$0xff]  }
  0x23   :  { %1064 = vmatpush1.bf16.msra.mxu1 %v1763_v34  ;;  %v1849_v34 = vld [vmem:[%s2522_s1 + $0x160] ss:$8 sps:$4 sm:$0xff]   ;;  %v1867_v48 = vld [vmem:[%s2522_s1 + $0x190] ss:$8 sps:$4 sm:$0xff]   ;;  %v1878_v51 = vld [vmem:[%s2522_s1 + $0x3a4] ss:$8 sps:$4 sm:$0xff]  }
  0x24   :  { %1170 = vmatpush1.bf16.msra.mxu0 %v1764_v35  ;;  %1065 = vmatprep.subr.bf16.mxu1 %v1765_v36  ;;  %v1852_v35 = vld [vmem:[%s2522_s1 + $0x360] ss:$8 sps:$4 sm:$0xff]   ;;  %v1857_v36 = vld [vmem:[%s2522_s1 + $0x174] ss:$8 sps:$4 sm:$0xff]  }
  0x25   :  { %1171 = vmatprep.subr.bf16.mxu0 %v1767_v37  ;;  %v1860_v37 = vld [vmem:[%s2522_s1 + $0x374] ss:$8 sps:$4 sm:$0xff]  }
  0x27   :  { %1066 = vmatpush1.bf16.msra.mxu1 %v1769_v38  ;;  %v1855_v38 = vld [vmem:[%s2522_s1 + $0x170] ss:$8 sps:$4 sm:$0xff]  }
  0x28   :  { %1172 = vmatpush1.bf16.msra.mxu0 %v1770_v39  ;;  %1067 = vmatprep.subr.bf16.mxu1 %v1771_v40  ;;  %v1858_v39 = vld [vmem:[%s2522_s1 + $0x370] ss:$8 sps:$4 sm:$0xff]   ;;  %v1863_v40 = vld [vmem:[%s2522_s1 + $0x184] ss:$8 sps:$4 sm:$0xff]  }
  0x29   :  { %1173 = vmatprep.subr.bf16.mxu0 %v1773_v41  ;;  %v1917_v41 = vld [vmem:[%s2523_s0 + $0xc] ss:$36 sps:$4 sm:$0xff]  }
  0x2b   :  { %1068 = vmatpush1.bf16.msra.mxu1 %v1775_v42  ;;  %v1866_v42 = vld [vmem:[%s2522_s1 + $0x384] ss:$8 sps:$4 sm:$0xff]  }
  0x2c   :  { %1174 = vmatpush1.bf16.msra.mxu0 %v1776_v43  ;;  %1069 = vmatprep.subr.bf16.mxu1 %v1777_v44  ;;  %v1920_v43 = vld [vmem:[%s2523_s0 + $0x1c] ss:$36 sps:$4 sm:$0xff]  }
  0x2d   :  { %1175 = vmatprep.subr.bf16.mxu0 %v1779_v45  ;;  %v1861_v44 = vld [vmem:[%s2522_s1 + $0x180] ss:$8 sps:$4 sm:$0xff]  }
  0x2e   :  { %v1864_v45 = vld [vmem:[%s2522_s1 + $0x380] ss:$8 sps:$4 sm:$0xff]  }
  0x2f   :  { %1070 = vmatpush1.bf16.msra.mxu1 %v1781_v46  ;;  %v1869_v46 = vld [vmem:[%s2522_s1 + $0x194] ss:$8 sps:$4 sm:$0xff]  }
  0x30   :  { %1176 = vmatpush1.bf16.msra.mxu0 %v1782_v47  ;;  %1071 = vmatprep.subr.bf16.mxu1 %v1783_v49  ;;  %v1872_v47 = vld [vmem:[%s2522_s1 + $0x394] ss:$8 sps:$4 sm:$0xff]   ;;  %v1870_v49 = vld [vmem:[%s2522_s1 + $0x390] ss:$8 sps:$4 sm:$0xff]  }
  0x31   :  { %1177 = vmatprep.subr.bf16.mxu0 %v1785_v50  ;;  %v1875_v50 = vld [vmem:[%s2522_s1 + $0x1a4] ss:$8 sps:$4 sm:$0xff]  }
  0x33   :  { %1072 = vmatpush1.bf16.msra.mxu1 %v1787_v52  ;;  %v1873_v52 = vld [vmem:[%s2522_s1 + $0x1a0] ss:$8 sps:$4 sm:$0xff]  }
  0x34   :  { %1178 = vmatpush1.bf16.msra.mxu0 %v1788_v53  ;;  %1073 = vmatprep.subr.bf16.mxu1 %v1789_v54  ;;  %v1876_v53 = vld [vmem:[%s2522_s1 + $0x3a0] ss:$8 sps:$4 sm:$0xff]   ;;  %v1881_v54 = vld [vmem:[%s2522_s1 + $0x1b4] ss:$8 sps:$4 sm:$0xff]  }
  0x35   :  { %1179 = vmatprep.subr.bf16.mxu0 %v1791_v55  ;;  %v1884_v55 = vld [vmem:[%s2522_s1 + $0x3b4] ss:$8 sps:$4 sm:$0xff]  }
  0x37   :  { %1074 = vmatpush1.bf16.msra.mxu1 %v1793_v56  ;;  %v1879_v56 = vld [vmem:[%s2522_s1 + $0x1b0] ss:$8 sps:$4 sm:$0xff]  }
  0x38   :  { %1180 = vmatpush1.bf16.msra.mxu0 %v1794_v57  ;;  %1075 = vmatprep.subr.bf16.mxu1 %v1795_v58  ;;  %v1882_v57 = vld [vmem:[%s2522_s1 + $0x3b0] ss:$8 sps:$4 sm:$0xff]   ;;  %v1887_v58 = vld [vmem:[%s2522_s1 + $0x1c4] ss:$8 sps:$4 sm:$0xff]  }
  0x39   :  { %1181 = vmatprep.subr.bf16.mxu0 %v1797_v59  ;;  %v1890_v59 = vld [vmem:[%s2522_s1 + $0x3c4] ss:$8 sps:$4 sm:$0xff]  }
  0x3b   :  { %1076 = vmatpush1.bf16.msra.mxu1 %v1799_v60  ;;  %v1885_v60 = vld [vmem:[%s2522_s1 + $0x1c0] ss:$8 sps:$4 sm:$0xff]  }
  0x3c   :  { %1182 = vmatpush1.bf16.msra.mxu0 %v1800_v61  ;;  %1077 = vmatprep.subr.bf16.mxu1 %v1801_v62  ;;  %v1888_v61 = vld [vmem:[%s2522_s1 + $0x3c0] ss:$8 sps:$4 sm:$0xff]   ;;  %v1893_v62 = vld [vmem:[%s2522_s1 + $0x1d4] ss:$8 sps:$4 sm:$0xff]  }
  0x3d   :  { %1183 = vmatprep.subr.bf16.mxu0 %v1803_v63  ;;  %v1896_v63 = vld [vmem:[%s2522_s1 + $0x3d4] ss:$8 sps:$4 sm:$0xff]  }
  0x3f   :  { %1078 = vmatpush1.bf16.msra.mxu1 %v1805_v0  ;;  %v1891_v0 = vld [vmem:[%s2522_s1 + $0x1d0] ss:$8 sps:$4 sm:$0xff]  }
  0x40   :  { %1184 = vmatpush1.bf16.msra.mxu0 %v1806_v1  ;;  %1100 = vmatprep.subr.bf16.mxu1 %v1812_v2  ;;  %v1894_v1 = vld [vmem:[%s2522_s1 + $0x3d0] ss:$8 sps:$4 sm:$0xff]   ;;  %v1904_v2 = vld [vmem:[%s2522_s1 + $0x1e4] ss:$8 sps:$4 sm:$0xff]  }
  0x41   :  { %1206 = vmatprep.subr.bf16.mxu0 %v1818_v3  ;;  %v1908_v3 = vld [vmem:[%s2522_s1 + $0x3e4] ss:$8 sps:$4 sm:$0xff]  }
  0x42   :  { %1080 = vmatmul.mubr.bf16.vlgmr.msra.gmra.mrb[0].mxu1 %v1807_v4  ;;  %v1902_v4 = vld [vmem:[%s2522_s1 + $0x1e0] ss:$8 sps:$4 sm:$0xff]  }
  0x43   :  { %1186 = vmatmul.mubr.bf16.vlgmr.msra.gmra.mrb[0].mxu0 %v1813_v6  ;;  %1101 = vmatpush1.bf16.msra.mxu1 %v1810_v5  ;;  %v1906_v5 = vld [vmem:[%s2522_s1 + $0x3e0] ss:$8 sps:$4 sm:$0xff]   ;;  %v1911_v6 = vld [vmem:[%s2522_s1 + $0x1f4] ss:$8 sps:$4 sm:$0xff]  }
  0x44   :  { %1207 = vmatpush1.bf16.msra.mxu0 %v1816_v7  ;;  %1102 = vmatprep.subr.bf16.mxu1 %v1821_v8  ;;  %v1914_v7 = vld [vmem:[%s2522_s1 + $0x3f4] ss:$8 sps:$4 sm:$0xff]   ;;  %v1909_v8 = vld [vmem:[%s2522_s1 + $0x1f0] ss:$8 sps:$4 sm:$0xff]  }
  0x45   :  { %1208 = vmatprep.subr.bf16.mxu0 %v1824_v9  ;;  %1089 = vmatprep.mubr.bf16.mxu1 %v1897_v29  ;;  %v1912_v9 = vld [vmem:[%s2522_s1 + $0x3f0] ss:$8 sps:$4 sm:$0xff]   ;;  %v1947_v29 = vld [vmem:[%s2522_s1 + $0x464] ss:$8 sps:$4 sm:$0xff]  }
  0x46   :  { %1195 = vmatprep.mubr.bf16.mxu0 %v1899_v30  ;;  %v1945_v30 = vld [vmem:[%s2522_s1 + $0x460] ss:$8 sps:$4 sm:$0xff]  }
  0x47   :  { %1103 = vmatpush1.bf16.msra.mxu1 %v1819_v10  ;;  %v1923_v10 = vld [vmem:[%s2522_s1 + $0x404] ss:$8 sps:$4 sm:$0xff]  }
  0x48   :  { %1209 = vmatpush1.bf16.msra.mxu0 %v1822_v11  ;;  %1104 = vmatprep.subr.bf16.mxu1 %v1827_v12  ;;  %v1915_v11 = vld [vmem:[%s2523_s0 + $0x8] ss:$36 sps:$4 sm:$0xff]   ;;  %v1918_v12 = vld [vmem:[%s2523_s0 + $0x18] ss:$36 sps:$4 sm:$0xff]  }
  0x49   :  { %1210 = vmatprep.subr.bf16.mxu0 %v1830_v13  ;;  %v1921_v13 = vld [vmem:[%s2522_s1 + $0x400] ss:$8 sps:$4 sm:$0xff]  }
  0x4a   :  { %1090 = vmatmul.mubr.bf16.gmra.mrb[4].mxu1 %v1901_v31  ;;  %v1950_v31 = vld [vmem:[%s2522_s1 + $0x474] ss:$8 sps:$4 sm:$0xff]  }
  0x4b   :  { %1105 = vmatpush1.bf16.msra.mxu1 %v1825_v14  ;;  %1196 = vmatmul.mubr.bf16.gmra.mrb[4].mxu0 %v1905_v33  ;;  %v1926_v14 = vld [vmem:[%s2522_s1 + $0x414] ss:$8 sps:$4 sm:$0xff]   ;;  %v1951_v33 = vld [vmem:[%s2523_s0 + $0x20] ss:$36 sps:$4 sm:$0xff]  }
  0x4c   :  { %1211 = vmatpush1.bf16.msra.mxu0 %v1828_v15  ;;  %1106 = vmatprep.subr.bf16.mxu1 %v1833_v16  ;;  %v1927_v15 = vld [vmem:[%s2523_s0 + $0x54] ss:$36 sps:$4 sm:$0xff]   ;;  %v1929_v16 = vld [vmem:[%s2523_s0 + $0x64] ss:$36 sps:$4 sm:$0xff]  }
  0x4d   :  { %1212 = vmatprep.subr.bf16.mxu0 %v1836_v17  ;;  %1132 = vmatprep.mubr.bf16.mxu1 %v1917_v41  ;;  %v1924_v17 = vld [vmem:[%s2522_s1 + $0x410] ss:$8 sps:$4 sm:$0xff]  }
  0x4e   :  { %1238 = vmatprep.mubr.bf16.mxu0 %v1920_v43 }
  0x4f   :  { %1107 = vmatpush1.bf16.msra.mxu1 %v1831_v18  ;;  %v1935_v18 = vld [vmem:[%s2522_s1 + $0x424] ss:$8 sps:$4 sm:$0xff]  }
  0x50   :  { %1213 = vmatpush1.bf16.msra.mxu0 %v1834_v19  ;;  %1108 = vmatprep.subr.bf16.mxu1 %v1839_v20  ;;  %v1931_v19 = vld [vmem:[%s2523_s0 + $0x50] ss:$36 sps:$4 sm:$0xff]   ;;  %v1932_v20 = vld [vmem:[%s2523_s0 + $0x60] ss:$36 sps:$4 sm:$0xff]  }
  0x51   :  { %1214 = vmatprep.subr.bf16.mxu0 %v1842_v21  ;;  %v1933_v21 = vld [vmem:[%s2522_s1 + $0x420] ss:$8 sps:$4 sm:$0xff]  }
  0x53   :  { %1109 = vmatpush1.bf16.msra.mxu1 %v1837_v22  ;;  %v1938_v22 = vld [vmem:[%s2522_s1 + $0x434] ss:$8 sps:$4 sm:$0xff]  }
  0x54   :  { %1215 = vmatpush1.bf16.msra.mxu0 %v1840_v23  ;;  %1110 = vmatprep.subr.bf16.mxu1 %v1845_v24  ;;  %v1936_v23 = vld [vmem:[%s2522_s1 + $0x430] ss:$8 sps:$4 sm:$0xff]   ;;  %v1941_v24 = vld [vmem:[%s2522_s1 + $0x444] ss:$8 sps:$4 sm:$0xff]  }
  0x55   :  { %1216 = vmatprep.subr.bf16.mxu0 %v1848_v25  ;;  %v1953_v25 = vmov 0  }
  0x57   :  { %1111 = vmatpush1.bf16.msra.mxu1 %v1843_v26  ;;  %v1939_v26 = vld [vmem:[%s2522_s1 + $0x440] ss:$8 sps:$4 sm:$0xff]  }
  0x58   :  { %1217 = vmatpush1.bf16.msra.mxu0 %v1846_v27  ;;  %1112 = vmatprep.subr.bf16.mxu1 %v1851_v28  ;;  %v1944_v27 = vld [vmem:[%s2522_s1 + $0x454] ss:$8 sps:$4 sm:$0xff]   ;;  %v1942_v28 = vld [vmem:[%s2522_s1 + $0x450] ss:$8 sps:$4 sm:$0xff]  }
  0x59   :  { %1218 = vmatprep.subr.bf16.mxu0 %v1854_v32  ;;  %v1948_v32 = vld [vmem:[%s2522_s1 + $0x470] ss:$8 sps:$4 sm:$0xff]  }
  0x5b   :  { %1113 = vmatpush1.bf16.msra.mxu1 %v1849_v34  ;;  %v1952_v34 = vld [vmem:[%s2523_s0 + $0x68] ss:$36 sps:$4 sm:$0xff]  }
  0x5c   :  { %1219 = vmatpush1.bf16.msra.mxu0 %v1852_v35  ;;  %1114 = vmatprep.subr.bf16.mxu1 %v1857_v36  ;;  %v225_v35 = vlaneseq }
  0x5d   :  { %1220 = vmatprep.subr.bf16.mxu0 %v1860_v37  ;;  %v1954_v37 = vmov 0.0  }
  0x5e   :  { %vm2472_vm0 = vcmp.lt.s32.totalorder %v225_v35, 256 }
  0x5f   :  { %1115 = vmatpush1.bf16.msra.mxu1 %v1855_v38  ;;  %1349 = vst.msk [vmem:[%s2524_s5] sm:$0x3] %vm2472_vm0, %v1954_v37  ;;  %1348 = vst.msk [vmem:[%s2525_s4] sm:$0x3] %vm2472_vm0, %v1954_v37  ;;  %v2486_v38 = vshrl.u32 %v225_v35, 7 }
  0x60   :  { %1221 = vmatpush1.bf16.msra.mxu0 %v1858_v39  ;;  %1116 = vmatprep.subr.bf16.mxu1 %v1863_v40 }
  0x61   :  { %1222 = vmatprep.subr.bf16.mxu0 %v1866_v42  ;;  %v227_v42 = vsub.s32 0, %v2486_v38 }
  0x63   :  { %1117 = vmatpush1.bf16.msra.mxu1 %v1861_v44  ;;  %v223_v44 = vld [vmem:[%s2526_s2] sm:$0x3] }
  0x64   :  { %1223 = vmatpush1.bf16.msra.mxu0 %v1864_v45  ;;  %1118 = vmatprep.subr.bf16.mxu1 %v1869_v46  ;;  %v231_v45 = vsub.s32 1, %v2486_v38  ;;  %v228_v46 = vrot.slane %v223_v44, %v227_v42 }
  0x65   :  { %1224 = vmatprep.subr.bf16.mxu0 %v1872_v47 }
  0x66   :  { %v232_v47 = vrot.slane %v223_v44, %v231_v45 }
  0x67   :  { %1119 = vmatpush1.bf16.msra.mxu1 %v1867_v48 }
  0x68   :  { %1225 = vmatpush1.bf16.msra.mxu0 %v1870_v49  ;;  %1120 = vmatprep.subr.bf16.mxu1 %v1875_v50 }
  0x69   :  { %1226 = vmatprep.subr.bf16.mxu0 %v1878_v51 }
  0x6b   :  { %1121 = vmatpush1.bf16.msra.mxu1 %v1873_v52 }
  0x6c   :  { %1227 = vmatpush1.bf16.msra.mxu0 %v1876_v53  ;;  %1122 = vmatprep.subr.bf16.mxu1 %v1881_v54 }
  0x6d   :  { %1228 = vmatprep.subr.bf16.mxu0 %v1884_v55 }
  0x6f   :  { %1123 = vmatpush1.bf16.msra.mxu1 %v1879_v56 }
  0x70   :  { %1229 = vmatpush1.bf16.msra.mxu0 %v1882_v57  ;;  %1124 = vmatprep.subr.bf16.mxu1 %v1887_v58 }
  0x71   :  { %1230 = vmatprep.subr.bf16.mxu0 %v1890_v59 }
  0x73   :  { %1125 = vmatpush1.bf16.msra.mxu1 %v1885_v60 }
  0x74   :  { %1231 = vmatpush1.bf16.msra.mxu0 %v1888_v61  ;;  %1126 = vmatprep.subr.bf16.mxu1 %v1893_v62 }
  0x75   :  { %1232 = vmatprep.subr.bf16.mxu0 %v1896_v63 }
  0x77   :  { %1127 = vmatpush1.bf16.msra.mxu1 %v1891_v0 }
  0x78   :  { %1233 = vmatpush1.bf16.msra.mxu0 %v1894_v1  ;;  %1128 = vmatprep.subr.bf16.mxu1 %v1904_v2 }
  0x79   :  { %1234 = vmatprep.subr.bf16.mxu0 %v1908_v3 }
  0x7b   :  { %1129 = vmatpush1.bf16.msra.mxu1 %v1902_v4 }
  0x7c   :  { %1235 = vmatpush1.bf16.msra.mxu0 %v1906_v5  ;;  %1130 = vmatprep.subr.bf16.mxu1 %v1911_v6 }
  0x7d   :  { %1236 = vmatprep.subr.bf16.mxu0 %v1914_v7 }
  0x7f   :  { %1131 = vmatpush1.bf16.msra.mxu1 %v1909_v8 }
  0x80   :  { %1237 = vmatpush1.bf16.msra.mxu0 %v1912_v9  ;;  %1652 = vmatprep.subr.bf16.mxu1 %v1923_v10 }
  0x81   :  { %1259 = vmatprep.subr.bf16.mxu0 %v1923_v10 }
  0x82   :  { %1133 = vmatmul.mubr.bf16.vlgmr.msra.gmra.mrb[0].mxu1 %v1915_v11 }
  0x83   :  { %1239 = vmatmul.mubr.bf16.vlgmr.msra.gmra.mrb[0].mxu0 %v1918_v12  ;;  %1660 = vmatpush1.bf16.msra.mxu1 %v1921_v13 }
  0x84   :  { %1260 = vmatpush1.bf16.msra.mxu0 %v1921_v13  ;;  %1653 = vmatprep.subr.bf16.mxu1 %v1926_v14 }
  0x85   :  { %1261 = vmatprep.subr.bf16.mxu0 %v1926_v14  ;;  %1142 = vmatprep.mubr.bf16.mxu1 %v1927_v15 }
  0x86   :  { %1248 = vmatprep.mubr.bf16.mxu0 %v1929_v16 }
  0x87   :  { %1661 = vmatpush1.bf16.msra.mxu1 %v1924_v17 }
  0x88   :  { %1262 = vmatpush1.bf16.msra.mxu0 %v1924_v17  ;;  %1654 = vmatprep.subr.bf16.mxu1 %v1935_v18 }
  0x89   :  { %1263 = vmatprep.subr.bf16.mxu0 %v1935_v18 }
  0x8a   :  { %1143 = vmatmul.mubr.bf16.gmra.mrb[4].mxu1 %v1931_v19 }
  0x8b   :  { %1249 = vmatmul.mubr.bf16.gmra.mrb[4].mxu0 %v1932_v20  ;;  %1662 = vmatpush1.bf16.msra.mxu1 %v1933_v21 }
  0x8c   :  { %1264 = vmatpush1.bf16.msra.mxu0 %v1933_v21  ;;  %1655 = vmatprep.subr.bf16.mxu1 %v1938_v22 }
  0x8d   :  { %1265 = vmatprep.subr.bf16.mxu0 %v1938_v22  ;;  %1291 = vmatprep.mubr.bf16.mxu0 %v1953_v25 }
  0x8e   :  { %1301 = vmatprep.mubr.bf16.mxu1 %v1953_v25 }
  0x8f   :  { %1663 = vmatpush1.bf16.msra.mxu1 %v1936_v23 }
  0x90   :  { %1266 = vmatpush1.bf16.msra.mxu0 %v1936_v23  ;;  %1656 = vmatprep.subr.bf16.mxu1 %v1941_v24 }
  0x91   :  { %1267 = vmatprep.subr.bf16.mxu0 %v1941_v24 }
  0x93   :  { %1664 = vmatpush1.bf16.msra.mxu1 %v1939_v26 }
  0x94   :  { %1268 = vmatpush1.bf16.msra.mxu0 %v1939_v26  ;;  %1657 = vmatprep.subr.bf16.mxu1 %v1944_v27 }
  0x95   :  { %1269 = vmatprep.subr.bf16.mxu0 %v1944_v27 }
  0x97   :  { %1665 = vmatpush1.bf16.msra.mxu1 %v1942_v28 }
  0x98   :  { %1270 = vmatpush1.bf16.msra.mxu0 %v1942_v28  ;;  %1658 = vmatprep.subr.bf16.mxu1 %v1947_v29 }
  0x99   :  { %1271 = vmatprep.subr.bf16.mxu0 %v1947_v29 }
  0x9b   :  { %1666 = vmatpush1.bf16.msra.mxu1 %v1945_v30 }
  0x9c   :  { %1272 = vmatpush1.bf16.msra.mxu0 %v1945_v30  ;;  %1659 = vmatprep.subr.bf16.mxu1 %v1950_v31 }
  0x9d   :  { %1273 = vmatprep.subr.bf16.mxu0 %v1950_v31 }
  0x9f   :  { %1667 = vmatpush1.bf16.msra.mxu1 %v1948_v32 }
  0xa0   :  { %1274 = vmatpush1.bf16.msra.mxu0 %v1948_v32 }
  0xa2   :  { %1302 = vmatmul.mubr.bf16.vlgmr.msra.gmra.mrb[8].mxu1 %v1952_v34 }
  0xa3   :  { %1292 = vmatmul.mubr.bf16.vlgmr.msra.gmra.mrb[0].mxu0 %v1951_v33 }
 0x155   :  { %v1134_v39 = vpop.f32.mrb[0].mxu1 }
 0x156   :  { %v1136_v40 = vpop.f32.mrb[1].mxu1  ;;  %v1668_v0 = vadd.f32 %v1134_v39, %v228_v46 }
 0x157   :  { %v1138_v41 = vpop.f32.mrb[2].mxu1  ;;  %v1670_v1 = vadd.f32 %v1136_v40, %v232_v47 }
 0x158   :  { %v1140_v43 = vpop.f32.mrb[3].mxu1  ;;  %v1672_v4 = vadd.f32 %v1138_v41, %v228_v46 }
 0x159   :  { %v1674_v13 = vadd.f32 %v1140_v43, %v232_v47 }
 0x15d   :  { %v1144_v48 = vpop.f32.mrb[4].mxu1 }
 0x15e   :  { %v1250_v49 = vpop.f32.mrb[4].mxu0  ;;  %v1676_v50 = vadd.f32 %v1144_v48, %v228_v46  ;;  %v1146_v51 = vpop.f32.mrb[5].mxu1 }
 0x15f   :  { %v1252_v52 = vpop.f32.mrb[5].mxu0  ;;  %v1679_v53 = vadd.f32 %v1146_v51, %v232_v47  ;;  %v1148_v54 = vpop.f32.mrb[6].mxu1 }
 0x160   :  { %v1254_v55 = vpop.f32.mrb[6].mxu0  ;;  %v1677_v56 = vadd.f32 %v1676_v50, %v1250_v49  ;;  %v1682_v57 = vadd.f32 %v1148_v54, %v228_v46  ;;  %v1150_v58 = vpop.f32.mrb[7].mxu1  ;;  %v1955_v50 = vmov 1966171168  }
 0x161   :  { %v1256_v59 = vpop.f32.mrb[7].mxu0  ;;  %v1680_v60 = vadd.f32 %v1679_v53, %v1252_v52  ;;  %v1685_v61 = vadd.f32 %v1150_v58, %v232_v47  ;;  %v1373_v51 = vunpack.c.l.s4 %v1955_v50 }
 0x162   :  { %v1683_v62 = vadd.f32 %v1682_v57, %v1254_v55 }
 0x163   :  { %v1686_v63 = vadd.f32 %v1685_v61, %v1256_v59 }
 0x175   :  { %v1303_v3 = vpop.f32.mrb[8].mxu1 }
 0x176   :  { %v1293_v2 = vpop.f32.mrb[0].mxu0  ;;  %v1678_v6 = vadd.f32 %v1677_v56, %v1303_v3  ;;  %v1305_v8 = vpop.f32.mrb[9].mxu1 }
 0x177   :  { %v1669_v5 = vadd.f32 %v1668_v0, %v1293_v2  ;;  %v1295_v7 = vpop.f32.mrb[1].mxu0  ;;  %v1681_v10 = vadd.f32 %v1680_v60, %v1305_v8  ;;  %v1307_v12 = vpop.f32.mrb[10].mxu1  ;;  %v1374_v60 = vunpack.c.0.s8 %v1373_v51 }
 0x178   :  { %v1671_v9 = vadd.f32 %v1670_v1, %v1295_v7  ;;  %v1297_v11 = vpop.f32.mrb[2].mxu0  ;;  %v1684_v15 = vadd.f32 %v1683_v62, %v1307_v12  ;;  %v1309_v17 = vpop.f32.mrb[11].mxu1  ;;  %v1398_v24 = vmul.f32 %v1678_v6, %v1678_v6  ;;  %v1350_v12 = vld [vmem:[%s2525_s4] sm:$0x3] }
 0x179   :  { %v1673_v14 = vadd.f32 %v1672_v4, %v1297_v11  ;;  %v1299_v16 = vpop.f32.mrb[3].mxu0  ;;  %v1650_v19 = vpack.c.bf16 %v1681_v10, %v1678_v6  ;;  %v1394_v20 = vmul.f32 %v1669_v5, %v1669_v5  ;;  %v1687_v25 = vadd.f32 %v1686_v63, %v1309_v17  ;;  %v1393_v17 = vld [vmem:[%s2524_s5] sm:$0x3] }
 0x17a   :  { %v1648_v18 = vpack.c.bf16 %v1671_v9, %v1669_v5  ;;  %v1675_v23 = vadd.f32 %v1674_v13, %v1299_v16  ;;  %v1395_v30 = vmul.f32 %v1671_v9, %v1671_v9  ;;  %v1400_v34 = vmul.f32 %v1684_v15, %v1684_v15 }
 0x17b   :  { %v1351_v21 = vadd.f32 %v1673_v14, %v1669_v5  ;;  %v1396_v22 = vmul.f32 %v1673_v14, %v1673_v14  ;;  %1338 = vst [vmem:[%s2527_s3 + $0x10] sm:$0xff] %v1650_v19  ;;  %v1651_v32 = vpack.c.bf16 %v1687_v25, %v1684_v15  ;;  %v1399_v39 = vmul.f32 %v1681_v10, %v1681_v10 }
 0x17c   :  { %1336 = vst [vmem:[%s2527_s3] sm:$0xff] %v1648_v18  ;;  %v1649_v28 = vpack.c.bf16 %v1675_v23, %v1673_v14  ;;  %v1360_v29 = vadd.f32 %v1675_v23, %v1671_v9  ;;  %v1397_v31 = vmul.f32 %v1675_v23, %v1675_v23  ;;  %v1401_v44 = vmul.f32 %v1687_v25, %v1687_v25 }
 0x17d   :  { %v1402_v26 = vadd.f32 %v1396_v22, %v1394_v20  ;;  %v1352_v27 = vadd.f32 %v1678_v6, %v1351_v21  ;;  %1339 = vst [vmem:[%s2527_s3 + $0x18] sm:$0xff] %v1651_v32  ;;  %v1377_v5 = vsub.s32 %v1374_v60, %v2486_v38 }
 0x17e   :  { %1337 = vst [vmem:[%s2527_s3 + $0x8] sm:$0xff] %v1649_v28  ;;  %v1361_v37 = vadd.f32 %v1681_v10, %v1360_v29  ;;  %v1411_v40 = vadd.f32 %v1397_v31, %v1395_v30 }
 0x17f   :  { %v1353_v33 = vadd.f32 %v1684_v15, %v1352_v27  ;;  %v1403_v35 = vadd.f32 %v1402_v26, %v1398_v24 }
 0x180   :  { %v1362_v43 = vadd.f32 %v1687_v25, %v1361_v37  ;;  %v1412_v45 = vadd.f32 %v1411_v40, %v1399_v39 }
 0x181   :  { %v1354_v41 = vrot.slane %v1353_v33, 4  ;;  %v1404_v42 = vadd.f32 %v1403_v35, %v1400_v34 }
 0x182   :  { %v1363_v48 = vrot.slane %v1362_v43, 4  ;;  %v1413_v49 = vadd.f32 %v1412_v45, %v1401_v44 }
 0x183   :  { %v1355_v46 = vadd.f32 %v1354_v41, %v1353_v33  ;;  %v1405_v47 = vrot.slane %v1404_v42, 4 }
 0x184   :  { %v1364_v54 = vadd.f32 %v1363_v48, %v1362_v43  ;;  %v1414_v55 = vrot.slane %v1413_v49, 4 }
 0x185   :  { %v1356_v52 = vrot.slane %v1355_v46, 2  ;;  %v1406_v53 = vadd.f32 %v1405_v47, %v1404_v42 }
 0x186   :  { %v1365_v58 = vrot.slane %v1364_v54, 2  ;;  %v1415_v59 = vadd.f32 %v1414_v55, %v1413_v49 }
 0x187   :  { %v1357_v56 = vadd.f32 %v1356_v52, %v1355_v46  ;;  %v1407_v57 = vrot.slane %v1406_v53, 2 }
 0x188   :  { %v1366_v63 = vadd.f32 %v1365_v58, %v1364_v54  ;;  %v1416_v0 = vrot.slane %v1415_v59, 2 }
 0x189   :  { %v1358_v61 = vrot.slane %v1357_v56, 1  ;;  %v1408_v62 = vadd.f32 %v1407_v57, %v1406_v53 }
 0x18a   :  { %v1367_v3 = vrot.slane %v1366_v63, 1  ;;  %v1417_v4 = vadd.f32 %v1416_v0, %v1415_v59 }
 0x18b   :  { %v1359_v1 = vadd.f32 %v1358_v61, %v1357_v56  ;;  %v1409_v2 = vrot.slane %v1408_v62, 1 }
 0x18c   :  { %v1368_v6 = vadd.f32 %v1367_v3, %v1366_v63  ;;  %v1418_v8 = vrot.slane %v1417_v4, 1 }
 0x18d   :  { %v1410_v7 = vadd.f32 %v1409_v2, %v1408_v62 }
 0x18e   :  { %v1371_v9 = vcombine.low %v1359_v1, %v1368_v6  ;;  %v1419_v10 = vadd.f32 %v1418_v8, %v1417_v4 }
 0x190   :  { %v1378_v11 = vrot.slane %v1371_v9, %v1377_v5  ;;  %v1422_v13 = vcombine.low %v1410_v7, %v1419_v10 }
 0x192   :  { %v1385_v14 = vrot.slane %v1378_v11, %v1377_v5  ;;  %v1429_v15 = vrot.slane %v1422_v13, %v1377_v5 }
 0x194   :  { %v1387_v16 = vadd.f32 %v1385_v14, %v1350_v12  ;;  %v1436_v18 = vrot.slane %v1429_v15, %v1377_v5 }
 0x196   :  { %1392 = vst.msk [vmem:[%s2525_s4] sm:$0x3] %vm2472_vm0, %v1387_v16  ;;  %v1438_v38 = vadd.f32 %v1436_v18, %v1393_v17 }
 0x198   :  { %1439 = vst.msk [vmem:[%s2524_s5] sm:$0x3] %vm2472_vm0, %v1438_v38 }

// kernel: discriminator_forward.32
= control target key start
LH: loop header
LB: loop body
LE: loop exit
PB: predicated region body
PF: predicated region fallthrough
CT: control target
= control target key end

     0   :  { %v82_v8 = vlaneseq  ;;  %s231_s1 = inlined_call_operand.vmem [shape: f32[1,1,256], index: 1, kind: input, shape index: {}]   ;;  %s232_s2 = inlined_call_operand.vmem [shape: f32[1,1,256], index: 2, kind: input, shape index: {}]   ;;  %s233_s0 = inlined_call_operand.vmem [shape: bf16[16,256], index: 0, kind: input, shape index: {}]   ;;  %s234_s3 = inlined_call_operand.vmem [shape: f32[1,256], index: 3, kind: input, shape index: {}]   ;;  %s235_s4 = inlined_call_operand.vmem [shape: f32[1,256], index: 4, kind: input, shape index: {}]   ;;  %s236_s5 = inlined_call_operand.vmem [shape: bf16[16,256], index: 5, kind: output, shape index: {}]  }
   0x1   :  { %v61_v0 = vld [vmem:[%s231_s1] sm:$0x3]  ;;  %v76_v12 = vld [vmem:[%s233_s0 + $0x8] sm:$0xff] }
   0x2   :  { %v63_v1 = vld [vmem:[%s232_s2] sm:$0x3]  ;;  %v62_v2 = vmul.f32 0.125, %v61_v0  ;;  %v83_v9 = vshrl.u32 %v82_v8, 7  ;;  %v79_v19 = vunpack.c.l.bf16 %v76_v12  ;;  %v80_v21 = vunpack.c.h.bf16 %v76_v12 }
   0x3   :  { %v64_v3 = vmul.f32 0.125, %v63_v1  ;;  %v70_v10 = vld [vmem:[%s234_s3] sm:$0x3] }
   0x4   :  { %v65_v4 = vmul.f32 %v62_v2, %v62_v2  ;;  %v75_v11 = vld [vmem:[%s233_s0] sm:$0xff]  ;;  %v84_v13 = vsub.s32 0, %v83_v9  ;;  %v88_v14 = vsub.s32 1, %v83_v9 }
   0x5   :  { %v77_v17 = vunpack.c.l.bf16 %v75_v11  ;;  %v78_v18 = vunpack.c.h.bf16 %v75_v11  ;;  %v72_v20 = vld [vmem:[%s235_s4] sm:$0x3] }
   0x6   :  { %v66_v5 = vsub.f32 %v64_v3, %v65_v4 }
   0x8   :  { %v67_v6 = vmax.f32 %v66_v5, 0.0 }
   0xa   :  { %v68_v7 = vadd.f32 1e-05, %v67_v6 }
   0xc   :  { %175 = vrsqrt.f32 %v68_v7 }
  0x16   :  { %v176_v15 = vpop.eup %175 }
  0x17   :  { %v71_v16 = vmul.f32 %v176_v15, %v70_v10 }
  0x19   :  { %v73_v22 = vmul.f32 %v71_v16, %v62_v2  ;;  %v85_v23 = vrot.slane %v71_v16, %v84_v13  ;;  %v89_v24 = vrot.slane %v71_v16, %v88_v14 }
  0x1b   :  { %v74_v25 = vsub.f32 %v72_v20, %v73_v22  ;;  %v92_v26 = vmul.f32 %v85_v23, %v77_v17  ;;  %v93_v27 = vmul.f32 %v89_v24, %v78_v18  ;;  %v94_v28 = vmul.f32 %v85_v23, %v79_v19 }
  0x1c   :  { %v95_v29 = vmul.f32 %v89_v24, %v80_v21 }
  0x1d   :  { %v100_v30 = vrot.slane %v74_v25, %v84_v13  ;;  %v104_v31 = vrot.slane %v74_v25, %v88_v14 }
  0x1f   :  { %v107_v32 = vadd.f32 %v100_v30, %v92_v26  ;;  %v108_v33 = vadd.f32 %v104_v31, %v93_v27  ;;  %v109_v34 = vadd.f32 %v100_v30, %v94_v28  ;;  %v110_v35 = vadd.f32 %v104_v31, %v95_v29 }
  0x21   :  { %vm111_vm0 = vcmp.ge.f32.partialorder %v107_v32, 0.0  ;;  %vm112_vm1 = vcmp.ge.f32.partialorder %v108_v33, 0.0  ;;  %v115_v36 = vmul.f32 0.2, %v107_v32  ;;  %v116_v37 = vmul.f32 0.2, %v108_v33 }
  0x22   :  { %vm113_vm2 = vcmp.ge.f32.partialorder %v109_v34, 0.0  ;;  %vm114_vm3 = vcmp.ge.f32.partialorder %v110_v35, 0.0  ;;  %v117_v38 = vmul.f32 0.2, %v109_v34  ;;  %v118_v39 = vmul.f32 0.2, %v110_v35 }
  0x23   :  { %v119_v40 = vsel %vm111_vm0, %v107_v32, %v115_v36  ;;  %v120_v41 = vsel %vm112_vm1, %v108_v33, %v116_v37 }
  0x24   :  { %v173_v42 = vpack.c.bf16 %v120_v41, %v119_v40  ;;  %v121_v43 = vsel %vm113_vm2, %v109_v34, %v117_v38  ;;  %v122_v44 = vsel %vm114_vm3, %v110_v35, %v118_v39 }
  0x25   :  { %v174_v45 = vpack.c.bf16 %v122_v44, %v121_v43 }
  0x26   :  { %135 = vst [vmem:[%s236_s5] sm:$0xff] %v173_v42 }
  0x27   :  { %136 = vst [vmem:[%s236_s5 + $0x8] sm:$0xff] %v174_v45 }

// kernel: discriminator_forward.31
= control target key start
LH: loop header
LB: loop body
LE: loop exit
PB: predicated region body
PF: predicated region fallthrough
CT: control target
= control target key end

     0   :  { %s4250_s1 = inlined_call_operand.vmem [shape: bf16[2304,256], index: 1, kind: input, shape index: {}]   ;;  %s4251_s0 = inlined_call_operand.vmem [shape: bf16[16,2304], index: 0, kind: input, shape index: {}]   ;;  %s4252_s4 = inlined_call_operand.vmem [shape: f32[1,1,256], index: 4, kind: output, shape index: {1}]   ;;  %s4253_s5 = inlined_call_operand.vmem [shape: f32[1,1,256], index: 5, kind: output, shape index: {2}]   ;;  %s4254_s2 = inlined_call_operand.vmem [shape: f32[1,256], index: 2, kind: input, shape index: {}]   ;;  %s4255_s3 = inlined_call_operand.vmem [shape: bf16[16,256], index: 3, kind: output, shape index: {0}]  }
   0x1   :  { %v2802_v0 = vld [vmem:[%s4250_s1 + $0x4] ss:$8 sps:$4 sm:$0xff]   ;;  %v2806_v2 = vld [vmem:[%s4250_s1] ss:$8 sps:$4 sm:$0xff]   ;;  %v2808_v4 = vld [vmem:[%s4250_s1 + $0x14] ss:$8 sps:$4 sm:$0xff]  }
   0x2   :  { %v2804_v1 = vld [vmem:[%s4250_s1 + $0x404] ss:$8 sps:$4 sm:$0xff]   ;;  %1906 = vmatprep.subr.bf16.mxu1 %v2802_v0  ;;  %v2807_v3 = vld [vmem:[%s4250_s1 + $0x400] ss:$8 sps:$4 sm:$0xff]   ;;  %v2810_v5 = vld [vmem:[%s4250_s1 + $0x414] ss:$8 sps:$4 sm:$0xff]  }
   0x3   :  { %2078 = vmatprep.subr.bf16.mxu0 %v2804_v1  ;;  %1907 = vmatpush1.bf16.msra.mxu1 %v2806_v2  ;;  %v2812_v6 = vld [vmem:[%s4250_s1 + $0x10] ss:$8 sps:$4 sm:$0xff]   ;;  %v2814_v8 = vld [vmem:[%s4250_s1 + $0x24] ss:$8 sps:$4 sm:$0xff]   ;;  %v2818_v10 = vld [vmem:[%s4250_s1 + $0x20] ss:$8 sps:$4 sm:$0xff]  }
   0x4   :  { %2079 = vmatpush1.bf16.msra.mxu0 %v2807_v3  ;;  %1908 = vmatprep.subr.bf16.mxu1 %v2808_v4  ;;  %v2813_v7 = vld [vmem:[%s4250_s1 + $0x410] ss:$8 sps:$4 sm:$0xff]   ;;  %v2816_v9 = vld [vmem:[%s4250_s1 + $0x424] ss:$8 sps:$4 sm:$0xff]   ;;  %v2819_v11 = vld [vmem:[%s4250_s1 + $0x420] ss:$8 sps:$4 sm:$0xff]  }
   0x5   :  { %2080 = vmatprep.subr.bf16.mxu0 %v2810_v5  ;;  %v2820_v12 = vld [vmem:[%s4250_s1 + $0x34] ss:$8 sps:$4 sm:$0xff]   ;;  %v2824_v14 = vld [vmem:[%s4250_s1 + $0x30] ss:$8 sps:$4 sm:$0xff]   ;;  %v2826_v16 = vld [vmem:[%s4250_s1 + $0x44] ss:$8 sps:$4 sm:$0xff]  }
   0x6   :  { %v2822_v13 = vld [vmem:[%s4250_s1 + $0x434] ss:$8 sps:$4 sm:$0xff]   ;;  %v2825_v15 = vld [vmem:[%s4250_s1 + $0x430] ss:$8 sps:$4 sm:$0xff]   ;;  %v2828_v17 = vld [vmem:[%s4250_s1 + $0x444] ss:$8 sps:$4 sm:$0xff]  }
   0x7   :  { %1909 = vmatpush1.bf16.msra.mxu1 %v2812_v6  ;;  %v2830_v18 = vld [vmem:[%s4250_s1 + $0x40] ss:$8 sps:$4 sm:$0xff]   ;;  %v2832_v20 = vld [vmem:[%s4250_s1 + $0x54] ss:$8 sps:$4 sm:$0xff]   ;;  %v2836_v22 = vld [vmem:[%s4250_s1 + $0x50] ss:$8 sps:$4 sm:$0xff]  }
   0x8   :  { %2081 = vmatpush1.bf16.msra.mxu0 %v2813_v7  ;;  %1910 = vmatprep.subr.bf16.mxu1 %v2814_v8  ;;  %v2831_v19 = vld [vmem:[%s4250_s1 + $0x440] ss:$8 sps:$4 sm:$0xff]   ;;  %v2834_v21 = vld [vmem:[%s4250_s1 + $0x454] ss:$8 sps:$4 sm:$0xff]   ;;  %v2837_v23 = vld [vmem:[%s4250_s1 + $0x450] ss:$8 sps:$4 sm:$0xff]  }
   0x9   :  { %2082 = vmatprep.subr.bf16.mxu0 %v2816_v9  ;;  %v2838_v24 = vld [vmem:[%s4250_s1 + $0x64] ss:$8 sps:$4 sm:$0xff]   ;;  %v2842_v26 = vld [vmem:[%s4250_s1 + $0x60] ss:$8 sps:$4 sm:$0xff]   ;;  %v2844_v28 = vld [vmem:[%s4250_s1 + $0x74] ss:$8 sps:$4 sm:$0xff]  }
   0xa   :  { %v2840_v25 = vld [vmem:[%s4250_s1 + $0x464] ss:$8 sps:$4 sm:$0xff]   ;;  %v2843_v27 = vld [vmem:[%s4250_s1 + $0x460] ss:$8 sps:$4 sm:$0xff]   ;;  %v2846_v29 = vld [vmem:[%s4250_s1 + $0x474] ss:$8 sps:$4 sm:$0xff]  }
   0xb   :  { %1911 = vmatpush1.bf16.msra.mxu1 %v2818_v10  ;;  %v2848_v30 = vld [vmem:[%s4250_s1 + $0x70] ss:$8 sps:$4 sm:$0xff]   ;;  %v2850_v32 = vld [vmem:[%s4250_s1 + $0x84] ss:$8 sps:$4 sm:$0xff]   ;;  %v2854_v34 = vld [vmem:[%s4250_s1 + $0x80] ss:$8 sps:$4 sm:$0xff]  }
   0xc   :  { %2083 = vmatpush1.bf16.msra.mxu0 %v2819_v11  ;;  %1912 = vmatprep.subr.bf16.mxu1 %v2820_v12  ;;  %v2849_v31 = vld [vmem:[%s4250_s1 + $0x470] ss:$8 sps:$4 sm:$0xff]   ;;  %v2852_v33 = vld [vmem:[%s4250_s1 + $0x484] ss:$8 sps:$4 sm:$0xff]   ;;  %v2855_v35 = vld [vmem:[%s4250_s1 + $0x480] ss:$8 sps:$4 sm:$0xff]  }
   0xd   :  { %2084 = vmatprep.subr.bf16.mxu0 %v2822_v13  ;;  %v2856_v36 = vld [vmem:[%s4250_s1 + $0x94] ss:$8 sps:$4 sm:$0xff]   ;;  %v2860_v38 = vld [vmem:[%s4250_s1 + $0x90] ss:$8 sps:$4 sm:$0xff]   ;;  %v2862_v40 = vld [vmem:[%s4250_s1 + $0xa4] ss:$8 sps:$4 sm:$0xff]  }
   0xe   :  { %v2858_v37 = vld [vmem:[%s4250_s1 + $0x494] ss:$8 sps:$4 sm:$0xff]   ;;  %v2861_v39 = vld [vmem:[%s4250_s1 + $0x490] ss:$8 sps:$4 sm:$0xff]   ;;  %v2864_v41 = vld [vmem:[%s4250_s1 + $0x4a4] ss:$8 sps:$4 sm:$0xff]  }
   0xf   :  { %1913 = vmatpush1.bf16.msra.mxu1 %v2824_v14  ;;  %v2866_v42 = vld [vmem:[%s4250_s1 + $0xa0] ss:$8 sps:$4 sm:$0xff]   ;;  %v2868_v44 = vld [vmem:[%s4250_s1 + $0xb4] ss:$8 sps:$4 sm:$0xff]   ;;  %v2872_v46 = vld [vmem:[%s4250_s1 + $0xb0] ss:$8 sps:$4 sm:$0xff]  }
  0x10   :  { %2085 = vmatpush1.bf16.msra.mxu0 %v2825_v15  ;;  %1914 = vmatprep.subr.bf16.mxu1 %v2826_v16  ;;  %v2867_v43 = vld [vmem:[%s4250_s1 + $0x4a0] ss:$8 sps:$4 sm:$0xff]   ;;  %v2870_v45 = vld [vmem:[%s4250_s1 + $0x4b4] ss:$8 sps:$4 sm:$0xff]   ;;  %v2873_v47 = vld [vmem:[%s4250_s1 + $0x4b0] ss:$8 sps:$4 sm:$0xff]  }
  0x11   :  { %2086 = vmatprep.subr.bf16.mxu0 %v2828_v17  ;;  %v2900_v48 = vld [vmem:[%s4251_s0 + $0x4] ss:$72 sps:$4 sm:$0xff]   ;;  %v2878_v52 = vld [vmem:[%s4250_s1 + $0xc0] ss:$8 sps:$4 sm:$0xff]   ;;  %v2880_v54 = vld [vmem:[%s4250_s1 + $0xd4] ss:$8 sps:$4 sm:$0xff]  }
  0x12   :  { %v2874_v49 = vld [vmem:[%s4250_s1 + $0xc4] ss:$8 sps:$4 sm:$0xff]   ;;  %1938 = vmatprep.mubr.bf16.mxu1 %v2900_v48  ;;  %v2879_v53 = vld [vmem:[%s4250_s1 + $0x4c0] ss:$8 sps:$4 sm:$0xff]   ;;  %v2882_v55 = vld [vmem:[%s4250_s1 + $0x4d4] ss:$8 sps:$4 sm:$0xff]  }
  0x13   :  { %1915 = vmatpush1.bf16.msra.mxu1 %v2830_v18  ;;  %v2876_v50 = vld [vmem:[%s4250_s1 + $0x4c4] ss:$8 sps:$4 sm:$0xff]   ;;  %v2884_v56 = vld [vmem:[%s4250_s1 + $0xd0] ss:$8 sps:$4 sm:$0xff]   ;;  %v2890_v60 = vld [vmem:[%s4250_s1 + $0xe0] ss:$8 sps:$4 sm:$0xff]  }
  0x14   :  { %2087 = vmatpush1.bf16.msra.mxu0 %v2831_v19  ;;  %1916 = vmatprep.subr.bf16.mxu1 %v2832_v20  ;;  %v2906_v51 = vld [vmem:[%s4251_s0 + $0x24] ss:$72 sps:$4 sm:$0xff]   ;;  %v2885_v57 = vld [vmem:[%s4250_s1 + $0x4d0] ss:$8 sps:$4 sm:$0xff]   ;;  %v2891_v61 = vld [vmem:[%s4250_s1 + $0x4e0] ss:$8 sps:$4 sm:$0xff]  }
  0x15   :  { %2088 = vmatprep.subr.bf16.mxu0 %v2834_v21  ;;  %2110 = vmatprep.mubr.bf16.mxu0 %v2906_v51  ;;  %v2886_v58 = vld [vmem:[%s4250_s1 + $0xe4] ss:$8 sps:$4 sm:$0xff]   ;;  %v2892_v62 = vld [vmem:[%s4250_s1 + $0xf4] ss:$8 sps:$4 sm:$0xff]   ;;  %v2896_v0 = vld [vmem:[%s4250_s1 + $0xf0] ss:$8 sps:$4 sm:$0xff]  }
  0x16   :  { %v2888_v59 = vld [vmem:[%s4250_s1 + $0x4e4] ss:$8 sps:$4 sm:$0xff]   ;;  %v2894_v63 = vld [vmem:[%s4250_s1 + $0x4f4] ss:$8 sps:$4 sm:$0xff]   ;;  %v2897_v1 = vld [vmem:[%s4250_s1 + $0x4f0] ss:$8 sps:$4 sm:$0xff]  }
  0x17   :  { %1917 = vmatpush1.bf16.msra.mxu1 %v2836_v22  ;;  %v2903_v2 = vld [vmem:[%s4250_s1 + $0x104] ss:$8 sps:$4 sm:$0xff]   ;;  %v2898_v4 = vld [vmem:[%s4251_s0] ss:$72 sps:$4 sm:$0xff]   ;;  %v2912_v8 = vld [vmem:[%s4250_s1 + $0x114] ss:$8 sps:$4 sm:$0xff]  }
  0x18   :  { %2089 = vmatpush1.bf16.msra.mxu0 %v2837_v23  ;;  %1918 = vmatprep.subr.bf16.mxu1 %v2838_v24  ;;  %v2909_v3 = vld [vmem:[%s4250_s1 + $0x504] ss:$8 sps:$4 sm:$0xff]   ;;  %v2901_v5 = vld [vmem:[%s4250_s1 + $0x100] ss:$8 sps:$4 sm:$0xff]   ;;  %v2915_v9 = vld [vmem:[%s4250_s1 + $0x514] ss:$8 sps:$4 sm:$0xff]  }
  0x19   :  { %2090 = vmatprep.subr.bf16.mxu0 %v2840_v25  ;;  %v2904_v6 = vld [vmem:[%s4251_s0 + $0x20] ss:$72 sps:$4 sm:$0xff]   ;;  %v2910_v10 = vld [vmem:[%s4250_s1 + $0x110] ss:$8 sps:$4 sm:$0xff]   ;;  %v2918_v12 = vld [vmem:[%s4250_s1 + $0x124] ss:$8 sps:$4 sm:$0xff]  }
  0x1a   :  { %v2907_v7 = vld [vmem:[%s4250_s1 + $0x500] ss:$8 sps:$4 sm:$0xff]   ;;  %v2913_v11 = vld [vmem:[%s4250_s1 + $0x510] ss:$8 sps:$4 sm:$0xff]   ;;  %v2921_v13 = vld [vmem:[%s4250_s1 + $0x524] ss:$8 sps:$4 sm:$0xff]  }
  0x1b   :  { %1919 = vmatpush1.bf16.msra.mxu1 %v2842_v26  ;;  %v2916_v14 = vld [vmem:[%s4250_s1 + $0x120] ss:$8 sps:$4 sm:$0xff]   ;;  %v2924_v16 = vld [vmem:[%s4250_s1 + $0x134] ss:$8 sps:$4 sm:$0xff]   ;;  %v2922_v18 = vld [vmem:[%s4250_s1 + $0x130] ss:$8 sps:$4 sm:$0xff]  }
  0x1c   :  { %2091 = vmatpush1.bf16.msra.mxu0 %v2843_v27  ;;  %1920 = vmatprep.subr.bf16.mxu1 %v2844_v28  ;;  %v2919_v15 = vld [vmem:[%s4250_s1 + $0x520] ss:$8 sps:$4 sm:$0xff]   ;;  %v2927_v17 = vld [vmem:[%s4250_s1 + $0x534] ss:$8 sps:$4 sm:$0xff]   ;;  %v2925_v19 = vld [vmem:[%s4250_s1 + $0x530] ss:$8 sps:$4 sm:$0xff]  }
  0x1d   :  { %2092 = vmatprep.subr.bf16.mxu0 %v2846_v29  ;;  %v2930_v20 = vld [vmem:[%s4250_s1 + $0x144] ss:$8 sps:$4 sm:$0xff]   ;;  %v2928_v22 = vld [vmem:[%s4250_s1 + $0x140] ss:$8 sps:$4 sm:$0xff]   ;;  %v2936_v24 = vld [vmem:[%s4250_s1 + $0x154] ss:$8 sps:$4 sm:$0xff]  }
  0x1e   :  { %v2933_v21 = vld [vmem:[%s4250_s1 + $0x544] ss:$8 sps:$4 sm:$0xff]   ;;  %v2931_v23 = vld [vmem:[%s4250_s1 + $0x540] ss:$8 sps:$4 sm:$0xff]   ;;  %v2939_v25 = vld [vmem:[%s4250_s1 + $0x554] ss:$8 sps:$4 sm:$0xff]  }
  0x1f   :  { %1921 = vmatpush1.bf16.msra.mxu1 %v2848_v30  ;;  %v2934_v26 = vld [vmem:[%s4250_s1 + $0x150] ss:$8 sps:$4 sm:$0xff]   ;;  %v2942_v28 = vld [vmem:[%s4250_s1 + $0x164] ss:$8 sps:$4 sm:$0xff]   ;;  %v2940_v30 = vld [vmem:[%s4250_s1 + $0x160] ss:$8 sps:$4 sm:$0xff]  }
  0x20   :  { %2093 = vmatpush1.bf16.msra.mxu0 %v2849_v31  ;;  %1922 = vmatprep.subr.bf16.mxu1 %v2850_v32  ;;  %v2937_v27 = vld [vmem:[%s4250_s1 + $0x550] ss:$8 sps:$4 sm:$0xff]   ;;  %v2945_v29 = vld [vmem:[%s4250_s1 + $0x564] ss:$8 sps:$4 sm:$0xff]   ;;  %v2943_v31 = vld [vmem:[%s4250_s1 + $0x560] ss:$8 sps:$4 sm:$0xff]  }
  0x21   :  { %2094 = vmatprep.subr.bf16.mxu0 %v2852_v33  ;;  %v2948_v32 = vld [vmem:[%s4250_s1 + $0x174] ss:$8 sps:$4 sm:$0xff]   ;;  %v2964_v48 = vld [vmem:[%s4250_s1 + $0x1a0] ss:$8 sps:$4 sm:$0xff]  }
  0x22   :  { %v2951_v33 = vld [vmem:[%s4250_s1 + $0x574] ss:$8 sps:$4 sm:$0xff]  }
  0x23   :  { %1923 = vmatpush1.bf16.msra.mxu1 %v2854_v34  ;;  %v3002_v34 = vld [vmem:[%s4251_s0 + $0xc] ss:$72 sps:$4 sm:$0xff]  }
  0x24   :  { %2095 = vmatpush1.bf16.msra.mxu0 %v2855_v35  ;;  %1924 = vmatprep.subr.bf16.mxu1 %v2856_v36  ;;  %v2946_v35 = vld [vmem:[%s4250_s1 + $0x170] ss:$8 sps:$4 sm:$0xff]   ;;  %v2975_v51 = vld [vmem:[%s4250_s1 + $0x5b4] ss:$8 sps:$4 sm:$0xff]  }
  0x25   :  { %2096 = vmatprep.subr.bf16.mxu0 %v2858_v37  ;;  %v2949_v36 = vld [vmem:[%s4250_s1 + $0x570] ss:$8 sps:$4 sm:$0xff]   ;;  %v3008_v37 = vld [vmem:[%s4251_s0 + $0x2c] ss:$72 sps:$4 sm:$0xff]  }
  0x27   :  { %1925 = vmatpush1.bf16.msra.mxu1 %v2860_v38  ;;  %v2954_v38 = vld [vmem:[%s4250_s1 + $0x184] ss:$8 sps:$4 sm:$0xff]  }
  0x28   :  { %2097 = vmatpush1.bf16.msra.mxu0 %v2861_v39  ;;  %1926 = vmatprep.subr.bf16.mxu1 %v2862_v40  ;;  %v2957_v39 = vld [vmem:[%s4250_s1 + $0x584] ss:$8 sps:$4 sm:$0xff]   ;;  %v2952_v40 = vld [vmem:[%s4250_s1 + $0x180] ss:$8 sps:$4 sm:$0xff]  }
  0x29   :  { %2098 = vmatprep.subr.bf16.mxu0 %v2864_v41  ;;  %v2955_v41 = vld [vmem:[%s4250_s1 + $0x580] ss:$8 sps:$4 sm:$0xff]  }
  0x2b   :  { %1927 = vmatpush1.bf16.msra.mxu1 %v2866_v42  ;;  %v2960_v42 = vld [vmem:[%s4250_s1 + $0x194] ss:$8 sps:$4 sm:$0xff]  }
  0x2c   :  { %2099 = vmatpush1.bf16.msra.mxu0 %v2867_v43  ;;  %1928 = vmatprep.subr.bf16.mxu1 %v2868_v44  ;;  %v2963_v43 = vld [vmem:[%s4250_s1 + $0x594] ss:$8 sps:$4 sm:$0xff]   ;;  %v2958_v44 = vld [vmem:[%s4250_s1 + $0x190] ss:$8 sps:$4 sm:$0xff]  }
  0x2d   :  { %2100 = vmatprep.subr.bf16.mxu0 %v2870_v45  ;;  %v2961_v45 = vld [vmem:[%s4250_s1 + $0x590] ss:$8 sps:$4 sm:$0xff]  }
  0x2f   :  { %1929 = vmatpush1.bf16.msra.mxu1 %v2872_v46  ;;  %v2966_v46 = vld [vmem:[%s4250_s1 + $0x1a4] ss:$8 sps:$4 sm:$0xff]  }
  0x30   :  { %2101 = vmatpush1.bf16.msra.mxu0 %v2873_v47  ;;  %1930 = vmatprep.subr.bf16.mxu1 %v2874_v49  ;;  %v2969_v47 = vld [vmem:[%s4250_s1 + $0x5a4] ss:$8 sps:$4 sm:$0xff]   ;;  %v2967_v49 = vld [vmem:[%s4250_s1 + $0x5a0] ss:$8 sps:$4 sm:$0xff]  }
  0x31   :  { %2102 = vmatprep.subr.bf16.mxu0 %v2876_v50  ;;  %v2972_v50 = vld [vmem:[%s4250_s1 + $0x1b4] ss:$8 sps:$4 sm:$0xff]  }
  0x33   :  { %1931 = vmatpush1.bf16.msra.mxu1 %v2878_v52  ;;  %v2970_v52 = vld [vmem:[%s4250_s1 + $0x1b0] ss:$8 sps:$4 sm:$0xff]  }
  0x34   :  { %2103 = vmatpush1.bf16.msra.mxu0 %v2879_v53  ;;  %1932 = vmatprep.subr.bf16.mxu1 %v2880_v54  ;;  %v2973_v53 = vld [vmem:[%s4250_s1 + $0x5b0] ss:$8 sps:$4 sm:$0xff]   ;;  %v2978_v54 = vld [vmem:[%s4250_s1 + $0x1c4] ss:$8 sps:$4 sm:$0xff]  }
  0x35   :  { %2104 = vmatprep.subr.bf16.mxu0 %v2882_v55  ;;  %v2981_v55 = vld [vmem:[%s4250_s1 + $0x5c4] ss:$8 sps:$4 sm:$0xff]  }
  0x37   :  { %1933 = vmatpush1.bf16.msra.mxu1 %v2884_v56  ;;  %v2976_v56 = vld [vmem:[%s4250_s1 + $0x1c0] ss:$8 sps:$4 sm:$0xff]  }
  0x38   :  { %2105 = vmatpush1.bf16.msra.mxu0 %v2885_v57  ;;  %1934 = vmatprep.subr.bf16.mxu1 %v2886_v58  ;;  %v2979_v57 = vld [vmem:[%s4250_s1 + $0x5c0] ss:$8 sps:$4 sm:$0xff]   ;;  %v2984_v58 = vld [vmem:[%s4250_s1 + $0x1d4] ss:$8 sps:$4 sm:$0xff]  }
  0x39   :  { %2106 = vmatprep.subr.bf16.mxu0 %v2888_v59  ;;  %v2987_v59 = vld [vmem:[%s4250_s1 + $0x5d4] ss:$8 sps:$4 sm:$0xff]  }
  0x3b   :  { %1935 = vmatpush1.bf16.msra.mxu1 %v2890_v60  ;;  %v2982_v60 = vld [vmem:[%s4250_s1 + $0x1d0] ss:$8 sps:$4 sm:$0xff]  }
  0x3c   :  { %2107 = vmatpush1.bf16.msra.mxu0 %v2891_v61  ;;  %1936 = vmatprep.subr.bf16.mxu1 %v2892_v62  ;;  %v2985_v61 = vld [vmem:[%s4250_s1 + $0x5d0] ss:$8 sps:$4 sm:$0xff]   ;;  %v2990_v62 = vld [vmem:[%s4250_s1 + $0x1e4] ss:$8 sps:$4 sm:$0xff]  }
  0x3d   :  { %2108 = vmatprep.subr.bf16.mxu0 %v2894_v63  ;;  %v2993_v63 = vld [vmem:[%s4250_s1 + $0x5e4] ss:$8 sps:$4 sm:$0xff]  }
  0x3f   :  { %1937 = vmatpush1.bf16.msra.mxu1 %v2896_v0  ;;  %v2988_v0 = vld [vmem:[%s4250_s1 + $0x1e0] ss:$8 sps:$4 sm:$0xff]  }
  0x40   :  { %2109 = vmatpush1.bf16.msra.mxu0 %v2897_v1  ;;  %1949 = vmatprep.subr.bf16.mxu1 %v2903_v2  ;;  %v2991_v1 = vld [vmem:[%s4250_s1 + $0x5e0] ss:$8 sps:$4 sm:$0xff]   ;;  %v2996_v2 = vld [vmem:[%s4250_s1 + $0x1f4] ss:$8 sps:$4 sm:$0xff]  }
  0x41   :  { %2121 = vmatprep.subr.bf16.mxu0 %v2909_v3  ;;  %v2999_v3 = vld [vmem:[%s4250_s1 + $0x5f4] ss:$8 sps:$4 sm:$0xff]  }
  0x42   :  { %1939 = vmatmul.mubr.bf16.vlgmr.msra.gmra.mrb[0].mxu1 %v2898_v4  ;;  %v2994_v4 = vld [vmem:[%s4250_s1 + $0x1f0] ss:$8 sps:$4 sm:$0xff]  }
  0x43   :  { %2111 = vmatmul.mubr.bf16.vlgmr.msra.gmra.mrb[0].mxu0 %v2904_v6  ;;  %1950 = vmatpush1.bf16.msra.mxu1 %v2901_v5  ;;  %v2997_v5 = vld [vmem:[%s4250_s1 + $0x5f0] ss:$8 sps:$4 sm:$0xff]   ;;  %v3005_v6 = vld [vmem:[%s4250_s1 + $0x204] ss:$8 sps:$4 sm:$0xff]  }
  0x44   :  { %2122 = vmatpush1.bf16.msra.mxu0 %v2907_v7  ;;  %1951 = vmatprep.subr.bf16.mxu1 %v2912_v8  ;;  %v3011_v7 = vld [vmem:[%s4250_s1 + $0x604] ss:$8 sps:$4 sm:$0xff]   ;;  %v3000_v8 = vld [vmem:[%s4251_s0 + $0x8] ss:$72 sps:$4 sm:$0xff]  }
  0x45   :  { %2123 = vmatprep.subr.bf16.mxu0 %v2915_v9  ;;  %1981 = vmatprep.mubr.bf16.mxu1 %v3002_v34  ;;  %v3003_v9 = vld [vmem:[%s4250_s1 + $0x200] ss:$8 sps:$4 sm:$0xff]   ;;  %v3044_v34 = vld [vmem:[%s4250_s1 + $0x264] ss:$8 sps:$4 sm:$0xff]  }
  0x46   :  { %2153 = vmatprep.mubr.bf16.mxu0 %v3008_v37  ;;  %v3045_v37 = vld [vmem:[%s4250_s1 + $0x660] ss:$8 sps:$4 sm:$0xff]  }
  0x47   :  { %1952 = vmatpush1.bf16.msra.mxu1 %v2910_v10  ;;  %v3006_v10 = vld [vmem:[%s4251_s0 + $0x28] ss:$72 sps:$4 sm:$0xff]  }
  0x48   :  { %2124 = vmatpush1.bf16.msra.mxu0 %v2913_v11  ;;  %1953 = vmatprep.subr.bf16.mxu1 %v2918_v12  ;;  %v3009_v11 = vld [vmem:[%s4250_s1 + $0x600] ss:$8 sps:$4 sm:$0xff]   ;;  %v3014_v12 = vld [vmem:[%s4250_s1 + $0x214] ss:$8 sps:$4 sm:$0xff]  }
  0x49   :  { %2125 = vmatprep.subr.bf16.mxu0 %v2921_v13  ;;  %v3017_v13 = vld [vmem:[%s4250_s1 + $0x614] ss:$8 sps:$4 sm:$0xff]  }
  0x4b   :  { %1954 = vmatpush1.bf16.msra.mxu1 %v2916_v14  ;;  %v3012_v14 = vld [vmem:[%s4250_s1 + $0x210] ss:$8 sps:$4 sm:$0xff]  }
  0x4c   :  { %2126 = vmatpush1.bf16.msra.mxu0 %v2919_v15  ;;  %1955 = vmatprep.subr.bf16.mxu1 %v2924_v16  ;;  %v3015_v15 = vld [vmem:[%s4250_s1 + $0x610] ss:$8 sps:$4 sm:$0xff]   ;;  %v3020_v16 = vld [vmem:[%s4250_s1 + $0x224] ss:$8 sps:$4 sm:$0xff]  }
  0x4d   :  { %2127 = vmatprep.subr.bf16.mxu0 %v2927_v17  ;;  %v3023_v17 = vld [vmem:[%s4250_s1 + $0x624] ss:$8 sps:$4 sm:$0xff]  }
  0x4f   :  { %1956 = vmatpush1.bf16.msra.mxu1 %v2922_v18  ;;  %v3018_v18 = vld [vmem:[%s4250_s1 + $0x220] ss:$8 sps:$4 sm:$0xff]  }
  0x50   :  { %2128 = vmatpush1.bf16.msra.mxu0 %v2925_v19  ;;  %1957 = vmatprep.subr.bf16.mxu1 %v2930_v20  ;;  %v3104_v19 = vld [vmem:[%s4251_s0 + $0x14] ss:$72 sps:$4 sm:$0xff]   ;;  %v3021_v20 = vld [vmem:[%s4250_s1 + $0x620] ss:$8 sps:$4 sm:$0xff]  }
  0x51   :  { %2129 = vmatprep.subr.bf16.mxu0 %v2933_v21  ;;  %v3026_v21 = vld [vmem:[%s4250_s1 + $0x234] ss:$8 sps:$4 sm:$0xff]  }
  0x53   :  { %1958 = vmatpush1.bf16.msra.mxu1 %v2928_v22  ;;  %v3029_v22 = vld [vmem:[%s4250_s1 + $0x634] ss:$8 sps:$4 sm:$0xff]  }
  0x54   :  { %2130 = vmatpush1.bf16.msra.mxu0 %v2931_v23  ;;  %1959 = vmatprep.subr.bf16.mxu1 %v2936_v24  ;;  %v3110_v23 = vld [vmem:[%s4251_s0 + $0x34] ss:$72 sps:$4 sm:$0xff]   ;;  %v3024_v24 = vld [vmem:[%s4250_s1 + $0x230] ss:$8 sps:$4 sm:$0xff]  }
  0x55   :  { %2131 = vmatprep.subr.bf16.mxu0 %v2939_v25  ;;  %v3027_v25 = vld [vmem:[%s4250_s1 + $0x630] ss:$8 sps:$4 sm:$0xff]  }
  0x57   :  { %1960 = vmatpush1.bf16.msra.mxu1 %v2934_v26  ;;  %v3032_v26 = vld [vmem:[%s4250_s1 + $0x244] ss:$8 sps:$4 sm:$0xff]  }
  0x58   :  { %2132 = vmatpush1.bf16.msra.mxu0 %v2937_v27  ;;  %1961 = vmatprep.subr.bf16.mxu1 %v2942_v28  ;;  %v3035_v27 = vld [vmem:[%s4250_s1 + $0x644] ss:$8 sps:$4 sm:$0xff]   ;;  %v3030_v28 = vld [vmem:[%s4250_s1 + $0x240] ss:$8 sps:$4 sm:$0xff]  }
  0x59   :  { %2133 = vmatprep.subr.bf16.mxu0 %v2945_v29  ;;  %v3033_v29 = vld [vmem:[%s4250_s1 + $0x640] ss:$8 sps:$4 sm:$0xff]  }
  0x5b   :  { %1962 = vmatpush1.bf16.msra.mxu1 %v2940_v30  ;;  %v3038_v30 = vld [vmem:[%s4250_s1 + $0x254] ss:$8 sps:$4 sm:$0xff]  }
  0x5c   :  { %2134 = vmatpush1.bf16.msra.mxu0 %v2943_v31  ;;  %1963 = vmatprep.subr.bf16.mxu1 %v2948_v32  ;;  %v3041_v31 = vld [vmem:[%s4250_s1 + $0x654] ss:$8 sps:$4 sm:$0xff]   ;;  %v3036_v32 = vld [vmem:[%s4250_s1 + $0x250] ss:$8 sps:$4 sm:$0xff]  }
  0x5d   :  { %2135 = vmatprep.subr.bf16.mxu0 %v2951_v33  ;;  %v3039_v33 = vld [vmem:[%s4250_s1 + $0x650] ss:$8 sps:$4 sm:$0xff]  }
  0x5f   :  { %1964 = vmatpush1.bf16.msra.mxu1 %v2946_v35  ;;  %v3047_v35 = vld [vmem:[%s4250_s1 + $0x664] ss:$8 sps:$4 sm:$0xff]  }
  0x60   :  { %2136 = vmatpush1.bf16.msra.mxu0 %v2949_v36  ;;  %1965 = vmatprep.subr.bf16.mxu1 %v2954_v38  ;;  %v3042_v36 = vld [vmem:[%s4250_s1 + $0x260] ss:$8 sps:$4 sm:$0xff]   ;;  %v3050_v38 = vld [vmem:[%s4250_s1 + $0x274] ss:$8 sps:$4 sm:$0xff]  }
  0x61   :  { %2137 = vmatprep.subr.bf16.mxu0 %v2957_v39  ;;  %v3053_v39 = vld [vmem:[%s4250_s1 + $0x674] ss:$8 sps:$4 sm:$0xff]  }
  0x63   :  { %1966 = vmatpush1.bf16.msra.mxu1 %v2952_v40  ;;  %v3048_v40 = vld [vmem:[%s4250_s1 + $0x270] ss:$8 sps:$4 sm:$0xff]  }
  0x64   :  { %2138 = vmatpush1.bf16.msra.mxu0 %v2955_v41  ;;  %1967 = vmatprep.subr.bf16.mxu1 %v2960_v42  ;;  %v3051_v41 = vld [vmem:[%s4250_s1 + $0x670] ss:$8 sps:$4 sm:$0xff]   ;;  %v3056_v42 = vld [vmem:[%s4250_s1 + $0x284] ss:$8 sps:$4 sm:$0xff]  }
  0x65   :  { %2139 = vmatprep.subr.bf16.mxu0 %v2963_v43  ;;  %v3059_v43 = vld [vmem:[%s4250_s1 + $0x684] ss:$8 sps:$4 sm:$0xff]  }
  0x67   :  { %1968 = vmatpush1.bf16.msra.mxu1 %v2958_v44  ;;  %v3054_v44 = vld [vmem:[%s4250_s1 + $0x280] ss:$8 sps:$4 sm:$0xff]  }
  0x68   :  { %2140 = vmatpush1.bf16.msra.mxu0 %v2961_v45  ;;  %1969 = vmatprep.subr.bf16.mxu1 %v2966_v46  ;;  %v3057_v45 = vld [vmem:[%s4250_s1 + $0x680] ss:$8 sps:$4 sm:$0xff]   ;;  %v3062_v46 = vld [vmem:[%s4250_s1 + $0x294] ss:$8 sps:$4 sm:$0xff]  }
  0x69   :  { %2141 = vmatprep.subr.bf16.mxu0 %v2969_v47  ;;  %v3065_v47 = vld [vmem:[%s4250_s1 + $0x694] ss:$8 sps:$4 sm:$0xff]  }
  0x6b   :  { %1970 = vmatpush1.bf16.msra.mxu1 %v2964_v48  ;;  %v3060_v48 = vld [vmem:[%s4250_s1 + $0x290] ss:$8 sps:$4 sm:$0xff]  }
  0x6c   :  { %2142 = vmatpush1.bf16.msra.mxu0 %v2967_v49  ;;  %1971 = vmatprep.subr.bf16.mxu1 %v2972_v50  ;;  %v3063_v49 = vld [vmem:[%s4250_s1 + $0x690] ss:$8 sps:$4 sm:$0xff]   ;;  %v3068_v50 = vld [vmem:[%s4250_s1 + $0x2a4] ss:$8 sps:$4 sm:$0xff]  }
  0x6d   :  { %2143 = vmatprep.subr.bf16.mxu0 %v2975_v51  ;;  %v3071_v51 = vld [vmem:[%s4250_s1 + $0x6a4] ss:$8 sps:$4 sm:$0xff]  }
  0x6f   :  { %1972 = vmatpush1.bf16.msra.mxu1 %v2970_v52  ;;  %v3066_v52 = vld [vmem:[%s4250_s1 + $0x2a0] ss:$8 sps:$4 sm:$0xff]  }
  0x70   :  { %2144 = vmatpush1.bf16.msra.mxu0 %v2973_v53  ;;  %1973 = vmatprep.subr.bf16.mxu1 %v2978_v54  ;;  %v3069_v53 = vld [vmem:[%s4250_s1 + $0x6a0] ss:$8 sps:$4 sm:$0xff]   ;;  %v3074_v54 = vld [vmem:[%s4250_s1 + $0x2b4] ss:$8 sps:$4 sm:$0xff]  }
  0x71   :  { %2145 = vmatprep.subr.bf16.mxu0 %v2981_v55  ;;  %v3077_v55 = vld [vmem:[%s4250_s1 + $0x6b4] ss:$8 sps:$4 sm:$0xff]  }
  0x73   :  { %1974 = vmatpush1.bf16.msra.mxu1 %v2976_v56  ;;  %v3072_v56 = vld [vmem:[%s4250_s1 + $0x2b0] ss:$8 sps:$4 sm:$0xff]  }
  0x74   :  { %2146 = vmatpush1.bf16.msra.mxu0 %v2979_v57  ;;  %1975 = vmatprep.subr.bf16.mxu1 %v2984_v58  ;;  %v3075_v57 = vld [vmem:[%s4250_s1 + $0x6b0] ss:$8 sps:$4 sm:$0xff]   ;;  %v3080_v58 = vld [vmem:[%s4250_s1 + $0x2c4] ss:$8 sps:$4 sm:$0xff]  }
  0x75   :  { %2147 = vmatprep.subr.bf16.mxu0 %v2987_v59  ;;  %v3083_v59 = vld [vmem:[%s4250_s1 + $0x6c4] ss:$8 sps:$4 sm:$0xff]  }
  0x77   :  { %1976 = vmatpush1.bf16.msra.mxu1 %v2982_v60  ;;  %v3078_v60 = vld [vmem:[%s4250_s1 + $0x2c0] ss:$8 sps:$4 sm:$0xff]  }
  0x78   :  { %2148 = vmatpush1.bf16.msra.mxu0 %v2985_v61  ;;  %1977 = vmatprep.subr.bf16.mxu1 %v2990_v62  ;;  %v3081_v61 = vld [vmem:[%s4250_s1 + $0x6c0] ss:$8 sps:$4 sm:$0xff]   ;;  %v3086_v62 = vld [vmem:[%s4250_s1 + $0x2d4] ss:$8 sps:$4 sm:$0xff]  }
  0x79   :  { %2149 = vmatprep.subr.bf16.mxu0 %v2993_v63  ;;  %v3089_v63 = vld [vmem:[%s4250_s1 + $0x6d4] ss:$8 sps:$4 sm:$0xff]  }
  0x7b   :  { %1978 = vmatpush1.bf16.msra.mxu1 %v2988_v0  ;;  %v3084_v0 = vld [vmem:[%s4250_s1 + $0x2d0] ss:$8 sps:$4 sm:$0xff]  }
  0x7c   :  { %2150 = vmatpush1.bf16.msra.mxu0 %v2991_v1  ;;  %1979 = vmatprep.subr.bf16.mxu1 %v2996_v2  ;;  %v3087_v1 = vld [vmem:[%s4250_s1 + $0x6d0] ss:$8 sps:$4 sm:$0xff]   ;;  %v3092_v2 = vld [vmem:[%s4250_s1 + $0x2e4] ss:$8 sps:$4 sm:$0xff]  }
  0x7d   :  { %2151 = vmatprep.subr.bf16.mxu0 %v2999_v3  ;;  %v3095_v3 = vld [vmem:[%s4250_s1 + $0x6e4] ss:$8 sps:$4 sm:$0xff]  }
  0x7f   :  { %1980 = vmatpush1.bf16.msra.mxu1 %v2994_v4  ;;  %v3090_v4 = vld [vmem:[%s4250_s1 + $0x2e0] ss:$8 sps:$4 sm:$0xff]  }
  0x80   :  { %2152 = vmatpush1.bf16.msra.mxu0 %v2997_v5  ;;  %1992 = vmatprep.subr.bf16.mxu1 %v3005_v6  ;;  %v3093_v5 = vld [vmem:[%s4250_s1 + $0x6e0] ss:$8 sps:$4 sm:$0xff]   ;;  %v3098_v6 = vld [vmem:[%s4250_s1 + $0x2f4] ss:$8 sps:$4 sm:$0xff]  }
  0x81   :  { %2164 = vmatprep.subr.bf16.mxu0 %v3011_v7  ;;  %v3101_v7 = vld [vmem:[%s4250_s1 + $0x6f4] ss:$8 sps:$4 sm:$0xff]  }
  0x82   :  { %1982 = vmatmul.mubr.bf16.vlgmr.msra.gmra.mrb[0].mxu1 %v3000_v8  ;;  %v3096_v8 = vld [vmem:[%s4250_s1 + $0x2f0] ss:$8 sps:$4 sm:$0xff]  }
  0x83   :  { %2154 = vmatmul.mubr.bf16.vlgmr.msra.gmra.mrb[0].mxu0 %v3006_v10  ;;  %1993 = vmatpush1.bf16.msra.mxu1 %v3003_v9  ;;  %v3099_v9 = vld [vmem:[%s4250_s1 + $0x6f0] ss:$8 sps:$4 sm:$0xff]   ;;  %v3107_v10 = vld [vmem:[%s4250_s1 + $0x304] ss:$8 sps:$4 sm:$0xff]  }
  0x84   :  { %2165 = vmatpush1.bf16.msra.mxu0 %v3009_v11  ;;  %1994 = vmatprep.subr.bf16.mxu1 %v3014_v12  ;;  %v3113_v11 = vld [vmem:[%s4250_s1 + $0x704] ss:$8 sps:$4 sm:$0xff]   ;;  %v3102_v12 = vld [vmem:[%s4251_s0 + $0x10] ss:$72 sps:$4 sm:$0xff]  }
  0x85   :  { %2166 = vmatprep.subr.bf16.mxu0 %v3017_v13  ;;  %2024 = vmatprep.mubr.bf16.mxu1 %v3104_v19  ;;  %v3105_v13 = vld [vmem:[%s4250_s1 + $0x300] ss:$8 sps:$4 sm:$0xff]   ;;  %v3209_v19 = vld [vmem:[%s4251_s0 + $0x3c] ss:$72 sps:$4 sm:$0xff]  }
  0x86   :  { %2196 = vmatprep.mubr.bf16.mxu0 %v3110_v23  ;;  %v3125_v23 = vld [vmem:[%s4250_s1 + $0x724] ss:$8 sps:$4 sm:$0xff]  }
  0x87   :  { %1995 = vmatpush1.bf16.msra.mxu1 %v3012_v14  ;;  %v3108_v14 = vld [vmem:[%s4251_s0 + $0x30] ss:$72 sps:$4 sm:$0xff]  }
  0x88   :  { %2167 = vmatpush1.bf16.msra.mxu0 %v3015_v15  ;;  %1996 = vmatprep.subr.bf16.mxu1 %v3020_v16  ;;  %v3111_v15 = vld [vmem:[%s4250_s1 + $0x700] ss:$8 sps:$4 sm:$0xff]   ;;  %v3116_v16 = vld [vmem:[%s4250_s1 + $0x314] ss:$8 sps:$4 sm:$0xff]  }
  0x89   :  { %2168 = vmatprep.subr.bf16.mxu0 %v3023_v17  ;;  %v3119_v17 = vld [vmem:[%s4250_s1 + $0x714] ss:$8 sps:$4 sm:$0xff]  }
  0x8b   :  { %1997 = vmatpush1.bf16.msra.mxu1 %v3018_v18  ;;  %v3206_v18 = vld [vmem:[%s4251_s0 + $0x1c] ss:$72 sps:$4 sm:$0xff]  }
  0x8c   :  { %2169 = vmatpush1.bf16.msra.mxu0 %v3021_v20  ;;  %1998 = vmatprep.subr.bf16.mxu1 %v3026_v21  ;;  %v3114_v20 = vld [vmem:[%s4250_s1 + $0x310] ss:$8 sps:$4 sm:$0xff]  }
  0x8d   :  { %2170 = vmatprep.subr.bf16.mxu0 %v3029_v22  ;;  %v3117_v21 = vld [vmem:[%s4250_s1 + $0x710] ss:$8 sps:$4 sm:$0xff]   ;;  %v3122_v22 = vld [vmem:[%s4250_s1 + $0x324] ss:$8 sps:$4 sm:$0xff]  }
  0x8f   :  { %1999 = vmatpush1.bf16.msra.mxu1 %v3024_v24  ;;  %v3120_v24 = vld [vmem:[%s4250_s1 + $0x320] ss:$8 sps:$4 sm:$0xff]  }
  0x90   :  { %2171 = vmatpush1.bf16.msra.mxu0 %v3027_v25  ;;  %2000 = vmatprep.subr.bf16.mxu1 %v3032_v26  ;;  %v3123_v25 = vld [vmem:[%s4250_s1 + $0x720] ss:$8 sps:$4 sm:$0xff]   ;;  %v3128_v26 = vld [vmem:[%s4250_s1 + $0x334] ss:$8 sps:$4 sm:$0xff]  }
  0x91   :  { %2172 = vmatprep.subr.bf16.mxu0 %v3035_v27  ;;  %v3131_v27 = vld [vmem:[%s4250_s1 + $0x734] ss:$8 sps:$4 sm:$0xff]  }
  0x93   :  { %2001 = vmatpush1.bf16.msra.mxu1 %v3030_v28  ;;  %v3126_v28 = vld [vmem:[%s4250_s1 + $0x330] ss:$8 sps:$4 sm:$0xff]  }
  0x94   :  { %2173 = vmatpush1.bf16.msra.mxu0 %v3033_v29  ;;  %2002 = vmatprep.subr.bf16.mxu1 %v3038_v30  ;;  %v3129_v29 = vld [vmem:[%s4250_s1 + $0x730] ss:$8 sps:$4 sm:$0xff]   ;;  %v3134_v30 = vld [vmem:[%s4250_s1 + $0x344] ss:$8 sps:$4 sm:$0xff]  }
  0x95   :  { %2174 = vmatprep.subr.bf16.mxu0 %v3041_v31  ;;  %v3137_v31 = vld [vmem:[%s4250_s1 + $0x744] ss:$8 sps:$4 sm:$0xff]  }
  0x97   :  { %2003 = vmatpush1.bf16.msra.mxu1 %v3036_v32  ;;  %v3132_v32 = vld [vmem:[%s4250_s1 + $0x340] ss:$8 sps:$4 sm:$0xff]  }
  0x98   :  { %2175 = vmatpush1.bf16.msra.mxu0 %v3039_v33  ;;  %2004 = vmatprep.subr.bf16.mxu1 %v3044_v34  ;;  %v3135_v33 = vld [vmem:[%s4250_s1 + $0x740] ss:$8 sps:$4 sm:$0xff]   ;;  %v3140_v34 = vld [vmem:[%s4250_s1 + $0x354] ss:$8 sps:$4 sm:$0xff]  }
  0x99   :  { %2176 = vmatprep.subr.bf16.mxu0 %v3047_v35  ;;  %v3143_v35 = vld [vmem:[%s4250_s1 + $0x754] ss:$8 sps:$4 sm:$0xff]  }
  0x9b   :  { %2005 = vmatpush1.bf16.msra.mxu1 %v3042_v36  ;;  %v3138_v36 = vld [vmem:[%s4250_s1 + $0x350] ss:$8 sps:$4 sm:$0xff]  }
  0x9c   :  { %2177 = vmatpush1.bf16.msra.mxu0 %v3045_v37  ;;  %2006 = vmatprep.subr.bf16.mxu1 %v3050_v38  ;;  %v3141_v37 = vld [vmem:[%s4250_s1 + $0x750] ss:$8 sps:$4 sm:$0xff]   ;;  %v3146_v38 = vld [vmem:[%s4250_s1 + $0x364] ss:$8 sps:$4 sm:$0xff]  }
  0x9d   :  { %2178 = vmatprep.subr.bf16.mxu0 %v3053_v39  ;;  %v3149_v39 = vld [vmem:[%s4250_s1 + $0x764] ss:$8 sps:$4 sm:$0xff]  }
  0x9f   :  { %2007 = vmatpush1.bf16.msra.mxu1 %v3048_v40  ;;  %v3144_v40 = vld [vmem:[%s4250_s1 + $0x360] ss:$8 sps:$4 sm:$0xff]  }
  0xa0   :  { %2179 = vmatpush1.bf16.msra.mxu0 %v3051_v41  ;;  %2008 = vmatprep.subr.bf16.mxu1 %v3056_v42  ;;  %v3147_v41 = vld [vmem:[%s4250_s1 + $0x760] ss:$8 sps:$4 sm:$0xff]   ;;  %v3152_v42 = vld [vmem:[%s4250_s1 + $0x374] ss:$8 sps:$4 sm:$0xff]  }
  0xa1   :  { %2180 = vmatprep.subr.bf16.mxu0 %v3059_v43  ;;  %v3155_v43 = vld [vmem:[%s4250_s1 + $0x774] ss:$8 sps:$4 sm:$0xff]  }
  0xa3   :  { %2009 = vmatpush1.bf16.msra.mxu1 %v3054_v44  ;;  %v3150_v44 = vld [vmem:[%s4250_s1 + $0x370] ss:$8 sps:$4 sm:$0xff]  }
  0xa4   :  { %2181 = vmatpush1.bf16.msra.mxu0 %v3057_v45  ;;  %2010 = vmatprep.subr.bf16.mxu1 %v3062_v46  ;;  %v3153_v45 = vld [vmem:[%s4250_s1 + $0x770] ss:$8 sps:$4 sm:$0xff]   ;;  %v3158_v46 = vld [vmem:[%s4250_s1 + $0x384] ss:$8 sps:$4 sm:$0xff]  }
  0xa5   :  { %2182 = vmatprep.subr.bf16.mxu0 %v3065_v47  ;;  %v3161_v47 = vld [vmem:[%s4250_s1 + $0x784] ss:$8 sps:$4 sm:$0xff]  }
  0xa7   :  { %2011 = vmatpush1.bf16.msra.mxu1 %v3060_v48  ;;  %v3156_v48 = vld [vmem:[%s4250_s1 + $0x380] ss:$8 sps:$4 sm:$0xff]  }
  0xa8   :  { %2183 = vmatpush1.bf16.msra.mxu0 %v3063_v49  ;;  %2012 = vmatprep.subr.bf16.mxu1 %v3068_v50  ;;  %v3159_v49 = vld [vmem:[%s4250_s1 + $0x780] ss:$8 sps:$4 sm:$0xff]   ;;  %v3164_v50 = vld [vmem:[%s4250_s1 + $0x394] ss:$8 sps:$4 sm:$0xff]  }
  0xa9   :  { %2184 = vmatprep.subr.bf16.mxu0 %v3071_v51  ;;  %v3167_v51 = vld [vmem:[%s4250_s1 + $0x794] ss:$8 sps:$4 sm:$0xff]  }
  0xab   :  { %2013 = vmatpush1.bf16.msra.mxu1 %v3066_v52  ;;  %v3162_v52 = vld [vmem:[%s4250_s1 + $0x390] ss:$8 sps:$4 sm:$0xff]  }
  0xac   :  { %2185 = vmatpush1.bf16.msra.mxu0 %v3069_v53  ;;  %2014 = vmatprep.subr.bf16.mxu1 %v3074_v54  ;;  %v3165_v53 = vld [vmem:[%s4250_s1 + $0x790] ss:$8 sps:$4 sm:$0xff]   ;;  %v3170_v54 = vld [vmem:[%s4250_s1 + $0x3a4] ss:$8 sps:$4 sm:$0xff]  }
  0xad   :  { %2186 = vmatprep.subr.bf16.mxu0 %v3077_v55  ;;  %v3173_v55 = vld [vmem:[%s4250_s1 + $0x7a4] ss:$8 sps:$4 sm:$0xff]  }
  0xaf   :  { %2015 = vmatpush1.bf16.msra.mxu1 %v3072_v56  ;;  %v3168_v56 = vld [vmem:[%s4250_s1 + $0x3a0] ss:$8 sps:$4 sm:$0xff]  }
  0xb0   :  { %2187 = vmatpush1.bf16.msra.mxu0 %v3075_v57  ;;  %2016 = vmatprep.subr.bf16.mxu1 %v3080_v58  ;;  %v3171_v57 = vld [vmem:[%s4250_s1 + $0x7a0] ss:$8 sps:$4 sm:$0xff]   ;;  %v3176_v58 = vld [vmem:[%s4250_s1 + $0x3b4] ss:$8 sps:$4 sm:$0xff]  }
  0xb1   :  { %2188 = vmatprep.subr.bf16.mxu0 %v3083_v59  ;;  %v3179_v59 = vld [vmem:[%s4250_s1 + $0x7b4] ss:$8 sps:$4 sm:$0xff]  }
  0xb3   :  { %2017 = vmatpush1.bf16.msra.mxu1 %v3078_v60  ;;  %v3174_v60 = vld [vmem:[%s4250_s1 + $0x3b0] ss:$8 sps:$4 sm:$0xff]  }
  0xb4   :  { %2189 = vmatpush1.bf16.msra.mxu0 %v3081_v61  ;;  %2018 = vmatprep.subr.bf16.mxu1 %v3086_v62  ;;  %v3177_v61 = vld [vmem:[%s4250_s1 + $0x7b0] ss:$8 sps:$4 sm:$0xff]   ;;  %v3182_v62 = vld [vmem:[%s4250_s1 + $0x3c4] ss:$8 sps:$4 sm:$0xff]  }
  0xb5   :  { %2190 = vmatprep.subr.bf16.mxu0 %v3089_v63  ;;  %v3185_v63 = vld [vmem:[%s4250_s1 + $0x7c4] ss:$8 sps:$4 sm:$0xff]  }
  0xb7   :  { %2019 = vmatpush1.bf16.msra.mxu1 %v3084_v0  ;;  %v3180_v0 = vld [vmem:[%s4250_s1 + $0x3c0] ss:$8 sps:$4 sm:$0xff]  }
  0xb8   :  { %2191 = vmatpush1.bf16.msra.mxu0 %v3087_v1  ;;  %2020 = vmatprep.subr.bf16.mxu1 %v3092_v2  ;;  %v3183_v1 = vld [vmem:[%s4250_s1 + $0x7c0] ss:$8 sps:$4 sm:$0xff]   ;;  %v3188_v2 = vld [vmem:[%s4250_s1 + $0x3d4] ss:$8 sps:$4 sm:$0xff]  }
  0xb9   :  { %2192 = vmatprep.subr.bf16.mxu0 %v3095_v3  ;;  %v3191_v3 = vld [vmem:[%s4250_s1 + $0x7d4] ss:$8 sps:$4 sm:$0xff]  }
  0xbb   :  { %2021 = vmatpush1.bf16.msra.mxu1 %v3090_v4  ;;  %v3186_v4 = vld [vmem:[%s4250_s1 + $0x3d0] ss:$8 sps:$4 sm:$0xff]  }
  0xbc   :  { %2193 = vmatpush1.bf16.msra.mxu0 %v3093_v5  ;;  %2022 = vmatprep.subr.bf16.mxu1 %v3098_v6  ;;  %v3189_v5 = vld [vmem:[%s4250_s1 + $0x7d0] ss:$8 sps:$4 sm:$0xff]   ;;  %v3194_v6 = vld [vmem:[%s4250_s1 + $0x3e4] ss:$8 sps:$4 sm:$0xff]  }
  0xbd   :  { %2194 = vmatprep.subr.bf16.mxu0 %v3101_v7  ;;  %v3197_v7 = vld [vmem:[%s4250_s1 + $0x7e4] ss:$8 sps:$4 sm:$0xff]  }
  0xbf   :  { %2023 = vmatpush1.bf16.msra.mxu1 %v3096_v8  ;;  %v3192_v8 = vld [vmem:[%s4250_s1 + $0x3e0] ss:$8 sps:$4 sm:$0xff]  }
  0xc0   :  { %2195 = vmatpush1.bf16.msra.mxu0 %v3099_v9  ;;  %2035 = vmatprep.subr.bf16.mxu1 %v3107_v10  ;;  %v3195_v9 = vld [vmem:[%s4250_s1 + $0x7e0] ss:$8 sps:$4 sm:$0xff]   ;;  %v3200_v10 = vld [vmem:[%s4250_s1 + $0x3f4] ss:$8 sps:$4 sm:$0xff]  }
  0xc1   :  { %2207 = vmatprep.subr.bf16.mxu0 %v3113_v11  ;;  %v3203_v11 = vld [vmem:[%s4250_s1 + $0x7f4] ss:$8 sps:$4 sm:$0xff]  }
  0xc2   :  { %2025 = vmatmul.mubr.bf16.vlgmr.msra.gmra.mrb[0].mxu1 %v3102_v12  ;;  %v3198_v12 = vld [vmem:[%s4250_s1 + $0x3f0] ss:$8 sps:$4 sm:$0xff]  }
  0xc3   :  { %2197 = vmatmul.mubr.bf16.vlgmr.msra.gmra.mrb[0].mxu0 %v3108_v14  ;;  %2036 = vmatpush1.bf16.msra.mxu1 %v3105_v13  ;;  %v3201_v13 = vld [vmem:[%s4250_s1 + $0x7f0] ss:$8 sps:$4 sm:$0xff]   ;;  %v3212_v14 = vld [vmem:[%s4250_s1 + $0x804] ss:$8 sps:$4 sm:$0xff]  }
  0xc4   :  { %2208 = vmatpush1.bf16.msra.mxu0 %v3111_v15  ;;  %2037 = vmatprep.subr.bf16.mxu1 %v3116_v16  ;;  %v3204_v15 = vld [vmem:[%s4251_s0 + $0x18] ss:$72 sps:$4 sm:$0xff]  }
  0xc5   :  { %2209 = vmatprep.subr.bf16.mxu0 %v3119_v17  ;;  %2067 = vmatprep.mubr.bf16.mxu1 %v3206_v18  ;;  %v3207_v16 = vld [vmem:[%s4251_s0 + $0x38] ss:$72 sps:$4 sm:$0xff]   ;;  %v3260_v18 = vld [vmem:[%s4251_s0 + $0x44] ss:$72 sps:$4 sm:$0xff]  }
  0xc6   :  { %2239 = vmatprep.mubr.bf16.mxu0 %v3209_v19  ;;  %v3210_v17 = vld [vmem:[%s4250_s1 + $0x800] ss:$8 sps:$4 sm:$0xff]   ;;  %v3215_v19 = vld [vmem:[%s4250_s1 + $0x814] ss:$8 sps:$4 sm:$0xff]  }
  0xc7   :  { %2038 = vmatpush1.bf16.msra.mxu1 %v3114_v20  ;;  %v3213_v20 = vld [vmem:[%s4250_s1 + $0x810] ss:$8 sps:$4 sm:$0xff]  }
  0xc8   :  { %2210 = vmatpush1.bf16.msra.mxu0 %v3117_v21  ;;  %2039 = vmatprep.subr.bf16.mxu1 %v3122_v22  ;;  %v3218_v21 = vld [vmem:[%s4250_s1 + $0x824] ss:$8 sps:$4 sm:$0xff]   ;;  %v3216_v22 = vld [vmem:[%s4250_s1 + $0x820] ss:$8 sps:$4 sm:$0xff]  }
  0xc9   :  { %2211 = vmatprep.subr.bf16.mxu0 %v3125_v23  ;;  %v3221_v23 = vld [vmem:[%s4250_s1 + $0x834] ss:$8 sps:$4 sm:$0xff]  }
  0xcb   :  { %2040 = vmatpush1.bf16.msra.mxu1 %v3120_v24  ;;  %v3219_v24 = vld [vmem:[%s4250_s1 + $0x830] ss:$8 sps:$4 sm:$0xff]  }
  0xcc   :  { %2212 = vmatpush1.bf16.msra.mxu0 %v3123_v25  ;;  %2041 = vmatprep.subr.bf16.mxu1 %v3128_v26  ;;  %v3224_v25 = vld [vmem:[%s4250_s1 + $0x844] ss:$8 sps:$4 sm:$0xff]   ;;  %v3222_v26 = vld [vmem:[%s4250_s1 + $0x840] ss:$8 sps:$4 sm:$0xff]  }
  0xcd   :  { %2213 = vmatprep.subr.bf16.mxu0 %v3131_v27  ;;  %v3227_v27 = vld [vmem:[%s4250_s1 + $0x854] ss:$8 sps:$4 sm:$0xff]  }
  0xcf   :  { %2042 = vmatpush1.bf16.msra.mxu1 %v3126_v28  ;;  %v3225_v28 = vld [vmem:[%s4250_s1 + $0x850] ss:$8 sps:$4 sm:$0xff]  }
  0xd0   :  { %2214 = vmatpush1.bf16.msra.mxu0 %v3129_v29  ;;  %2043 = vmatprep.subr.bf16.mxu1 %v3134_v30  ;;  %v3230_v29 = vld [vmem:[%s4250_s1 + $0x864] ss:$8 sps:$4 sm:$0xff]   ;;  %v3228_v30 = vld [vmem:[%s4250_s1 + $0x860] ss:$8 sps:$4 sm:$0xff]  }
  0xd1   :  { %2215 = vmatprep.subr.bf16.mxu0 %v3137_v31  ;;  %v3233_v31 = vld [vmem:[%s4250_s1 + $0x874] ss:$8 sps:$4 sm:$0xff]  }
  0xd3   :  { %2044 = vmatpush1.bf16.msra.mxu1 %v3132_v32  ;;  %v3231_v32 = vld [vmem:[%s4250_s1 + $0x870] ss:$8 sps:$4 sm:$0xff]  }
  0xd4   :  { %2216 = vmatpush1.bf16.msra.mxu0 %v3135_v33  ;;  %2045 = vmatprep.subr.bf16.mxu1 %v3140_v34  ;;  %v3236_v33 = vld [vmem:[%s4250_s1 + $0x884] ss:$8 sps:$4 sm:$0xff]   ;;  %v3234_v34 = vld [vmem:[%s4250_s1 + $0x880] ss:$8 sps:$4 sm:$0xff]  }
  0xd5   :  { %2217 = vmatprep.subr.bf16.mxu0 %v3143_v35  ;;  %v3239_v35 = vld [vmem:[%s4250_s1 + $0x894] ss:$8 sps:$4 sm:$0xff]  }
  0xd7   :  { %2046 = vmatpush1.bf16.msra.mxu1 %v3138_v36  ;;  %v3237_v36 = vld [vmem:[%s4250_s1 + $0x890] ss:$8 sps:$4 sm:$0xff]  }
  0xd8   :  { %2218 = vmatpush1.bf16.msra.mxu0 %v3141_v37  ;;  %2047 = vmatprep.subr.bf16.mxu1 %v3146_v38  ;;  %v3242_v37 = vld [vmem:[%s4250_s1 + $0x8a4] ss:$8 sps:$4 sm:$0xff]   ;;  %v3240_v38 = vld [vmem:[%s4250_s1 + $0x8a0] ss:$8 sps:$4 sm:$0xff]  }
  0xd9   :  { %2219 = vmatprep.subr.bf16.mxu0 %v3149_v39  ;;  %v3245_v39 = vld [vmem:[%s4250_s1 + $0x8b4] ss:$8 sps:$4 sm:$0xff]  }
  0xdb   :  { %2048 = vmatpush1.bf16.msra.mxu1 %v3144_v40  ;;  %v3243_v40 = vld [vmem:[%s4250_s1 + $0x8b0] ss:$8 sps:$4 sm:$0xff]  }
  0xdc   :  { %2220 = vmatpush1.bf16.msra.mxu0 %v3147_v41  ;;  %2049 = vmatprep.subr.bf16.mxu1 %v3152_v42  ;;  %v3248_v41 = vld [vmem:[%s4250_s1 + $0x8c4] ss:$8 sps:$4 sm:$0xff]   ;;  %v3246_v42 = vld [vmem:[%s4250_s1 + $0x8c0] ss:$8 sps:$4 sm:$0xff]  }
  0xdd   :  { %2221 = vmatprep.subr.bf16.mxu0 %v3155_v43  ;;  %v3251_v43 = vld [vmem:[%s4250_s1 + $0x8d4] ss:$8 sps:$4 sm:$0xff]  }
  0xdf   :  { %2050 = vmatpush1.bf16.msra.mxu1 %v3150_v44  ;;  %v3249_v44 = vld [vmem:[%s4250_s1 + $0x8d0] ss:$8 sps:$4 sm:$0xff]  }
  0xe0   :  { %2222 = vmatpush1.bf16.msra.mxu0 %v3153_v45  ;;  %2051 = vmatprep.subr.bf16.mxu1 %v3158_v46  ;;  %v3254_v45 = vld [vmem:[%s4250_s1 + $0x8e4] ss:$8 sps:$4 sm:$0xff]   ;;  %v3252_v46 = vld [vmem:[%s4250_s1 + $0x8e0] ss:$8 sps:$4 sm:$0xff]  }
  0xe1   :  { %2223 = vmatprep.subr.bf16.mxu0 %v3161_v47  ;;  %v3257_v47 = vld [vmem:[%s4250_s1 + $0x8f4] ss:$8 sps:$4 sm:$0xff]  }
  0xe3   :  { %2052 = vmatpush1.bf16.msra.mxu1 %v3156_v48  ;;  %v3255_v48 = vld [vmem:[%s4250_s1 + $0x8f0] ss:$8 sps:$4 sm:$0xff]  }
  0xe4   :  { %2224 = vmatpush1.bf16.msra.mxu0 %v3159_v49  ;;  %2053 = vmatprep.subr.bf16.mxu1 %v3164_v50  ;;  %v3258_v49 = vld [vmem:[%s4251_s0 + $0x40] ss:$72 sps:$4 sm:$0xff]   ;;  %v366_v50 = vlaneseq }
  0xe5   :  { %2225 = vmatprep.subr.bf16.mxu0 %v3167_v51 }
  0xe6   :  { %vm4211_vm0 = vcmp.lt.s32.totalorder %v366_v50, 256 }
  0xe7   :  { %2054 = vmatpush1.bf16.msra.mxu1 %v3162_v52  ;;  %v3261_v52 = vmov 0.0  }
  0xe8   :  { %2226 = vmatpush1.bf16.msra.mxu0 %v3165_v53  ;;  %2055 = vmatprep.subr.bf16.mxu1 %v3170_v54  ;;  %2332 = vst.msk [vmem:[%s4252_s4] sm:$0x3] %vm4211_vm0, %v3261_v52  ;;  %2333 = vst.msk [vmem:[%s4253_s5] sm:$0x3] %vm4211_vm0, %v3261_v52 }
  0xe9   :  { %2227 = vmatprep.subr.bf16.mxu0 %v3173_v55 }
  0xeb   :  { %2056 = vmatpush1.bf16.msra.mxu1 %v3168_v56 }
  0xec   :  { %2228 = vmatpush1.bf16.msra.mxu0 %v3171_v57  ;;  %2057 = vmatprep.subr.bf16.mxu1 %v3176_v58  ;;  %v367_v57 = vshrl.u32 %v366_v50, 7 }
  0xed   :  { %2229 = vmatprep.subr.bf16.mxu0 %v3179_v59  ;;  %v364_v59 = vld [vmem:[%s4254_s2] sm:$0x3] }
  0xee   :  { %v368_v58 = vsub.s32 0, %v367_v57 }
  0xef   :  { %2058 = vmatpush1.bf16.msra.mxu1 %v3174_v60  ;;  %v372_v60 = vsub.s32 1, %v367_v57 }
  0xf0   :  { %2230 = vmatpush1.bf16.msra.mxu0 %v3177_v61  ;;  %2059 = vmatprep.subr.bf16.mxu1 %v3182_v62  ;;  %v369_v61 = vrot.slane %v364_v59, %v368_v58 }
  0xf1   :  { %2231 = vmatprep.subr.bf16.mxu0 %v3185_v63  ;;  %v373_v62 = vrot.slane %v364_v59, %v372_v60 }
  0xf3   :  { %2060 = vmatpush1.bf16.msra.mxu1 %v3180_v0 }
  0xf4   :  { %2232 = vmatpush1.bf16.msra.mxu0 %v3183_v1  ;;  %2061 = vmatprep.subr.bf16.mxu1 %v3188_v2 }
  0xf5   :  { %2233 = vmatprep.subr.bf16.mxu0 %v3191_v3 }
  0xf7   :  { %2062 = vmatpush1.bf16.msra.mxu1 %v3186_v4 }
  0xf8   :  { %2234 = vmatpush1.bf16.msra.mxu0 %v3189_v5  ;;  %2063 = vmatprep.subr.bf16.mxu1 %v3194_v6 }
  0xf9   :  { %2235 = vmatprep.subr.bf16.mxu0 %v3197_v7 }
  0xfb   :  { %2064 = vmatpush1.bf16.msra.mxu1 %v3192_v8 }
  0xfc   :  { %2236 = vmatpush1.bf16.msra.mxu0 %v3195_v9  ;;  %2065 = vmatprep.subr.bf16.mxu1 %v3200_v10 }
  0xfd   :  { %2237 = vmatprep.subr.bf16.mxu0 %v3203_v11 }
  0xff   :  { %2066 = vmatpush1.bf16.msra.mxu1 %v3198_v12 }
 0x100   :  { %2238 = vmatpush1.bf16.msra.mxu0 %v3201_v13 }
 0x101   :  { %2250 = vmatprep.subr.bf16.mxu0 %v3212_v14 }
 0x102   :  { %2068 = vmatmul.mubr.bf16.vlgmr.msra.gmra.mrb[0].mxu1 %v3204_v15 }
 0x103   :  { %2240 = vmatmul.mubr.bf16.vlgmr.msra.gmra.mrb[0].mxu0 %v3207_v16 }
 0x104   :  { %2251 = vmatpush1.bf16.msra.mxu0 %v3210_v17  ;;  %2282 = vmatprep.mubr.bf16.mxu0 %v3260_v18  ;;  %v3262_v18 = vmov 1966171168  }
 0x105   :  { %2252 = vmatprep.subr.bf16.mxu0 %v3215_v19  ;;  %v2353_v19 = vunpack.c.l.s4 %v3262_v18 }
 0x108   :  { %2253 = vmatpush1.bf16.msra.mxu0 %v3213_v20 }
 0x109   :  { %2254 = vmatprep.subr.bf16.mxu0 %v3218_v21 }
 0x10c   :  { %2255 = vmatpush1.bf16.msra.mxu0 %v3216_v22 }
 0x10d   :  { %2256 = vmatprep.subr.bf16.mxu0 %v3221_v23 }
 0x110   :  { %2257 = vmatpush1.bf16.msra.mxu0 %v3219_v24 }
 0x111   :  { %2258 = vmatprep.subr.bf16.mxu0 %v3224_v25 }
 0x114   :  { %2259 = vmatpush1.bf16.msra.mxu0 %v3222_v26 }
 0x115   :  { %2260 = vmatprep.subr.bf16.mxu0 %v3227_v27 }
 0x118   :  { %2261 = vmatpush1.bf16.msra.mxu0 %v3225_v28 }
 0x119   :  { %2262 = vmatprep.subr.bf16.mxu0 %v3230_v29  ;;  %v2354_v29 = vunpack.c.0.s8 %v2353_v19 }
 0x11c   :  { %2263 = vmatpush1.bf16.msra.mxu0 %v3228_v30 }
 0x11d   :  { %2264 = vmatprep.subr.bf16.mxu0 %v3233_v31 }
 0x120   :  { %2265 = vmatpush1.bf16.msra.mxu0 %v3231_v32 }
 0x121   :  { %2266 = vmatprep.subr.bf16.mxu0 %v3236_v33 }
 0x124   :  { %2267 = vmatpush1.bf16.msra.mxu0 %v3234_v34 }
 0x125   :  { %2268 = vmatprep.subr.bf16.mxu0 %v3239_v35 }
 0x128   :  { %2269 = vmatpush1.bf16.msra.mxu0 %v3237_v36 }
 0x129   :  { %2270 = vmatprep.subr.bf16.mxu0 %v3242_v37 }
 0x12c   :  { %2271 = vmatpush1.bf16.msra.mxu0 %v3240_v38  ;;  %v2357_v38 = vsub.s32 %v2354_v29, %v367_v57 }
 0x12d   :  { %2272 = vmatprep.subr.bf16.mxu0 %v3245_v39 }
 0x130   :  { %2273 = vmatpush1.bf16.msra.mxu0 %v3243_v40 }
 0x131   :  { %2274 = vmatprep.subr.bf16.mxu0 %v3248_v41 }
 0x134   :  { %2275 = vmatpush1.bf16.msra.mxu0 %v3246_v42 }
 0x135   :  { %2276 = vmatprep.subr.bf16.mxu0 %v3251_v43 }
 0x138   :  { %2277 = vmatpush1.bf16.msra.mxu0 %v3249_v44 }
 0x139   :  { %2278 = vmatprep.subr.bf16.mxu0 %v3254_v45 }
 0x13c   :  { %2279 = vmatpush1.bf16.msra.mxu0 %v3252_v46  ;;  %v2334_v46 = vld [vmem:[%s4252_s4] sm:$0x3] }
 0x13d   :  { %2280 = vmatprep.subr.bf16.mxu0 %v3257_v47 }
 0x140   :  { %2281 = vmatpush1.bf16.msra.mxu0 %v3255_v48 }
 0x143   :  { %2283 = vmatmul.mubr.bf16.vlgmr.msra.gmra.mrb[0].mxu0 %v3258_v49  ;;  %v2373_v49 = vld [vmem:[%s4253_s5] sm:$0x3] }
 0x1d5   :  { %v2069_v53 = vpop.f32.mrb[0].mxu1 }
 0x1d6   :  { %v2071_v54 = vpop.f32.mrb[1].mxu1  ;;  %v2764_v63 = vadd.f32 %v2069_v53, %v369_v61 }
 0x1d7   :  { %v2073_v55 = vpop.f32.mrb[2].mxu1  ;;  %v2766_v0 = vadd.f32 %v2071_v54, %v373_v62 }
 0x1d8   :  { %v2075_v56 = vpop.f32.mrb[3].mxu1  ;;  %v2768_v2 = vadd.f32 %v2073_v55, %v369_v61 }
 0x1d9   :  { %v2770_v5 = vadd.f32 %v2075_v56, %v373_v62 }
 0x216   :  { %v2284_v1 = vpop.f32.mrb[0].mxu0 }
 0x217   :  { %v2765_v3 = vadd.f32 %v2764_v63, %v2284_v1  ;;  %v2286_v4 = vpop.f32.mrb[1].mxu0 }
 0x218   :  { %v2767_v6 = vadd.f32 %v2766_v0, %v2286_v4  ;;  %v2288_v7 = vpop.f32.mrb[2].mxu0 }
 0x219   :  { %v2336_v8 = vrot.slane %v2765_v3, 4  ;;  %v2374_v9 = vmul.f32 %v2765_v3, %v2765_v3  ;;  %v2769_v10 = vadd.f32 %v2768_v2, %v2288_v7  ;;  %v2290_v11 = vpop.f32.mrb[3].mxu0 }
 0x21a   :  { %v2343_v12 = vrot.slane %v2767_v6, 4  ;;  %v2375_v13 = vmul.f32 %v2767_v6, %v2767_v6  ;;  %v2771_v14 = vadd.f32 %v2770_v5, %v2290_v11  ;;  %v2762_v15 = vpack.c.bf16 %v2767_v6, %v2765_v3 }
 0x21b   :  { %v2337_v16 = vadd.f32 %v2765_v3, %v2336_v8  ;;  %v2379_v17 = vrot.slane %v2374_v9, 4 }
 0x21c   :  { %v2344_v20 = vadd.f32 %v2767_v6, %v2343_v12  ;;  %v2386_v21 = vrot.slane %v2375_v13, 4  ;;  %v2763_v22 = vpack.c.bf16 %v2771_v14, %v2769_v10  ;;  %2305 = vst [vmem:[%s4255_s3] sm:$0xff] %v2762_v15 }
 0x21d   :  { %v2338_v23 = vrot.slane %v2337_v16, 2  ;;  %v2380_v24 = vadd.f32 %v2379_v17, %v2374_v9 }
 0x21e   :  { %v2345_v25 = vrot.slane %v2344_v20, 2  ;;  %v2387_v26 = vadd.f32 %v2386_v21, %v2375_v13  ;;  %2306 = vst [vmem:[%s4255_s3 + $0x8] sm:$0xff] %v2763_v22 }
 0x21f   :  { %v2339_v27 = vadd.f32 %v2338_v23, %v2337_v16  ;;  %v2381_v28 = vrot.slane %v2380_v24, 2 }
 0x220   :  { %v2346_v30 = vadd.f32 %v2345_v25, %v2344_v20  ;;  %v2388_v31 = vrot.slane %v2387_v26, 2 }
 0x221   :  { %v2340_v32 = vrot.slane %v2339_v27, 1  ;;  %v2382_v33 = vadd.f32 %v2381_v28, %v2380_v24 }
 0x222   :  { %v2347_v34 = vrot.slane %v2346_v30, 1  ;;  %v2389_v35 = vadd.f32 %v2388_v31, %v2387_v26 }
 0x223   :  { %v2341_v36 = vadd.f32 %v2340_v32, %v2339_v27  ;;  %v2383_v37 = vrot.slane %v2382_v33, 1 }
 0x224   :  { %v2348_v39 = vadd.f32 %v2347_v34, %v2346_v30  ;;  %v2390_v40 = vrot.slane %v2389_v35, 1 }
 0x225   :  { %v2384_v41 = vadd.f32 %v2383_v37, %v2382_v33 }
 0x226   :  { %v2351_v42 = vcombine.low %v2341_v36, %v2348_v39  ;;  %v2391_v43 = vadd.f32 %v2390_v40, %v2389_v35 }
 0x228   :  { %v2358_v44 = vrot.slane %v2351_v42, %v2357_v38  ;;  %v2394_v45 = vcombine.low %v2384_v41, %v2391_v43 }
 0x22a   :  { %v2365_v47 = vrot.slane %v2358_v44, %v2357_v38  ;;  %v2401_v48 = vrot.slane %v2394_v45, %v2357_v38 }
 0x22c   :  { %v2367_v50 = vadd.f32 %v2365_v47, %v2334_v46  ;;  %v2408_v52 = vrot.slane %v2401_v48, %v2357_v38 }
 0x22e   :  { %2372 = vst.msk [vmem:[%s4252_s4] sm:$0x3] %vm4211_vm0, %v2367_v50  ;;  %v2410_v53 = vadd.f32 %v2408_v52, %v2373_v49 }
 0x230   :  { %2411 = vst.msk [vmem:[%s4253_s5] sm:$0x3] %vm4211_vm0, %v2410_v53 }

// kernel: discriminator_forward.34
= control target key start
LH: loop header
LB: loop body
LE: loop exit
PB: predicated region body
PF: predicated region fallthrough
CT: control target
= control target key end

     0   :  { %v88_v8 = vlaneseq  ;;  %s307_s1 = inlined_call_operand.vmem [shape: f32[1,1,512], index: 1, kind: input, shape index: {}]   ;;  %s308_s2 = inlined_call_operand.vmem [shape: f32[1,1,512], index: 2, kind: input, shape index: {}]   ;;  %s309_s0 = inlined_call_operand.vmem [shape: bf16[16,512], index: 0, kind: input, shape index: {}]   ;;  %s310_s3 = inlined_call_operand.vmem [shape: f32[1,512], index: 3, kind: input, shape index: {}]   ;;  %s311_s4 = inlined_call_operand.vmem [shape: f32[1,512], index: 4, kind: input, shape index: {}]   ;;  %s312_s5 = inlined_call_operand.vmem [shape: bf16[16,512], index: 5, kind: output, shape index: {}]  }
   0x1   :  { %v61_v0 = vld [vmem:[%s307_s1] sm:$0xf]  ;;  %v76_v12 = vld [vmem:[%s309_s0 + $0x8] sm:$0xff]  ;;  %v77_v16 = vld [vmem:[%s309_s0 + $0x10] sm:$0xff] }
   0x2   :  { %v63_v1 = vld [vmem:[%s308_s2] sm:$0xf]  ;;  %v62_v2 = vmul.f32 0.125, %v61_v0  ;;  %v89_v9 = vshrl.u32 %v88_v8, 7  ;;  %v78_v17 = vld [vmem:[%s309_s0 + $0x18] sm:$0xff]  ;;  %v81_v23 = vunpack.c.l.bf16 %v76_v12  ;;  %v82_v25 = vunpack.c.h.bf16 %v76_v12 }
   0x3   :  { %v64_v3 = vmul.f32 0.125, %v63_v1  ;;  %v70_v10 = vld [vmem:[%s310_s3] sm:$0xf]  ;;  %v83_v26 = vunpack.c.l.bf16 %v77_v16  ;;  %v84_v27 = vunpack.c.h.bf16 %v77_v16  ;;  %v85_v28 = vunpack.c.l.bf16 %v78_v17 }
   0x4   :  { %v65_v4 = vmul.f32 %v62_v2, %v62_v2  ;;  %v75_v11 = vld [vmem:[%s309_s0] sm:$0xff]  ;;  %v90_v13 = vsub.s32 0, %v89_v9  ;;  %v94_v14 = vsub.s32 1, %v89_v9  ;;  %v98_v15 = vsub.s32 2, %v89_v9 }
   0x5   :  { %v102_v19 = vsub.s32 3, %v89_v9  ;;  %v79_v21 = vunpack.c.l.bf16 %v75_v11  ;;  %v80_v22 = vunpack.c.h.bf16 %v75_v11  ;;  %v72_v24 = vld [vmem:[%s311_s4] sm:$0xf]  ;;  %v86_v34 = vunpack.c.h.bf16 %v78_v17 }
   0x6   :  { %v66_v5 = vsub.f32 %v64_v3, %v65_v4 }
   0x8   :  { %v67_v6 = vmax.f32 %v66_v5, 0.0 }
   0xa   :  { %v68_v7 = vadd.f32 1e-05, %v67_v6 }
   0xc   :  { %239 = vrsqrt.f32 %v68_v7 }
  0x16   :  { %v240_v18 = vpop.eup %239 }
  0x17   :  { %v71_v20 = vmul.f32 %v240_v18, %v70_v10 }
  0x19   :  { %v73_v29 = vmul.f32 %v71_v20, %v62_v2  ;;  %v91_v30 = vrot.slane %v71_v20, %v90_v13  ;;  %v95_v31 = vrot.slane %v71_v20, %v94_v14  ;;  %v99_v32 = vrot.slane %v71_v20, %v98_v15 }
  0x1a   :  { %v103_v33 = vrot.slane %v71_v20, %v102_v19 }
  0x1b   :  { %v74_v35 = vsub.f32 %v72_v24, %v73_v29  ;;  %v108_v36 = vmul.f32 %v91_v30, %v79_v21  ;;  %v109_v37 = vmul.f32 %v95_v31, %v80_v22  ;;  %v110_v38 = vmul.f32 %v99_v32, %v81_v23 }
  0x1c   :  { %v111_v39 = vmul.f32 %v103_v33, %v82_v25  ;;  %v112_v40 = vmul.f32 %v91_v30, %v83_v26  ;;  %v113_v41 = vmul.f32 %v95_v31, %v84_v27  ;;  %v114_v42 = vmul.f32 %v99_v32, %v85_v28 }
  0x1d   :  { %v120_v43 = vrot.slane %v74_v35, %v90_v13  ;;  %v124_v44 = vrot.slane %v74_v35, %v94_v14  ;;  %v128_v45 = vrot.slane %v74_v35, %v98_v15  ;;  %v132_v46 = vrot.slane %v74_v35, %v102_v19 }
  0x1e   :  { %v115_v47 = vmul.f32 %v103_v33, %v86_v34 }
  0x1f   :  { %v137_v48 = vadd.f32 %v120_v43, %v108_v36  ;;  %v138_v49 = vadd.f32 %v124_v44, %v109_v37  ;;  %v139_v50 = vadd.f32 %v128_v45, %v110_v38  ;;  %v140_v51 = vadd.f32 %v132_v46, %v111_v39 }
  0x20   :  { %v141_v52 = vadd.f32 %v120_v43, %v112_v40  ;;  %v142_v53 = vadd.f32 %v124_v44, %v113_v41  ;;  %v143_v54 = vadd.f32 %v128_v45, %v114_v42  ;;  %v144_v55 = vadd.f32 %v132_v46, %v115_v47 }
  0x21   :  { %vm145_vm0 = vcmp.ge.f32.partialorder %v137_v48, 0.0  ;;  %vm146_vm1 = vcmp.ge.f32.partialorder %v138_v49, 0.0  ;;  %v153_v56 = vmul.f32 0.2, %v137_v48  ;;  %v154_v57 = vmul.f32 0.2, %v138_v49 }
  0x22   :  { %vm147_vm2 = vcmp.ge.f32.partialorder %v139_v50, 0.0  ;;  %vm148_vm3 = vcmp.ge.f32.partialorder %v140_v51, 0.0  ;;  %v155_v58 = vmul.f32 0.2, %v139_v50  ;;  %v156_v59 = vmul.f32 0.2, %v140_v51 }
  0x23   :  { %v161_v60 = vsel %vm145_vm0, %v137_v48, %v153_v56  ;;  %v162_v61 = vsel %vm146_vm1, %v138_v49, %v154_v57  ;;  %vm149_vm4 = vcmp.ge.f32.partialorder %v141_v52, 0.0  ;;  %vm150_vm5 = vcmp.ge.f32.partialorder %v142_v53, 0.0 }
  0x24   :  { %v235_v62 = vpack.c.bf16 %v162_v61, %v161_v60  ;;  %v163_v63 = vsel %vm147_vm2, %v139_v50, %v155_v58  ;;  %v164_v0 = vsel %vm148_vm3, %v140_v51, %v156_v59  ;;  %v157_v1 = vmul.f32 0.2, %v141_v52 }
  0x25   :  { %v236_v2 = vpack.c.bf16 %v164_v0, %v163_v63  ;;  %v158_v3 = vmul.f32 0.2, %v142_v53  ;;  %vm151_vm6 = vcmp.ge.f32.partialorder %v143_v54, 0.0  ;;  %vm152_vm7 = vcmp.ge.f32.partialorder %v144_v55, 0.0 }
  0x26   :  { %193 = vst [vmem:[%s312_s5] sm:$0xff] %v235_v62  ;;  %v165_v4 = vsel %vm149_vm4, %v141_v52, %v157_v1  ;;  %v159_v5 = vmul.f32 0.2, %v143_v54  ;;  %v160_v6 = vmul.f32 0.2, %v144_v55 }
  0x27   :  { %194 = vst [vmem:[%s312_s5 + $0x8] sm:$0xff] %v236_v2  ;;  %v166_v7 = vsel %vm150_vm5, %v142_v53, %v158_v3 }
  0x28   :  { %v237_v8 = vpack.c.bf16 %v166_v7, %v165_v4  ;;  %v167_v9 = vsel %vm151_vm6, %v143_v54, %v159_v5  ;;  %v168_v10 = vsel %vm152_vm7, %v144_v55, %v160_v6 }
  0x29   :  { %v238_v11 = vpack.c.bf16 %v168_v10, %v167_v9 }
  0x2a   :  { %195 = vst [vmem:[%s312_s5 + $0x10] sm:$0xff] %v237_v8 }
  0x2b   :  { %196 = vst [vmem:[%s312_s5 + $0x18] sm:$0xff] %v238_v11 }

// kernel: discriminator_forward.35
= control target key start
LH: loop header
LB: loop body
LE: loop exit
PB: predicated region body
PF: predicated region fallthrough
CT: control target
= control target key end

     0   :  { %s646_s1 = inlined_call_operand.vmem [shape: bf16[512,128], index: 1, kind: input, shape index: {}]   ;;  %s647_s0 = inlined_call_operand.vmem [shape: bf16[16,512], index: 0, kind: input, shape index: {}]   ;;  %s648_s2 = inlined_call_operand.vmem [shape: f32[1,128], index: 2, kind: input, shape index: {}]   ;;  %s649_s3 = inlined_call_operand.vmem [shape: f32[16,128], index: 3, kind: output, shape index: {}]  }
   0x1   :  { %v471_v0 = vld [vmem:[%s646_s1 + $0x40] sm:$0xff]   ;;  %v475_v4 = vld [vmem:[%s646_s1 + $0x48] sm:$0xff]   ;;  %v479_v8 = vld [vmem:[%s646_s1 + $0x50] sm:$0xff]  }
   0x2   :  { %v472_v1 = vld [vmem:[%s646_s1 + $0xc0] sm:$0xff]   ;;  %427 = vmatprep.subr.bf16.mxu0 %v471_v0  ;;  %v476_v5 = vld [vmem:[%s646_s1 + $0xc8] sm:$0xff]   ;;  %v480_v9 = vld [vmem:[%s646_s1 + $0xd0] sm:$0xff]  }
   0x3   :  { %v473_v2 = vld [vmem:[%s646_s1] sm:$0xff]   ;;  %449 = vmatprep.subr.bf16.mxu1 %v472_v1  ;;  %v477_v6 = vld [vmem:[%s646_s1 + $0x8] sm:$0xff]   ;;  %v481_v10 = vld [vmem:[%s646_s1 + $0x10] sm:$0xff]  }
   0x4   :  { %v474_v3 = vld [vmem:[%s646_s1 + $0x80] sm:$0xff]   ;;  %428 = vmatpush3.bf16.msra.mxu0 %v473_v2  ;;  %v478_v7 = vld [vmem:[%s646_s1 + $0x88] sm:$0xff]   ;;  %v482_v11 = vld [vmem:[%s646_s1 + $0x90] sm:$0xff]  }
   0x5   :  { %450 = vmatpush3.bf16.msra.mxu1 %v474_v3  ;;  %429 = vmatprep.subr.bf16.mxu0 %v475_v4  ;;  %v483_v12 = vld [vmem:[%s646_s1 + $0x58] sm:$0xff]   ;;  %v487_v16 = vld [vmem:[%s646_s1 + $0x60] sm:$0xff]   ;;  %v491_v20 = vld [vmem:[%s646_s1 + $0x68] sm:$0xff]  }
   0x6   :  { %451 = vmatprep.subr.bf16.mxu1 %v476_v5  ;;  %v484_v13 = vld [vmem:[%s646_s1 + $0xd8] sm:$0xff]   ;;  %v488_v17 = vld [vmem:[%s646_s1 + $0xe0] sm:$0xff]   ;;  %v492_v21 = vld [vmem:[%s646_s1 + $0xe8] sm:$0xff]  }
   0x7   :  { %v485_v14 = vld [vmem:[%s646_s1 + $0x18] sm:$0xff]   ;;  %v489_v18 = vld [vmem:[%s646_s1 + $0x20] sm:$0xff]   ;;  %v493_v22 = vld [vmem:[%s646_s1 + $0x28] sm:$0xff]  }
   0x8   :  { %430 = vmatpush3.bf16.msra.mxu0 %v477_v6  ;;  %v486_v15 = vld [vmem:[%s646_s1 + $0x98] sm:$0xff]   ;;  %v490_v19 = vld [vmem:[%s646_s1 + $0xa0] sm:$0xff]   ;;  %v494_v23 = vld [vmem:[%s646_s1 + $0xa8] sm:$0xff]  }
   0x9   :  { %452 = vmatpush3.bf16.msra.mxu1 %v478_v7  ;;  %431 = vmatprep.subr.bf16.mxu0 %v479_v8  ;;  %v495_v24 = vld [vmem:[%s646_s1 + $0x70] sm:$0xff]   ;;  %v499_v28 = vld [vmem:[%s646_s1 + $0x78] sm:$0xff]   ;;  %v390_v38 = vld [vmem:[%s648_s2] ss:$0 sm:$0xff] }
   0xa   :  { %453 = vmatprep.subr.bf16.mxu1 %v480_v9  ;;  %v496_v25 = vld [vmem:[%s646_s1 + $0xf0] sm:$0xff]   ;;  %v500_v29 = vld [vmem:[%s646_s1 + $0xf8] sm:$0xff]  }
   0xb   :  { %v497_v26 = vld [vmem:[%s646_s1 + $0x30] sm:$0xff]   ;;  %v501_v30 = vld [vmem:[%s646_s1 + $0x38] sm:$0xff]  }
   0xc   :  { %432 = vmatpush3.bf16.msra.mxu0 %v481_v10  ;;  %v498_v27 = vld [vmem:[%s646_s1 + $0xb0] sm:$0xff]   ;;  %v502_v31 = vld [vmem:[%s646_s1 + $0xb8] sm:$0xff]  }
   0xd   :  { %454 = vmatpush3.bf16.msra.mxu1 %v482_v11  ;;  %433 = vmatprep.subr.bf16.mxu0 %v483_v12  ;;  %v503_v32 = vld [vmem:[%s647_s0] ss:$16 sps:$4 sm:$0xff]   ;;  %v505_v33 = vld [vmem:[%s647_s0 + $0x4] ss:$16 sps:$4 sm:$0xff]   ;;  %v506_v34 = vld [vmem:[%s647_s0 + $0x8] ss:$16 sps:$4 sm:$0xff]  }
   0xe   :  { %455 = vmatprep.subr.bf16.mxu1 %v484_v13  ;;  %v508_v35 = vld [vmem:[%s647_s0 + $0xc] ss:$16 sps:$4 sm:$0xff]   ;;  %334 = vmatprep.mubr.bf16.mxu0 %v505_v33 }
   0xf   :  { %375 = vmatprep.mubr.bf16.mxu1 %v508_v35 }
  0x10   :  { %434 = vmatpush3.bf16.msra.mxu0 %v485_v14 }
  0x11   :  { %456 = vmatpush3.bf16.msra.mxu1 %v486_v15  ;;  %435 = vmatprep.subr.bf16.mxu0 %v487_v16 }
  0x12   :  { %457 = vmatprep.subr.bf16.mxu1 %v488_v17 }
  0x14   :  { %436 = vmatpush3.bf16.msra.mxu0 %v489_v18 }
  0x15   :  { %458 = vmatpush3.bf16.msra.mxu1 %v490_v19  ;;  %437 = vmatprep.subr.bf16.mxu0 %v491_v20 }
  0x16   :  { %459 = vmatprep.subr.bf16.mxu1 %v492_v21 }
  0x18   :  { %438 = vmatpush3.bf16.msra.mxu0 %v493_v22 }
  0x19   :  { %460 = vmatpush3.bf16.msra.mxu1 %v494_v23  ;;  %439 = vmatprep.subr.bf16.mxu0 %v495_v24 }
  0x1a   :  { %461 = vmatprep.subr.bf16.mxu1 %v496_v25 }
  0x1c   :  { %440 = vmatpush3.bf16.msra.mxu0 %v497_v26 }
  0x1d   :  { %462 = vmatpush3.bf16.msra.mxu1 %v498_v27  ;;  %441 = vmatprep.subr.bf16.mxu0 %v499_v28 }
  0x1e   :  { %463 = vmatprep.subr.bf16.mxu1 %v500_v29 }
  0x20   :  { %442 = vmatpush3.bf16.msra.mxu0 %v501_v30 }
  0x21   :  { %464 = vmatpush3.bf16.msra.mxu1 %v502_v31 }
  0x23   :  { %335 = vmatmul.mubr.bf16.vlgmr.msra.gmra.mrb[0].mxu0 %v503_v32 }
  0x24   :  { %376 = vmatmul.mubr.bf16.vlgmr.msra.gmra.mrb[0].mxu1 %v506_v34 }
  0xf6   :  { %v443_v36 = vpop.f32.mrb[0].mxu0 }
  0xf7   :  { %v465_v37 = vpop.f32.mrb[0].mxu1  ;;  %v444_v39 = vpop.f32.mrb[1].mxu0 }
  0xf8   :  { %v445_v40 = vadd.f32 %v444_v39, %v443_v36  ;;  %v466_v41 = vpop.f32.mrb[1].mxu1  ;;  %v446_v42 = vpop.f32.mrb[2].mxu0 }
  0xf9   :  { %v467_v43 = vadd.f32 %v466_v41, %v465_v37  ;;  %v468_v44 = vpop.f32.mrb[2].mxu1  ;;  %v447_v45 = vpop.f32.mrb[3].mxu0 }
  0xfa   :  { %v337_v46 = vadd.f32 %v445_v40, %v390_v38  ;;  %v448_v47 = vadd.f32 %v447_v45, %v446_v42  ;;  %v469_v48 = vpop.f32.mrb[3].mxu1 }
  0xfb   :  { %v470_v49 = vadd.f32 %v469_v48, %v468_v44 }
  0xfc   :  { %v378_v50 = vadd.f32 %v467_v43, %v337_v46  ;;  %v340_v51 = vadd.f32 %v448_v47, %v390_v38 }
  0xfe   :  { %384 = vst [vmem:[%s649_s3] sm:$0xff] %v378_v50  ;;  %v381_v52 = vadd.f32 %v470_v49, %v340_v51 }
 0x100   :  { %385 = vst [vmem:[%s649_s3 + $0x8] sm:$0xff] %v381_v52 }

// kernel: discriminator_forward.33
= control target key start
LH: loop header
LB: loop body
LE: loop exit
PB: predicated region body
PF: predicated region fallthrough
CT: control target
= control target key end

     0   :  { %s8101_s1 = inlined_call_operand.vmem [shape: bf16[2304,512], index: 1, kind: input, shape index: {}]   ;;  %s8102_s0 = inlined_call_operand.vmem [shape: bf16[16,2304], index: 0, kind: input, shape index: {}]   ;;  %s8103_s4 = inlined_call_operand.vmem [shape: f32[1,1,512], index: 4, kind: output, shape index: {1}]   ;;  %s8104_s5 = inlined_call_operand.vmem [shape: f32[1,1,512], index: 5, kind: output, shape index: {2}]   ;;  %s8105_s2 = inlined_call_operand.vmem [shape: f32[1,512], index: 2, kind: input, shape index: {}]   ;;  %s8106_s3 = inlined_call_operand.vmem [shape: bf16[16,512], index: 3, kind: output, shape index: {0}]  }
   0x1   :  { %v5327_v0 = vld [vmem:[%s8101_s1 + $0x4] ss:$16 sps:$4 sm:$0xff]   ;;  %v5329_v1 = vld [vmem:[%s8101_s1 + $0xc] ss:$16 sps:$4 sm:$0xff]   ;;  %v5331_v2 = vld [vmem:[%s8101_s1] ss:$16 sps:$4 sm:$0xff]  }
   0x2   :  { %3644 = vmatprep.subr.bf16.mxu0 %v5327_v0  ;;  %v5332_v3 = vld [vmem:[%s8101_s1 + $0x8] ss:$16 sps:$4 sm:$0xff]   ;;  %4031 = vmatprep.subr.bf16.mxu1 %v5329_v1  ;;  %v5333_v4 = vld [vmem:[%s8101_s1 + $0x24] ss:$16 sps:$4 sm:$0xff]   ;;  %v5335_v5 = vld [vmem:[%s8101_s1 + $0x2c] ss:$16 sps:$4 sm:$0xff]  }
   0x3   :  { %3645 = vmatpush1.bf16.msra.mxu0 %v5331_v2  ;;  %4032 = vmatpush1.bf16.msra.mxu1 %v5332_v3  ;;  %v5337_v6 = vld [vmem:[%s8101_s1 + $0x20] ss:$16 sps:$4 sm:$0xff]   ;;  %v5338_v7 = vld [vmem:[%s8101_s1 + $0x28] ss:$16 sps:$4 sm:$0xff]   ;;  %v5339_v8 = vld [vmem:[%s8101_s1 + $0x44] ss:$16 sps:$4 sm:$0xff]  }
   0x4   :  { %3646 = vmatprep.subr.bf16.mxu0 %v5333_v4  ;;  %4033 = vmatprep.subr.bf16.mxu1 %v5335_v5  ;;  %v5341_v9 = vld [vmem:[%s8101_s1 + $0x4c] ss:$16 sps:$4 sm:$0xff]   ;;  %v5343_v10 = vld [vmem:[%s8101_s1 + $0x40] ss:$16 sps:$4 sm:$0xff]   ;;  %v5344_v11 = vld [vmem:[%s8101_s1 + $0x48] ss:$16 sps:$4 sm:$0xff]  }
   0x5   :  { %v5345_v12 = vld [vmem:[%s8101_s1 + $0x64] ss:$16 sps:$4 sm:$0xff]   ;;  %v5347_v13 = vld [vmem:[%s8101_s1 + $0x6c] ss:$16 sps:$4 sm:$0xff]   ;;  %v5349_v14 = vld [vmem:[%s8101_s1 + $0x60] ss:$16 sps:$4 sm:$0xff]  }
   0x6   :  { %v5350_v15 = vld [vmem:[%s8101_s1 + $0x68] ss:$16 sps:$4 sm:$0xff]   ;;  %v5351_v16 = vld [vmem:[%s8101_s1 + $0x84] ss:$16 sps:$4 sm:$0xff]   ;;  %v5353_v17 = vld [vmem:[%s8101_s1 + $0x8c] ss:$16 sps:$4 sm:$0xff]  }
   0x7   :  { %3647 = vmatpush1.bf16.msra.mxu0 %v5337_v6  ;;  %4034 = vmatpush1.bf16.msra.mxu1 %v5338_v7  ;;  %v5355_v18 = vld [vmem:[%s8101_s1 + $0x80] ss:$16 sps:$4 sm:$0xff]   ;;  %v5356_v19 = vld [vmem:[%s8101_s1 + $0x88] ss:$16 sps:$4 sm:$0xff]   ;;  %v5357_v20 = vld [vmem:[%s8101_s1 + $0xa4] ss:$16 sps:$4 sm:$0xff]  }
   0x8   :  { %3648 = vmatprep.subr.bf16.mxu0 %v5339_v8  ;;  %4035 = vmatprep.subr.bf16.mxu1 %v5341_v9  ;;  %v5359_v21 = vld [vmem:[%s8101_s1 + $0xac] ss:$16 sps:$4 sm:$0xff]   ;;  %v5361_v22 = vld [vmem:[%s8101_s1 + $0xa0] ss:$16 sps:$4 sm:$0xff]   ;;  %v5362_v23 = vld [vmem:[%s8101_s1 + $0xa8] ss:$16 sps:$4 sm:$0xff]  }
   0x9   :  { %v5363_v24 = vld [vmem:[%s8101_s1 + $0xc4] ss:$16 sps:$4 sm:$0xff]   ;;  %v5365_v25 = vld [vmem:[%s8101_s1 + $0xcc] ss:$16 sps:$4 sm:$0xff]   ;;  %v5367_v26 = vld [vmem:[%s8101_s1 + $0xc0] ss:$16 sps:$4 sm:$0xff]  }
   0xa   :  { %v5368_v27 = vld [vmem:[%s8101_s1 + $0xc8] ss:$16 sps:$4 sm:$0xff]   ;;  %v5369_v28 = vld [vmem:[%s8101_s1 + $0xe4] ss:$16 sps:$4 sm:$0xff]   ;;  %v5371_v29 = vld [vmem:[%s8101_s1 + $0xec] ss:$16 sps:$4 sm:$0xff]  }
   0xb   :  { %3649 = vmatpush1.bf16.msra.mxu0 %v5343_v10  ;;  %4036 = vmatpush1.bf16.msra.mxu1 %v5344_v11  ;;  %v5373_v30 = vld [vmem:[%s8101_s1 + $0xe0] ss:$16 sps:$4 sm:$0xff]   ;;  %v5374_v31 = vld [vmem:[%s8101_s1 + $0xe8] ss:$16 sps:$4 sm:$0xff]   ;;  %v5375_v32 = vld [vmem:[%s8101_s1 + $0x104] ss:$16 sps:$4 sm:$0xff]  }
   0xc   :  { %3650 = vmatprep.subr.bf16.mxu0 %v5345_v12  ;;  %4037 = vmatprep.subr.bf16.mxu1 %v5347_v13  ;;  %v5377_v33 = vld [vmem:[%s8101_s1 + $0x10c] ss:$16 sps:$4 sm:$0xff]   ;;  %v5379_v34 = vld [vmem:[%s8101_s1 + $0x100] ss:$16 sps:$4 sm:$0xff]   ;;  %v5380_v35 = vld [vmem:[%s8101_s1 + $0x108] ss:$16 sps:$4 sm:$0xff]  }
   0xd   :  { %v5381_v36 = vld [vmem:[%s8101_s1 + $0x124] ss:$16 sps:$4 sm:$0xff]   ;;  %v5383_v37 = vld [vmem:[%s8101_s1 + $0x12c] ss:$16 sps:$4 sm:$0xff]   ;;  %v5385_v38 = vld [vmem:[%s8101_s1 + $0x120] ss:$16 sps:$4 sm:$0xff]  }
   0xe   :  { %v5386_v39 = vld [vmem:[%s8101_s1 + $0x128] ss:$16 sps:$4 sm:$0xff]   ;;  %v5387_v40 = vld [vmem:[%s8101_s1 + $0x144] ss:$16 sps:$4 sm:$0xff]   ;;  %v5389_v41 = vld [vmem:[%s8101_s1 + $0x14c] ss:$16 sps:$4 sm:$0xff]  }
   0xf   :  { %3651 = vmatpush1.bf16.msra.mxu0 %v5349_v14  ;;  %4038 = vmatpush1.bf16.msra.mxu1 %v5350_v15  ;;  %v5391_v42 = vld [vmem:[%s8101_s1 + $0x140] ss:$16 sps:$4 sm:$0xff]   ;;  %v5392_v43 = vld [vmem:[%s8101_s1 + $0x148] ss:$16 sps:$4 sm:$0xff]   ;;  %v5393_v44 = vld [vmem:[%s8101_s1 + $0x164] ss:$16 sps:$4 sm:$0xff]  }
  0x10   :  { %3652 = vmatprep.subr.bf16.mxu0 %v5351_v16  ;;  %4039 = vmatprep.subr.bf16.mxu1 %v5353_v17  ;;  %v5395_v45 = vld [vmem:[%s8101_s1 + $0x16c] ss:$16 sps:$4 sm:$0xff]   ;;  %v5397_v46 = vld [vmem:[%s8101_s1 + $0x160] ss:$16 sps:$4 sm:$0xff]   ;;  %v5398_v47 = vld [vmem:[%s8101_s1 + $0x168] ss:$16 sps:$4 sm:$0xff]  }
  0x11   :  { %v5425_v48 = vld [vmem:[%s8102_s0 + $0x4] ss:$72 sps:$4 sm:$0xff]   ;;  %v5403_v51 = vld [vmem:[%s8101_s1 + $0x180] ss:$16 sps:$4 sm:$0xff]   ;;  %v5404_v52 = vld [vmem:[%s8101_s1 + $0x188] ss:$16 sps:$4 sm:$0xff]  }
  0x12   :  { %v5399_v49 = vld [vmem:[%s8101_s1 + $0x184] ss:$16 sps:$4 sm:$0xff]   ;;  %v5401_v50 = vld [vmem:[%s8101_s1 + $0x18c] ss:$16 sps:$4 sm:$0xff]   ;;  %3676 = vmatprep.mubr.bf16.mxu0 %v5425_v48  ;;  %4063 = vmatprep.mubr.bf16.mxu1 %v5425_v48  ;;  %v5409_v55 = vld [vmem:[%s8101_s1 + $0x1a0] ss:$16 sps:$4 sm:$0xff]  }
  0x13   :  { %3653 = vmatpush1.bf16.msra.mxu0 %v5355_v18  ;;  %4040 = vmatpush1.bf16.msra.mxu1 %v5356_v19  ;;  %v5405_v53 = vld [vmem:[%s8101_s1 + $0x1a4] ss:$16 sps:$4 sm:$0xff]   ;;  %v5407_v54 = vld [vmem:[%s8101_s1 + $0x1ac] ss:$16 sps:$4 sm:$0xff]   ;;  %v5410_v56 = vld [vmem:[%s8101_s1 + $0x1a8] ss:$16 sps:$4 sm:$0xff]  }
  0x14   :  { %3654 = vmatprep.subr.bf16.mxu0 %v5357_v20  ;;  %4041 = vmatprep.subr.bf16.mxu1 %v5359_v21  ;;  %v5411_v57 = vld [vmem:[%s8101_s1 + $0x1c4] ss:$16 sps:$4 sm:$0xff]   ;;  %v5413_v58 = vld [vmem:[%s8101_s1 + $0x1cc] ss:$16 sps:$4 sm:$0xff]   ;;  %v5415_v59 = vld [vmem:[%s8101_s1 + $0x1c0] ss:$16 sps:$4 sm:$0xff]  }
  0x15   :  { %v5416_v60 = vld [vmem:[%s8101_s1 + $0x1c8] ss:$16 sps:$4 sm:$0xff]   ;;  %v5417_v61 = vld [vmem:[%s8101_s1 + $0x1e4] ss:$16 sps:$4 sm:$0xff]   ;;  %v5419_v62 = vld [vmem:[%s8101_s1 + $0x1ec] ss:$16 sps:$4 sm:$0xff]  }
  0x16   :  { %v5421_v63 = vld [vmem:[%s8101_s1 + $0x1e0] ss:$16 sps:$4 sm:$0xff]   ;;  %v5422_v0 = vld [vmem:[%s8101_s1 + $0x1e8] ss:$16 sps:$4 sm:$0xff]   ;;  %v5428_v1 = vld [vmem:[%s8101_s1 + $0x204] ss:$16 sps:$4 sm:$0xff]  }
  0x17   :  { %3655 = vmatpush1.bf16.msra.mxu0 %v5361_v22  ;;  %4042 = vmatpush1.bf16.msra.mxu1 %v5362_v23  ;;  %v5431_v2 = vld [vmem:[%s8101_s1 + $0x20c] ss:$16 sps:$4 sm:$0xff]   ;;  %v5423_v3 = vld [vmem:[%s8102_s0] ss:$72 sps:$4 sm:$0xff]   ;;  %v5434_v6 = vld [vmem:[%s8101_s1 + $0x224] ss:$16 sps:$4 sm:$0xff]  }
  0x18   :  { %3656 = vmatprep.subr.bf16.mxu0 %v5363_v24  ;;  %4043 = vmatprep.subr.bf16.mxu1 %v5365_v25  ;;  %v5426_v4 = vld [vmem:[%s8101_s1 + $0x200] ss:$16 sps:$4 sm:$0xff]   ;;  %v5429_v5 = vld [vmem:[%s8101_s1 + $0x208] ss:$16 sps:$4 sm:$0xff]   ;;  %v5437_v7 = vld [vmem:[%s8101_s1 + $0x22c] ss:$16 sps:$4 sm:$0xff]  }
  0x19   :  { %v5432_v8 = vld [vmem:[%s8101_s1 + $0x220] ss:$16 sps:$4 sm:$0xff]   ;;  %v5435_v9 = vld [vmem:[%s8101_s1 + $0x228] ss:$16 sps:$4 sm:$0xff]   ;;  %v5440_v10 = vld [vmem:[%s8101_s1 + $0x244] ss:$16 sps:$4 sm:$0xff]  }
  0x1a   :  { %v5443_v11 = vld [vmem:[%s8101_s1 + $0x24c] ss:$16 sps:$4 sm:$0xff]   ;;  %v5438_v12 = vld [vmem:[%s8101_s1 + $0x240] ss:$16 sps:$4 sm:$0xff]   ;;  %v5441_v13 = vld [vmem:[%s8101_s1 + $0x248] ss:$16 sps:$4 sm:$0xff]  }
  0x1b   :  { %3657 = vmatpush1.bf16.msra.mxu0 %v5367_v26  ;;  %4044 = vmatpush1.bf16.msra.mxu1 %v5368_v27  ;;  %v5446_v14 = vld [vmem:[%s8101_s1 + $0x264] ss:$16 sps:$4 sm:$0xff]   ;;  %v5449_v15 = vld [vmem:[%s8101_s1 + $0x26c] ss:$16 sps:$4 sm:$0xff]   ;;  %v5444_v16 = vld [vmem:[%s8101_s1 + $0x260] ss:$16 sps:$4 sm:$0xff]  }
  0x1c   :  { %3658 = vmatprep.subr.bf16.mxu0 %v5369_v28  ;;  %4045 = vmatprep.subr.bf16.mxu1 %v5371_v29  ;;  %v5447_v17 = vld [vmem:[%s8101_s1 + $0x268] ss:$16 sps:$4 sm:$0xff]   ;;  %v5452_v18 = vld [vmem:[%s8101_s1 + $0x284] ss:$16 sps:$4 sm:$0xff]   ;;  %v5455_v19 = vld [vmem:[%s8101_s1 + $0x28c] ss:$16 sps:$4 sm:$0xff]  }
  0x1d   :  { %v5450_v20 = vld [vmem:[%s8101_s1 + $0x280] ss:$16 sps:$4 sm:$0xff]   ;;  %v5453_v21 = vld [vmem:[%s8101_s1 + $0x288] ss:$16 sps:$4 sm:$0xff]   ;;  %v5458_v22 = vld [vmem:[%s8101_s1 + $0x2a4] ss:$16 sps:$4 sm:$0xff]  }
  0x1e   :  { %v5461_v23 = vld [vmem:[%s8101_s1 + $0x2ac] ss:$16 sps:$4 sm:$0xff]   ;;  %v5456_v24 = vld [vmem:[%s8101_s1 + $0x2a0] ss:$16 sps:$4 sm:$0xff]   ;;  %v5459_v25 = vld [vmem:[%s8101_s1 + $0x2a8] ss:$16 sps:$4 sm:$0xff]  }
  0x1f   :  { %3659 = vmatpush1.bf16.msra.mxu0 %v5373_v30  ;;  %4046 = vmatpush1.bf16.msra.mxu1 %v5374_v31  ;;  %v5464_v26 = vld [vmem:[%s8101_s1 + $0x2c4] ss:$16 sps:$4 sm:$0xff]   ;;  %v5467_v27 = vld [vmem:[%s8101_s1 + $0x2cc] ss:$16 sps:$4 sm:$0xff]   ;;  %v5462_v28 = vld [vmem:[%s8101_s1 + $0x2c0] ss:$16 sps:$4 sm:$0xff]  }
  0x20   :  { %3660 = vmatprep.subr.bf16.mxu0 %v5375_v32  ;;  %4047 = vmatprep.subr.bf16.mxu1 %v5377_v33  ;;  %v5465_v29 = vld [vmem:[%s8101_s1 + $0x2c8] ss:$16 sps:$4 sm:$0xff]   ;;  %v5524_v30 = vld [vmem:[%s8102_s0 + $0xc] ss:$72 sps:$4 sm:$0xff]   ;;  %v5468_v33 = vld [vmem:[%s8101_s1 + $0x2e0] ss:$16 sps:$4 sm:$0xff]  }
  0x21   :  { %v5470_v31 = vld [vmem:[%s8101_s1 + $0x2e4] ss:$16 sps:$4 sm:$0xff]   ;;  %v5473_v32 = vld [vmem:[%s8101_s1 + $0x2ec] ss:$16 sps:$4 sm:$0xff]  }
  0x22   :  { %v5497_v48 = vld [vmem:[%s8101_s1 + $0x36c] ss:$16 sps:$4 sm:$0xff]  }
  0x23   :  { %3661 = vmatpush1.bf16.msra.mxu0 %v5379_v34  ;;  %4048 = vmatpush1.bf16.msra.mxu1 %v5380_v35  ;;  %v5471_v34 = vld [vmem:[%s8101_s1 + $0x2e8] ss:$16 sps:$4 sm:$0xff]   ;;  %v5476_v35 = vld [vmem:[%s8101_s1 + $0x304] ss:$16 sps:$4 sm:$0xff]  }
  0x24   :  { %3662 = vmatprep.subr.bf16.mxu0 %v5381_v36  ;;  %4049 = vmatprep.subr.bf16.mxu1 %v5383_v37  ;;  %v5479_v36 = vld [vmem:[%s8101_s1 + $0x30c] ss:$16 sps:$4 sm:$0xff]   ;;  %v5474_v37 = vld [vmem:[%s8101_s1 + $0x300] ss:$16 sps:$4 sm:$0xff]  }
  0x27   :  { %3663 = vmatpush1.bf16.msra.mxu0 %v5385_v38  ;;  %4050 = vmatpush1.bf16.msra.mxu1 %v5386_v39  ;;  %v5477_v38 = vld [vmem:[%s8101_s1 + $0x308] ss:$16 sps:$4 sm:$0xff]   ;;  %v5482_v39 = vld [vmem:[%s8101_s1 + $0x324] ss:$16 sps:$4 sm:$0xff]  }
  0x28   :  { %3664 = vmatprep.subr.bf16.mxu0 %v5387_v40  ;;  %4051 = vmatprep.subr.bf16.mxu1 %v5389_v41  ;;  %v5485_v40 = vld [vmem:[%s8101_s1 + $0x32c] ss:$16 sps:$4 sm:$0xff]   ;;  %v5480_v41 = vld [vmem:[%s8101_s1 + $0x320] ss:$16 sps:$4 sm:$0xff]  }
  0x2b   :  { %3665 = vmatpush1.bf16.msra.mxu0 %v5391_v42  ;;  %4052 = vmatpush1.bf16.msra.mxu1 %v5392_v43  ;;  %v5483_v42 = vld [vmem:[%s8101_s1 + $0x328] ss:$16 sps:$4 sm:$0xff]   ;;  %v5488_v43 = vld [vmem:[%s8101_s1 + $0x344] ss:$16 sps:$4 sm:$0xff]  }
  0x2c   :  { %3666 = vmatprep.subr.bf16.mxu0 %v5393_v44  ;;  %4053 = vmatprep.subr.bf16.mxu1 %v5395_v45  ;;  %v5491_v44 = vld [vmem:[%s8101_s1 + $0x34c] ss:$16 sps:$4 sm:$0xff]   ;;  %v5486_v45 = vld [vmem:[%s8101_s1 + $0x340] ss:$16 sps:$4 sm:$0xff]  }
  0x2f   :  { %3667 = vmatpush1.bf16.msra.mxu0 %v5397_v46  ;;  %4054 = vmatpush1.bf16.msra.mxu1 %v5398_v47  ;;  %v5489_v46 = vld [vmem:[%s8101_s1 + $0x348] ss:$16 sps:$4 sm:$0xff]   ;;  %v5494_v47 = vld [vmem:[%s8101_s1 + $0x364] ss:$16 sps:$4 sm:$0xff]  }
  0x30   :  { %3668 = vmatprep.subr.bf16.mxu0 %v5399_v49  ;;  %4055 = vmatprep.subr.bf16.mxu1 %v5401_v50  ;;  %v5492_v49 = vld [vmem:[%s8101_s1 + $0x360] ss:$16 sps:$4 sm:$0xff]   ;;  %v5495_v50 = vld [vmem:[%s8101_s1 + $0x368] ss:$16 sps:$4 sm:$0xff]  }
  0x33   :  { %3669 = vmatpush1.bf16.msra.mxu0 %v5403_v51  ;;  %4056 = vmatpush1.bf16.msra.mxu1 %v5404_v52  ;;  %v5500_v51 = vld [vmem:[%s8101_s1 + $0x384] ss:$16 sps:$4 sm:$0xff]   ;;  %v5503_v52 = vld [vmem:[%s8101_s1 + $0x38c] ss:$16 sps:$4 sm:$0xff]  }
  0x34   :  { %3670 = vmatprep.subr.bf16.mxu0 %v5405_v53  ;;  %4057 = vmatprep.subr.bf16.mxu1 %v5407_v54  ;;  %v5498_v53 = vld [vmem:[%s8101_s1 + $0x380] ss:$16 sps:$4 sm:$0xff]   ;;  %v5501_v54 = vld [vmem:[%s8101_s1 + $0x388] ss:$16 sps:$4 sm:$0xff]  }
  0x37   :  { %3671 = vmatpush1.bf16.msra.mxu0 %v5409_v55  ;;  %4058 = vmatpush1.bf16.msra.mxu1 %v5410_v56  ;;  %v5506_v55 = vld [vmem:[%s8101_s1 + $0x3a4] ss:$16 sps:$4 sm:$0xff]   ;;  %v5509_v56 = vld [vmem:[%s8101_s1 + $0x3ac] ss:$16 sps:$4 sm:$0xff]  }
  0x38   :  { %3672 = vmatprep.subr.bf16.mxu0 %v5411_v57  ;;  %4059 = vmatprep.subr.bf16.mxu1 %v5413_v58  ;;  %v5504_v57 = vld [vmem:[%s8101_s1 + $0x3a0] ss:$16 sps:$4 sm:$0xff]   ;;  %v5507_v58 = vld [vmem:[%s8101_s1 + $0x3a8] ss:$16 sps:$4 sm:$0xff]  }
  0x3b   :  { %3673 = vmatpush1.bf16.msra.mxu0 %v5415_v59  ;;  %4060 = vmatpush1.bf16.msra.mxu1 %v5416_v60  ;;  %v5512_v59 = vld [vmem:[%s8101_s1 + $0x3c4] ss:$16 sps:$4 sm:$0xff]   ;;  %v5515_v60 = vld [vmem:[%s8101_s1 + $0x3cc] ss:$16 sps:$4 sm:$0xff]  }
  0x3c   :  { %3674 = vmatprep.subr.bf16.mxu0 %v5417_v61  ;;  %4061 = vmatprep.subr.bf16.mxu1 %v5419_v62  ;;  %v5510_v61 = vld [vmem:[%s8101_s1 + $0x3c0] ss:$16 sps:$4 sm:$0xff]   ;;  %v5513_v62 = vld [vmem:[%s8101_s1 + $0x3c8] ss:$16 sps:$4 sm:$0xff]  }
  0x3f   :  { %3675 = vmatpush1.bf16.msra.mxu0 %v5421_v63  ;;  %4062 = vmatpush1.bf16.msra.mxu1 %v5422_v0  ;;  %v5518_v63 = vld [vmem:[%s8101_s1 + $0x3e4] ss:$16 sps:$4 sm:$0xff]   ;;  %v5521_v0 = vld [vmem:[%s8101_s1 + $0x3ec] ss:$16 sps:$4 sm:$0xff]  }
  0x40   :  { %3687 = vmatprep.subr.bf16.mxu0 %v5428_v1  ;;  %4074 = vmatprep.subr.bf16.mxu1 %v5431_v2  ;;  %v5516_v1 = vld [vmem:[%s8101_s1 + $0x3e0] ss:$16 sps:$4 sm:$0xff]   ;;  %v5519_v2 = vld [vmem:[%s8101_s1 + $0x3e8] ss:$16 sps:$4 sm:$0xff]  }
  0x42   :  { %3677 = vmatmul.mubr.bf16.vlgmr.msra.gmra.mrb[0].mxu0 %v5423_v3  ;;  %4064 = vmatmul.mubr.bf16.vlgmr.msra.gmra.mrb[0].mxu1 %v5423_v3  ;;  %v5527_v3 = vld [vmem:[%s8101_s1 + $0x404] ss:$16 sps:$4 sm:$0xff]  }
  0x43   :  { %3688 = vmatpush1.bf16.msra.mxu0 %v5426_v4  ;;  %4075 = vmatpush1.bf16.msra.mxu1 %v5429_v5  ;;  %v5530_v4 = vld [vmem:[%s8101_s1 + $0x40c] ss:$16 sps:$4 sm:$0xff]   ;;  %v5522_v5 = vld [vmem:[%s8102_s0 + $0x8] ss:$72 sps:$4 sm:$0xff]  }
  0x44   :  { %3689 = vmatprep.subr.bf16.mxu0 %v5434_v6  ;;  %4076 = vmatprep.subr.bf16.mxu1 %v5437_v7  ;;  %v5525_v6 = vld [vmem:[%s8101_s1 + $0x400] ss:$16 sps:$4 sm:$0xff]   ;;  %v5528_v7 = vld [vmem:[%s8101_s1 + $0x408] ss:$16 sps:$4 sm:$0xff]  }
  0x45   :  { %3719 = vmatprep.mubr.bf16.mxu0 %v5524_v30  ;;  %4106 = vmatprep.mubr.bf16.mxu1 %v5524_v30  ;;  %v5566_v30 = vld [vmem:[%s8101_s1 + $0x4cc] ss:$16 sps:$4 sm:$0xff]  }
  0x47   :  { %3690 = vmatpush1.bf16.msra.mxu0 %v5432_v8  ;;  %4077 = vmatpush1.bf16.msra.mxu1 %v5435_v9  ;;  %v5533_v8 = vld [vmem:[%s8101_s1 + $0x424] ss:$16 sps:$4 sm:$0xff]   ;;  %v5536_v9 = vld [vmem:[%s8101_s1 + $0x42c] ss:$16 sps:$4 sm:$0xff]  }
  0x48   :  { %3691 = vmatprep.subr.bf16.mxu0 %v5440_v10  ;;  %4078 = vmatprep.subr.bf16.mxu1 %v5443_v11  ;;  %v5531_v10 = vld [vmem:[%s8101_s1 + $0x420] ss:$16 sps:$4 sm:$0xff]   ;;  %v5534_v11 = vld [vmem:[%s8101_s1 + $0x428] ss:$16 sps:$4 sm:$0xff]  }
  0x4b   :  { %3692 = vmatpush1.bf16.msra.mxu0 %v5438_v12  ;;  %4079 = vmatpush1.bf16.msra.mxu1 %v5441_v13  ;;  %v5623_v12 = vld [vmem:[%s8102_s0 + $0x14] ss:$72 sps:$4 sm:$0xff]  }
  0x4c   :  { %3693 = vmatprep.subr.bf16.mxu0 %v5446_v14  ;;  %4080 = vmatprep.subr.bf16.mxu1 %v5449_v15  ;;  %v5539_v13 = vld [vmem:[%s8101_s1 + $0x444] ss:$16 sps:$4 sm:$0xff]   ;;  %v5542_v14 = vld [vmem:[%s8101_s1 + $0x44c] ss:$16 sps:$4 sm:$0xff]   ;;  %v5537_v15 = vld [vmem:[%s8101_s1 + $0x440] ss:$16 sps:$4 sm:$0xff]  }
  0x4f   :  { %3694 = vmatpush1.bf16.msra.mxu0 %v5444_v16  ;;  %4081 = vmatpush1.bf16.msra.mxu1 %v5447_v17  ;;  %v5540_v16 = vld [vmem:[%s8101_s1 + $0x448] ss:$16 sps:$4 sm:$0xff]   ;;  %v5545_v17 = vld [vmem:[%s8101_s1 + $0x464] ss:$16 sps:$4 sm:$0xff]  }
  0x50   :  { %3695 = vmatprep.subr.bf16.mxu0 %v5452_v18  ;;  %4082 = vmatprep.subr.bf16.mxu1 %v5455_v19  ;;  %v5548_v18 = vld [vmem:[%s8101_s1 + $0x46c] ss:$16 sps:$4 sm:$0xff]   ;;  %v5543_v19 = vld [vmem:[%s8101_s1 + $0x460] ss:$16 sps:$4 sm:$0xff]  }
  0x53   :  { %3696 = vmatpush1.bf16.msra.mxu0 %v5450_v20  ;;  %4083 = vmatpush1.bf16.msra.mxu1 %v5453_v21  ;;  %v5546_v20 = vld [vmem:[%s8101_s1 + $0x468] ss:$16 sps:$4 sm:$0xff]   ;;  %v5551_v21 = vld [vmem:[%s8101_s1 + $0x484] ss:$16 sps:$4 sm:$0xff]  }
  0x54   :  { %3697 = vmatprep.subr.bf16.mxu0 %v5458_v22  ;;  %4084 = vmatprep.subr.bf16.mxu1 %v5461_v23  ;;  %v5554_v22 = vld [vmem:[%s8101_s1 + $0x48c] ss:$16 sps:$4 sm:$0xff]   ;;  %v5549_v23 = vld [vmem:[%s8101_s1 + $0x480] ss:$16 sps:$4 sm:$0xff]  }
  0x57   :  { %3698 = vmatpush1.bf16.msra.mxu0 %v5456_v24  ;;  %4085 = vmatpush1.bf16.msra.mxu1 %v5459_v25  ;;  %v5552_v24 = vld [vmem:[%s8101_s1 + $0x488] ss:$16 sps:$4 sm:$0xff]   ;;  %v5557_v25 = vld [vmem:[%s8101_s1 + $0x4a4] ss:$16 sps:$4 sm:$0xff]  }
  0x58   :  { %3699 = vmatprep.subr.bf16.mxu0 %v5464_v26  ;;  %4086 = vmatprep.subr.bf16.mxu1 %v5467_v27  ;;  %v5560_v26 = vld [vmem:[%s8101_s1 + $0x4ac] ss:$16 sps:$4 sm:$0xff]   ;;  %v5555_v27 = vld [vmem:[%s8101_s1 + $0x4a0] ss:$16 sps:$4 sm:$0xff]  }
  0x5b   :  { %3700 = vmatpush1.bf16.msra.mxu0 %v5462_v28  ;;  %4087 = vmatpush1.bf16.msra.mxu1 %v5465_v29  ;;  %v5558_v28 = vld [vmem:[%s8101_s1 + $0x4a8] ss:$16 sps:$4 sm:$0xff]   ;;  %v5563_v29 = vld [vmem:[%s8101_s1 + $0x4c4] ss:$16 sps:$4 sm:$0xff]  }
  0x5c   :  { %3701 = vmatprep.subr.bf16.mxu0 %v5470_v31  ;;  %4088 = vmatprep.subr.bf16.mxu1 %v5473_v32  ;;  %v5561_v31 = vld [vmem:[%s8101_s1 + $0x4c0] ss:$16 sps:$4 sm:$0xff]   ;;  %v5564_v32 = vld [vmem:[%s8101_s1 + $0x4c8] ss:$16 sps:$4 sm:$0xff]  }
  0x5f   :  { %3702 = vmatpush1.bf16.msra.mxu0 %v5468_v33  ;;  %4089 = vmatpush1.bf16.msra.mxu1 %v5471_v34  ;;  %v5569_v33 = vld [vmem:[%s8101_s1 + $0x4e4] ss:$16 sps:$4 sm:$0xff]   ;;  %v5572_v34 = vld [vmem:[%s8101_s1 + $0x4ec] ss:$16 sps:$4 sm:$0xff]  }
  0x60   :  { %3703 = vmatprep.subr.bf16.mxu0 %v5476_v35  ;;  %4090 = vmatprep.subr.bf16.mxu1 %v5479_v36  ;;  %v5567_v35 = vld [vmem:[%s8101_s1 + $0x4e0] ss:$16 sps:$4 sm:$0xff]   ;;  %v5570_v36 = vld [vmem:[%s8101_s1 + $0x4e8] ss:$16 sps:$4 sm:$0xff]  }
  0x63   :  { %3704 = vmatpush1.bf16.msra.mxu0 %v5474_v37  ;;  %4091 = vmatpush1.bf16.msra.mxu1 %v5477_v38  ;;  %v5575_v37 = vld [vmem:[%s8101_s1 + $0x504] ss:$16 sps:$4 sm:$0xff]   ;;  %v5578_v38 = vld [vmem:[%s8101_s1 + $0x50c] ss:$16 sps:$4 sm:$0xff]  }
  0x64   :  { %3705 = vmatprep.subr.bf16.mxu0 %v5482_v39  ;;  %4092 = vmatprep.subr.bf16.mxu1 %v5485_v40  ;;  %v5573_v39 = vld [vmem:[%s8101_s1 + $0x500] ss:$16 sps:$4 sm:$0xff]   ;;  %v5576_v40 = vld [vmem:[%s8101_s1 + $0x508] ss:$16 sps:$4 sm:$0xff]  }
  0x67   :  { %3706 = vmatpush1.bf16.msra.mxu0 %v5480_v41  ;;  %4093 = vmatpush1.bf16.msra.mxu1 %v5483_v42  ;;  %v5581_v41 = vld [vmem:[%s8101_s1 + $0x524] ss:$16 sps:$4 sm:$0xff]   ;;  %v5584_v42 = vld [vmem:[%s8101_s1 + $0x52c] ss:$16 sps:$4 sm:$0xff]  }
  0x68   :  { %3707 = vmatprep.subr.bf16.mxu0 %v5488_v43  ;;  %4094 = vmatprep.subr.bf16.mxu1 %v5491_v44  ;;  %v5579_v43 = vld [vmem:[%s8101_s1 + $0x520] ss:$16 sps:$4 sm:$0xff]   ;;  %v5582_v44 = vld [vmem:[%s8101_s1 + $0x528] ss:$16 sps:$4 sm:$0xff]  }
  0x6b   :  { %3708 = vmatpush1.bf16.msra.mxu0 %v5486_v45  ;;  %4095 = vmatpush1.bf16.msra.mxu1 %v5489_v46  ;;  %v5587_v45 = vld [vmem:[%s8101_s1 + $0x544] ss:$16 sps:$4 sm:$0xff]   ;;  %v5590_v46 = vld [vmem:[%s8101_s1 + $0x54c] ss:$16 sps:$4 sm:$0xff]  }
  0x6c   :  { %3709 = vmatprep.subr.bf16.mxu0 %v5494_v47  ;;  %4096 = vmatprep.subr.bf16.mxu1 %v5497_v48  ;;  %v5585_v47 = vld [vmem:[%s8101_s1 + $0x540] ss:$16 sps:$4 sm:$0xff]   ;;  %v5588_v48 = vld [vmem:[%s8101_s1 + $0x548] ss:$16 sps:$4 sm:$0xff]  }
  0x6f   :  { %3710 = vmatpush1.bf16.msra.mxu0 %v5492_v49  ;;  %4097 = vmatpush1.bf16.msra.mxu1 %v5495_v50  ;;  %v5593_v49 = vld [vmem:[%s8101_s1 + $0x564] ss:$16 sps:$4 sm:$0xff]   ;;  %v5596_v50 = vld [vmem:[%s8101_s1 + $0x56c] ss:$16 sps:$4 sm:$0xff]  }
  0x70   :  { %3711 = vmatprep.subr.bf16.mxu0 %v5500_v51  ;;  %4098 = vmatprep.subr.bf16.mxu1 %v5503_v52  ;;  %v5591_v51 = vld [vmem:[%s8101_s1 + $0x560] ss:$16 sps:$4 sm:$0xff]   ;;  %v5594_v52 = vld [vmem:[%s8101_s1 + $0x568] ss:$16 sps:$4 sm:$0xff]  }
  0x73   :  { %3712 = vmatpush1.bf16.msra.mxu0 %v5498_v53  ;;  %4099 = vmatpush1.bf16.msra.mxu1 %v5501_v54  ;;  %v5599_v53 = vld [vmem:[%s8101_s1 + $0x584] ss:$16 sps:$4 sm:$0xff]   ;;  %v5602_v54 = vld [vmem:[%s8101_s1 + $0x58c] ss:$16 sps:$4 sm:$0xff]  }
  0x74   :  { %3713 = vmatprep.subr.bf16.mxu0 %v5506_v55  ;;  %4100 = vmatprep.subr.bf16.mxu1 %v5509_v56  ;;  %v5597_v55 = vld [vmem:[%s8101_s1 + $0x580] ss:$16 sps:$4 sm:$0xff]   ;;  %v5600_v56 = vld [vmem:[%s8101_s1 + $0x588] ss:$16 sps:$4 sm:$0xff]  }
  0x77   :  { %3714 = vmatpush1.bf16.msra.mxu0 %v5504_v57  ;;  %4101 = vmatpush1.bf16.msra.mxu1 %v5507_v58  ;;  %v5605_v57 = vld [vmem:[%s8101_s1 + $0x5a4] ss:$16 sps:$4 sm:$0xff]   ;;  %v5608_v58 = vld [vmem:[%s8101_s1 + $0x5ac] ss:$16 sps:$4 sm:$0xff]  }
  0x78   :  { %3715 = vmatprep.subr.bf16.mxu0 %v5512_v59  ;;  %4102 = vmatprep.subr.bf16.mxu1 %v5515_v60  ;;  %v5603_v59 = vld [vmem:[%s8101_s1 + $0x5a0] ss:$16 sps:$4 sm:$0xff]   ;;  %v5606_v60 = vld [vmem:[%s8101_s1 + $0x5a8] ss:$16 sps:$4 sm:$0xff]  }
  0x7b   :  { %3716 = vmatpush1.bf16.msra.mxu0 %v5510_v61  ;;  %4103 = vmatpush1.bf16.msra.mxu1 %v5513_v62  ;;  %v5611_v61 = vld [vmem:[%s8101_s1 + $0x5c4] ss:$16 sps:$4 sm:$0xff]   ;;  %v5614_v62 = vld [vmem:[%s8101_s1 + $0x5cc] ss:$16 sps:$4 sm:$0xff]  }
  0x7c   :  { %3717 = vmatprep.subr.bf16.mxu0 %v5518_v63  ;;  %4104 = vmatprep.subr.bf16.mxu1 %v5521_v0  ;;  %v5609_v63 = vld [vmem:[%s8101_s1 + $0x5c0] ss:$16 sps:$4 sm:$0xff]   ;;  %v5612_v0 = vld [vmem:[%s8101_s1 + $0x5c8] ss:$16 sps:$4 sm:$0xff]  }
  0x7f   :  { %3718 = vmatpush1.bf16.msra.mxu0 %v5516_v1  ;;  %4105 = vmatpush1.bf16.msra.mxu1 %v5519_v2  ;;  %v5617_v1 = vld [vmem:[%s8101_s1 + $0x5e4] ss:$16 sps:$4 sm:$0xff]   ;;  %v5620_v2 = vld [vmem:[%s8101_s1 + $0x5ec] ss:$16 sps:$4 sm:$0xff]  }
  0x80   :  { %3730 = vmatprep.subr.bf16.mxu0 %v5527_v3  ;;  %4117 = vmatprep.subr.bf16.mxu1 %v5530_v4  ;;  %v5615_v3 = vld [vmem:[%s8101_s1 + $0x5e0] ss:$16 sps:$4 sm:$0xff]   ;;  %v5618_v4 = vld [vmem:[%s8101_s1 + $0x5e8] ss:$16 sps:$4 sm:$0xff]  }
  0x82   :  { %3720 = vmatmul.mubr.bf16.vlgmr.msra.gmra.mrb[0].mxu0 %v5522_v5  ;;  %4107 = vmatmul.mubr.bf16.vlgmr.msra.gmra.mrb[0].mxu1 %v5522_v5  ;;  %v5626_v5 = vld [vmem:[%s8101_s1 + $0x604] ss:$16 sps:$4 sm:$0xff]  }
  0x83   :  { %3731 = vmatpush1.bf16.msra.mxu0 %v5525_v6  ;;  %4118 = vmatpush1.bf16.msra.mxu1 %v5528_v7  ;;  %v5629_v6 = vld [vmem:[%s8101_s1 + $0x60c] ss:$16 sps:$4 sm:$0xff]   ;;  %v5621_v7 = vld [vmem:[%s8102_s0 + $0x10] ss:$72 sps:$4 sm:$0xff]  }
  0x84   :  { %3732 = vmatprep.subr.bf16.mxu0 %v5533_v8  ;;  %4119 = vmatprep.subr.bf16.mxu1 %v5536_v9  ;;  %v5624_v8 = vld [vmem:[%s8101_s1 + $0x600] ss:$16 sps:$4 sm:$0xff]   ;;  %v5627_v9 = vld [vmem:[%s8101_s1 + $0x608] ss:$16 sps:$4 sm:$0xff]  }
  0x85   :  { %3762 = vmatprep.mubr.bf16.mxu0 %v5623_v12  ;;  %4149 = vmatprep.mubr.bf16.mxu1 %v5623_v12  ;;  %v5722_v12 = vld [vmem:[%s8102_s0 + $0x1c] ss:$72 sps:$4 sm:$0xff]  }
  0x87   :  { %3733 = vmatpush1.bf16.msra.mxu0 %v5531_v10  ;;  %4120 = vmatpush1.bf16.msra.mxu1 %v5534_v11  ;;  %v5632_v10 = vld [vmem:[%s8101_s1 + $0x624] ss:$16 sps:$4 sm:$0xff]   ;;  %v5635_v11 = vld [vmem:[%s8101_s1 + $0x62c] ss:$16 sps:$4 sm:$0xff]  }
  0x88   :  { %3734 = vmatprep.subr.bf16.mxu0 %v5539_v13  ;;  %4121 = vmatprep.subr.bf16.mxu1 %v5542_v14  ;;  %v5630_v13 = vld [vmem:[%s8101_s1 + $0x620] ss:$16 sps:$4 sm:$0xff]   ;;  %v5633_v14 = vld [vmem:[%s8101_s1 + $0x628] ss:$16 sps:$4 sm:$0xff]  }
  0x8b   :  { %3735 = vmatpush1.bf16.msra.mxu0 %v5537_v15  ;;  %4122 = vmatpush1.bf16.msra.mxu1 %v5540_v16  ;;  %v5638_v15 = vld [vmem:[%s8101_s1 + $0x644] ss:$16 sps:$4 sm:$0xff]   ;;  %v5641_v16 = vld [vmem:[%s8101_s1 + $0x64c] ss:$16 sps:$4 sm:$0xff]  }
  0x8c   :  { %3736 = vmatprep.subr.bf16.mxu0 %v5545_v17  ;;  %4123 = vmatprep.subr.bf16.mxu1 %v5548_v18  ;;  %v5636_v17 = vld [vmem:[%s8101_s1 + $0x640] ss:$16 sps:$4 sm:$0xff]   ;;  %v5639_v18 = vld [vmem:[%s8101_s1 + $0x648] ss:$16 sps:$4 sm:$0xff]  }
  0x8f   :  { %3737 = vmatpush1.bf16.msra.mxu0 %v5543_v19  ;;  %4124 = vmatpush1.bf16.msra.mxu1 %v5546_v20  ;;  %v5644_v19 = vld [vmem:[%s8101_s1 + $0x664] ss:$16 sps:$4 sm:$0xff]   ;;  %v5647_v20 = vld [vmem:[%s8101_s1 + $0x66c] ss:$16 sps:$4 sm:$0xff]  }
  0x90   :  { %3738 = vmatprep.subr.bf16.mxu0 %v5551_v21  ;;  %4125 = vmatprep.subr.bf16.mxu1 %v5554_v22  ;;  %v5642_v21 = vld [vmem:[%s8101_s1 + $0x660] ss:$16 sps:$4 sm:$0xff]   ;;  %v5645_v22 = vld [vmem:[%s8101_s1 + $0x668] ss:$16 sps:$4 sm:$0xff]  }
  0x93   :  { %3739 = vmatpush1.bf16.msra.mxu0 %v5549_v23  ;;  %4126 = vmatpush1.bf16.msra.mxu1 %v5552_v24  ;;  %v5650_v23 = vld [vmem:[%s8101_s1 + $0x684] ss:$16 sps:$4 sm:$0xff]   ;;  %v5653_v24 = vld [vmem:[%s8101_s1 + $0x68c] ss:$16 sps:$4 sm:$0xff]  }
  0x94   :  { %3740 = vmatprep.subr.bf16.mxu0 %v5557_v25  ;;  %4127 = vmatprep.subr.bf16.mxu1 %v5560_v26  ;;  %v5648_v25 = vld [vmem:[%s8101_s1 + $0x680] ss:$16 sps:$4 sm:$0xff]   ;;  %v5651_v26 = vld [vmem:[%s8101_s1 + $0x688] ss:$16 sps:$4 sm:$0xff]  }
  0x97   :  { %3741 = vmatpush1.bf16.msra.mxu0 %v5555_v27  ;;  %4128 = vmatpush1.bf16.msra.mxu1 %v5558_v28  ;;  %v5656_v27 = vld [vmem:[%s8101_s1 + $0x6a4] ss:$16 sps:$4 sm:$0xff]   ;;  %v5659_v28 = vld [vmem:[%s8101_s1 + $0x6ac] ss:$16 sps:$4 sm:$0xff]  }
  0x98   :  { %3742 = vmatprep.subr.bf16.mxu0 %v5563_v29  ;;  %4129 = vmatprep.subr.bf16.mxu1 %v5566_v30  ;;  %v5654_v29 = vld [vmem:[%s8101_s1 + $0x6a0] ss:$16 sps:$4 sm:$0xff]   ;;  %v5657_v30 = vld [vmem:[%s8101_s1 + $0x6a8] ss:$16 sps:$4 sm:$0xff]  }
  0x9b   :  { %3743 = vmatpush1.bf16.msra.mxu0 %v5561_v31  ;;  %4130 = vmatpush1.bf16.msra.mxu1 %v5564_v32  ;;  %v5662_v31 = vld [vmem:[%s8101_s1 + $0x6c4] ss:$16 sps:$4 sm:$0xff]   ;;  %v5665_v32 = vld [vmem:[%s8101_s1 + $0x6cc] ss:$16 sps:$4 sm:$0xff]  }
  0x9c   :  { %3744 = vmatprep.subr.bf16.mxu0 %v5569_v33  ;;  %4131 = vmatprep.subr.bf16.mxu1 %v5572_v34  ;;  %v5660_v33 = vld [vmem:[%s8101_s1 + $0x6c0] ss:$16 sps:$4 sm:$0xff]   ;;  %v5663_v34 = vld [vmem:[%s8101_s1 + $0x6c8] ss:$16 sps:$4 sm:$0xff]  }
  0x9f   :  { %3745 = vmatpush1.bf16.msra.mxu0 %v5567_v35  ;;  %4132 = vmatpush1.bf16.msra.mxu1 %v5570_v36  ;;  %v5668_v35 = vld [vmem:[%s8101_s1 + $0x6e4] ss:$16 sps:$4 sm:$0xff]   ;;  %v5671_v36 = vld [vmem:[%s8101_s1 + $0x6ec] ss:$16 sps:$4 sm:$0xff]  }
  0xa0   :  { %3746 = vmatprep.subr.bf16.mxu0 %v5575_v37  ;;  %4133 = vmatprep.subr.bf16.mxu1 %v5578_v38  ;;  %v5666_v37 = vld [vmem:[%s8101_s1 + $0x6e0] ss:$16 sps:$4 sm:$0xff]   ;;  %v5669_v38 = vld [vmem:[%s8101_s1 + $0x6e8] ss:$16 sps:$4 sm:$0xff]  }
  0xa3   :  { %3747 = vmatpush1.bf16.msra.mxu0 %v5573_v39  ;;  %4134 = vmatpush1.bf16.msra.mxu1 %v5576_v40  ;;  %v5674_v39 = vld [vmem:[%s8101_s1 + $0x704] ss:$16 sps:$4 sm:$0xff]   ;;  %v5677_v40 = vld [vmem:[%s8101_s1 + $0x70c] ss:$16 sps:$4 sm:$0xff]  }
  0xa4   :  { %3748 = vmatprep.subr.bf16.mxu0 %v5581_v41  ;;  %4135 = vmatprep.subr.bf16.mxu1 %v5584_v42  ;;  %v5672_v41 = vld [vmem:[%s8101_s1 + $0x700] ss:$16 sps:$4 sm:$0xff]   ;;  %v5675_v42 = vld [vmem:[%s8101_s1 + $0x708] ss:$16 sps:$4 sm:$0xff]  }
  0xa7   :  { %3749 = vmatpush1.bf16.msra.mxu0 %v5579_v43  ;;  %4136 = vmatpush1.bf16.msra.mxu1 %v5582_v44  ;;  %v5680_v43 = vld [vmem:[%s8101_s1 + $0x724] ss:$16 sps:$4 sm:$0xff]   ;;  %v5683_v44 = vld [vmem:[%s8101_s1 + $0x72c] ss:$16 sps:$4 sm:$0xff]  }
  0xa8   :  { %3750 = vmatprep.subr.bf16.mxu0 %v5587_v45  ;;  %4137 = vmatprep.subr.bf16.mxu1 %v5590_v46  ;;  %v5678_v45 = vld [vmem:[%s8101_s1 + $0x720] ss:$16 sps:$4 sm:$0xff]   ;;  %v5681_v46 = vld [vmem:[%s8101_s1 + $0x728] ss:$16 sps:$4 sm:$0xff]  }
  0xab   :  { %3751 = vmatpush1.bf16.msra.mxu0 %v5585_v47  ;;  %4138 = vmatpush1.bf16.msra.mxu1 %v5588_v48  ;;  %v5686_v47 = vld [vmem:[%s8101_s1 + $0x744] ss:$16 sps:$4 sm:$0xff]   ;;  %v5689_v48 = vld [vmem:[%s8101_s1 + $0x74c] ss:$16 sps:$4 sm:$0xff]  }
  0xac   :  { %3752 = vmatprep.subr.bf16.mxu0 %v5593_v49  ;;  %4139 = vmatprep.subr.bf16.mxu1 %v5596_v50  ;;  %v5684_v49 = vld [vmem:[%s8101_s1 + $0x740] ss:$16 sps:$4 sm:$0xff]   ;;  %v5687_v50 = vld [vmem:[%s8101_s1 + $0x748] ss:$16 sps:$4 sm:$0xff]  }
  0xaf   :  { %3753 = vmatpush1.bf16.msra.mxu0 %v5591_v51  ;;  %4140 = vmatpush1.bf16.msra.mxu1 %v5594_v52  ;;  %v5692_v51 = vld [vmem:[%s8101_s1 + $0x764] ss:$16 sps:$4 sm:$0xff]   ;;  %v5695_v52 = vld [vmem:[%s8101_s1 + $0x76c] ss:$16 sps:$4 sm:$0xff]  }
  0xb0   :  { %3754 = vmatprep.subr.bf16.mxu0 %v5599_v53  ;;  %4141 = vmatprep.subr.bf16.mxu1 %v5602_v54  ;;  %v5690_v53 = vld [vmem:[%s8101_s1 + $0x760] ss:$16 sps:$4 sm:$0xff]   ;;  %v5693_v54 = vld [vmem:[%s8101_s1 + $0x768] ss:$16 sps:$4 sm:$0xff]  }
  0xb3   :  { %3755 = vmatpush1.bf16.msra.mxu0 %v5597_v55  ;;  %4142 = vmatpush1.bf16.msra.mxu1 %v5600_v56  ;;  %v5698_v55 = vld [vmem:[%s8101_s1 + $0x784] ss:$16 sps:$4 sm:$0xff]   ;;  %v5701_v56 = vld [vmem:[%s8101_s1 + $0x78c] ss:$16 sps:$4 sm:$0xff]  }
  0xb4   :  { %3756 = vmatprep.subr.bf16.mxu0 %v5605_v57  ;;  %4143 = vmatprep.subr.bf16.mxu1 %v5608_v58  ;;  %v5696_v57 = vld [vmem:[%s8101_s1 + $0x780] ss:$16 sps:$4 sm:$0xff]   ;;  %v5699_v58 = vld [vmem:[%s8101_s1 + $0x788] ss:$16 sps:$4 sm:$0xff]  }
  0xb7   :  { %3757 = vmatpush1.bf16.msra.mxu0 %v5603_v59  ;;  %4144 = vmatpush1.bf16.msra.mxu1 %v5606_v60  ;;  %v5704_v59 = vld [vmem:[%s8101_s1 + $0x7a4] ss:$16 sps:$4 sm:$0xff]   ;;  %v5707_v60 = vld [vmem:[%s8101_s1 + $0x7ac] ss:$16 sps:$4 sm:$0xff]  }
  0xb8   :  { %3758 = vmatprep.subr.bf16.mxu0 %v5611_v61  ;;  %4145 = vmatprep.subr.bf16.mxu1 %v5614_v62  ;;  %v5702_v61 = vld [vmem:[%s8101_s1 + $0x7a0] ss:$16 sps:$4 sm:$0xff]   ;;  %v5705_v62 = vld [vmem:[%s8101_s1 + $0x7a8] ss:$16 sps:$4 sm:$0xff]  }
  0xbb   :  { %3759 = vmatpush1.bf16.msra.mxu0 %v5609_v63  ;;  %4146 = vmatpush1.bf16.msra.mxu1 %v5612_v0  ;;  %v5710_v63 = vld [vmem:[%s8101_s1 + $0x7c4] ss:$16 sps:$4 sm:$0xff]   ;;  %v5713_v0 = vld [vmem:[%s8101_s1 + $0x7cc] ss:$16 sps:$4 sm:$0xff]  }
  0xbc   :  { %3760 = vmatprep.subr.bf16.mxu0 %v5617_v1  ;;  %4147 = vmatprep.subr.bf16.mxu1 %v5620_v2  ;;  %v5708_v1 = vld [vmem:[%s8101_s1 + $0x7c0] ss:$16 sps:$4 sm:$0xff]   ;;  %v5711_v2 = vld [vmem:[%s8101_s1 + $0x7c8] ss:$16 sps:$4 sm:$0xff]  }
  0xbf   :  { %3761 = vmatpush1.bf16.msra.mxu0 %v5615_v3  ;;  %4148 = vmatpush1.bf16.msra.mxu1 %v5618_v4  ;;  %v5716_v3 = vld [vmem:[%s8101_s1 + $0x7e4] ss:$16 sps:$4 sm:$0xff]   ;;  %v5719_v4 = vld [vmem:[%s8101_s1 + $0x7ec] ss:$16 sps:$4 sm:$0xff]  }
  0xc0   :  { %3773 = vmatprep.subr.bf16.mxu0 %v5626_v5  ;;  %4160 = vmatprep.subr.bf16.mxu1 %v5629_v6  ;;  %v5714_v5 = vld [vmem:[%s8101_s1 + $0x7e0] ss:$16 sps:$4 sm:$0xff]   ;;  %v5717_v6 = vld [vmem:[%s8101_s1 + $0x7e8] ss:$16 sps:$4 sm:$0xff]  }
  0xc2   :  { %3763 = vmatmul.mubr.bf16.vlgmr.msra.gmra.mrb[0].mxu0 %v5621_v7  ;;  %4150 = vmatmul.mubr.bf16.vlgmr.msra.gmra.mrb[0].mxu1 %v5621_v7  ;;  %v5725_v7 = vld [vmem:[%s8101_s1 + $0x804] ss:$16 sps:$4 sm:$0xff]  }
  0xc3   :  { %3774 = vmatpush1.bf16.msra.mxu0 %v5624_v8  ;;  %4161 = vmatpush1.bf16.msra.mxu1 %v5627_v9  ;;  %v5728_v8 = vld [vmem:[%s8101_s1 + $0x80c] ss:$16 sps:$4 sm:$0xff]   ;;  %v5720_v9 = vld [vmem:[%s8102_s0 + $0x18] ss:$72 sps:$4 sm:$0xff]  }
  0xc4   :  { %3775 = vmatprep.subr.bf16.mxu0 %v5632_v10  ;;  %4162 = vmatprep.subr.bf16.mxu1 %v5635_v11  ;;  %v5723_v10 = vld [vmem:[%s8101_s1 + $0x800] ss:$16 sps:$4 sm:$0xff]   ;;  %v5726_v11 = vld [vmem:[%s8101_s1 + $0x808] ss:$16 sps:$4 sm:$0xff]  }
  0xc5   :  { %3805 = vmatprep.mubr.bf16.mxu0 %v5722_v12  ;;  %4192 = vmatprep.mubr.bf16.mxu1 %v5722_v12  ;;  %v5731_v12 = vld [vmem:[%s8101_s1 + $0x824] ss:$16 sps:$4 sm:$0xff]  }
  0xc7   :  { %3776 = vmatpush1.bf16.msra.mxu0 %v5630_v13  ;;  %4163 = vmatpush1.bf16.msra.mxu1 %v5633_v14  ;;  %v5734_v13 = vld [vmem:[%s8101_s1 + $0x82c] ss:$16 sps:$4 sm:$0xff]  }
  0xc8   :  { %3777 = vmatprep.subr.bf16.mxu0 %v5638_v15  ;;  %4164 = vmatprep.subr.bf16.mxu1 %v5641_v16  ;;  %v5821_v14 = vld [vmem:[%s8102_s0 + $0x24] ss:$72 sps:$4 sm:$0xff]   ;;  %v5729_v15 = vld [vmem:[%s8101_s1 + $0x820] ss:$16 sps:$4 sm:$0xff]   ;;  %v5732_v16 = vld [vmem:[%s8101_s1 + $0x828] ss:$16 sps:$4 sm:$0xff]  }
  0xcb   :  { %3778 = vmatpush1.bf16.msra.mxu0 %v5636_v17  ;;  %4165 = vmatpush1.bf16.msra.mxu1 %v5639_v18  ;;  %v5737_v17 = vld [vmem:[%s8101_s1 + $0x844] ss:$16 sps:$4 sm:$0xff]   ;;  %v5740_v18 = vld [vmem:[%s8101_s1 + $0x84c] ss:$16 sps:$4 sm:$0xff]  }
  0xcc   :  { %3779 = vmatprep.subr.bf16.mxu0 %v5644_v19  ;;  %4166 = vmatprep.subr.bf16.mxu1 %v5647_v20  ;;  %v5735_v19 = vld [vmem:[%s8101_s1 + $0x840] ss:$16 sps:$4 sm:$0xff]   ;;  %v5738_v20 = vld [vmem:[%s8101_s1 + $0x848] ss:$16 sps:$4 sm:$0xff]  }
  0xcf   :  { %3780 = vmatpush1.bf16.msra.mxu0 %v5642_v21  ;;  %4167 = vmatpush1.bf16.msra.mxu1 %v5645_v22  ;;  %v5743_v21 = vld [vmem:[%s8101_s1 + $0x864] ss:$16 sps:$4 sm:$0xff]   ;;  %v5746_v22 = vld [vmem:[%s8101_s1 + $0x86c] ss:$16 sps:$4 sm:$0xff]  }
  0xd0   :  { %3781 = vmatprep.subr.bf16.mxu0 %v5650_v23  ;;  %4168 = vmatprep.subr.bf16.mxu1 %v5653_v24  ;;  %v5741_v23 = vld [vmem:[%s8101_s1 + $0x860] ss:$16 sps:$4 sm:$0xff]   ;;  %v5744_v24 = vld [vmem:[%s8101_s1 + $0x868] ss:$16 sps:$4 sm:$0xff]  }
  0xd3   :  { %3782 = vmatpush1.bf16.msra.mxu0 %v5648_v25  ;;  %4169 = vmatpush1.bf16.msra.mxu1 %v5651_v26  ;;  %v5749_v25 = vld [vmem:[%s8101_s1 + $0x884] ss:$16 sps:$4 sm:$0xff]   ;;  %v5752_v26 = vld [vmem:[%s8101_s1 + $0x88c] ss:$16 sps:$4 sm:$0xff]  }
  0xd4   :  { %3783 = vmatprep.subr.bf16.mxu0 %v5656_v27  ;;  %4170 = vmatprep.subr.bf16.mxu1 %v5659_v28  ;;  %v5747_v27 = vld [vmem:[%s8101_s1 + $0x880] ss:$16 sps:$4 sm:$0xff]   ;;  %v5750_v28 = vld [vmem:[%s8101_s1 + $0x888] ss:$16 sps:$4 sm:$0xff]  }
  0xd7   :  { %3784 = vmatpush1.bf16.msra.mxu0 %v5654_v29  ;;  %4171 = vmatpush1.bf16.msra.mxu1 %v5657_v30  ;;  %v5755_v29 = vld [vmem:[%s8101_s1 + $0x8a4] ss:$16 sps:$4 sm:$0xff]   ;;  %v5758_v30 = vld [vmem:[%s8101_s1 + $0x8ac] ss:$16 sps:$4 sm:$0xff]  }
  0xd8   :  { %3785 = vmatprep.subr.bf16.mxu0 %v5662_v31  ;;  %4172 = vmatprep.subr.bf16.mxu1 %v5665_v32  ;;  %v5753_v31 = vld [vmem:[%s8101_s1 + $0x8a0] ss:$16 sps:$4 sm:$0xff]   ;;  %v5756_v32 = vld [vmem:[%s8101_s1 + $0x8a8] ss:$16 sps:$4 sm:$0xff]  }
  0xdb   :  { %3786 = vmatpush1.bf16.msra.mxu0 %v5660_v33  ;;  %4173 = vmatpush1.bf16.msra.mxu1 %v5663_v34  ;;  %v5761_v33 = vld [vmem:[%s8101_s1 + $0x8c4] ss:$16 sps:$4 sm:$0xff]   ;;  %v5764_v34 = vld [vmem:[%s8101_s1 + $0x8cc] ss:$16 sps:$4 sm:$0xff]  }
  0xdc   :  { %3787 = vmatprep.subr.bf16.mxu0 %v5668_v35  ;;  %4174 = vmatprep.subr.bf16.mxu1 %v5671_v36  ;;  %v5759_v35 = vld [vmem:[%s8101_s1 + $0x8c0] ss:$16 sps:$4 sm:$0xff]   ;;  %v5762_v36 = vld [vmem:[%s8101_s1 + $0x8c8] ss:$16 sps:$4 sm:$0xff]  }
  0xdf   :  { %3788 = vmatpush1.bf16.msra.mxu0 %v5666_v37  ;;  %4175 = vmatpush1.bf16.msra.mxu1 %v5669_v38  ;;  %v5767_v37 = vld [vmem:[%s8101_s1 + $0x8e4] ss:$16 sps:$4 sm:$0xff]   ;;  %v5770_v38 = vld [vmem:[%s8101_s1 + $0x8ec] ss:$16 sps:$4 sm:$0xff]  }
  0xe0   :  { %3789 = vmatprep.subr.bf16.mxu0 %v5674_v39  ;;  %4176 = vmatprep.subr.bf16.mxu1 %v5677_v40  ;;  %v5765_v39 = vld [vmem:[%s8101_s1 + $0x8e0] ss:$16 sps:$4 sm:$0xff]   ;;  %v5768_v40 = vld [vmem:[%s8101_s1 + $0x8e8] ss:$16 sps:$4 sm:$0xff]  }
  0xe3   :  { %3790 = vmatpush1.bf16.msra.mxu0 %v5672_v41  ;;  %4177 = vmatpush1.bf16.msra.mxu1 %v5675_v42  ;;  %v5773_v41 = vld [vmem:[%s8101_s1 + $0x904] ss:$16 sps:$4 sm:$0xff]   ;;  %v5776_v42 = vld [vmem:[%s8101_s1 + $0x90c] ss:$16 sps:$4 sm:$0xff]  }
  0xe4   :  { %3791 = vmatprep.subr.bf16.mxu0 %v5680_v43  ;;  %4178 = vmatprep.subr.bf16.mxu1 %v5683_v44  ;;  %v5771_v43 = vld [vmem:[%s8101_s1 + $0x900] ss:$16 sps:$4 sm:$0xff]   ;;  %v5774_v44 = vld [vmem:[%s8101_s1 + $0x908] ss:$16 sps:$4 sm:$0xff]  }
  0xe7   :  { %3792 = vmatpush1.bf16.msra.mxu0 %v5678_v45  ;;  %4179 = vmatpush1.bf16.msra.mxu1 %v5681_v46  ;;  %v5779_v45 = vld [vmem:[%s8101_s1 + $0x924] ss:$16 sps:$4 sm:$0xff]   ;;  %v5782_v46 = vld [vmem:[%s8101_s1 + $0x92c] ss:$16 sps:$4 sm:$0xff]  }
  0xe8   :  { %3793 = vmatprep.subr.bf16.mxu0 %v5686_v47  ;;  %4180 = vmatprep.subr.bf16.mxu1 %v5689_v48  ;;  %v5777_v47 = vld [vmem:[%s8101_s1 + $0x920] ss:$16 sps:$4 sm:$0xff]   ;;  %v5780_v48 = vld [vmem:[%s8101_s1 + $0x928] ss:$16 sps:$4 sm:$0xff]  }
  0xeb   :  { %3794 = vmatpush1.bf16.msra.mxu0 %v5684_v49  ;;  %4181 = vmatpush1.bf16.msra.mxu1 %v5687_v50  ;;  %v5785_v49 = vld [vmem:[%s8101_s1 + $0x944] ss:$16 sps:$4 sm:$0xff]   ;;  %v5788_v50 = vld [vmem:[%s8101_s1 + $0x94c] ss:$16 sps:$4 sm:$0xff]  }
  0xec   :  { %3795 = vmatprep.subr.bf16.mxu0 %v5692_v51  ;;  %4182 = vmatprep.subr.bf16.mxu1 %v5695_v52  ;;  %v5783_v51 = vld [vmem:[%s8101_s1 + $0x940] ss:$16 sps:$4 sm:$0xff]   ;;  %v5786_v52 = vld [vmem:[%s8101_s1 + $0x948] ss:$16 sps:$4 sm:$0xff]  }
  0xef   :  { %3796 = vmatpush1.bf16.msra.mxu0 %v5690_v53  ;;  %4183 = vmatpush1.bf16.msra.mxu1 %v5693_v54  ;;  %v5791_v53 = vld [vmem:[%s8101_s1 + $0x964] ss:$16 sps:$4 sm:$0xff]   ;;  %v5794_v54 = vld [vmem:[%s8101_s1 + $0x96c] ss:$16 sps:$4 sm:$0xff]  }
  0xf0   :  { %3797 = vmatprep.subr.bf16.mxu0 %v5698_v55  ;;  %4184 = vmatprep.subr.bf16.mxu1 %v5701_v56  ;;  %v5789_v55 = vld [vmem:[%s8101_s1 + $0x960] ss:$16 sps:$4 sm:$0xff]   ;;  %v5792_v56 = vld [vmem:[%s8101_s1 + $0x968] ss:$16 sps:$4 sm:$0xff]  }
  0xf3   :  { %3798 = vmatpush1.bf16.msra.mxu0 %v5696_v57  ;;  %4185 = vmatpush1.bf16.msra.mxu1 %v5699_v58  ;;  %v5797_v57 = vld [vmem:[%s8101_s1 + $0x984] ss:$16 sps:$4 sm:$0xff]   ;;  %v5800_v58 = vld [vmem:[%s8101_s1 + $0x98c] ss:$16 sps:$4 sm:$0xff]  }
  0xf4   :  { %3799 = vmatprep.subr.bf16.mxu0 %v5704_v59  ;;  %4186 = vmatprep.subr.bf16.mxu1 %v5707_v60  ;;  %v5795_v59 = vld [vmem:[%s8101_s1 + $0x980] ss:$16 sps:$4 sm:$0xff]   ;;  %v5798_v60 = vld [vmem:[%s8101_s1 + $0x988] ss:$16 sps:$4 sm:$0xff]  }
  0xf7   :  { %3800 = vmatpush1.bf16.msra.mxu0 %v5702_v61  ;;  %4187 = vmatpush1.bf16.msra.mxu1 %v5705_v62  ;;  %v5803_v61 = vld [vmem:[%s8101_s1 + $0x9a4] ss:$16 sps:$4 sm:$0xff]   ;;  %v5806_v62 = vld [vmem:[%s8101_s1 + $0x9ac] ss:$16 sps:$4 sm:$0xff]  }
  0xf8   :  { %3801 = vmatprep.subr.bf16.mxu0 %v5710_v63  ;;  %4188 = vmatprep.subr.bf16.mxu1 %v5713_v0  ;;  %v5801_v63 = vld [vmem:[%s8101_s1 + $0x9a0] ss:$16 sps:$4 sm:$0xff]   ;;  %v5804_v0 = vld [vmem:[%s8101_s1 + $0x9a8] ss:$16 sps:$4 sm:$0xff]  }
  0xfb   :  { %3802 = vmatpush1.bf16.msra.mxu0 %v5708_v1  ;;  %4189 = vmatpush1.bf16.msra.mxu1 %v5711_v2  ;;  %v5809_v1 = vld [vmem:[%s8101_s1 + $0x9c4] ss:$16 sps:$4 sm:$0xff]   ;;  %v5812_v2 = vld [vmem:[%s8101_s1 + $0x9cc] ss:$16 sps:$4 sm:$0xff]  }
  0xfc   :  { %3803 = vmatprep.subr.bf16.mxu0 %v5716_v3  ;;  %4190 = vmatprep.subr.bf16.mxu1 %v5719_v4  ;;  %v5807_v3 = vld [vmem:[%s8101_s1 + $0x9c0] ss:$16 sps:$4 sm:$0xff]   ;;  %v5810_v4 = vld [vmem:[%s8101_s1 + $0x9c8] ss:$16 sps:$4 sm:$0xff]  }
  0xff   :  { %3804 = vmatpush1.bf16.msra.mxu0 %v5714_v5  ;;  %4191 = vmatpush1.bf16.msra.mxu1 %v5717_v6  ;;  %v5815_v5 = vld [vmem:[%s8101_s1 + $0x9e4] ss:$16 sps:$4 sm:$0xff]   ;;  %v5818_v6 = vld [vmem:[%s8101_s1 + $0x9ec] ss:$16 sps:$4 sm:$0xff]  }
 0x100   :  { %3816 = vmatprep.subr.bf16.mxu0 %v5725_v7  ;;  %4203 = vmatprep.subr.bf16.mxu1 %v5728_v8  ;;  %v5813_v7 = vld [vmem:[%s8101_s1 + $0x9e0] ss:$16 sps:$4 sm:$0xff]   ;;  %v5816_v8 = vld [vmem:[%s8101_s1 + $0x9e8] ss:$16 sps:$4 sm:$0xff]  }
 0x102   :  { %3806 = vmatmul.mubr.bf16.vlgmr.msra.gmra.mrb[0].mxu0 %v5720_v9  ;;  %4193 = vmatmul.mubr.bf16.vlgmr.msra.gmra.mrb[0].mxu1 %v5720_v9  ;;  %v5819_v9 = vld [vmem:[%s8102_s0 + $0x20] ss:$72 sps:$4 sm:$0xff]  }
 0x103   :  { %3817 = vmatpush1.bf16.msra.mxu0 %v5723_v10  ;;  %4204 = vmatpush1.bf16.msra.mxu1 %v5726_v11  ;;  %v5824_v10 = vld [vmem:[%s8101_s1 + $0xa04] ss:$16 sps:$4 sm:$0xff]   ;;  %v5827_v11 = vld [vmem:[%s8101_s1 + $0xa0c] ss:$16 sps:$4 sm:$0xff]  }
 0x104   :  { %3818 = vmatprep.subr.bf16.mxu0 %v5731_v12  ;;  %4205 = vmatprep.subr.bf16.mxu1 %v5734_v13  ;;  %v5822_v12 = vld [vmem:[%s8101_s1 + $0xa00] ss:$16 sps:$4 sm:$0xff]   ;;  %v5825_v13 = vld [vmem:[%s8101_s1 + $0xa08] ss:$16 sps:$4 sm:$0xff]  }
 0x105   :  { %3848 = vmatprep.mubr.bf16.mxu0 %v5821_v14  ;;  %4235 = vmatprep.mubr.bf16.mxu1 %v5821_v14  ;;  %v5830_v14 = vld [vmem:[%s8101_s1 + $0xa24] ss:$16 sps:$4 sm:$0xff]  }
 0x107   :  { %3819 = vmatpush1.bf16.msra.mxu0 %v5729_v15  ;;  %4206 = vmatpush1.bf16.msra.mxu1 %v5732_v16  ;;  %v5833_v15 = vld [vmem:[%s8101_s1 + $0xa2c] ss:$16 sps:$4 sm:$0xff]  }
 0x108   :  { %3820 = vmatprep.subr.bf16.mxu0 %v5737_v17  ;;  %4207 = vmatprep.subr.bf16.mxu1 %v5740_v18  ;;  %v5920_v16 = vld [vmem:[%s8102_s0 + $0x2c] ss:$72 sps:$4 sm:$0xff]   ;;  %v5828_v17 = vld [vmem:[%s8101_s1 + $0xa20] ss:$16 sps:$4 sm:$0xff]   ;;  %v5831_v18 = vld [vmem:[%s8101_s1 + $0xa28] ss:$16 sps:$4 sm:$0xff]  }
 0x10b   :  { %3821 = vmatpush1.bf16.msra.mxu0 %v5735_v19  ;;  %4208 = vmatpush1.bf16.msra.mxu1 %v5738_v20  ;;  %v5836_v19 = vld [vmem:[%s8101_s1 + $0xa44] ss:$16 sps:$4 sm:$0xff]   ;;  %v5839_v20 = vld [vmem:[%s8101_s1 + $0xa4c] ss:$16 sps:$4 sm:$0xff]  }
 0x10c   :  { %3822 = vmatprep.subr.bf16.mxu0 %v5743_v21  ;;  %4209 = vmatprep.subr.bf16.mxu1 %v5746_v22  ;;  %v5834_v21 = vld [vmem:[%s8101_s1 + $0xa40] ss:$16 sps:$4 sm:$0xff]   ;;  %v5837_v22 = vld [vmem:[%s8101_s1 + $0xa48] ss:$16 sps:$4 sm:$0xff]  }
 0x10f   :  { %3823 = vmatpush1.bf16.msra.mxu0 %v5741_v23  ;;  %4210 = vmatpush1.bf16.msra.mxu1 %v5744_v24  ;;  %v5842_v23 = vld [vmem:[%s8101_s1 + $0xa64] ss:$16 sps:$4 sm:$0xff]   ;;  %v5845_v24 = vld [vmem:[%s8101_s1 + $0xa6c] ss:$16 sps:$4 sm:$0xff]  }
 0x110   :  { %3824 = vmatprep.subr.bf16.mxu0 %v5749_v25  ;;  %4211 = vmatprep.subr.bf16.mxu1 %v5752_v26  ;;  %v5840_v25 = vld [vmem:[%s8101_s1 + $0xa60] ss:$16 sps:$4 sm:$0xff]   ;;  %v5843_v26 = vld [vmem:[%s8101_s1 + $0xa68] ss:$16 sps:$4 sm:$0xff]  }
 0x113   :  { %3825 = vmatpush1.bf16.msra.mxu0 %v5747_v27  ;;  %4212 = vmatpush1.bf16.msra.mxu1 %v5750_v28  ;;  %v5848_v27 = vld [vmem:[%s8101_s1 + $0xa84] ss:$16 sps:$4 sm:$0xff]   ;;  %v5851_v28 = vld [vmem:[%s8101_s1 + $0xa8c] ss:$16 sps:$4 sm:$0xff]  }
 0x114   :  { %3826 = vmatprep.subr.bf16.mxu0 %v5755_v29  ;;  %4213 = vmatprep.subr.bf16.mxu1 %v5758_v30  ;;  %v5846_v29 = vld [vmem:[%s8101_s1 + $0xa80] ss:$16 sps:$4 sm:$0xff]   ;;  %v5849_v30 = vld [vmem:[%s8101_s1 + $0xa88] ss:$16 sps:$4 sm:$0xff]  }
 0x117   :  { %3827 = vmatpush1.bf16.msra.mxu0 %v5753_v31  ;;  %4214 = vmatpush1.bf16.msra.mxu1 %v5756_v32  ;;  %v5854_v31 = vld [vmem:[%s8101_s1 + $0xaa4] ss:$16 sps:$4 sm:$0xff]   ;;  %v5857_v32 = vld [vmem:[%s8101_s1 + $0xaac] ss:$16 sps:$4 sm:$0xff]  }
 0x118   :  { %3828 = vmatprep.subr.bf16.mxu0 %v5761_v33  ;;  %4215 = vmatprep.subr.bf16.mxu1 %v5764_v34  ;;  %v5852_v33 = vld [vmem:[%s8101_s1 + $0xaa0] ss:$16 sps:$4 sm:$0xff]   ;;  %v5855_v34 = vld [vmem:[%s8101_s1 + $0xaa8] ss:$16 sps:$4 sm:$0xff]  }
 0x11b   :  { %3829 = vmatpush1.bf16.msra.mxu0 %v5759_v35  ;;  %4216 = vmatpush1.bf16.msra.mxu1 %v5762_v36  ;;  %v5860_v35 = vld [vmem:[%s8101_s1 + $0xac4] ss:$16 sps:$4 sm:$0xff]   ;;  %v5863_v36 = vld [vmem:[%s8101_s1 + $0xacc] ss:$16 sps:$4 sm:$0xff]  }
 0x11c   :  { %3830 = vmatprep.subr.bf16.mxu0 %v5767_v37  ;;  %4217 = vmatprep.subr.bf16.mxu1 %v5770_v38  ;;  %v5858_v37 = vld [vmem:[%s8101_s1 + $0xac0] ss:$16 sps:$4 sm:$0xff]   ;;  %v5861_v38 = vld [vmem:[%s8101_s1 + $0xac8] ss:$16 sps:$4 sm:$0xff]  }
 0x11f   :  { %3831 = vmatpush1.bf16.msra.mxu0 %v5765_v39  ;;  %4218 = vmatpush1.bf16.msra.mxu1 %v5768_v40  ;;  %v5866_v39 = vld [vmem:[%s8101_s1 + $0xae4] ss:$16 sps:$4 sm:$0xff]   ;;  %v5869_v40 = vld [vmem:[%s8101_s1 + $0xaec] ss:$16 sps:$4 sm:$0xff]  }
 0x120   :  { %3832 = vmatprep.subr.bf16.mxu0 %v5773_v41  ;;  %4219 = vmatprep.subr.bf16.mxu1 %v5776_v42  ;;  %v5864_v41 = vld [vmem:[%s8101_s1 + $0xae0] ss:$16 sps:$4 sm:$0xff]   ;;  %v5867_v42 = vld [vmem:[%s8101_s1 + $0xae8] ss:$16 sps:$4 sm:$0xff]  }
 0x123   :  { %3833 = vmatpush1.bf16.msra.mxu0 %v5771_v43  ;;  %4220 = vmatpush1.bf16.msra.mxu1 %v5774_v44  ;;  %v5872_v43 = vld [vmem:[%s8101_s1 + $0xb04] ss:$16 sps:$4 sm:$0xff]   ;;  %v5875_v44 = vld [vmem:[%s8101_s1 + $0xb0c] ss:$16 sps:$4 sm:$0xff]  }
 0x124   :  { %3834 = vmatprep.subr.bf16.mxu0 %v5779_v45  ;;  %4221 = vmatprep.subr.bf16.mxu1 %v5782_v46  ;;  %v5870_v45 = vld [vmem:[%s8101_s1 + $0xb00] ss:$16 sps:$4 sm:$0xff]   ;;  %v5873_v46 = vld [vmem:[%s8101_s1 + $0xb08] ss:$16 sps:$4 sm:$0xff]  }
 0x127   :  { %3835 = vmatpush1.bf16.msra.mxu0 %v5777_v47  ;;  %4222 = vmatpush1.bf16.msra.mxu1 %v5780_v48  ;;  %v5878_v47 = vld [vmem:[%s8101_s1 + $0xb24] ss:$16 sps:$4 sm:$0xff]   ;;  %v5881_v48 = vld [vmem:[%s8101_s1 + $0xb2c] ss:$16 sps:$4 sm:$0xff]  }
 0x128   :  { %3836 = vmatprep.subr.bf16.mxu0 %v5785_v49  ;;  %4223 = vmatprep.subr.bf16.mxu1 %v5788_v50  ;;  %v5876_v49 = vld [vmem:[%s8101_s1 + $0xb20] ss:$16 sps:$4 sm:$0xff]   ;;  %v5879_v50 = vld [vmem:[%s8101_s1 + $0xb28] ss:$16 sps:$4 sm:$0xff]  }
 0x12b   :  { %3837 = vmatpush1.bf16.msra.mxu0 %v5783_v51  ;;  %4224 = vmatpush1.bf16.msra.mxu1 %v5786_v52  ;;  %v5884_v51 = vld [vmem:[%s8101_s1 + $0xb44] ss:$16 sps:$4 sm:$0xff]   ;;  %v5887_v52 = vld [vmem:[%s8101_s1 + $0xb4c] ss:$16 sps:$4 sm:$0xff]  }
 0x12c   :  { %3838 = vmatprep.subr.bf16.mxu0 %v5791_v53  ;;  %4225 = vmatprep.subr.bf16.mxu1 %v5794_v54  ;;  %v5882_v53 = vld [vmem:[%s8101_s1 + $0xb40] ss:$16 sps:$4 sm:$0xff]   ;;  %v5885_v54 = vld [vmem:[%s8101_s1 + $0xb48] ss:$16 sps:$4 sm:$0xff]  }
 0x12f   :  { %3839 = vmatpush1.bf16.msra.mxu0 %v5789_v55  ;;  %4226 = vmatpush1.bf16.msra.mxu1 %v5792_v56  ;;  %v5890_v55 = vld [vmem:[%s8101_s1 + $0xb64] ss:$16 sps:$4 sm:$0xff]   ;;  %v5893_v56 = vld [vmem:[%s8101_s1 + $0xb6c] ss:$16 sps:$4 sm:$0xff]  }
 0x130   :  { %3840 = vmatprep.subr.bf16.mxu0 %v5797_v57  ;;  %4227 = vmatprep.subr.bf16.mxu1 %v5800_v58  ;;  %v5888_v57 = vld [vmem:[%s8101_s1 + $0xb60] ss:$16 sps:$4 sm:$0xff]   ;;  %v5891_v58 = vld [vmem:[%s8101_s1 + $0xb68] ss:$16 sps:$4 sm:$0xff]  }
 0x133   :  { %3841 = vmatpush1.bf16.msra.mxu0 %v5795_v59  ;;  %4228 = vmatpush1.bf16.msra.mxu1 %v5798_v60  ;;  %v5896_v59 = vld [vmem:[%s8101_s1 + $0xb84] ss:$16 sps:$4 sm:$0xff]   ;;  %v5899_v60 = vld [vmem:[%s8101_s1 + $0xb8c] ss:$16 sps:$4 sm:$0xff]  }
 0x134   :  { %3842 = vmatprep.subr.bf16.mxu0 %v5803_v61  ;;  %4229 = vmatprep.subr.bf16.mxu1 %v5806_v62  ;;  %v5894_v61 = vld [vmem:[%s8101_s1 + $0xb80] ss:$16 sps:$4 sm:$0xff]   ;;  %v5897_v62 = vld [vmem:[%s8101_s1 + $0xb88] ss:$16 sps:$4 sm:$0xff]  }
 0x137   :  { %3843 = vmatpush1.bf16.msra.mxu0 %v5801_v63  ;;  %4230 = vmatpush1.bf16.msra.mxu1 %v5804_v0  ;;  %v5902_v63 = vld [vmem:[%s8101_s1 + $0xba4] ss:$16 sps:$4 sm:$0xff]   ;;  %v5905_v0 = vld [vmem:[%s8101_s1 + $0xbac] ss:$16 sps:$4 sm:$0xff]  }
 0x138   :  { %3844 = vmatprep.subr.bf16.mxu0 %v5809_v1  ;;  %4231 = vmatprep.subr.bf16.mxu1 %v5812_v2  ;;  %v5900_v1 = vld [vmem:[%s8101_s1 + $0xba0] ss:$16 sps:$4 sm:$0xff]   ;;  %v5903_v2 = vld [vmem:[%s8101_s1 + $0xba8] ss:$16 sps:$4 sm:$0xff]  }
 0x13b   :  { %3845 = vmatpush1.bf16.msra.mxu0 %v5807_v3  ;;  %4232 = vmatpush1.bf16.msra.mxu1 %v5810_v4  ;;  %v5908_v3 = vld [vmem:[%s8101_s1 + $0xbc4] ss:$16 sps:$4 sm:$0xff]   ;;  %v5911_v4 = vld [vmem:[%s8101_s1 + $0xbcc] ss:$16 sps:$4 sm:$0xff]  }
 0x13c   :  { %3846 = vmatprep.subr.bf16.mxu0 %v5815_v5  ;;  %4233 = vmatprep.subr.bf16.mxu1 %v5818_v6  ;;  %v5906_v5 = vld [vmem:[%s8101_s1 + $0xbc0] ss:$16 sps:$4 sm:$0xff]   ;;  %v5909_v6 = vld [vmem:[%s8101_s1 + $0xbc8] ss:$16 sps:$4 sm:$0xff]  }
 0x13f   :  { %3847 = vmatpush1.bf16.msra.mxu0 %v5813_v7  ;;  %4234 = vmatpush1.bf16.msra.mxu1 %v5816_v8  ;;  %v5914_v7 = vld [vmem:[%s8101_s1 + $0xbe4] ss:$16 sps:$4 sm:$0xff]   ;;  %v5917_v8 = vld [vmem:[%s8101_s1 + $0xbec] ss:$16 sps:$4 sm:$0xff]  }
 0x140   :  { %3859 = vmatprep.subr.bf16.mxu0 %v5824_v10  ;;  %4246 = vmatprep.subr.bf16.mxu1 %v5827_v11  ;;  %v5915_v10 = vld [vmem:[%s8101_s1 + $0xbe8] ss:$16 sps:$4 sm:$0xff]   ;;  %v5923_v11 = vld [vmem:[%s8101_s1 + $0xc04] ss:$16 sps:$4 sm:$0xff]  }
 0x142   :  { %3849 = vmatmul.mubr.bf16.vlgmr.msra.gmra.mrb[0].mxu0 %v5819_v9  ;;  %4236 = vmatmul.mubr.bf16.vlgmr.msra.gmra.mrb[0].mxu1 %v5819_v9  ;;  %v5912_v9 = vld [vmem:[%s8101_s1 + $0xbe0] ss:$16 sps:$4 sm:$0xff]  }
 0x143   :  { %3860 = vmatpush1.bf16.msra.mxu0 %v5822_v12  ;;  %4247 = vmatpush1.bf16.msra.mxu1 %v5825_v13  ;;  %v5926_v12 = vld [vmem:[%s8101_s1 + $0xc0c] ss:$16 sps:$4 sm:$0xff]   ;;  %v5918_v13 = vld [vmem:[%s8102_s0 + $0x28] ss:$72 sps:$4 sm:$0xff]  }
 0x144   :  { %3861 = vmatprep.subr.bf16.mxu0 %v5830_v14  ;;  %4248 = vmatprep.subr.bf16.mxu1 %v5833_v15  ;;  %v5921_v14 = vld [vmem:[%s8101_s1 + $0xc00] ss:$16 sps:$4 sm:$0xff]   ;;  %v5924_v15 = vld [vmem:[%s8101_s1 + $0xc08] ss:$16 sps:$4 sm:$0xff]  }
 0x145   :  { %3891 = vmatprep.mubr.bf16.mxu0 %v5920_v16  ;;  %4278 = vmatprep.mubr.bf16.mxu1 %v5920_v16  ;;  %v5929_v16 = vld [vmem:[%s8101_s1 + $0xc24] ss:$16 sps:$4 sm:$0xff]  }
 0x147   :  { %3862 = vmatpush1.bf16.msra.mxu0 %v5828_v17  ;;  %4249 = vmatpush1.bf16.msra.mxu1 %v5831_v18  ;;  %v5932_v17 = vld [vmem:[%s8101_s1 + $0xc2c] ss:$16 sps:$4 sm:$0xff]  }
 0x148   :  { %3863 = vmatprep.subr.bf16.mxu0 %v5836_v19  ;;  %4250 = vmatprep.subr.bf16.mxu1 %v5839_v20  ;;  %v6019_v18 = vld [vmem:[%s8102_s0 + $0x34] ss:$72 sps:$4 sm:$0xff]   ;;  %v5927_v19 = vld [vmem:[%s8101_s1 + $0xc20] ss:$16 sps:$4 sm:$0xff]   ;;  %v5930_v20 = vld [vmem:[%s8101_s1 + $0xc28] ss:$16 sps:$4 sm:$0xff]  }
 0x14b   :  { %3864 = vmatpush1.bf16.msra.mxu0 %v5834_v21  ;;  %4251 = vmatpush1.bf16.msra.mxu1 %v5837_v22  ;;  %v5935_v21 = vld [vmem:[%s8101_s1 + $0xc44] ss:$16 sps:$4 sm:$0xff]   ;;  %v5938_v22 = vld [vmem:[%s8101_s1 + $0xc4c] ss:$16 sps:$4 sm:$0xff]  }
 0x14c   :  { %3865 = vmatprep.subr.bf16.mxu0 %v5842_v23  ;;  %4252 = vmatprep.subr.bf16.mxu1 %v5845_v24  ;;  %v5933_v23 = vld [vmem:[%s8101_s1 + $0xc40] ss:$16 sps:$4 sm:$0xff]   ;;  %v5936_v24 = vld [vmem:[%s8101_s1 + $0xc48] ss:$16 sps:$4 sm:$0xff]  }
 0x14f   :  { %3866 = vmatpush1.bf16.msra.mxu0 %v5840_v25  ;;  %4253 = vmatpush1.bf16.msra.mxu1 %v5843_v26  ;;  %v5941_v25 = vld [vmem:[%s8101_s1 + $0xc64] ss:$16 sps:$4 sm:$0xff]   ;;  %v5944_v26 = vld [vmem:[%s8101_s1 + $0xc6c] ss:$16 sps:$4 sm:$0xff]  }
 0x150   :  { %3867 = vmatprep.subr.bf16.mxu0 %v5848_v27  ;;  %4254 = vmatprep.subr.bf16.mxu1 %v5851_v28  ;;  %v5939_v27 = vld [vmem:[%s8101_s1 + $0xc60] ss:$16 sps:$4 sm:$0xff]   ;;  %v5942_v28 = vld [vmem:[%s8101_s1 + $0xc68] ss:$16 sps:$4 sm:$0xff]  }
 0x153   :  { %3868 = vmatpush1.bf16.msra.mxu0 %v5846_v29  ;;  %4255 = vmatpush1.bf16.msra.mxu1 %v5849_v30  ;;  %v5947_v29 = vld [vmem:[%s8101_s1 + $0xc84] ss:$16 sps:$4 sm:$0xff]   ;;  %v5950_v30 = vld [vmem:[%s8101_s1 + $0xc8c] ss:$16 sps:$4 sm:$0xff]  }
 0x154   :  { %3869 = vmatprep.subr.bf16.mxu0 %v5854_v31  ;;  %4256 = vmatprep.subr.bf16.mxu1 %v5857_v32  ;;  %v5945_v31 = vld [vmem:[%s8101_s1 + $0xc80] ss:$16 sps:$4 sm:$0xff]   ;;  %v5948_v32 = vld [vmem:[%s8101_s1 + $0xc88] ss:$16 sps:$4 sm:$0xff]  }
 0x157   :  { %3870 = vmatpush1.bf16.msra.mxu0 %v5852_v33  ;;  %4257 = vmatpush1.bf16.msra.mxu1 %v5855_v34  ;;  %v5953_v33 = vld [vmem:[%s8101_s1 + $0xca4] ss:$16 sps:$4 sm:$0xff]   ;;  %v5956_v34 = vld [vmem:[%s8101_s1 + $0xcac] ss:$16 sps:$4 sm:$0xff]  }
 0x158   :  { %3871 = vmatprep.subr.bf16.mxu0 %v5860_v35  ;;  %4258 = vmatprep.subr.bf16.mxu1 %v5863_v36  ;;  %v5951_v35 = vld [vmem:[%s8101_s1 + $0xca0] ss:$16 sps:$4 sm:$0xff]   ;;  %v5954_v36 = vld [vmem:[%s8101_s1 + $0xca8] ss:$16 sps:$4 sm:$0xff]  }
 0x15b   :  { %3872 = vmatpush1.bf16.msra.mxu0 %v5858_v37  ;;  %4259 = vmatpush1.bf16.msra.mxu1 %v5861_v38  ;;  %v5959_v37 = vld [vmem:[%s8101_s1 + $0xcc4] ss:$16 sps:$4 sm:$0xff]   ;;  %v5962_v38 = vld [vmem:[%s8101_s1 + $0xccc] ss:$16 sps:$4 sm:$0xff]  }
 0x15c   :  { %3873 = vmatprep.subr.bf16.mxu0 %v5866_v39  ;;  %4260 = vmatprep.subr.bf16.mxu1 %v5869_v40  ;;  %v5957_v39 = vld [vmem:[%s8101_s1 + $0xcc0] ss:$16 sps:$4 sm:$0xff]   ;;  %v5960_v40 = vld [vmem:[%s8101_s1 + $0xcc8] ss:$16 sps:$4 sm:$0xff]  }
 0x15f   :  { %3874 = vmatpush1.bf16.msra.mxu0 %v5864_v41  ;;  %4261 = vmatpush1.bf16.msra.mxu1 %v5867_v42  ;;  %v5965_v41 = vld [vmem:[%s8101_s1 + $0xce4] ss:$16 sps:$4 sm:$0xff]   ;;  %v5968_v42 = vld [vmem:[%s8101_s1 + $0xcec] ss:$16 sps:$4 sm:$0xff]  }
 0x160   :  { %3875 = vmatprep.subr.bf16.mxu0 %v5872_v43  ;;  %4262 = vmatprep.subr.bf16.mxu1 %v5875_v44  ;;  %v5963_v43 = vld [vmem:[%s8101_s1 + $0xce0] ss:$16 sps:$4 sm:$0xff]   ;;  %v5966_v44 = vld [vmem:[%s8101_s1 + $0xce8] ss:$16 sps:$4 sm:$0xff]  }
 0x163   :  { %3876 = vmatpush1.bf16.msra.mxu0 %v5870_v45  ;;  %4263 = vmatpush1.bf16.msra.mxu1 %v5873_v46  ;;  %v5971_v45 = vld [vmem:[%s8101_s1 + $0xd04] ss:$16 sps:$4 sm:$0xff]   ;;  %v5974_v46 = vld [vmem:[%s8101_s1 + $0xd0c] ss:$16 sps:$4 sm:$0xff]  }
 0x164   :  { %3877 = vmatprep.subr.bf16.mxu0 %v5878_v47  ;;  %4264 = vmatprep.subr.bf16.mxu1 %v5881_v48  ;;  %v5969_v47 = vld [vmem:[%s8101_s1 + $0xd00] ss:$16 sps:$4 sm:$0xff]   ;;  %v5972_v48 = vld [vmem:[%s8101_s1 + $0xd08] ss:$16 sps:$4 sm:$0xff]  }
 0x167   :  { %3878 = vmatpush1.bf16.msra.mxu0 %v5876_v49  ;;  %4265 = vmatpush1.bf16.msra.mxu1 %v5879_v50  ;;  %v5977_v49 = vld [vmem:[%s8101_s1 + $0xd24] ss:$16 sps:$4 sm:$0xff]   ;;  %v5980_v50 = vld [vmem:[%s8101_s1 + $0xd2c] ss:$16 sps:$4 sm:$0xff]  }
 0x168   :  { %3879 = vmatprep.subr.bf16.mxu0 %v5884_v51  ;;  %4266 = vmatprep.subr.bf16.mxu1 %v5887_v52  ;;  %v5975_v51 = vld [vmem:[%s8101_s1 + $0xd20] ss:$16 sps:$4 sm:$0xff]   ;;  %v5978_v52 = vld [vmem:[%s8101_s1 + $0xd28] ss:$16 sps:$4 sm:$0xff]  }
 0x16b   :  { %3880 = vmatpush1.bf16.msra.mxu0 %v5882_v53  ;;  %4267 = vmatpush1.bf16.msra.mxu1 %v5885_v54  ;;  %v5983_v53 = vld [vmem:[%s8101_s1 + $0xd44] ss:$16 sps:$4 sm:$0xff]   ;;  %v5986_v54 = vld [vmem:[%s8101_s1 + $0xd4c] ss:$16 sps:$4 sm:$0xff]  }
 0x16c   :  { %3881 = vmatprep.subr.bf16.mxu0 %v5890_v55  ;;  %4268 = vmatprep.subr.bf16.mxu1 %v5893_v56  ;;  %v5981_v55 = vld [vmem:[%s8101_s1 + $0xd40] ss:$16 sps:$4 sm:$0xff]   ;;  %v5984_v56 = vld [vmem:[%s8101_s1 + $0xd48] ss:$16 sps:$4 sm:$0xff]  }
 0x16f   :  { %3882 = vmatpush1.bf16.msra.mxu0 %v5888_v57  ;;  %4269 = vmatpush1.bf16.msra.mxu1 %v5891_v58  ;;  %v5989_v57 = vld [vmem:[%s8101_s1 + $0xd64] ss:$16 sps:$4 sm:$0xff]   ;;  %v5992_v58 = vld [vmem:[%s8101_s1 + $0xd6c] ss:$16 sps:$4 sm:$0xff]  }
 0x170   :  { %3883 = vmatprep.subr.bf16.mxu0 %v5896_v59  ;;  %4270 = vmatprep.subr.bf16.mxu1 %v5899_v60  ;;  %v5987_v59 = vld [vmem:[%s8101_s1 + $0xd60] ss:$16 sps:$4 sm:$0xff]   ;;  %v5990_v60 = vld [vmem:[%s8101_s1 + $0xd68] ss:$16 sps:$4 sm:$0xff]  }
 0x173   :  { %3884 = vmatpush1.bf16.msra.mxu0 %v5894_v61  ;;  %4271 = vmatpush1.bf16.msra.mxu1 %v5897_v62  ;;  %v5995_v61 = vld [vmem:[%s8101_s1 + $0xd84] ss:$16 sps:$4 sm:$0xff]   ;;  %v5998_v62 = vld [vmem:[%s8101_s1 + $0xd8c] ss:$16 sps:$4 sm:$0xff]  }
 0x174   :  { %3885 = vmatprep.subr.bf16.mxu0 %v5902_v63  ;;  %4272 = vmatprep.subr.bf16.mxu1 %v5905_v0  ;;  %v5993_v63 = vld [vmem:[%s8101_s1 + $0xd80] ss:$16 sps:$4 sm:$0xff]   ;;  %v5996_v0 = vld [vmem:[%s8101_s1 + $0xd88] ss:$16 sps:$4 sm:$0xff]  }
 0x177   :  { %3886 = vmatpush1.bf16.msra.mxu0 %v5900_v1  ;;  %4273 = vmatpush1.bf16.msra.mxu1 %v5903_v2  ;;  %v6001_v1 = vld [vmem:[%s8101_s1 + $0xda4] ss:$16 sps:$4 sm:$0xff]   ;;  %v6004_v2 = vld [vmem:[%s8101_s1 + $0xdac] ss:$16 sps:$4 sm:$0xff]  }
 0x178   :  { %3887 = vmatprep.subr.bf16.mxu0 %v5908_v3  ;;  %4274 = vmatprep.subr.bf16.mxu1 %v5911_v4  ;;  %v5999_v3 = vld [vmem:[%s8101_s1 + $0xda0] ss:$16 sps:$4 sm:$0xff]   ;;  %v6002_v4 = vld [vmem:[%s8101_s1 + $0xda8] ss:$16 sps:$4 sm:$0xff]  }
 0x17b   :  { %3888 = vmatpush1.bf16.msra.mxu0 %v5906_v5  ;;  %4275 = vmatpush1.bf16.msra.mxu1 %v5909_v6  ;;  %v6007_v5 = vld [vmem:[%s8101_s1 + $0xdc4] ss:$16 sps:$4 sm:$0xff]   ;;  %v6010_v6 = vld [vmem:[%s8101_s1 + $0xdcc] ss:$16 sps:$4 sm:$0xff]  }
 0x17c   :  { %3889 = vmatprep.subr.bf16.mxu0 %v5914_v7  ;;  %4276 = vmatprep.subr.bf16.mxu1 %v5917_v8  ;;  %v6005_v7 = vld [vmem:[%s8101_s1 + $0xdc0] ss:$16 sps:$4 sm:$0xff]   ;;  %v6008_v8 = vld [vmem:[%s8101_s1 + $0xdc8] ss:$16 sps:$4 sm:$0xff]  }
 0x17f   :  { %3890 = vmatpush1.bf16.msra.mxu0 %v5912_v9  ;;  %4277 = vmatpush1.bf16.msra.mxu1 %v5915_v10  ;;  %v6013_v9 = vld [vmem:[%s8101_s1 + $0xde4] ss:$16 sps:$4 sm:$0xff]   ;;  %v6016_v10 = vld [vmem:[%s8101_s1 + $0xdec] ss:$16 sps:$4 sm:$0xff]  }
 0x180   :  { %3902 = vmatprep.subr.bf16.mxu0 %v5923_v11  ;;  %4289 = vmatprep.subr.bf16.mxu1 %v5926_v12  ;;  %v6011_v11 = vld [vmem:[%s8101_s1 + $0xde0] ss:$16 sps:$4 sm:$0xff]   ;;  %v6014_v12 = vld [vmem:[%s8101_s1 + $0xde8] ss:$16 sps:$4 sm:$0xff]  }
 0x182   :  { %3892 = vmatmul.mubr.bf16.vlgmr.msra.gmra.mrb[0].mxu0 %v5918_v13  ;;  %4279 = vmatmul.mubr.bf16.vlgmr.msra.gmra.mrb[0].mxu1 %v5918_v13  ;;  %v6022_v13 = vld [vmem:[%s8101_s1 + $0xe04] ss:$16 sps:$4 sm:$0xff]  }
 0x183   :  { %3903 = vmatpush1.bf16.msra.mxu0 %v5921_v14  ;;  %4290 = vmatpush1.bf16.msra.mxu1 %v5924_v15  ;;  %v6025_v14 = vld [vmem:[%s8101_s1 + $0xe0c] ss:$16 sps:$4 sm:$0xff]   ;;  %v6017_v15 = vld [vmem:[%s8102_s0 + $0x30] ss:$72 sps:$4 sm:$0xff]  }
 0x184   :  { %3904 = vmatprep.subr.bf16.mxu0 %v5929_v16  ;;  %4291 = vmatprep.subr.bf16.mxu1 %v5932_v17  ;;  %v6020_v16 = vld [vmem:[%s8101_s1 + $0xe00] ss:$16 sps:$4 sm:$0xff]   ;;  %v6023_v17 = vld [vmem:[%s8101_s1 + $0xe08] ss:$16 sps:$4 sm:$0xff]  }
 0x185   :  { %3934 = vmatprep.mubr.bf16.mxu0 %v6019_v18  ;;  %4321 = vmatprep.mubr.bf16.mxu1 %v6019_v18  ;;  %v6028_v18 = vld [vmem:[%s8101_s1 + $0xe24] ss:$16 sps:$4 sm:$0xff]  }
 0x187   :  { %3905 = vmatpush1.bf16.msra.mxu0 %v5927_v19  ;;  %4292 = vmatpush1.bf16.msra.mxu1 %v5930_v20  ;;  %v6031_v19 = vld [vmem:[%s8101_s1 + $0xe2c] ss:$16 sps:$4 sm:$0xff]  }
 0x188   :  { %3906 = vmatprep.subr.bf16.mxu0 %v5935_v21  ;;  %4293 = vmatprep.subr.bf16.mxu1 %v5938_v22  ;;  %v6118_v20 = vld [vmem:[%s8102_s0 + $0x3c] ss:$72 sps:$4 sm:$0xff]   ;;  %v6026_v21 = vld [vmem:[%s8101_s1 + $0xe20] ss:$16 sps:$4 sm:$0xff]   ;;  %v6029_v22 = vld [vmem:[%s8101_s1 + $0xe28] ss:$16 sps:$4 sm:$0xff]  }
 0x18b   :  { %3907 = vmatpush1.bf16.msra.mxu0 %v5933_v23  ;;  %4294 = vmatpush1.bf16.msra.mxu1 %v5936_v24  ;;  %v6034_v23 = vld [vmem:[%s8101_s1 + $0xe44] ss:$16 sps:$4 sm:$0xff]   ;;  %v6037_v24 = vld [vmem:[%s8101_s1 + $0xe4c] ss:$16 sps:$4 sm:$0xff]  }
 0x18c   :  { %3908 = vmatprep.subr.bf16.mxu0 %v5941_v25  ;;  %4295 = vmatprep.subr.bf16.mxu1 %v5944_v26  ;;  %v6032_v25 = vld [vmem:[%s8101_s1 + $0xe40] ss:$16 sps:$4 sm:$0xff]   ;;  %v6035_v26 = vld [vmem:[%s8101_s1 + $0xe48] ss:$16 sps:$4 sm:$0xff]  }
 0x18f   :  { %3909 = vmatpush1.bf16.msra.mxu0 %v5939_v27  ;;  %4296 = vmatpush1.bf16.msra.mxu1 %v5942_v28  ;;  %v6040_v27 = vld [vmem:[%s8101_s1 + $0xe64] ss:$16 sps:$4 sm:$0xff]   ;;  %v6043_v28 = vld [vmem:[%s8101_s1 + $0xe6c] ss:$16 sps:$4 sm:$0xff]  }
 0x190   :  { %3910 = vmatprep.subr.bf16.mxu0 %v5947_v29  ;;  %4297 = vmatprep.subr.bf16.mxu1 %v5950_v30  ;;  %v6038_v29 = vld [vmem:[%s8101_s1 + $0xe60] ss:$16 sps:$4 sm:$0xff]   ;;  %v6041_v30 = vld [vmem:[%s8101_s1 + $0xe68] ss:$16 sps:$4 sm:$0xff]  }
 0x193   :  { %3911 = vmatpush1.bf16.msra.mxu0 %v5945_v31  ;;  %4298 = vmatpush1.bf16.msra.mxu1 %v5948_v32  ;;  %v6046_v31 = vld [vmem:[%s8101_s1 + $0xe84] ss:$16 sps:$4 sm:$0xff]   ;;  %v6049_v32 = vld [vmem:[%s8101_s1 + $0xe8c] ss:$16 sps:$4 sm:$0xff]  }
 0x194   :  { %3912 = vmatprep.subr.bf16.mxu0 %v5953_v33  ;;  %4299 = vmatprep.subr.bf16.mxu1 %v5956_v34  ;;  %v6044_v33 = vld [vmem:[%s8101_s1 + $0xe80] ss:$16 sps:$4 sm:$0xff]   ;;  %v6047_v34 = vld [vmem:[%s8101_s1 + $0xe88] ss:$16 sps:$4 sm:$0xff]  }
 0x197   :  { %3913 = vmatpush1.bf16.msra.mxu0 %v5951_v35  ;;  %4300 = vmatpush1.bf16.msra.mxu1 %v5954_v36  ;;  %v6052_v35 = vld [vmem:[%s8101_s1 + $0xea4] ss:$16 sps:$4 sm:$0xff]   ;;  %v6055_v36 = vld [vmem:[%s8101_s1 + $0xeac] ss:$16 sps:$4 sm:$0xff]  }
 0x198   :  { %3914 = vmatprep.subr.bf16.mxu0 %v5959_v37  ;;  %4301 = vmatprep.subr.bf16.mxu1 %v5962_v38  ;;  %v6050_v37 = vld [vmem:[%s8101_s1 + $0xea0] ss:$16 sps:$4 sm:$0xff]   ;;  %v6053_v38 = vld [vmem:[%s8101_s1 + $0xea8] ss:$16 sps:$4 sm:$0xff]  }
 0x19b   :  { %3915 = vmatpush1.bf16.msra.mxu0 %v5957_v39  ;;  %4302 = vmatpush1.bf16.msra.mxu1 %v5960_v40  ;;  %v6058_v39 = vld [vmem:[%s8101_s1 + $0xec4] ss:$16 sps:$4 sm:$0xff]   ;;  %v6061_v40 = vld [vmem:[%s8101_s1 + $0xecc] ss:$16 sps:$4 sm:$0xff]  }
 0x19c   :  { %3916 = vmatprep.subr.bf16.mxu0 %v5965_v41  ;;  %4303 = vmatprep.subr.bf16.mxu1 %v5968_v42  ;;  %v6056_v41 = vld [vmem:[%s8101_s1 + $0xec0] ss:$16 sps:$4 sm:$0xff]   ;;  %v6059_v42 = vld [vmem:[%s8101_s1 + $0xec8] ss:$16 sps:$4 sm:$0xff]  }
 0x19f   :  { %3917 = vmatpush1.bf16.msra.mxu0 %v5963_v43  ;;  %4304 = vmatpush1.bf16.msra.mxu1 %v5966_v44  ;;  %v6064_v43 = vld [vmem:[%s8101_s1 + $0xee4] ss:$16 sps:$4 sm:$0xff]   ;;  %v6067_v44 = vld [vmem:[%s8101_s1 + $0xeec] ss:$16 sps:$4 sm:$0xff]  }
 0x1a0   :  { %3918 = vmatprep.subr.bf16.mxu0 %v5971_v45  ;;  %4305 = vmatprep.subr.bf16.mxu1 %v5974_v46  ;;  %v6062_v45 = vld [vmem:[%s8101_s1 + $0xee0] ss:$16 sps:$4 sm:$0xff]   ;;  %v6065_v46 = vld [vmem:[%s8101_s1 + $0xee8] ss:$16 sps:$4 sm:$0xff]  }
 0x1a3   :  { %3919 = vmatpush1.bf16.msra.mxu0 %v5969_v47  ;;  %4306 = vmatpush1.bf16.msra.mxu1 %v5972_v48  ;;  %v6070_v47 = vld [vmem:[%s8101_s1 + $0xf04] ss:$16 sps:$4 sm:$0xff]   ;;  %v6073_v48 = vld [vmem:[%s8101_s1 + $0xf0c] ss:$16 sps:$4 sm:$0xff]  }
 0x1a4   :  { %3920 = vmatprep.subr.bf16.mxu0 %v5977_v49  ;;  %4307 = vmatprep.subr.bf16.mxu1 %v5980_v50  ;;  %v6068_v49 = vld [vmem:[%s8101_s1 + $0xf00] ss:$16 sps:$4 sm:$0xff]   ;;  %v6071_v50 = vld [vmem:[%s8101_s1 + $0xf08] ss:$16 sps:$4 sm:$0xff]  }
 0x1a7   :  { %3921 = vmatpush1.bf16.msra.mxu0 %v5975_v51  ;;  %4308 = vmatpush1.bf16.msra.mxu1 %v5978_v52  ;;  %v6076_v51 = vld [vmem:[%s8101_s1 + $0xf24] ss:$16 sps:$4 sm:$0xff]   ;;  %v6079_v52 = vld [vmem:[%s8101_s1 + $0xf2c] ss:$16 sps:$4 sm:$0xff]  }
 0x1a8   :  { %3922 = vmatprep.subr.bf16.mxu0 %v5983_v53  ;;  %4309 = vmatprep.subr.bf16.mxu1 %v5986_v54  ;;  %v6074_v53 = vld [vmem:[%s8101_s1 + $0xf20] ss:$16 sps:$4 sm:$0xff]   ;;  %v6077_v54 = vld [vmem:[%s8101_s1 + $0xf28] ss:$16 sps:$4 sm:$0xff]  }
 0x1ab   :  { %3923 = vmatpush1.bf16.msra.mxu0 %v5981_v55  ;;  %4310 = vmatpush1.bf16.msra.mxu1 %v5984_v56  ;;  %v6082_v55 = vld [vmem:[%s8101_s1 + $0xf44] ss:$16 sps:$4 sm:$0xff]   ;;  %v6085_v56 = vld [vmem:[%s8101_s1 + $0xf4c] ss:$16 sps:$4 sm:$0xff]  }
 0x1ac   :  { %3924 = vmatprep.subr.bf16.mxu0 %v5989_v57  ;;  %4311 = vmatprep.subr.bf16.mxu1 %v5992_v58  ;;  %v6080_v57 = vld [vmem:[%s8101_s1 + $0xf40] ss:$16 sps:$4 sm:$0xff]   ;;  %v6083_v58 = vld [vmem:[%s8101_s1 + $0xf48] ss:$16 sps:$4 sm:$0xff]  }
 0x1af   :  { %3925 = vmatpush1.bf16.msra.mxu0 %v5987_v59  ;;  %4312 = vmatpush1.bf16.msra.mxu1 %v5990_v60  ;;  %v6088_v59 = vld [vmem:[%s8101_s1 + $0xf64] ss:$16 sps:$4 sm:$0xff]   ;;  %v6091_v60 = vld [vmem:[%s8101_s1 + $0xf6c] ss:$16 sps:$4 sm:$0xff]  }
 0x1b0   :  { %3926 = vmatprep.subr.bf16.mxu0 %v5995_v61  ;;  %4313 = vmatprep.subr.bf16.mxu1 %v5998_v62  ;;  %v6086_v61 = vld [vmem:[%s8101_s1 + $0xf60] ss:$16 sps:$4 sm:$0xff]   ;;  %v6089_v62 = vld [vmem:[%s8101_s1 + $0xf68] ss:$16 sps:$4 sm:$0xff]  }
 0x1b3   :  { %3927 = vmatpush1.bf16.msra.mxu0 %v5993_v63  ;;  %4314 = vmatpush1.bf16.msra.mxu1 %v5996_v0  ;;  %v6094_v63 = vld [vmem:[%s8101_s1 + $0xf84] ss:$16 sps:$4 sm:$0xff]   ;;  %v6097_v0 = vld [vmem:[%s8101_s1 + $0xf8c] ss:$16 sps:$4 sm:$0xff]  }
 0x1b4   :  { %3928 = vmatprep.subr.bf16.mxu0 %v6001_v1  ;;  %4315 = vmatprep.subr.bf16.mxu1 %v6004_v2  ;;  %v6092_v1 = vld [vmem:[%s8101_s1 + $0xf80] ss:$16 sps:$4 sm:$0xff]   ;;  %v6095_v2 = vld [vmem:[%s8101_s1 + $0xf88] ss:$16 sps:$4 sm:$0xff]  }
 0x1b7   :  { %3929 = vmatpush1.bf16.msra.mxu0 %v5999_v3  ;;  %4316 = vmatpush1.bf16.msra.mxu1 %v6002_v4  ;;  %v6100_v3 = vld [vmem:[%s8101_s1 + $0xfa4] ss:$16 sps:$4 sm:$0xff]   ;;  %v6103_v4 = vld [vmem:[%s8101_s1 + $0xfac] ss:$16 sps:$4 sm:$0xff]  }
 0x1b8   :  { %3930 = vmatprep.subr.bf16.mxu0 %v6007_v5  ;;  %4317 = vmatprep.subr.bf16.mxu1 %v6010_v6  ;;  %v6098_v5 = vld [vmem:[%s8101_s1 + $0xfa0] ss:$16 sps:$4 sm:$0xff]   ;;  %v6101_v6 = vld [vmem:[%s8101_s1 + $0xfa8] ss:$16 sps:$4 sm:$0xff]  }
 0x1bb   :  { %3931 = vmatpush1.bf16.msra.mxu0 %v6005_v7  ;;  %4318 = vmatpush1.bf16.msra.mxu1 %v6008_v8  ;;  %v6106_v7 = vld [vmem:[%s8101_s1 + $0xfc4] ss:$16 sps:$4 sm:$0xff]   ;;  %v6109_v8 = vld [vmem:[%s8101_s1 + $0xfcc] ss:$16 sps:$4 sm:$0xff]  }
 0x1bc   :  { %3932 = vmatprep.subr.bf16.mxu0 %v6013_v9  ;;  %4319 = vmatprep.subr.bf16.mxu1 %v6016_v10  ;;  %v6104_v9 = vld [vmem:[%s8101_s1 + $0xfc0] ss:$16 sps:$4 sm:$0xff]   ;;  %v6107_v10 = vld [vmem:[%s8101_s1 + $0xfc8] ss:$16 sps:$4 sm:$0xff]  }
 0x1bf   :  { %3933 = vmatpush1.bf16.msra.mxu0 %v6011_v11  ;;  %4320 = vmatpush1.bf16.msra.mxu1 %v6014_v12  ;;  %v6112_v11 = vld [vmem:[%s8101_s1 + $0xfe4] ss:$16 sps:$4 sm:$0xff]   ;;  %v6115_v12 = vld [vmem:[%s8101_s1 + $0xfec] ss:$16 sps:$4 sm:$0xff]  }
 0x1c0   :  { %3945 = vmatprep.subr.bf16.mxu0 %v6022_v13  ;;  %4332 = vmatprep.subr.bf16.mxu1 %v6025_v14  ;;  %v6110_v13 = vld [vmem:[%s8101_s1 + $0xfe0] ss:$16 sps:$4 sm:$0xff]   ;;  %v6113_v14 = vld [vmem:[%s8101_s1 + $0xfe8] ss:$16 sps:$4 sm:$0xff]  }
 0x1c2   :  { %3935 = vmatmul.mubr.bf16.vlgmr.msra.gmra.mrb[0].mxu0 %v6017_v15  ;;  %4322 = vmatmul.mubr.bf16.vlgmr.msra.gmra.mrb[0].mxu1 %v6017_v15  ;;  %v6121_v15 = vld [vmem:[%s8101_s1 + $0x1004] ss:$16 sps:$4 sm:$0xff]  }
 0x1c3   :  { %3946 = vmatpush1.bf16.msra.mxu0 %v6020_v16  ;;  %4333 = vmatpush1.bf16.msra.mxu1 %v6023_v17  ;;  %v6124_v16 = vld [vmem:[%s8101_s1 + $0x100c] ss:$16 sps:$4 sm:$0xff]   ;;  %v6116_v17 = vld [vmem:[%s8102_s0 + $0x38] ss:$72 sps:$4 sm:$0xff]  }
 0x1c4   :  { %3947 = vmatprep.subr.bf16.mxu0 %v6028_v18  ;;  %4334 = vmatprep.subr.bf16.mxu1 %v6031_v19  ;;  %v6119_v18 = vld [vmem:[%s8101_s1 + $0x1000] ss:$16 sps:$4 sm:$0xff]   ;;  %v6122_v19 = vld [vmem:[%s8101_s1 + $0x1008] ss:$16 sps:$4 sm:$0xff]  }
 0x1c5   :  { %3977 = vmatprep.mubr.bf16.mxu0 %v6118_v20  ;;  %4364 = vmatprep.mubr.bf16.mxu1 %v6118_v20  ;;  %v6127_v20 = vld [vmem:[%s8101_s1 + $0x1024] ss:$16 sps:$4 sm:$0xff]  }
 0x1c7   :  { %3948 = vmatpush1.bf16.msra.mxu0 %v6026_v21  ;;  %4335 = vmatpush1.bf16.msra.mxu1 %v6029_v22  ;;  %v6130_v21 = vld [vmem:[%s8101_s1 + $0x102c] ss:$16 sps:$4 sm:$0xff]  }
 0x1c8   :  { %3949 = vmatprep.subr.bf16.mxu0 %v6034_v23  ;;  %4336 = vmatprep.subr.bf16.mxu1 %v6037_v24  ;;  %v6217_v22 = vld [vmem:[%s8102_s0 + $0x44] ss:$72 sps:$4 sm:$0xff]   ;;  %v6125_v23 = vld [vmem:[%s8101_s1 + $0x1020] ss:$16 sps:$4 sm:$0xff]   ;;  %v6128_v24 = vld [vmem:[%s8101_s1 + $0x1028] ss:$16 sps:$4 sm:$0xff]  }
 0x1cb   :  { %3950 = vmatpush1.bf16.msra.mxu0 %v6032_v25  ;;  %4337 = vmatpush1.bf16.msra.mxu1 %v6035_v26  ;;  %v6133_v25 = vld [vmem:[%s8101_s1 + $0x1044] ss:$16 sps:$4 sm:$0xff]   ;;  %v6136_v26 = vld [vmem:[%s8101_s1 + $0x104c] ss:$16 sps:$4 sm:$0xff]  }
 0x1cc   :  { %3951 = vmatprep.subr.bf16.mxu0 %v6040_v27  ;;  %4338 = vmatprep.subr.bf16.mxu1 %v6043_v28  ;;  %v6131_v27 = vld [vmem:[%s8101_s1 + $0x1040] ss:$16 sps:$4 sm:$0xff]   ;;  %v6134_v28 = vld [vmem:[%s8101_s1 + $0x1048] ss:$16 sps:$4 sm:$0xff]  }
 0x1cf   :  { %3952 = vmatpush1.bf16.msra.mxu0 %v6038_v29  ;;  %4339 = vmatpush1.bf16.msra.mxu1 %v6041_v30  ;;  %v6139_v29 = vld [vmem:[%s8101_s1 + $0x1064] ss:$16 sps:$4 sm:$0xff]   ;;  %v6142_v30 = vld [vmem:[%s8101_s1 + $0x106c] ss:$16 sps:$4 sm:$0xff]  }
 0x1d0   :  { %3953 = vmatprep.subr.bf16.mxu0 %v6046_v31  ;;  %4340 = vmatprep.subr.bf16.mxu1 %v6049_v32  ;;  %v6137_v31 = vld [vmem:[%s8101_s1 + $0x1060] ss:$16 sps:$4 sm:$0xff]   ;;  %v6140_v32 = vld [vmem:[%s8101_s1 + $0x1068] ss:$16 sps:$4 sm:$0xff]  }
 0x1d3   :  { %3954 = vmatpush1.bf16.msra.mxu0 %v6044_v33  ;;  %4341 = vmatpush1.bf16.msra.mxu1 %v6047_v34  ;;  %v6145_v33 = vld [vmem:[%s8101_s1 + $0x1084] ss:$16 sps:$4 sm:$0xff]   ;;  %v6148_v34 = vld [vmem:[%s8101_s1 + $0x108c] ss:$16 sps:$4 sm:$0xff]  }
 0x1d4   :  { %3955 = vmatprep.subr.bf16.mxu0 %v6052_v35  ;;  %4342 = vmatprep.subr.bf16.mxu1 %v6055_v36  ;;  %v6143_v35 = vld [vmem:[%s8101_s1 + $0x1080] ss:$16 sps:$4 sm:$0xff]   ;;  %v6146_v36 = vld [vmem:[%s8101_s1 + $0x1088] ss:$16 sps:$4 sm:$0xff]  }
 0x1d7   :  { %3956 = vmatpush1.bf16.msra.mxu0 %v6050_v37  ;;  %4343 = vmatpush1.bf16.msra.mxu1 %v6053_v38  ;;  %v6151_v37 = vld [vmem:[%s8101_s1 + $0x10a4] ss:$16 sps:$4 sm:$0xff]   ;;  %v6154_v38 = vld [vmem:[%s8101_s1 + $0x10ac] ss:$16 sps:$4 sm:$0xff]  }
 0x1d8   :  { %3957 = vmatprep.subr.bf16.mxu0 %v6058_v39  ;;  %4344 = vmatprep.subr.bf16.mxu1 %v6061_v40  ;;  %v6149_v39 = vld [vmem:[%s8101_s1 + $0x10a0] ss:$16 sps:$4 sm:$0xff]   ;;  %v6152_v40 = vld [vmem:[%s8101_s1 + $0x10a8] ss:$16 sps:$4 sm:$0xff]  }
 0x1db   :  { %3958 = vmatpush1.bf16.msra.mxu0 %v6056_v41  ;;  %4345 = vmatpush1.bf16.msra.mxu1 %v6059_v42  ;;  %v6157_v41 = vld [vmem:[%s8101_s1 + $0x10c4] ss:$16 sps:$4 sm:$0xff]   ;;  %v6160_v42 = vld [vmem:[%s8101_s1 + $0x10cc] ss:$16 sps:$4 sm:$0xff]  }
 0x1dc   :  { %3959 = vmatprep.subr.bf16.mxu0 %v6064_v43  ;;  %4346 = vmatprep.subr.bf16.mxu1 %v6067_v44  ;;  %v6155_v43 = vld [vmem:[%s8101_s1 + $0x10c0] ss:$16 sps:$4 sm:$0xff]   ;;  %v6158_v44 = vld [vmem:[%s8101_s1 + $0x10c8] ss:$16 sps:$4 sm:$0xff]  }
 0x1df   :  { %3960 = vmatpush1.bf16.msra.mxu0 %v6062_v45  ;;  %4347 = vmatpush1.bf16.msra.mxu1 %v6065_v46  ;;  %v6163_v45 = vld [vmem:[%s8101_s1 + $0x10e4] ss:$16 sps:$4 sm:$0xff]   ;;  %v6166_v46 = vld [vmem:[%s8101_s1 + $0x10ec] ss:$16 sps:$4 sm:$0xff]  }
 0x1e0   :  { %3961 = vmatprep.subr.bf16.mxu0 %v6070_v47  ;;  %4348 = vmatprep.subr.bf16.mxu1 %v6073_v48  ;;  %v6161_v47 = vld [vmem:[%s8101_s1 + $0x10e0] ss:$16 sps:$4 sm:$0xff]   ;;  %v6164_v48 = vld [vmem:[%s8101_s1 + $0x10e8] ss:$16 sps:$4 sm:$0xff]  }
 0x1e3   :  { %3962 = vmatpush1.bf16.msra.mxu0 %v6068_v49  ;;  %4349 = vmatpush1.bf16.msra.mxu1 %v6071_v50  ;;  %v6169_v49 = vld [vmem:[%s8101_s1 + $0x1104] ss:$16 sps:$4 sm:$0xff]   ;;  %v6172_v50 = vld [vmem:[%s8101_s1 + $0x110c] ss:$16 sps:$4 sm:$0xff]  }
 0x1e4   :  { %3963 = vmatprep.subr.bf16.mxu0 %v6076_v51  ;;  %4350 = vmatprep.subr.bf16.mxu1 %v6079_v52  ;;  %v6167_v51 = vld [vmem:[%s8101_s1 + $0x1100] ss:$16 sps:$4 sm:$0xff]   ;;  %v6170_v52 = vld [vmem:[%s8101_s1 + $0x1108] ss:$16 sps:$4 sm:$0xff]  }
 0x1e7   :  { %3964 = vmatpush1.bf16.msra.mxu0 %v6074_v53  ;;  %4351 = vmatpush1.bf16.msra.mxu1 %v6077_v54  ;;  %v6175_v53 = vld [vmem:[%s8101_s1 + $0x1124] ss:$16 sps:$4 sm:$0xff]   ;;  %v6178_v54 = vld [vmem:[%s8101_s1 + $0x112c] ss:$16 sps:$4 sm:$0xff]  }
 0x1e8   :  { %3965 = vmatprep.subr.bf16.mxu0 %v6082_v55  ;;  %4352 = vmatprep.subr.bf16.mxu1 %v6085_v56  ;;  %v6173_v55 = vld [vmem:[%s8101_s1 + $0x1120] ss:$16 sps:$4 sm:$0xff]   ;;  %v6176_v56 = vld [vmem:[%s8101_s1 + $0x1128] ss:$16 sps:$4 sm:$0xff]  }
 0x1eb   :  { %3966 = vmatpush1.bf16.msra.mxu0 %v6080_v57  ;;  %4353 = vmatpush1.bf16.msra.mxu1 %v6083_v58  ;;  %v6181_v57 = vld [vmem:[%s8101_s1 + $0x1144] ss:$16 sps:$4 sm:$0xff]   ;;  %v6184_v58 = vld [vmem:[%s8101_s1 + $0x114c] ss:$16 sps:$4 sm:$0xff]  }
 0x1ec   :  { %3967 = vmatprep.subr.bf16.mxu0 %v6088_v59  ;;  %4354 = vmatprep.subr.bf16.mxu1 %v6091_v60  ;;  %v6179_v59 = vld [vmem:[%s8101_s1 + $0x1140] ss:$16 sps:$4 sm:$0xff]   ;;  %v6182_v60 = vld [vmem:[%s8101_s1 + $0x1148] ss:$16 sps:$4 sm:$0xff]  }
 0x1ef   :  { %3968 = vmatpush1.bf16.msra.mxu0 %v6086_v61  ;;  %4355 = vmatpush1.bf16.msra.mxu1 %v6089_v62  ;;  %v6187_v61 = vld [vmem:[%s8101_s1 + $0x1164] ss:$16 sps:$4 sm:$0xff]   ;;  %v6190_v62 = vld [vmem:[%s8101_s1 + $0x116c] ss:$16 sps:$4 sm:$0xff]  }
 0x1f0   :  { %3969 = vmatprep.subr.bf16.mxu0 %v6094_v63  ;;  %4356 = vmatprep.subr.bf16.mxu1 %v6097_v0  ;;  %v6185_v63 = vld [vmem:[%s8101_s1 + $0x1160] ss:$16 sps:$4 sm:$0xff]   ;;  %v6188_v0 = vld [vmem:[%s8101_s1 + $0x1168] ss:$16 sps:$4 sm:$0xff]  }
 0x1f3   :  { %3970 = vmatpush1.bf16.msra.mxu0 %v6092_v1  ;;  %4357 = vmatpush1.bf16.msra.mxu1 %v6095_v2  ;;  %v6193_v1 = vld [vmem:[%s8101_s1 + $0x1184] ss:$16 sps:$4 sm:$0xff]   ;;  %v6196_v2 = vld [vmem:[%s8101_s1 + $0x118c] ss:$16 sps:$4 sm:$0xff]  }
 0x1f4   :  { %3971 = vmatprep.subr.bf16.mxu0 %v6100_v3  ;;  %4358 = vmatprep.subr.bf16.mxu1 %v6103_v4  ;;  %v6191_v3 = vld [vmem:[%s8101_s1 + $0x1180] ss:$16 sps:$4 sm:$0xff]   ;;  %v6194_v4 = vld [vmem:[%s8101_s1 + $0x1188] ss:$16 sps:$4 sm:$0xff]  }
 0x1f7   :  { %3972 = vmatpush1.bf16.msra.mxu0 %v6098_v5  ;;  %4359 = vmatpush1.bf16.msra.mxu1 %v6101_v6  ;;  %v6199_v5 = vld [vmem:[%s8101_s1 + $0x11a4] ss:$16 sps:$4 sm:$0xff]   ;;  %v6202_v6 = vld [vmem:[%s8101_s1 + $0x11ac] ss:$16 sps:$4 sm:$0xff]  }
 0x1f8   :  { %3973 = vmatprep.subr.bf16.mxu0 %v6106_v7  ;;  %4360 = vmatprep.subr.bf16.mxu1 %v6109_v8  ;;  %v6197_v7 = vld [vmem:[%s8101_s1 + $0x11a0] ss:$16 sps:$4 sm:$0xff]   ;;  %v6200_v8 = vld [vmem:[%s8101_s1 + $0x11a8] ss:$16 sps:$4 sm:$0xff]  }
 0x1fb   :  { %3974 = vmatpush1.bf16.msra.mxu0 %v6104_v9  ;;  %4361 = vmatpush1.bf16.msra.mxu1 %v6107_v10  ;;  %v6205_v9 = vld [vmem:[%s8101_s1 + $0x11c4] ss:$16 sps:$4 sm:$0xff]   ;;  %v6208_v10 = vld [vmem:[%s8101_s1 + $0x11cc] ss:$16 sps:$4 sm:$0xff]  }
 0x1fc   :  { %3975 = vmatprep.subr.bf16.mxu0 %v6112_v11  ;;  %4362 = vmatprep.subr.bf16.mxu1 %v6115_v12  ;;  %v6203_v11 = vld [vmem:[%s8101_s1 + $0x11c0] ss:$16 sps:$4 sm:$0xff]   ;;  %v6206_v12 = vld [vmem:[%s8101_s1 + $0x11c8] ss:$16 sps:$4 sm:$0xff]  }
 0x1ff   :  { %3976 = vmatpush1.bf16.msra.mxu0 %v6110_v13  ;;  %4363 = vmatpush1.bf16.msra.mxu1 %v6113_v14  ;;  %v6211_v13 = vld [vmem:[%s8101_s1 + $0x11e4] ss:$16 sps:$4 sm:$0xff]   ;;  %v6214_v14 = vld [vmem:[%s8101_s1 + $0x11ec] ss:$16 sps:$4 sm:$0xff]  }
 0x200   :  { %3988 = vmatprep.subr.bf16.mxu0 %v6121_v15  ;;  %4375 = vmatprep.subr.bf16.mxu1 %v6124_v16  ;;  %v6209_v15 = vld [vmem:[%s8101_s1 + $0x11e0] ss:$16 sps:$4 sm:$0xff]   ;;  %v6212_v16 = vld [vmem:[%s8101_s1 + $0x11e8] ss:$16 sps:$4 sm:$0xff]  }
 0x202   :  { %3978 = vmatmul.mubr.bf16.vlgmr.msra.gmra.mrb[0].mxu0 %v6116_v17  ;;  %4365 = vmatmul.mubr.bf16.vlgmr.msra.gmra.mrb[0].mxu1 %v6116_v17  ;;  %v6215_v17 = vld [vmem:[%s8102_s0 + $0x40] ss:$72 sps:$4 sm:$0xff]  }
 0x203   :  { %3989 = vmatpush1.bf16.msra.mxu0 %v6119_v18  ;;  %4376 = vmatpush1.bf16.msra.mxu1 %v6122_v19  ;;  %v654_v18 = vlaneseq }
 0x204   :  { %3990 = vmatprep.subr.bf16.mxu0 %v6127_v20  ;;  %4377 = vmatprep.subr.bf16.mxu1 %v6130_v21  ;;  %v6218_v20 = vmov 0.0  }
 0x205   :  { %4020 = vmatprep.mubr.bf16.mxu0 %v6217_v22  ;;  %4407 = vmatprep.mubr.bf16.mxu1 %v6217_v22  ;;  %vm8032_vm0 = vcmp.lt.s32.totalorder %v654_v18, 512  ;;  %v655_v21 = vshrl.u32 %v654_v18, 7 }
 0x206   :  { %4475 = vst.msk [vmem:[%s8103_s4] sm:$0xf] %vm8032_vm0, %v6218_v20  ;;  %4476 = vst.msk [vmem:[%s8104_s5] sm:$0xf] %vm8032_vm0, %v6218_v20 }
 0x207   :  { %3991 = vmatpush1.bf16.msra.mxu0 %v6125_v23  ;;  %4378 = vmatpush1.bf16.msra.mxu1 %v6128_v24  ;;  %v656_v22 = vsub.s32 0, %v655_v21  ;;  %v664_v23 = vsub.s32 2, %v655_v21  ;;  %v652_v24 = vld [vmem:[%s8105_s2] sm:$0xf] }
 0x208   :  { %3992 = vmatprep.subr.bf16.mxu0 %v6133_v25  ;;  %4379 = vmatprep.subr.bf16.mxu1 %v6136_v26  ;;  %v6219_v25 = vmov 1966171168  }
 0x209   :  { %v4513_v26 = vunpack.c.l.s4 %v6219_v25 }
 0x20b   :  { %3993 = vmatpush1.bf16.msra.mxu0 %v6131_v27  ;;  %4380 = vmatpush1.bf16.msra.mxu1 %v6134_v28  ;;  %v660_v27 = vsub.s32 1, %v655_v21  ;;  %v668_v28 = vsub.s32 3, %v655_v21 }
 0x20c   :  { %3994 = vmatprep.subr.bf16.mxu0 %v6139_v29  ;;  %4381 = vmatprep.subr.bf16.mxu1 %v6142_v30  ;;  %v8049_v29 = vrot.slane %v652_v24, %v656_v22  ;;  %v8051_v30 = vrot.slane %v652_v24, %v664_v23 }
 0x20f   :  { %3995 = vmatpush1.bf16.msra.mxu0 %v6137_v31  ;;  %4382 = vmatpush1.bf16.msra.mxu1 %v6140_v32  ;;  %v4514_v31 = vunpack.c.0.s8 %v4513_v26  ;;  %v8053_v32 = vrot.slane %v652_v24, %v660_v27 }
 0x210   :  { %3996 = vmatprep.subr.bf16.mxu0 %v6145_v33  ;;  %4383 = vmatprep.subr.bf16.mxu1 %v6148_v34  ;;  %v8055_v33 = vrot.slane %v652_v24, %v668_v28 }
 0x213   :  { %3997 = vmatpush1.bf16.msra.mxu0 %v6143_v35  ;;  %4384 = vmatpush1.bf16.msra.mxu1 %v6146_v36 }
 0x214   :  { %3998 = vmatprep.subr.bf16.mxu0 %v6151_v37  ;;  %4385 = vmatprep.subr.bf16.mxu1 %v6154_v38 }
 0x217   :  { %3999 = vmatpush1.bf16.msra.mxu0 %v6149_v39  ;;  %4386 = vmatpush1.bf16.msra.mxu1 %v6152_v40  ;;  %v8059_v40 = vsub.s32 %v4514_v31, %v655_v21 }
 0x218   :  { %4000 = vmatprep.subr.bf16.mxu0 %v6157_v41  ;;  %4387 = vmatprep.subr.bf16.mxu1 %v6160_v42 }
 0x21b   :  { %4001 = vmatpush1.bf16.msra.mxu0 %v6155_v43  ;;  %4388 = vmatpush1.bf16.msra.mxu1 %v6158_v44 }
 0x21c   :  { %4002 = vmatprep.subr.bf16.mxu0 %v6163_v45  ;;  %4389 = vmatprep.subr.bf16.mxu1 %v6166_v46 }
 0x21f   :  { %4003 = vmatpush1.bf16.msra.mxu0 %v6161_v47  ;;  %4390 = vmatpush1.bf16.msra.mxu1 %v6164_v48 }
 0x220   :  { %4004 = vmatprep.subr.bf16.mxu0 %v6169_v49  ;;  %4391 = vmatprep.subr.bf16.mxu1 %v6172_v50 }
 0x223   :  { %4005 = vmatpush1.bf16.msra.mxu0 %v6167_v51  ;;  %4392 = vmatpush1.bf16.msra.mxu1 %v6170_v52 }
 0x224   :  { %4006 = vmatprep.subr.bf16.mxu0 %v6175_v53  ;;  %4393 = vmatprep.subr.bf16.mxu1 %v6178_v54 }
 0x227   :  { %4007 = vmatpush1.bf16.msra.mxu0 %v6173_v55  ;;  %4394 = vmatpush1.bf16.msra.mxu1 %v6176_v56 }
 0x228   :  { %4008 = vmatprep.subr.bf16.mxu0 %v6181_v57  ;;  %4395 = vmatprep.subr.bf16.mxu1 %v6184_v58 }
 0x22b   :  { %4009 = vmatpush1.bf16.msra.mxu0 %v6179_v59  ;;  %4396 = vmatpush1.bf16.msra.mxu1 %v6182_v60 }
 0x22c   :  { %4010 = vmatprep.subr.bf16.mxu0 %v6187_v61  ;;  %4397 = vmatprep.subr.bf16.mxu1 %v6190_v62 }
 0x22f   :  { %4011 = vmatpush1.bf16.msra.mxu0 %v6185_v63  ;;  %4398 = vmatpush1.bf16.msra.mxu1 %v6188_v0 }
 0x230   :  { %4012 = vmatprep.subr.bf16.mxu0 %v6193_v1  ;;  %4399 = vmatprep.subr.bf16.mxu1 %v6196_v2 }
 0x233   :  { %4013 = vmatpush1.bf16.msra.mxu0 %v6191_v3  ;;  %4400 = vmatpush1.bf16.msra.mxu1 %v6194_v4 }
 0x234   :  { %4014 = vmatprep.subr.bf16.mxu0 %v6199_v5  ;;  %4401 = vmatprep.subr.bf16.mxu1 %v6202_v6 }
 0x237   :  { %4015 = vmatpush1.bf16.msra.mxu0 %v6197_v7  ;;  %4402 = vmatpush1.bf16.msra.mxu1 %v6200_v8 }
 0x238   :  { %4016 = vmatprep.subr.bf16.mxu0 %v6205_v9  ;;  %4403 = vmatprep.subr.bf16.mxu1 %v6208_v10 }
 0x23b   :  { %4017 = vmatpush1.bf16.msra.mxu0 %v6203_v11  ;;  %4404 = vmatpush1.bf16.msra.mxu1 %v6206_v12 }
 0x23c   :  { %4018 = vmatprep.subr.bf16.mxu0 %v6211_v13  ;;  %4405 = vmatprep.subr.bf16.mxu1 %v6214_v14 }
 0x23f   :  { %4019 = vmatpush1.bf16.msra.mxu0 %v6209_v15  ;;  %4406 = vmatpush1.bf16.msra.mxu1 %v6212_v16 }
 0x242   :  { %4021 = vmatmul.mubr.bf16.vlgmr.msra.gmra.mrb[0].mxu0 %v6215_v17  ;;  %4408 = vmatmul.mubr.bf16.vlgmr.msra.gmra.mrb[0].mxu1 %v6215_v17 }
 0x315   :  { %v4022_v34 = vpop.f32.mrb[0].mxu0  ;;  %v4409_v35 = vpop.f32.mrb[0].mxu1 }
 0x316   :  { %v5253_v36 = vadd.f32 %v4022_v34, %v8049_v29  ;;  %v5257_v37 = vadd.f32 %v4409_v35, %v8051_v30  ;;  %v4024_v38 = vpop.f32.mrb[1].mxu0  ;;  %v4411_v39 = vpop.f32.mrb[1].mxu1 }
 0x317   :  { %v5254_v41 = vadd.f32 %v4024_v38, %v8053_v32  ;;  %v5258_v42 = vadd.f32 %v4411_v39, %v8055_v33  ;;  %v4026_v43 = vpop.f32.mrb[2].mxu0  ;;  %v4413_v44 = vpop.f32.mrb[2].mxu1 }
 0x318   :  { %v4479_v45 = vrot.slane %v5253_v36, 4  ;;  %v4542_v46 = vmul.f32 %v5253_v36, %v5253_v36  ;;  %v4493_v47 = vrot.slane %v5257_v37, 4  ;;  %v4544_v48 = vmul.f32 %v5257_v37, %v5257_v37  ;;  %v4028_v49 = vpop.f32.mrb[3].mxu0  ;;  %v4415_v50 = vpop.f32.mrb[3].mxu1 }
 0x319   :  { %v5249_v51 = vpack.c.bf16 %v5254_v41, %v5253_v36  ;;  %v4486_v52 = vrot.slane %v5254_v41, 4  ;;  %v4543_v53 = vmul.f32 %v5254_v41, %v5254_v41  ;;  %v5250_v54 = vpack.c.bf16 %v5258_v42, %v5257_v37 }
 0x31a   :  { %v4480_v55 = vadd.f32 %v5253_v36, %v4479_v45  ;;  %v4551_v56 = vrot.slane %v4542_v46, 4  ;;  %v4494_v57 = vadd.f32 %v5257_v37, %v4493_v47  ;;  %v4565_v58 = vrot.slane %v4544_v48, 4 }
 0x31b   :  { %v4487_v59 = vadd.f32 %v5254_v41, %v4486_v52  ;;  %v4558_v60 = vrot.slane %v4543_v53, 4  ;;  %v4500_v61 = vrot.slane %v5258_v42, 4  ;;  %v4545_v62 = vmul.f32 %v5258_v42, %v5258_v42  ;;  %4442 = vst [vmem:[%s8106_s3] sm:$0xff] %v5249_v51  ;;  %4443 = vst [vmem:[%s8106_s3 + $0x8] sm:$0xff] %v5250_v54 }
 0x31c   :  { %v4481_v63 = vrot.slane %v4480_v55, 2  ;;  %v4552_v0 = vadd.f32 %v4551_v56, %v4542_v46  ;;  %v4495_v1 = vrot.slane %v4494_v57, 2  ;;  %v4566_v2 = vadd.f32 %v4565_v58, %v4544_v48 }
 0x31d   :  { %v4488_v3 = vrot.slane %v4487_v59, 2  ;;  %v4559_v4 = vadd.f32 %v4558_v60, %v4543_v53  ;;  %v4501_v5 = vadd.f32 %v5258_v42, %v4500_v61  ;;  %v4572_v6 = vrot.slane %v4545_v62, 4 }
 0x31e   :  { %v4482_v7 = vadd.f32 %v4481_v63, %v4480_v55  ;;  %v4553_v8 = vrot.slane %v4552_v0, 2  ;;  %v4496_v9 = vadd.f32 %v4495_v1, %v4494_v57  ;;  %v4567_v10 = vrot.slane %v4566_v2, 2 }
 0x31f   :  { %v4489_v11 = vadd.f32 %v4488_v3, %v4487_v59  ;;  %v4560_v12 = vrot.slane %v4559_v4, 2  ;;  %v4502_v13 = vrot.slane %v4501_v5, 2  ;;  %v4573_v14 = vadd.f32 %v4572_v6, %v4545_v62 }
 0x320   :  { %v4483_v15 = vrot.slane %v4482_v7, 1  ;;  %v4554_v16 = vadd.f32 %v4553_v8, %v4552_v0  ;;  %v4497_v17 = vrot.slane %v4496_v9, 1  ;;  %v4568_v18 = vadd.f32 %v4567_v10, %v4566_v2 }
 0x321   :  { %v4490_v20 = vrot.slane %v4489_v11, 1  ;;  %v4561_v21 = vadd.f32 %v4560_v12, %v4559_v4  ;;  %v4503_v22 = vadd.f32 %v4502_v13, %v4501_v5  ;;  %v4574_v23 = vrot.slane %v4573_v14, 2 }
 0x322   :  { %v4484_v24 = vadd.f32 %v4483_v15, %v4482_v7  ;;  %v4555_v25 = vrot.slane %v4554_v16, 1  ;;  %v4498_v26 = vadd.f32 %v4497_v17, %v4496_v9  ;;  %v4569_v27 = vrot.slane %v4568_v18, 1 }
 0x323   :  { %v4491_v28 = vadd.f32 %v4490_v20, %v4489_v11  ;;  %v4562_v31 = vrot.slane %v4561_v21, 1  ;;  %v4504_v34 = vrot.slane %v4503_v22, 1  ;;  %v4575_v35 = vadd.f32 %v4574_v23, %v4573_v14 }
 0x324   :  { %v4556_v36 = vadd.f32 %v4555_v25, %v4554_v16  ;;  %v4570_v37 = vadd.f32 %v4569_v27, %v4568_v18  ;;  %v5255_v38 = vadd.f32 %v4026_v43, %v8049_v29  ;;  %v5259_v39 = vadd.f32 %v4413_v44, %v8051_v30  ;;  %v4477_v43 = vld [vmem:[%s8103_s4] sm:$0xf] }
 0x325   :  { %v4510_v41 = vcombine.low %v4484_v24, %v4491_v28  ;;  %v4563_v42 = vadd.f32 %v4562_v31, %v4561_v21  ;;  %v4505_v45 = vadd.f32 %v4504_v34, %v4503_v22  ;;  %v4576_v46 = vrot.slane %v4575_v35, 1 }
 0x326   :  { %v5256_v47 = vadd.f32 %v4028_v49, %v8053_v32  ;;  %v5260_v48 = vadd.f32 %v4415_v50, %v8055_v33  ;;  %v4541_v50 = vld [vmem:[%s8104_s5] sm:$0xf] }
 0x327   :  { %v4518_v51 = vrot.slane %v4510_v41, %v8059_v40  ;;  %v4582_v52 = vcombine.low %v4556_v36, %v4563_v42  ;;  %v4511_v53 = vcombine.low %v4498_v26, %v4505_v45  ;;  %v4577_v54 = vadd.f32 %v4576_v46, %v4575_v35 }
 0x328   :  { %v5251_v55 = vpack.c.bf16 %v5256_v47, %v5255_v38  ;;  %v5252_v56 = vpack.c.bf16 %v5260_v48, %v5259_v39 }
 0x329   :  { %v4590_v57 = vrot.slane %v4582_v52, %v8059_v40  ;;  %v4525_v29 = vrot.slane %v4511_v53, %v8059_v40  ;;  %v4583_v30 = vcombine.low %v4570_v37, %v4577_v54 }
 0x32a   :  { %4444 = vst [vmem:[%s8106_s3 + $0x10] sm:$0xff] %v5251_v55  ;;  %4445 = vst [vmem:[%s8106_s3 + $0x18] sm:$0xff] %v5252_v56 }
 0x32b   :  { %v4526_v32 = vcombine.low %v4518_v51, %v4525_v29  ;;  %v4597_v33 = vrot.slane %v4583_v30, %v8059_v40 }
 0x32d   :  { %v4533_v44 = vrot.slane %v4526_v32, %v8059_v40  ;;  %v4598_v49 = vcombine.low %v4590_v57, %v4597_v33 }
 0x32f   :  { %v4535_v58 = vadd.f32 %v4533_v44, %v4477_v43  ;;  %v4605_v59 = vrot.slane %v4598_v49, %v8059_v40 }
 0x331   :  { %4540 = vst.msk [vmem:[%s8103_s4] sm:$0xf] %vm8032_vm0, %v4535_v58  ;;  %v4607_v60 = vadd.f32 %v4605_v59, %v4541_v50 }
 0x333   :  { %4608 = vst.msk [vmem:[%s8104_s5] sm:$0xf] %vm8032_vm0, %v4607_v60 }

</bundles_post_ra>
